<compile_context>
chip_gen: v5e
topology: v5e:2x2
jax: 0.10.0
libtpu: 0.0.40
codegen_flags: <defaults>
</compile_context>

<pallas_src>
import functools

import jax
import jax.numpy as jnp
from jax.experimental import pallas as pl
from jax.experimental.pallas import tpu as pltpu


# ---------------------------------------------------------------------------
# Pallas kernel: fused  out = relu(x @ w + b)  (conv layers via im2col).
# Operands are small enough to live as single full-array VMEM blocks.
# ---------------------------------------------------------------------------
def _conv_matmul_kernel(x_ref, w_ref, b_ref, o_ref):
    acc = jnp.dot(x_ref[...], w_ref[...], preferred_element_type=jnp.float32)
    acc = jnp.maximum(acc + b_ref[...], 0.0)        # b_ref is (1, Cout)
    o_ref[...] = acc.astype(o_ref.dtype)


# ---------------------------------------------------------------------------
# Pallas kernel: fused head = conv4 (+bias +ReLU) -> hidden_linear -> out_layer.
# The PyTorch NCHW flatten is pre-absorbed into the row order of w1, so the
# hidden_linear contraction is done as n_spatial (=16) accumulated matmuls
# over (n_batch, Cout) row slices of the conv4 activation.
# ---------------------------------------------------------------------------
def _head_kernel(p4_ref, w4_ref, b4_ref, w1_ref, b1_ref, w2_ref, b2_ref, o_ref,
                 *, n_batch, n_spatial, cout, lin_out):
    # conv4 as matmul over pre-gathered patches, + bias + ReLU.
    c4 = jnp.dot(p4_ref[...], w4_ref[...], preferred_element_type=jnp.float32)
    c4 = jnp.maximum(c4 + b4_ref[...], 0.0).astype(jnp.bfloat16)  # (n_batch*n_spatial, cout)

    # hidden_linear: contract over (spatial r, channel c).  w1 rows are
    # pre-permuted so rows [r*cout, (r+1)*cout) match spatial position r.
    h = jnp.zeros((n_batch, lin_out), dtype=jnp.float32)
    for r in range(n_spatial):
        lhs = jnp.concatenate(
            [c4[n * n_spatial + r:n * n_spatial + r + 1, :] for n in range(n_batch)],
            axis=0)                                      # (n_batch, cout)
        w1_blk = w1_ref[pl.ds(r * cout, cout), :]        # (cout, lin_out)
        h = h + jnp.dot(lhs, w1_blk, preferred_element_type=jnp.float32)
    h = h + b1_ref[...]          # NOTE: no ReLU on hidden_linear (matches module)

    # out_layer
    q = jnp.dot(h.astype(jnp.bfloat16), w2_ref[...],
                preferred_element_type=jnp.float32)
    o_ref[...] = q + b2_ref[...]


# ---------------------------------------------------------------------------
# im2col (stride-2, valid, k=3): pure data movement, fused by XLA.
# ---------------------------------------------------------------------------
def _im2col(x_nhwc, k, s):
    N, H, W, C = x_nhwc.shape
    Ho = (H - k) // s + 1
    Wo = (W - k) // s + 1
    cols = []
    for i in range(k):
        for j in range(k):
            cols.append(
                x_nhwc[:, i:i + s * (Ho - 1) + 1:s, j:j + s * (Wo - 1) + 1:s, :]
            )                                            # each (N, Ho, Wo, C)
    p = jnp.stack(cols, axis=3)                          # (N, Ho, Wo, k*k, C)
    return p.reshape(N * Ho * Wo, k * k * C), (N, Ho, Wo)


def _full_block_specs(operands):
    return [pl.BlockSpec(op.shape, lambda i: (0, 0)) for op in operands]


def conv_layer(x_nhwc, w_mat, b_row):
    """One Conv2d(k=3, s=2, valid) + ReLU layer.  w_mat: (9*Cin, Cout) bf16."""
    patches, (N, Ho, Wo) = _im2col(x_nhwc, 3, 2)
    M, K = patches.shape
    Cout = w_mat.shape[1]
    y = pl.pallas_call(
        _conv_matmul_kernel,
        out_shape=jax.ShapeDtypeStruct((M, Cout), jnp.bfloat16),
        grid=(1,),
        in_specs=_full_block_specs((patches, w_mat, b_row)),
        out_specs=pl.BlockSpec((M, Cout), lambda i: (0, 0)),
        compiler_params=pltpu.CompilerParams(
            dimension_semantics=("arbitrary",)),
    )(patches, w_mat, b_row)
    return y.reshape(N, Ho, Wo, Cout)


def head_call(p4, packed, *, n_batch, n_spatial):
    w4, b4 = packed["c4_w"], packed["c4_b"]
    w1, b1 = packed["l1_w"], packed["l1_b"]
    w2, b2 = packed["l2_w"], packed["l2_b"]
    cout = w4.shape[1]
    lin_out = w1.shape[1]
    out_dim = w2.shape[1]
    operands = (p4, w4, b4, w1, b1, w2, b2)
    return pl.pallas_call(
        functools.partial(_head_kernel, n_batch=n_batch, n_spatial=n_spatial,
                          cout=cout, lin_out=lin_out),
        out_shape=jax.ShapeDtypeStruct((n_batch, out_dim), jnp.float32),
        grid=(1,),
        in_specs=_full_block_specs(operands),
        out_specs=pl.BlockSpec((n_batch, out_dim), lambda i: (0, 0)),
        compiler_params=pltpu.CompilerParams(
            dimension_semantics=("arbitrary",)),
    )(*operands)


# ---------------------------------------------------------------------------
# Full forward pass (matches NeuralNetwork2.forward).
# ---------------------------------------------------------------------------
def neural_network2_forward(state_nchw, packed):
    x = jnp.transpose(state_nchw, (0, 2, 3, 1)).astype(jnp.bfloat16)  # -> NHWC bf16
    x = conv_layer(x, packed["c1_w"], packed["c1_b"])   # (N, 41, 41, 32)
    x = conv_layer(x, packed["c2_w"], packed["c2_b"])   # (N, 20, 20, 32)
    x = conv_layer(x, packed["c3_w"], packed["c3_b"])   # (N,  9,  9, 32)
    p4, (n, ho, wo) = _im2col(x, 3, 2)                  # conv4 patches (N*16, 288)
    return head_call(p4, packed, n_batch=n, n_spatial=ho * wo)


# ---------------------------------------------------------------------------
# Parameters: raw PyTorch-layout init + one-time packing/canonicalisation.
# ---------------------------------------------------------------------------
def init_params(key, input_dim, out_dim, hidden_dim=32,
                linear_input=32 * 4 * 4, linear_output=512):
    ks = jax.random.split(key, 12)
    s = 0.05

    def norm(k, shape):
        return (s * jax.random.normal(k, shape)).astype(jnp.float32)

    return {
        "c1_w": norm(ks[0], (hidden_dim, input_dim, 3, 3)),
        "c1_b": norm(ks[1], (hidden_dim,)),
        "c2_w": norm(ks[2], (hidden_dim, hidden_dim, 3, 3)),
        "c2_b": norm(ks[3], (hidden_dim,)),
        "c3_w": norm(ks[4], (hidden_dim, hidden_dim, 3, 3)),
        "c3_b": norm(ks[5], (hidden_dim,)),
        "c4_w": norm(ks[6], (hidden_dim, hidden_dim, 3, 3)),
        "c4_b": norm(ks[7], (hidden_dim,)),
        "l1_w": norm(ks[8], (linear_output, linear_input)),
        "l1_b": norm(ks[9], (linear_output,)),
        "l2_w": norm(ks[10], (out_dim, linear_output)),
        "l2_b": norm(ks[11], (out_dim,)),
    }


def pack_params(params, hidden_dim=32, conv_out_hw=4):
    """One-time weight canonicalisation (done outside the jitted step)."""
    def conv_pack(w, b):
        co, ci, kh, kw = w.shape
        # patch column order is ((ki, kj), ci) -> reorder weight to match.
        w_mat = jnp.transpose(w, (2, 3, 1, 0)).reshape(kh * kw * ci, co)
        return w_mat.astype(jnp.bfloat16), b.reshape(1, co).astype(jnp.float32)

    packed = {}
    for name in ("c1", "c2", "c3", "c4"):
        packed[name + "_w"], packed[name + "_b"] = conv_pack(
            params[name + "_w"], params[name + "_b"])

    # hidden_linear: PyTorch flattens NCHW, i.e. input feature k = c*16 + r
    # (r = h*4 + w).  The head kernel feeds features in order k' = r*32 + c,
    # so permute the rows of W1.T once here.
    sp = conv_out_hw * conv_out_hw                      # 16 spatial positions
    lin_in = hidden_dim * sp
    idx = jnp.arange(lin_in)
    r = idx // hidden_dim
    c = idx % hidden_dim
    perm = c * sp + r                                   # original PyTorch index
    w1 = jnp.transpose(params["l1_w"], (1, 0))[perm, :]
    packed["l1_w"] = w1.astype(jnp.bfloat16)
    packed["l1_b"] = params["l1_b"].reshape(1, -1).astype(jnp.float32)
    packed["l2_w"] = jnp.transpose(params["l2_w"], (1, 0)).astype(jnp.bfloat16)
    packed["l2_b"] = params["l2_b"].reshape(1, -1).astype(jnp.float32)
    return packed


if __name__ == "__main__":
    batch = 2
    input_dim = 4          # stacked frames (channels)
    out_dim = 6            # AirRaid action space
    spatial = 84           # module hard-codes linear_input = 32*4*4
                           # -> needs 84 -> 41 -> 20 -> 9 -> 4 spatial chain

    key = jax.random.PRNGKey(0)
    k_x, k_p = jax.random.split(key)
    x = jax.random.normal(k_x, (batch, input_dim, spatial, spatial),
                          dtype=jnp.float32)
    params = init_params(k_p, input_dim, out_dim)
    packed = pack_params(params)        # one-time canonicalisation

    fwd = jax.jit(neural_network2_forward)
    out = jax.block_until_ready(fwd(x, packed))

    assert out.shape == (batch, out_dim), out.shape
    assert out.dtype == jnp.float32
    assert bool(jnp.all(jnp.isfinite(out)))
    print("KERNEL_OK")
</pallas_src>

<mosaic_0001>
module attributes {stable_mosaic.version = 11 : i64} {
  func.func @_conv_matmul_kernel(%arg0: i32, %arg1: memref<3362x36xbf16, #tpu.memory_space<vmem>>, %arg2: memref<36x32xbf16, #tpu.memory_space<vmem>>, %arg3: memref<1x32xf32, #tpu.memory_space<vmem>>, %arg4: memref<3362x32xbf16, #tpu.memory_space<vmem>>) attributes {dimension_semantics = [#tpu.dimension_semantics<arbitrary>], iteration_bounds = array<i64: 1>, scalar_prefetch = 0 : i64, scratch_operands = 0 : i64, tpu.core_type = #tpu.core_type<tc>, window_params = [{pipeline_mode = #tpu.pipeline_mode<synchronous>, transform_indices = @transform_0, window_bounds = array<i64: 3362, 36>}, {pipeline_mode = #tpu.pipeline_mode<synchronous>, transform_indices = @transform_1, window_bounds = array<i64: 36, 32>}, {pipeline_mode = #tpu.pipeline_mode<synchronous>, transform_indices = @transform_2, window_bounds = array<i64: 1, 32>}, {pipeline_mode = #tpu.pipeline_mode<synchronous>, transform_indices = @transform_3, window_bounds = array<i64: 3362, 32>}]} {
    %c0 = arith.constant 0 : index
    %c0_0 = arith.constant 0 : index
    %0 = vector.load %arg1[%c0, %c0_0] : memref<3362x36xbf16, #tpu.memory_space<vmem>>, vector<3362x36xbf16>
    %c0_1 = arith.constant 0 : index
    %c0_2 = arith.constant 0 : index
    %1 = vector.load %arg2[%c0_1, %c0_2] : memref<36x32xbf16, #tpu.memory_space<vmem>>, vector<36x32xbf16>
    %cst = arith.constant dense<0.000000e+00> : vector<3362x32xf32>
    %2 = tpu.matmul %0, %1, %cst {dimension_numbers = #tpu.dot_dimension_numbers<[1], [0], [0], [1], [0, 0, 1, 1], [], []>} : vector<3362x36xbf16>, vector<36x32xbf16>, vector<3362x32xf32> -> vector<3362x32xf32>
    %c0_3 = arith.constant 0 : index
    %c0_4 = arith.constant 0 : index
    %3 = vector.load %arg3[%c0_3, %c0_4] : memref<1x32xf32, #tpu.memory_space<vmem>>, vector<1x32xf32>
    %4 = vector.broadcast %3 : vector<1x32xf32> to vector<3362x32xf32>
    %5 = arith.addf %2, %4 : vector<3362x32xf32>
    %cst_5 = arith.constant 0.000000e+00 : f32
    %6 = vector.broadcast %cst_5 : f32 to vector<3362x32xf32>
    %7 = arith.maximumf %5, %6 : vector<3362x32xf32>
    %8 = arith.truncf %7 : vector<3362x32xf32> to vector<3362x32xbf16>
    %c0_6 = arith.constant 0 : index
    %c0_7 = arith.constant 0 : index
    %9 = vector.load %arg4[%c0_6, %c0_7] : memref<3362x32xbf16, #tpu.memory_space<vmem>>, vector<3362x32xbf16>
    tpu.vector_store %arg4[%c0_6, %c0_7], %8 {strides = array<i32>} : memref<3362x32xbf16, #tpu.memory_space<vmem>>, vector<3362x32xbf16>,
    return
  }
  func.func @transform_0(%arg0: i32) -> (i32, i32) {
    %c0_i32 = arith.constant 0 : i32
    %c0_i32_0 = arith.constant 0 : i32
    %c0_i32_1 = arith.constant 0 : i32
    return %c0_i32, %c0_i32_0 : i32, i32
  }
  func.func @transform_1(%arg0: i32) -> (i32, i32) {
    %c0_i32 = arith.constant 0 : i32
    %c0_i32_0 = arith.constant 0 : i32
    %c0_i32_1 = arith.constant 0 : i32
    return %c0_i32, %c0_i32_0 : i32, i32
  }
  func.func @transform_2(%arg0: i32) -> (i32, i32) {
    %c0_i32 = arith.constant 0 : i32
    %c0_i32_0 = arith.constant 0 : i32
    %c0_i32_1 = arith.constant 0 : i32
    return %c0_i32, %c0_i32_0 : i32, i32
  }
  func.func @transform_3(%arg0: i32) -> (i32, i32) {
    %c0_i32 = arith.constant 0 : i32
    %c0_i32_0 = arith.constant 0 : i32
    %c0_i32_1 = arith.constant 0 : i32
    return %c0_i32, %c0_i32_0 : i32, i32
  }
}

module attributes {stable_mosaic.version = 11 : i64} {
  func.func @_conv_matmul_kernel(%arg0: i32, %arg1: memref<800x288xbf16, #tpu.memory_space<vmem>>, %arg2: memref<288x32xbf16, #tpu.memory_space<vmem>>, %arg3: memref<1x32xf32, #tpu.memory_space<vmem>>, %arg4: memref<800x32xbf16, #tpu.memory_space<vmem>>) attributes {dimension_semantics = [#tpu.dimension_semantics<arbitrary>], iteration_bounds = array<i64: 1>, scalar_prefetch = 0 : i64, scratch_operands = 0 : i64, tpu.core_type = #tpu.core_type<tc>, window_params = [{pipeline_mode = #tpu.pipeline_mode<synchronous>, transform_indices = @transform_0, window_bounds = array<i64: 800, 288>}, {pipeline_mode = #tpu.pipeline_mode<synchronous>, transform_indices = @transform_1, window_bounds = array<i64: 288, 32>}, {pipeline_mode = #tpu.pipeline_mode<synchronous>, transform_indices = @transform_2, window_bounds = array<i64: 1, 32>}, {pipeline_mode = #tpu.pipeline_mode<synchronous>, transform_indices = @transform_3, window_bounds = array<i64: 800, 32>}]} {
    %c0 = arith.constant 0 : index
    %c0_0 = arith.constant 0 : index
    %0 = vector.load %arg1[%c0, %c0_0] : memref<800x288xbf16, #tpu.memory_space<vmem>>, vector<800x288xbf16>
    %c0_1 = arith.constant 0 : index
    %c0_2 = arith.constant 0 : index
    %1 = vector.load %arg2[%c0_1, %c0_2] : memref<288x32xbf16, #tpu.memory_space<vmem>>, vector<288x32xbf16>
    %cst = arith.constant dense<0.000000e+00> : vector<800x32xf32>
    %2 = tpu.matmul %0, %1, %cst {dimension_numbers = #tpu.dot_dimension_numbers<[1], [0], [0], [1], [0, 0, 1, 1], [], []>} : vector<800x288xbf16>, vector<288x32xbf16>, vector<800x32xf32> -> vector<800x32xf32>
    %c0_3 = arith.constant 0 : index
    %c0_4 = arith.constant 0 : index
    %3 = vector.load %arg3[%c0_3, %c0_4] : memref<1x32xf32, #tpu.memory_space<vmem>>, vector<1x32xf32>
    %4 = vector.broadcast %3 : vector<1x32xf32> to vector<800x32xf32>
    %5 = arith.addf %2, %4 : vector<800x32xf32>
    %cst_5 = arith.constant 0.000000e+00 : f32
    %6 = vector.broadcast %cst_5 : f32 to vector<800x32xf32>
    %7 = arith.maximumf %5, %6 : vector<800x32xf32>
    %8 = arith.truncf %7 : vector<800x32xf32> to vector<800x32xbf16>
    %c0_6 = arith.constant 0 : index
    %c0_7 = arith.constant 0 : index
    %9 = vector.load %arg4[%c0_6, %c0_7] : memref<800x32xbf16, #tpu.memory_space<vmem>>, vector<800x32xbf16>
    tpu.vector_store %arg4[%c0_6, %c0_7], %8 {strides = array<i32>} : memref<800x32xbf16, #tpu.memory_space<vmem>>, vector<800x32xbf16>,
    return
  }
  func.func @transform_0(%arg0: i32) -> (i32, i32) {
    %c0_i32 = arith.constant 0 : i32
    %c0_i32_0 = arith.constant 0 : i32
    %c0_i32_1 = arith.constant 0 : i32
    return %c0_i32, %c0_i32_0 : i32, i32
  }
  func.func @transform_1(%arg0: i32) -> (i32, i32) {
    %c0_i32 = arith.constant 0 : i32
    %c0_i32_0 = arith.constant 0 : i32
    %c0_i32_1 = arith.constant 0 : i32
    return %c0_i32, %c0_i32_0 : i32, i32
  }
  func.func @transform_2(%arg0: i32) -> (i32, i32) {
    %c0_i32 = arith.constant 0 : i32
    %c0_i32_0 = arith.constant 0 : i32
    %c0_i32_1 = arith.constant 0 : i32
    return %c0_i32, %c0_i32_0 : i32, i32
  }
  func.func @transform_3(%arg0: i32) -> (i32, i32) {
    %c0_i32 = arith.constant 0 : i32
    %c0_i32_0 = arith.constant 0 : i32
    %c0_i32_1 = arith.constant 0 : i32
    return %c0_i32, %c0_i32_0 : i32, i32
  }
}

module attributes {stable_mosaic.version = 11 : i64} {
  func.func @_conv_matmul_kernel(%arg0: i32, %arg1: memref<162x288xbf16, #tpu.memory_space<vmem>>, %arg2: memref<288x32xbf16, #tpu.memory_space<vmem>>, %arg3: memref<1x32xf32, #tpu.memory_space<vmem>>, %arg4: memref<162x32xbf16, #tpu.memory_space<vmem>>) attributes {dimension_semantics = [#tpu.dimension_semantics<arbitrary>], iteration_bounds = array<i64: 1>, scalar_prefetch = 0 : i64, scratch_operands = 0 : i64, tpu.core_type = #tpu.core_type<tc>, window_params = [{pipeline_mode = #tpu.pipeline_mode<synchronous>, transform_indices = @transform_0, window_bounds = array<i64: 162, 288>}, {pipeline_mode = #tpu.pipeline_mode<synchronous>, transform_indices = @transform_1, window_bounds = array<i64: 288, 32>}, {pipeline_mode = #tpu.pipeline_mode<synchronous>, transform_indices = @transform_2, window_bounds = array<i64: 1, 32>}, {pipeline_mode = #tpu.pipeline_mode<synchronous>, transform_indices = @transform_3, window_bounds = array<i64: 162, 32>}]} {
    %c0 = arith.constant 0 : index
    %c0_0 = arith.constant 0 : index
    %0 = vector.load %arg1[%c0, %c0_0] : memref<162x288xbf16, #tpu.memory_space<vmem>>, vector<162x288xbf16>
    %c0_1 = arith.constant 0 : index
    %c0_2 = arith.constant 0 : index
    %1 = vector.load %arg2[%c0_1, %c0_2] : memref<288x32xbf16, #tpu.memory_space<vmem>>, vector<288x32xbf16>
    %cst = arith.constant dense<0.000000e+00> : vector<162x32xf32>
    %2 = tpu.matmul %0, %1, %cst {dimension_numbers = #tpu.dot_dimension_numbers<[1], [0], [0], [1], [0, 0, 1, 1], [], []>} : vector<162x288xbf16>, vector<288x32xbf16>, vector<162x32xf32> -> vector<162x32xf32>
    %c0_3 = arith.constant 0 : index
    %c0_4 = arith.constant 0 : index
    %3 = vector.load %arg3[%c0_3, %c0_4] : memref<1x32xf32, #tpu.memory_space<vmem>>, vector<1x32xf32>
    %4 = vector.broadcast %3 : vector<1x32xf32> to vector<162x32xf32>
    %5 = arith.addf %2, %4 : vector<162x32xf32>
    %cst_5 = arith.constant 0.000000e+00 : f32
    %6 = vector.broadcast %cst_5 : f32 to vector<162x32xf32>
    %7 = arith.maximumf %5, %6 : vector<162x32xf32>
    %8 = arith.truncf %7 : vector<162x32xf32> to vector<162x32xbf16>
    %c0_6 = arith.constant 0 : index
    %c0_7 = arith.constant 0 : index
    %9 = vector.load %arg4[%c0_6, %c0_7] : memref<162x32xbf16, #tpu.memory_space<vmem>>, vector<162x32xbf16>
    tpu.vector_store %arg4[%c0_6, %c0_7], %8 {strides = array<i32>} : memref<162x32xbf16, #tpu.memory_space<vmem>>, vector<162x32xbf16>,
    return
  }
  func.func @transform_0(%arg0: i32) -> (i32, i32) {
    %c0_i32 = arith.constant 0 : i32
    %c0_i32_0 = arith.constant 0 : i32
    %c0_i32_1 = arith.constant 0 : i32
    return %c0_i32, %c0_i32_0 : i32, i32
  }
  func.func @transform_1(%arg0: i32) -> (i32, i32) {
    %c0_i32 = arith.constant 0 : i32
    %c0_i32_0 = arith.constant 0 : i32
    %c0_i32_1 = arith.constant 0 : i32
    return %c0_i32, %c0_i32_0 : i32, i32
  }
  func.func @transform_2(%arg0: i32) -> (i32, i32) {
    %c0_i32 = arith.constant 0 : i32
    %c0_i32_0 = arith.constant 0 : i32
    %c0_i32_1 = arith.constant 0 : i32
    return %c0_i32, %c0_i32_0 : i32, i32
  }
  func.func @transform_3(%arg0: i32) -> (i32, i32) {
    %c0_i32 = arith.constant 0 : i32
    %c0_i32_0 = arith.constant 0 : i32
    %c0_i32_1 = arith.constant 0 : i32
    return %c0_i32, %c0_i32_0 : i32, i32
  }
}

module attributes {stable_mosaic.version = 11 : i64} {
  func.func @_head_kernel(%arg0: i32, %arg1: memref<32x288xbf16, #tpu.memory_space<vmem>>, %arg2: memref<288x32xbf16, #tpu.memory_space<vmem>>, %arg3: memref<1x32xf32, #tpu.memory_space<vmem>>, %arg4: memref<512x512xbf16, #tpu.memory_space<vmem>>, %arg5: memref<1x512xf32, #tpu.memory_space<vmem>>, %arg6: memref<512x6xbf16, #tpu.memory_space<vmem>>, %arg7: memref<1x6xf32, #tpu.memory_space<vmem>>, %arg8: memref<2x6xf32, #tpu.memory_space<vmem>>) attributes {dimension_semantics = [#tpu.dimension_semantics<arbitrary>], iteration_bounds = array<i64: 1>, scalar_prefetch = 0 : i64, scratch_operands = 0 : i64, tpu.core_type = #tpu.core_type<tc>, window_params = [{pipeline_mode = #tpu.pipeline_mode<synchronous>, transform_indices = @transform_0, window_bounds = array<i64: 32, 288>}, {pipeline_mode = #tpu.pipeline_mode<synchronous>, transform_indices = @transform_1, window_bounds = array<i64: 288, 32>}, {pipeline_mode = #tpu.pipeline_mode<synchronous>, transform_indices = @transform_2, window_bounds = array<i64: 1, 32>}, {pipeline_mode = #tpu.pipeline_mode<synchronous>, transform_indices = @transform_3, window_bounds = array<i64: 512, 512>}, {pipeline_mode = #tpu.pipeline_mode<synchronous>, transform_indices = @transform_4, window_bounds = array<i64: 1, 512>}, {pipeline_mode = #tpu.pipeline_mode<synchronous>, transform_indices = @transform_5, window_bounds = array<i64: 512, 6>}, {pipeline_mode = #tpu.pipeline_mode<synchronous>, transform_indices = @transform_6, window_bounds = array<i64: 1, 6>}, {pipeline_mode = #tpu.pipeline_mode<synchronous>, transform_indices = @transform_7, window_bounds = array<i64: 2, 6>}]} {
    %c0 = arith.constant 0 : index
    %c0_0 = arith.constant 0 : index
    %0 = vector.load %arg1[%c0, %c0_0] : memref<32x288xbf16, #tpu.memory_space<vmem>>, vector<32x288xbf16>
    %c0_1 = arith.constant 0 : index
    %c0_2 = arith.constant 0 : index
    %1 = vector.load %arg2[%c0_1, %c0_2] : memref<288x32xbf16, #tpu.memory_space<vmem>>, vector<288x32xbf16>
    %cst = arith.constant dense<0.000000e+00> : vector<32x32xf32>
    %2 = tpu.matmul %0, %1, %cst {dimension_numbers = #tpu.dot_dimension_numbers<[1], [0], [0], [1], [0, 0, 1, 1], [], []>} : vector<32x288xbf16>, vector<288x32xbf16>, vector<32x32xf32> -> vector<32x32xf32>
    %c0_3 = arith.constant 0 : index
    %c0_4 = arith.constant 0 : index
    %3 = vector.load %arg3[%c0_3, %c0_4] : memref<1x32xf32, #tpu.memory_space<vmem>>, vector<1x32xf32>
    %4 = vector.broadcast %3 : vector<1x32xf32> to vector<32x32xf32>
    %5 = arith.addf %2, %4 : vector<32x32xf32>
    %cst_5 = arith.constant 0.000000e+00 : f32
    %6 = vector.broadcast %cst_5 : f32 to vector<32x32xf32>
    %7 = arith.maximumf %5, %6 : vector<32x32xf32>
    %8 = arith.truncf %7 : vector<32x32xf32> to vector<32x32xbf16>
    %cst_6 = arith.constant 0.000000e+00 : f32
    %9 = vector.broadcast %cst_6 : f32 to vector<2x512xf32>
    %10 = vector.extract_strided_slice %8 {offsets = [0, 0], sizes = [1, 32], strides = [1, 1]} : vector<32x32xbf16> to vector<1x32xbf16>
    %11 = vector.extract_strided_slice %8 {offsets = [16, 0], sizes = [1, 32], strides = [1, 1]} : vector<32x32xbf16> to vector<1x32xbf16>
    %12 = tpu.concatenate %10, %11 in 0 : vector<1x32xbf16>, vector<1x32xbf16> -> vector<2x32xbf16>
    %c0_7 = arith.constant 0 : index
    %c0_8 = arith.constant 0 : index
    %13 = vector.load %arg4[%c0_7, %c0_8] : memref<512x512xbf16, #tpu.memory_space<vmem>>, vector<32x512xbf16>
    %cst_9 = arith.constant dense<0.000000e+00> : vector<2x512xf32>
    %14 = tpu.matmul %12, %13, %cst_9 {dimension_numbers = #tpu.dot_dimension_numbers<[1], [0], [0], [1], [0, 0, 1, 1], [], []>} : vector<2x32xbf16>, vector<32x512xbf16>, vector<2x512xf32> -> vector<2x512xf32>
    %15 = arith.addf %9, %14 : vector<2x512xf32>
    %16 = vector.extract_strided_slice %8 {offsets = [1, 0], sizes = [1, 32], strides = [1, 1]} : vector<32x32xbf16> to vector<1x32xbf16>
    %17 = vector.extract_strided_slice %8 {offsets = [17, 0], sizes = [1, 32], strides = [1, 1]} : vector<32x32xbf16> to vector<1x32xbf16>
    %18 = tpu.concatenate %16, %17 in 0 : vector<1x32xbf16>, vector<1x32xbf16> -> vector<2x32xbf16>
    %c32 = arith.constant 32 : index
    %c0_10 = arith.constant 0 : index
    %19 = vector.load %arg4[%c32, %c0_10] : memref<512x512xbf16, #tpu.memory_space<vmem>>, vector<32x512xbf16>
    %cst_11 = arith.constant dense<0.000000e+00> : vector<2x512xf32>
    %20 = tpu.matmul %18, %19, %cst_11 {dimension_numbers = #tpu.dot_dimension_numbers<[1], [0], [0], [1], [0, 0, 1, 1], [], []>} : vector<2x32xbf16>, vector<32x512xbf16>, vector<2x512xf32> -> vector<2x512xf32>
    %21 = arith.addf %15, %20 : vector<2x512xf32>
    %22 = vector.extract_strided_slice %8 {offsets = [2, 0], sizes = [1, 32], strides = [1, 1]} : vector<32x32xbf16> to vector<1x32xbf16>
    %23 = vector.extract_strided_slice %8 {offsets = [18, 0], sizes = [1, 32], strides = [1, 1]} : vector<32x32xbf16> to vector<1x32xbf16>
    %24 = tpu.concatenate %22, %23 in 0 : vector<1x32xbf16>, vector<1x32xbf16> -> vector<2x32xbf16>
    %c64 = arith.constant 64 : index
    %c0_12 = arith.constant 0 : index
    %25 = vector.load %arg4[%c64, %c0_12] : memref<512x512xbf16, #tpu.memory_space<vmem>>, vector<32x512xbf16>
    %cst_13 = arith.constant dense<0.000000e+00> : vector<2x512xf32>
    %26 = tpu.matmul %24, %25, %cst_13 {dimension_numbers = #tpu.dot_dimension_numbers<[1], [0], [0], [1], [0, 0, 1, 1], [], []>} : vector<2x32xbf16>, vector<32x512xbf16>, vector<2x512xf32> -> vector<2x512xf32>
    %27 = arith.addf %21, %26 : vector<2x512xf32>
    %28 = vector.extract_strided_slice %8 {offsets = [3, 0], sizes = [1, 32], strides = [1, 1]} : vector<32x32xbf16> to vector<1x32xbf16>
    %29 = vector.extract_strided_slice %8 {offsets = [19, 0], sizes = [1, 32], strides = [1, 1]} : vector<32x32xbf16> to vector<1x32xbf16>
    %30 = tpu.concatenate %28, %29 in 0 : vector<1x32xbf16>, vector<1x32xbf16> -> vector<2x32xbf16>
    %c96 = arith.constant 96 : index
    %c0_14 = arith.constant 0 : index
    %31 = vector.load %arg4[%c96, %c0_14] : memref<512x512xbf16, #tpu.memory_space<vmem>>, vector<32x512xbf16>
    %cst_15 = arith.constant dense<0.000000e+00> : vector<2x512xf32>
    %32 = tpu.matmul %30, %31, %cst_15 {dimension_numbers = #tpu.dot_dimension_numbers<[1], [0], [0], [1], [0, 0, 1, 1], [], []>} : vector<2x32xbf16>, vector<32x512xbf16>, vector<2x512xf32> -> vector<2x512xf32>
    %33 = arith.addf %27, %32 : vector<2x512xf32>
    %34 = vector.extract_strided_slice %8 {offsets = [4, 0], sizes = [1, 32], strides = [1, 1]} : vector<32x32xbf16> to vector<1x32xbf16>
    %35 = vector.extract_strided_slice %8 {offsets = [20, 0], sizes = [1, 32], strides = [1, 1]} : vector<32x32xbf16> to vector<1x32xbf16>
    %36 = tpu.concatenate %34, %35 in 0 : vector<1x32xbf16>, vector<1x32xbf16> -> vector<2x32xbf16>
    %c128 = arith.constant 128 : index
    %c0_16 = arith.constant 0 : index
    %37 = vector.load %arg4[%c128, %c0_16] : memref<512x512xbf16, #tpu.memory_space<vmem>>, vector<32x512xbf16>
    %cst_17 = arith.constant dense<0.000000e+00> : vector<2x512xf32>
    %38 = tpu.matmul %36, %37, %cst_17 {dimension_numbers = #tpu.dot_dimension_numbers<[1], [0], [0], [1], [0, 0, 1, 1], [], []>} : vector<2x32xbf16>, vector<32x512xbf16>, vector<2x512xf32> -> vector<2x512xf32>
    %39 = arith.addf %33, %38 : vector<2x512xf32>
    %40 = vector.extract_strided_slice %8 {offsets = [5, 0], sizes = [1, 32], strides = [1, 1]} : vector<32x32xbf16> to vector<1x32xbf16>
    %41 = vector.extract_strided_slice %8 {offsets = [21, 0], sizes = [1, 32], strides = [1, 1]} : vector<32x32xbf16> to vector<1x32xbf16>
    %42 = tpu.concatenate %40, %41 in 0 : vector<1x32xbf16>, vector<1x32xbf16> -> vector<2x32xbf16>
    %c160 = arith.constant 160 : index
    %c0_18 = arith.constant 0 : index
    %43 = vector.load %arg4[%c160, %c0_18] : memref<512x512xbf16, #tpu.memory_space<vmem>>, vector<32x512xbf16>
    %cst_19 = arith.constant dense<0.000000e+00> : vector<2x512xf32>
    %44 = tpu.matmul %42, %43, %cst_19 {dimension_numbers = #tpu.dot_dimension_numbers<[1], [0], [0], [1], [0, 0, 1, 1], [], []>} : vector<2x32xbf16>, vector<32x512xbf16>, vector<2x512xf32> -> vector<2x512xf32>
    %45 = arith.addf %39, %44 : vector<2x512xf32>
    %46 = vector.extract_strided_slice %8 {offsets = [6, 0], sizes = [1, 32], strides = [1, 1]} : vector<32x32xbf16> to vector<1x32xbf16>
    %47 = vector.extract_strided_slice %8 {offsets = [22, 0], sizes = [1, 32], strides = [1, 1]} : vector<32x32xbf16> to vector<1x32xbf16>
    %48 = tpu.concatenate %46, %47 in 0 : vector<1x32xbf16>, vector<1x32xbf16> -> vector<2x32xbf16>
    %c192 = arith.constant 192 : index
    %c0_20 = arith.constant 0 : index
    %49 = vector.load %arg4[%c192, %c0_20] : memref<512x512xbf16, #tpu.memory_space<vmem>>, vector<32x512xbf16>
    %cst_21 = arith.constant dense<0.000000e+00> : vector<2x512xf32>
    %50 = tpu.matmul %48, %49, %cst_21 {dimension_numbers = #tpu.dot_dimension_numbers<[1], [0], [0], [1], [0, 0, 1, 1], [], []>} : vector<2x32xbf16>, vector<32x512xbf16>, vector<2x512xf32> -> vector<2x512xf32>
    %51 = arith.addf %45, %50 : vector<2x512xf32>
    %52 = vector.extract_strided_slice %8 {offsets = [7, 0], sizes = [1, 32], strides = [1, 1]} : vector<32x32xbf16> to vector<1x32xbf16>
    %53 = vector.extract_strided_slice %8 {offsets = [23, 0], sizes = [1, 32], strides = [1, 1]} : vector<32x32xbf16> to vector<1x32xbf16>
    %54 = tpu.concatenate %52, %53 in 0 : vector<1x32xbf16>, vector<1x32xbf16> -> vector<2x32xbf16>
    %c224 = arith.constant 224 : index
    %c0_22 = arith.constant 0 : index
    %55 = vector.load %arg4[%c224, %c0_22] : memref<512x512xbf16, #tpu.memory_space<vmem>>, vector<32x512xbf16>
    %cst_23 = arith.constant dense<0.000000e+00> : vector<2x512xf32>
    %56 = tpu.matmul %54, %55, %cst_23 {dimension_numbers = #tpu.dot_dimension_numbers<[1], [0], [0], [1], [0, 0, 1, 1], [], []>} : vector<2x32xbf16>, vector<32x512xbf16>, vector<2x512xf32> -> vector<2x512xf32>
    %57 = arith.addf %51, %56 : vector<2x512xf32>
    %58 = vector.extract_strided_slice %8 {offsets = [8, 0], sizes = [1, 32], strides = [1, 1]} : vector<32x32xbf16> to vector<1x32xbf16>
    %59 = vector.extract_strided_slice %8 {offsets = [24, 0], sizes = [1, 32], strides = [1, 1]} : vector<32x32xbf16> to vector<1x32xbf16>
    %60 = tpu.concatenate %58, %59 in 0 : vector<1x32xbf16>, vector<1x32xbf16> -> vector<2x32xbf16>
    %c256 = arith.constant 256 : index
    %c0_24 = arith.constant 0 : index
    %61 = vector.load %arg4[%c256, %c0_24] : memref<512x512xbf16, #tpu.memory_space<vmem>>, vector<32x512xbf16>
    %cst_25 = arith.constant dense<0.000000e+00> : vector<2x512xf32>
    %62 = tpu.matmul %60, %61, %cst_25 {dimension_numbers = #tpu.dot_dimension_numbers<[1], [0], [0], [1], [0, 0, 1, 1], [], []>} : vector<2x32xbf16>, vector<32x512xbf16>, vector<2x512xf32> -> vector<2x512xf32>
    %63 = arith.addf %57, %62 : vector<2x512xf32>
    %64 = vector.extract_strided_slice %8 {offsets = [9, 0], sizes = [1, 32], strides = [1, 1]} : vector<32x32xbf16> to vector<1x32xbf16>
    %65 = vector.extract_strided_slice %8 {offsets = [25, 0], sizes = [1, 32], strides = [1, 1]} : vector<32x32xbf16> to vector<1x32xbf16>
    %66 = tpu.concatenate %64, %65 in 0 : vector<1x32xbf16>, vector<1x32xbf16> -> vector<2x32xbf16>
    %c288 = arith.constant 288 : index
    %c0_26 = arith.constant 0 : index
    %67 = vector.load %arg4[%c288, %c0_26] : memref<512x512xbf16, #tpu.memory_space<vmem>>, vector<32x512xbf16>
    %cst_27 = arith.constant dense<0.000000e+00> : vector<2x512xf32>
    %68 = tpu.matmul %66, %67, %cst_27 {dimension_numbers = #tpu.dot_dimension_numbers<[1], [0], [0], [1], [0, 0, 1, 1], [], []>} : vector<2x32xbf16>, vector<32x512xbf16>, vector<2x512xf32> -> vector<2x512xf32>
    %69 = arith.addf %63, %68 : vector<2x512xf32>
    %70 = vector.extract_strided_slice %8 {offsets = [10, 0], sizes = [1, 32], strides = [1, 1]} : vector<32x32xbf16> to vector<1x32xbf16>
    %71 = vector.extract_strided_slice %8 {offsets = [26, 0], sizes = [1, 32], strides = [1, 1]} : vector<32x32xbf16> to vector<1x32xbf16>
    %72 = tpu.concatenate %70, %71 in 0 : vector<1x32xbf16>, vector<1x32xbf16> -> vector<2x32xbf16>
    %c320 = arith.constant 320 : index
    %c0_28 = arith.constant 0 : index
    %73 = vector.load %arg4[%c320, %c0_28] : memref<512x512xbf16, #tpu.memory_space<vmem>>, vector<32x512xbf16>
    %cst_29 = arith.constant dense<0.000000e+00> : vector<2x512xf32>
    %74 = tpu.matmul %72, %73, %cst_29 {dimension_numbers = #tpu.dot_dimension_numbers<[1], [0], [0], [1], [0, 0, 1, 1], [], []>} : vector<2x32xbf16>, vector<32x512xbf16>, vector<2x512xf32> -> vector<2x512xf32>
    %75 = arith.addf %69, %74 : vector<2x512xf32>
    %76 = vector.extract_strided_slice %8 {offsets = [11, 0], sizes = [1, 32], strides = [1, 1]} : vector<32x32xbf16> to vector<1x32xbf16>
    %77 = vector.extract_strided_slice %8 {offsets = [27, 0], sizes = [1, 32], strides = [1, 1]} : vector<32x32xbf16> to vector<1x32xbf16>
    %78 = tpu.concatenate %76, %77 in 0 : vector<1x32xbf16>, vector<1x32xbf16> -> vector<2x32xbf16>
    %c352 = arith.constant 352 : index
    %c0_30 = arith.constant 0 : index
    %79 = vector.load %arg4[%c352, %c0_30] : memref<512x512xbf16, #tpu.memory_space<vmem>>, vector<32x512xbf16>
    %cst_31 = arith.constant dense<0.000000e+00> : vector<2x512xf32>
    %80 = tpu.matmul %78, %79, %cst_31 {dimension_numbers = #tpu.dot_dimension_numbers<[1], [0], [0], [1], [0, 0, 1, 1], [], []>} : vector<2x32xbf16>, vector<32x512xbf16>, vector<2x512xf32> -> vector<2x512xf32>
    %81 = arith.addf %75, %80 : vector<2x512xf32>
    %82 = vector.extract_strided_slice %8 {offsets = [12, 0], sizes = [1, 32], strides = [1, 1]} : vector<32x32xbf16> to vector<1x32xbf16>
    %83 = vector.extract_strided_slice %8 {offsets = [28, 0], sizes = [1, 32], strides = [1, 1]} : vector<32x32xbf16> to vector<1x32xbf16>
    %84 = tpu.concatenate %82, %83 in 0 : vector<1x32xbf16>, vector<1x32xbf16> -> vector<2x32xbf16>
    %c384 = arith.constant 384 : index
    %c0_32 = arith.constant 0 : index
    %85 = vector.load %arg4[%c384, %c0_32] : memref<512x512xbf16, #tpu.memory_space<vmem>>, vector<32x512xbf16>
    %cst_33 = arith.constant dense<0.000000e+00> : vector<2x512xf32>
    %86 = tpu.matmul %84, %85, %cst_33 {dimension_numbers = #tpu.dot_dimension_numbers<[1], [0], [0], [1], [0, 0, 1, 1], [], []>} : vector<2x32xbf16>, vector<32x512xbf16>, vector<2x512xf32> -> vector<2x512xf32>
    %87 = arith.addf %81, %86 : vector<2x512xf32>
    %88 = vector.extract_strided_slice %8 {offsets = [13, 0], sizes = [1, 32], strides = [1, 1]} : vector<32x32xbf16> to vector<1x32xbf16>
    %89 = vector.extract_strided_slice %8 {offsets = [29, 0], sizes = [1, 32], strides = [1, 1]} : vector<32x32xbf16> to vector<1x32xbf16>
    %90 = tpu.concatenate %88, %89 in 0 : vector<1x32xbf16>, vector<1x32xbf16> -> vector<2x32xbf16>
    %c416 = arith.constant 416 : index
    %c0_34 = arith.constant 0 : index
    %91 = vector.load %arg4[%c416, %c0_34] : memref<512x512xbf16, #tpu.memory_space<vmem>>, vector<32x512xbf16>
    %cst_35 = arith.constant dense<0.000000e+00> : vector<2x512xf32>
    %92 = tpu.matmul %90, %91, %cst_35 {dimension_numbers = #tpu.dot_dimension_numbers<[1], [0], [0], [1], [0, 0, 1, 1], [], []>} : vector<2x32xbf16>, vector<32x512xbf16>, vector<2x512xf32> -> vector<2x512xf32>
    %93 = arith.addf %87, %92 : vector<2x512xf32>
    %94 = vector.extract_strided_slice %8 {offsets = [14, 0], sizes = [1, 32], strides = [1, 1]} : vector<32x32xbf16> to vector<1x32xbf16>
    %95 = vector.extract_strided_slice %8 {offsets = [30, 0], sizes = [1, 32], strides = [1, 1]} : vector<32x32xbf16> to vector<1x32xbf16>
    %96 = tpu.concatenate %94, %95 in 0 : vector<1x32xbf16>, vector<1x32xbf16> -> vector<2x32xbf16>
    %c448 = arith.constant 448 : index
    %c0_36 = arith.constant 0 : index
    %97 = vector.load %arg4[%c448, %c0_36] : memref<512x512xbf16, #tpu.memory_space<vmem>>, vector<32x512xbf16>
    %cst_37 = arith.constant dense<0.000000e+00> : vector<2x512xf32>
    %98 = tpu.matmul %96, %97, %cst_37 {dimension_numbers = #tpu.dot_dimension_numbers<[1], [0], [0], [1], [0, 0, 1, 1], [], []>} : vector<2x32xbf16>, vector<32x512xbf16>, vector<2x512xf32> -> vector<2x512xf32>
    %99 = arith.addf %93, %98 : vector<2x512xf32>
    %100 = vector.extract_strided_slice %8 {offsets = [15, 0], sizes = [1, 32], strides = [1, 1]} : vector<32x32xbf16> to vector<1x32xbf16>
    %101 = vector.extract_strided_slice %8 {offsets = [31, 0], sizes = [1, 32], strides = [1, 1]} : vector<32x32xbf16> to vector<1x32xbf16>
    %102 = tpu.concatenate %100, %101 in 0 : vector<1x32xbf16>, vector<1x32xbf16> -> vector<2x32xbf16>
    %c480 = arith.constant 480 : index
    %c0_38 = arith.constant 0 : index
    %103 = vector.load %arg4[%c480, %c0_38] : memref<512x512xbf16, #tpu.memory_space<vmem>>, vector<32x512xbf16>
    %cst_39 = arith.constant dense<0.000000e+00> : vector<2x512xf32>
    %104 = tpu.matmul %102, %103, %cst_39 {dimension_numbers = #tpu.dot_dimension_numbers<[1], [0], [0], [1], [0, 0, 1, 1], [], []>} : vector<2x32xbf16>, vector<32x512xbf16>, vector<2x512xf32> -> vector<2x512xf32>
    %105 = arith.addf %99, %104 : vector<2x512xf32>
    %c0_40 = arith.constant 0 : index
    %c0_41 = arith.constant 0 : index
    %106 = vector.load %arg5[%c0_40, %c0_41] : memref<1x512xf32, #tpu.memory_space<vmem>>, vector<1x512xf32>
    %107 = vector.broadcast %106 : vector<1x512xf32> to vector<2x512xf32>
    %108 = arith.addf %105, %107 : vector<2x512xf32>
    %109 = arith.truncf %108 : vector<2x512xf32> to vector<2x512xbf16>
    %c0_42 = arith.constant 0 : index
    %c0_43 = arith.constant 0 : index
    %110 = vector.load %arg6[%c0_42, %c0_43] : memref<512x6xbf16, #tpu.memory_space<vmem>>, vector<512x6xbf16>
    %cst_44 = arith.constant dense<0.000000e+00> : vector<2x6xf32>
    %111 = tpu.matmul %109, %110, %cst_44 {dimension_numbers = #tpu.dot_dimension_numbers<[1], [0], [0], [1], [0, 0, 1, 1], [], []>} : vector<2x512xbf16>, vector<512x6xbf16>, vector<2x6xf32> -> vector<2x6xf32>
    %c0_45 = arith.constant 0 : index
    %c0_46 = arith.constant 0 : index
    %112 = vector.load %arg7[%c0_45, %c0_46] : memref<1x6xf32, #tpu.memory_space<vmem>>, vector<1x6xf32>
    %113 = vector.broadcast %112 : vector<1x6xf32> to vector<2x6xf32>
    %114 = arith.addf %111, %113 : vector<2x6xf32>
    %c0_47 = arith.constant 0 : index
    %c0_48 = arith.constant 0 : index
    %115 = vector.load %arg8[%c0_47, %c0_48] : memref<2x6xf32, #tpu.memory_space<vmem>>, vector<2x6xf32>
    tpu.vector_store %arg8[%c0_47, %c0_48], %114 {strides = array<i32>} : memref<2x6xf32, #tpu.memory_space<vmem>>, vector<2x6xf32>,
    return
  }
  func.func @transform_0(%arg0: i32) -> (i32, i32) {
    %c0_i32 = arith.constant 0 : i32
    %c0_i32_0 = arith.constant 0 : i32
    %c0_i32_1 = arith.constant 0 : i32
    return %c0_i32, %c0_i32_0 : i32, i32
  }
  func.func @transform_1(%arg0: i32) -> (i32, i32) {
    %c0_i32 = arith.constant 0 : i32
    %c0_i32_0 = arith.constant 0 : i32
    %c0_i32_1 = arith.constant 0 : i32
    return %c0_i32, %c0_i32_0 : i32, i32
  }
  func.func @transform_2(%arg0: i32) -> (i32, i32) {
    %c0_i32 = arith.constant 0 : i32
    %c0_i32_0 = arith.constant 0 : i32
    %c0_i32_1 = arith.constant 0 : i32
    return %c0_i32, %c0_i32_0 : i32, i32
  }
  func.func @transform_3(%arg0: i32) -> (i32, i32) {
    %c0_i32 = arith.constant 0 : i32
    %c0_i32_0 = arith.constant 0 : i32
    %c0_i32_1 = arith.constant 0 : i32
    return %c0_i32, %c0_i32_0 : i32, i32
  }
  func.func @transform_4(%arg0: i32) -> (i32, i32) {
    %c0_i32 = arith.constant 0 : i32
    %c0_i32_0 = arith.constant 0 : i32
    %c0_i32_1 = arith.constant 0 : i32
    return %c0_i32, %c0_i32_0 : i32, i32
  }
  func.func @transform_5(%arg0: i32) -> (i32, i32) {
    %c0_i32 = arith.constant 0 : i32
    %c0_i32_0 = arith.constant 0 : i32
    %c0_i32_1 = arith.constant 0 : i32
    return %c0_i32, %c0_i32_0 : i32, i32
  }
  func.func @transform_6(%arg0: i32) -> (i32, i32) {
    %c0_i32 = arith.constant 0 : i32
    %c0_i32_0 = arith.constant 0 : i32
    %c0_i32_1 = arith.constant 0 : i32
    return %c0_i32, %c0_i32_0 : i32, i32
  }
  func.func @transform_7(%arg0: i32) -> (i32, i32) {
    %c0_i32 = arith.constant 0 : i32
    %c0_i32_0 = arith.constant 0 : i32
    %c0_i32_1 = arith.constant 0 : i32
    return %c0_i32, %c0_i32_0 : i32, i32
  }
}

</mosaic_0001>

<bundles_post_ra>
// kernel: neural_network2_forward.4
= control target key start
LH: loop header
LB: loop body
LE: loop exit
PB: predicated region body
PF: predicated region fallthrough
CT: control target
= control target key end

     0   :  { %vm2147_vm0 = vcmask 1041408   ;;  %vm1513_vm1 = vcmask 293888   ;;  %vm4056_vm2 = vcmask 257024   ;;  %vm4477_vm3 = vcmask 253952   ;;  %s8770_s1 = inlined_call_operand.vmem [shape: bf16[36,32], index: 1, kind: input, shape index: {}]   ;;  %s8771_s2 = inlined_call_operand.vmem [shape: f32[1,32], index: 2, kind: input, shape index: {}]   ;;  %s8772_s0 = inlined_call_operand.vmem [shape: bf16[3362,36], index: 0, kind: input, shape index: {}]   ;;  %s8773_s3 = inlined_call_operand.vmem [shape: bf16[3362,32], index: 3, kind: output, shape index: {}]  }
   0x1   :  { %v440_v0 = vld [vmem:[%s8770_s1 + $0x10] sm:$0x3]  ;;  %v5753_v4 = vld [vmem:[%s8770_s1 + $0x8] sm:$0xff]  ;;  %v5752_v5 = vld [vmem:[%s8770_s1] sm:$0xff] }
   0x2   :  { %v1507_v1 = vunpack.c.l.b16 %v440_v0  ;;  %v5542_v6 = vld [vmem:[%s8772_s0] sm:$0xff]  ;;  %v5595_v7 = vld [vmem:[%s8772_s0 + $0x1a8] sm:$0xff]  ;;  %v5648_v8 = vld [vmem:[%s8772_s0 + $0x350] sm:$0xff] }
   0x3   :  { %v5701_v9 = vld [vmem:[%s8772_s0 + $0x4f8] sm:$0xff]  ;;  %v5543_v10 = vld [vmem:[%s8772_s0 + $0x8] sm:$0xff]  ;;  %v5596_v11 = vld [vmem:[%s8772_s0 + $0x1b0] sm:$0xff] }
   0x4   :  { %v1510_v2 = vpack.c.b16 %v1507_v1, %v1507_v1  ;;  %v5649_v12 = vld [vmem:[%s8772_s0 + $0x358] sm:$0xff]  ;;  %v5702_v13 = vld [vmem:[%s8772_s0 + $0x500] sm:$0xff]  ;;  %v5544_v14 = vld [vmem:[%s8772_s0 + $0x10] sm:$0xff] }
   0x5   :  { %v5597_v15 = vld [vmem:[%s8772_s0 + $0x1b8] sm:$0xff]  ;;  %v5650_v16 = vld [vmem:[%s8772_s0 + $0x360] sm:$0xff]  ;;  %v5703_v17 = vld [vmem:[%s8772_s0 + $0x508] sm:$0xff] }
   0x6   :  { %v2149_v3 = vsel %vm2147_vm0, %v1510_v2, 0  ;;  %v5545_v18 = vld [vmem:[%s8772_s0 + $0x18] sm:$0xff]  ;;  %v5598_v19 = vld [vmem:[%s8772_s0 + $0x1c0] sm:$0xff]  ;;  %v5651_v20 = vld [vmem:[%s8772_s0 + $0x368] sm:$0xff] }
   0x7   :  { %2156 = vmatpush.bf16.msra.mxu0 %v2149_v3  ;;  %5754 = vmatpush.bf16.msra.mxu1 %v2149_v3  ;;  %v5704_v21 = vld [vmem:[%s8772_s0 + $0x510] sm:$0xff]  ;;  %v5546_v22 = vld [vmem:[%s8772_s0 + $0x20] sm:$0xff]  ;;  %v5599_v23 = vld [vmem:[%s8772_s0 + $0x1c8] sm:$0xff] }
   0x8   :  { %5755 = vmatpush.bf16.msra.mxu2 %v2149_v3  ;;  %5756 = vmatpush.bf16.msra.mxu3 %v2149_v3  ;;  %v5652_v24 = vld [vmem:[%s8772_s0 + $0x370] sm:$0xff]  ;;  %v5705_v25 = vld [vmem:[%s8772_s0 + $0x518] sm:$0xff]  ;;  %v5547_v26 = vld [vmem:[%s8772_s0 + $0x28] sm:$0xff] }
   0x9   :  { %v5600_v27 = vld [vmem:[%s8772_s0 + $0x1d0] sm:$0xff]  ;;  %v5653_v28 = vld [vmem:[%s8772_s0 + $0x378] sm:$0xff]  ;;  %v5706_v29 = vld [vmem:[%s8772_s0 + $0x520] sm:$0xff] }
   0xa   :  { %v5548_v30 = vld [vmem:[%s8772_s0 + $0x30] sm:$0xff]  ;;  %v5601_v31 = vld [vmem:[%s8772_s0 + $0x1d8] sm:$0xff]  ;;  %v5654_v32 = vld [vmem:[%s8772_s0 + $0x380] sm:$0xff] }
   0xb   :  { %2157 = vmatpush.bf16.msra.mxu0 %v5753_v4  ;;  %5757 = vmatpush.bf16.msra.mxu1 %v5753_v4  ;;  %v5707_v33 = vld [vmem:[%s8772_s0 + $0x528] sm:$0xff]  ;;  %v5549_v34 = vld [vmem:[%s8772_s0 + $0x38] sm:$0xff]  ;;  %v5602_v35 = vld [vmem:[%s8772_s0 + $0x1e0] sm:$0xff] }
   0xc   :  { %5758 = vmatpush.bf16.msra.mxu2 %v5753_v4  ;;  %5759 = vmatpush.bf16.msra.mxu3 %v5753_v4  ;;  %v5655_v36 = vld [vmem:[%s8772_s0 + $0x388] sm:$0xff]  ;;  %v5708_v37 = vld [vmem:[%s8772_s0 + $0x530] sm:$0xff]  ;;  %v5928_v38 = vld [vmem:[%s8771_s2] ss:$0 sm:$0xff] }
   0xd   :  { %v5550_v39 = vld [vmem:[%s8772_s0 + $0x40] sm:$0xff]  ;;  %v5603_v40 = vld [vmem:[%s8772_s0 + $0x1e8] sm:$0xff]  ;;  %v5656_v43 = vld [vmem:[%s8772_s0 + $0x390] sm:$0xff] }
   0xe   :  { %v5709_v44 = vld [vmem:[%s8772_s0 + $0x538] sm:$0xff]  ;;  %v5551_v4 = vld [vmem:[%s8772_s0 + $0x48] sm:$0xff] }
   0xf   :  { %2158 = vmatpush.bf16.msra.mxu0 %v5752_v5  ;;  %5760 = vmatpush.bf16.msra.mxu1 %v5752_v5 }
  0x10   :  { %5761 = vmatpush.bf16.msra.mxu2 %v5752_v5  ;;  %5762 = vmatpush.bf16.msra.mxu3 %v5752_v5  ;;  %v5604_v5 = vld [vmem:[%s8772_s0 + $0x1f0] sm:$0xff] }
  0x12   :  { %5331 = vmatmul.msk.bf16.vlgmr.msra.gmra.mxu0 %vm1513_vm1, %v5542_v6  ;;  %5384 = vmatmul.msk.bf16.vlgmr.msra.gmra.mxu1 %vm1513_vm1, %v5595_v7 }
  0x13   :  { %5437 = vmatmul.msk.bf16.vlgmr.msra.gmra.mxu2 %vm1513_vm1, %v5648_v8  ;;  %5490 = vmatmul.msk.bf16.vlgmr.msra.gmra.mxu3 %vm1513_vm1, %v5701_v9 }
  0x22   :  { %5332 = vmatmul.msk.bf16.gmra.mxu0 %vm1513_vm1, %v5543_v10  ;;  %5385 = vmatmul.msk.bf16.gmra.mxu1 %vm1513_vm1, %v5596_v11  ;;  %v5657_v10 = vld [vmem:[%s8772_s0 + $0x398] sm:$0xff] }
  0x23   :  { %5438 = vmatmul.msk.bf16.gmra.mxu2 %vm1513_vm1, %v5649_v12  ;;  %5491 = vmatmul.msk.bf16.gmra.mxu3 %vm1513_vm1, %v5702_v13  ;;  %v5710_v12 = vld [vmem:[%s8772_s0 + $0x540] sm:$0xff] }
  0x32   :  { %5333 = vmatmul.msk.bf16.gmra.mxu0 %vm1513_vm1, %v5544_v14  ;;  %5386 = vmatmul.msk.bf16.gmra.mxu1 %vm1513_vm1, %v5597_v15 }
  0x33   :  { %5439 = vmatmul.msk.bf16.gmra.mxu2 %vm1513_vm1, %v5650_v16  ;;  %5492 = vmatmul.msk.bf16.gmra.mxu3 %vm1513_vm1, %v5703_v17 }
  0x42   :  { %5334 = vmatmul.msk.bf16.gmra.mxu0 %vm1513_vm1, %v5545_v18  ;;  %5387 = vmatmul.msk.bf16.gmra.mxu1 %vm1513_vm1, %v5598_v19 }
  0x43   :  { %5440 = vmatmul.msk.bf16.gmra.mxu2 %vm1513_vm1, %v5651_v20  ;;  %5493 = vmatmul.msk.bf16.gmra.mxu3 %vm1513_vm1, %v5704_v21 }
  0x52   :  { %5335 = vmatmul.msk.bf16.gmra.mxu0 %vm1513_vm1, %v5546_v22  ;;  %5388 = vmatmul.msk.bf16.gmra.mxu1 %vm1513_vm1, %v5599_v23 }
  0x53   :  { %5441 = vmatmul.msk.bf16.gmra.mxu2 %vm1513_vm1, %v5652_v24  ;;  %5494 = vmatmul.msk.bf16.gmra.mxu3 %vm1513_vm1, %v5705_v25 }
  0x62   :  { %5336 = vmatmul.msk.bf16.gmra.mxu0 %vm1513_vm1, %v5547_v26  ;;  %5389 = vmatmul.msk.bf16.gmra.mxu1 %vm1513_vm1, %v5600_v27 }
  0x63   :  { %5442 = vmatmul.msk.bf16.gmra.mxu2 %vm1513_vm1, %v5653_v28  ;;  %5495 = vmatmul.msk.bf16.gmra.mxu3 %vm1513_vm1, %v5706_v29 }
  0x72   :  { %5337 = vmatmul.msk.bf16.gmra.mxu0 %vm1513_vm1, %v5548_v30  ;;  %5390 = vmatmul.msk.bf16.gmra.mxu1 %vm1513_vm1, %v5601_v31 }
  0x73   :  { %5443 = vmatmul.msk.bf16.gmra.mxu2 %vm1513_vm1, %v5654_v32  ;;  %5496 = vmatmul.msk.bf16.gmra.mxu3 %vm1513_vm1, %v5707_v33 }
  0x82   :  { %5338 = vmatmul.msk.bf16.gmra.mxu0 %vm1513_vm1, %v5549_v34  ;;  %5391 = vmatmul.msk.bf16.gmra.mxu1 %vm1513_vm1, %v5602_v35 }
  0x83   :  { %5444 = vmatmul.msk.bf16.gmra.mxu2 %vm1513_vm1, %v5655_v36  ;;  %5497 = vmatmul.msk.bf16.gmra.mxu3 %vm1513_vm1, %v5708_v37 }
  0x8f   :  { %v2160_v41 = vpop.f32.mrf.mxu0  ;;  %v2425_v42 = vpop.f32.mrf.mxu1 }
  0x90   :  { %v2161_v45 = vadd.f32 %v5928_v38, %v2160_v41  ;;  %v2426_v46 = vadd.f32 %v5928_v38, %v2425_v42  ;;  %v5552_v41 = vld [vmem:[%s8772_s0 + $0x50] sm:$0xff]  ;;  %v5605_v42 = vld [vmem:[%s8772_s0 + $0x1f8] sm:$0xff] }
  0x92   :  { %v3214_v47 = vmax.f32 %v2161_v45, 0.0  ;;  %v3320_v48 = vmax.f32 %v2426_v46, 0.0  ;;  %5339 = vmatmul.msk.bf16.gmra.mxu0 %vm1513_vm1, %v5550_v39  ;;  %5392 = vmatmul.msk.bf16.gmra.mxu1 %vm1513_vm1, %v5603_v40 }
  0x93   :  { %5445 = vmatmul.msk.bf16.gmra.mxu2 %vm1513_vm1, %v5656_v43  ;;  %5498 = vmatmul.msk.bf16.gmra.mxu3 %vm1513_vm1, %v5709_v44 }
  0x94   :  { %v3635_v49 = vpack.c.bf16 %v3214_v47, %v3214_v47  ;;  %v3741_v50 = vpack.c.bf16 %v3320_v48, %v3320_v48  ;;  %v5658_v47 = vld [vmem:[%s8772_s0 + $0x3a0] sm:$0xff] }
  0x96   :  { %4057 = vst.msk [vmem:[%s8773_s3] sm:$0xf] %vm4056_vm2, %v3635_v49  ;;  %v2690_v51 = vpop.f32.mrf.mxu2  ;;  %v2955_v52 = vpop.f32.mrf.mxu3  ;;  %v5711_v49 = vld [vmem:[%s8772_s0 + $0x548] sm:$0xff] }
  0x97   :  { %4163 = vst.msk [vmem:[%s8773_s3 + $0x1a8] sm:$0xf] %vm4056_vm2, %v3741_v50  ;;  %v2691_v53 = vadd.f32 %v5928_v38, %v2690_v51  ;;  %v2162_v54 = vpop.f32.mrf.mxu0  ;;  %v2427_v55 = vpop.f32.mrf.mxu1  ;;  %v2956_v56 = vadd.f32 %v5928_v38, %v2955_v52 }
  0x98   :  { %v2163_v57 = vadd.f32 %v5928_v38, %v2162_v54  ;;  %v2428_v58 = vadd.f32 %v5928_v38, %v2427_v55 }
  0x99   :  { %v3426_v59 = vmax.f32 %v2691_v53, 0.0  ;;  %v3532_v60 = vmax.f32 %v2956_v56, 0.0 }
  0x9a   :  { %v3215_v61 = vmax.f32 %v2163_v57, 0.0  ;;  %v3321_v62 = vmax.f32 %v2428_v58, 0.0 }
  0x9b   :  { %v3847_v63 = vpack.c.bf16 %v3426_v59, %v3426_v59  ;;  %v3953_v2 = vpack.c.bf16 %v3532_v60, %v3532_v60 }
  0x9c   :  { %v3636_v0 = vpack.c.bf16 %v3215_v61, %v3215_v61  ;;  %v3742_v1 = vpack.c.bf16 %v3321_v62, %v3321_v62 }
  0x9d   :  { %4269 = vst.msk [vmem:[%s8773_s3 + $0x350] sm:$0xf] %vm4056_vm2, %v3847_v63 }
  0x9e   :  { %4058 = vst.msk [vmem:[%s8773_s3 + $0x4] sm:$0xf] %vm4056_vm2, %v3636_v0  ;;  %v2692_v3 = vpop.f32.mrf.mxu2  ;;  %v2957_v6 = vpop.f32.mrf.mxu3 }
  0x9f   :  { %4164 = vst.msk [vmem:[%s8773_s3 + $0x1ac] sm:$0xf] %vm4056_vm2, %v3742_v1  ;;  %v2693_v7 = vadd.f32 %v5928_v38, %v2692_v3  ;;  %v2165_v8 = vpop.f32.mrf.mxu0  ;;  %v2430_v9 = vpop.f32.mrf.mxu1  ;;  %v2958_v11 = vadd.f32 %v5928_v38, %v2957_v6 }
  0xa0   :  { %v2166_v13 = vadd.f32 %v5928_v38, %v2165_v8  ;;  %v2431_v14 = vadd.f32 %v5928_v38, %v2430_v9  ;;  %4375 = vst.msk [vmem:[%s8773_s3 + $0x4f8] sm:$0xf] %vm4056_vm2, %v3953_v2 }
  0xa1   :  { %v3427_v15 = vmax.f32 %v2693_v7, 0.0  ;;  %v3533_v16 = vmax.f32 %v2958_v11, 0.0 }
  0xa2   :  { %v3216_v17 = vmax.f32 %v2166_v13, 0.0  ;;  %v3322_v18 = vmax.f32 %v2431_v14, 0.0  ;;  %5340 = vmatmul.msk.bf16.gmra.mxu0 %vm1513_vm1, %v5551_v4  ;;  %5393 = vmatmul.msk.bf16.gmra.mxu1 %vm1513_vm1, %v5604_v5  ;;  %v5553_v13 = vld [vmem:[%s8772_s0 + $0x58] sm:$0xff]  ;;  %v5606_v14 = vld [vmem:[%s8772_s0 + $0x200] sm:$0xff] }
  0xa3   :  { %v3848_v19 = vpack.c.bf16 %v3427_v15, %v3427_v15  ;;  %5446 = vmatmul.msk.bf16.gmra.mxu2 %vm1513_vm1, %v5657_v10  ;;  %5499 = vmatmul.msk.bf16.gmra.mxu3 %vm1513_vm1, %v5710_v12  ;;  %v3954_v22 = vpack.c.bf16 %v3533_v16, %v3533_v16 }
  0xa4   :  { %v3637_v20 = vpack.c.bf16 %v3216_v17, %v3216_v17  ;;  %v3743_v21 = vpack.c.bf16 %v3322_v18, %v3322_v18 }
  0xa5   :  { %4270 = vst.msk [vmem:[%s8773_s3 + $0x354] sm:$0xf] %vm4056_vm2, %v3848_v19  ;;  %v5659_v19 = vld [vmem:[%s8772_s0 + $0x3a8] sm:$0xff] }
  0xa6   :  { %4059 = vst.msk [vmem:[%s8773_s3 + $0x8] sm:$0xf] %vm4056_vm2, %v3637_v20  ;;  %v2695_v23 = vpop.f32.mrf.mxu2  ;;  %v2960_v24 = vpop.f32.mrf.mxu3 }
  0xa7   :  { %4165 = vst.msk [vmem:[%s8773_s3 + $0x1b0] sm:$0xf] %vm4056_vm2, %v3743_v21  ;;  %v2696_v25 = vadd.f32 %v5928_v38, %v2695_v23  ;;  %v2167_v26 = vpop.f32.mrf.mxu0  ;;  %v2432_v27 = vpop.f32.mrf.mxu1  ;;  %v2961_v28 = vadd.f32 %v5928_v38, %v2960_v24  ;;  %v5712_v21 = vld [vmem:[%s8772_s0 + $0x550] sm:$0xff] }
  0xa8   :  { %v2168_v29 = vadd.f32 %v5928_v38, %v2167_v26  ;;  %v2433_v30 = vadd.f32 %v5928_v38, %v2432_v27  ;;  %4376 = vst.msk [vmem:[%s8773_s3 + $0x4fc] sm:$0xf] %vm4056_vm2, %v3954_v22 }
  0xa9   :  { %v3428_v31 = vmax.f32 %v2696_v25, 0.0  ;;  %v3534_v32 = vmax.f32 %v2961_v28, 0.0 }
  0xaa   :  { %v3217_v33 = vmax.f32 %v2168_v29, 0.0  ;;  %v3323_v34 = vmax.f32 %v2433_v30, 0.0 }
  0xab   :  { %v3849_v35 = vpack.c.bf16 %v3428_v31, %v3428_v31  ;;  %v3955_v39 = vpack.c.bf16 %v3534_v32, %v3534_v32 }
  0xac   :  { %v3638_v36 = vpack.c.bf16 %v3217_v33, %v3217_v33  ;;  %v3744_v37 = vpack.c.bf16 %v3323_v34, %v3323_v34 }
  0xad   :  { %4271 = vst.msk [vmem:[%s8773_s3 + $0x358] sm:$0xf] %vm4056_vm2, %v3849_v35 }
  0xae   :  { %4060 = vst.msk [vmem:[%s8773_s3 + $0xc] sm:$0xf] %vm4056_vm2, %v3638_v36  ;;  %v2697_v40 = vpop.f32.mrf.mxu2  ;;  %v2962_v43 = vpop.f32.mrf.mxu3 }
  0xaf   :  { %4166 = vst.msk [vmem:[%s8773_s3 + $0x1b4] sm:$0xf] %vm4056_vm2, %v3744_v37  ;;  %v2698_v44 = vadd.f32 %v5928_v38, %v2697_v40  ;;  %v2170_v45 = vpop.f32.mrf.mxu0  ;;  %v2435_v46 = vpop.f32.mrf.mxu1  ;;  %v2963_v48 = vadd.f32 %v5928_v38, %v2962_v43 }
  0xb0   :  { %v2171_v50 = vadd.f32 %v5928_v38, %v2170_v45  ;;  %v2436_v51 = vadd.f32 %v5928_v38, %v2435_v46  ;;  %4377 = vst.msk [vmem:[%s8773_s3 + $0x500] sm:$0xf] %vm4056_vm2, %v3955_v39 }
  0xb1   :  { %v3429_v52 = vmax.f32 %v2698_v44, 0.0  ;;  %v3535_v53 = vmax.f32 %v2963_v48, 0.0 }
  0xb2   :  { %v3218_v54 = vmax.f32 %v2171_v50, 0.0  ;;  %v3324_v55 = vmax.f32 %v2436_v51, 0.0  ;;  %5341 = vmatmul.msk.bf16.gmra.mxu0 %vm1513_vm1, %v5552_v41  ;;  %5394 = vmatmul.msk.bf16.gmra.mxu1 %vm1513_vm1, %v5605_v42  ;;  %v5554_v50 = vld [vmem:[%s8772_s0 + $0x60] sm:$0xff]  ;;  %v5607_v51 = vld [vmem:[%s8772_s0 + $0x208] sm:$0xff] }
  0xb3   :  { %v3850_v56 = vpack.c.bf16 %v3429_v52, %v3429_v52  ;;  %5447 = vmatmul.msk.bf16.gmra.mxu2 %vm1513_vm1, %v5658_v47  ;;  %5500 = vmatmul.msk.bf16.gmra.mxu3 %vm1513_vm1, %v5711_v49  ;;  %v3956_v59 = vpack.c.bf16 %v3535_v53, %v3535_v53 }
  0xb4   :  { %v3639_v57 = vpack.c.bf16 %v3218_v54, %v3218_v54  ;;  %v3745_v58 = vpack.c.bf16 %v3324_v55, %v3324_v55 }
  0xb5   :  { %4272 = vst.msk [vmem:[%s8773_s3 + $0x35c] sm:$0xf] %vm4056_vm2, %v3850_v56  ;;  %v5660_v56 = vld [vmem:[%s8772_s0 + $0x3b0] sm:$0xff] }
  0xb6   :  { %4061 = vst.msk [vmem:[%s8773_s3 + $0x10] sm:$0xf] %vm4056_vm2, %v3639_v57  ;;  %v2700_v60 = vpop.f32.mrf.mxu2  ;;  %v2965_v61 = vpop.f32.mrf.mxu3 }
  0xb7   :  { %4167 = vst.msk [vmem:[%s8773_s3 + $0x1b8] sm:$0xf] %vm4056_vm2, %v3745_v58  ;;  %v2701_v62 = vadd.f32 %v5928_v38, %v2700_v60  ;;  %v2172_v63 = vpop.f32.mrf.mxu0  ;;  %v2437_v0 = vpop.f32.mrf.mxu1  ;;  %v2966_v1 = vadd.f32 %v5928_v38, %v2965_v61  ;;  %v5713_v58 = vld [vmem:[%s8772_s0 + $0x558] sm:$0xff] }
  0xb8   :  { %v2173_v2 = vadd.f32 %v5928_v38, %v2172_v63  ;;  %v2438_v3 = vadd.f32 %v5928_v38, %v2437_v0  ;;  %4378 = vst.msk [vmem:[%s8773_s3 + $0x504] sm:$0xf] %vm4056_vm2, %v3956_v59 }
  0xb9   :  { %v3430_v4 = vmax.f32 %v2701_v62, 0.0  ;;  %v3536_v5 = vmax.f32 %v2966_v1, 0.0 }
  0xba   :  { %v3219_v6 = vmax.f32 %v2173_v2, 0.0  ;;  %v3325_v7 = vmax.f32 %v2438_v3, 0.0 }
  0xbb   :  { %v3851_v8 = vpack.c.bf16 %v3430_v4, %v3430_v4  ;;  %v3957_v11 = vpack.c.bf16 %v3536_v5, %v3536_v5 }
  0xbc   :  { %v3640_v9 = vpack.c.bf16 %v3219_v6, %v3219_v6  ;;  %v3746_v10 = vpack.c.bf16 %v3325_v7, %v3325_v7 }
  0xbd   :  { %4273 = vst.msk [vmem:[%s8773_s3 + $0x360] sm:$0xf] %vm4056_vm2, %v3851_v8 }
  0xbe   :  { %4062 = vst.msk [vmem:[%s8773_s3 + $0x14] sm:$0xf] %vm4056_vm2, %v3640_v9  ;;  %v2702_v12 = vpop.f32.mrf.mxu2  ;;  %v2967_v15 = vpop.f32.mrf.mxu3 }
  0xbf   :  { %4168 = vst.msk [vmem:[%s8773_s3 + $0x1bc] sm:$0xf] %vm4056_vm2, %v3746_v10  ;;  %v2703_v16 = vadd.f32 %v5928_v38, %v2702_v12  ;;  %v2175_v17 = vpop.f32.mrf.mxu0  ;;  %v2440_v18 = vpop.f32.mrf.mxu1  ;;  %v2968_v20 = vadd.f32 %v5928_v38, %v2967_v15 }
  0xc0   :  { %v2176_v22 = vadd.f32 %v5928_v38, %v2175_v17  ;;  %v2441_v23 = vadd.f32 %v5928_v38, %v2440_v18  ;;  %4379 = vst.msk [vmem:[%s8773_s3 + $0x508] sm:$0xf] %vm4056_vm2, %v3957_v11 }
  0xc1   :  { %v3431_v24 = vmax.f32 %v2703_v16, 0.0  ;;  %v3537_v25 = vmax.f32 %v2968_v20, 0.0 }
  0xc2   :  { %v3220_v26 = vmax.f32 %v2176_v22, 0.0  ;;  %v3326_v27 = vmax.f32 %v2441_v23, 0.0  ;;  %5342 = vmatmul.msk.bf16.gmra.mxu0 %vm1513_vm1, %v5553_v13  ;;  %5395 = vmatmul.msk.bf16.gmra.mxu1 %vm1513_vm1, %v5606_v14  ;;  %v5555_v22 = vld [vmem:[%s8772_s0 + $0x68] sm:$0xff]  ;;  %v5608_v23 = vld [vmem:[%s8772_s0 + $0x210] sm:$0xff] }
  0xc3   :  { %v3852_v28 = vpack.c.bf16 %v3431_v24, %v3431_v24  ;;  %5448 = vmatmul.msk.bf16.gmra.mxu2 %vm1513_vm1, %v5659_v19  ;;  %5501 = vmatmul.msk.bf16.gmra.mxu3 %vm1513_vm1, %v5712_v21  ;;  %v3958_v31 = vpack.c.bf16 %v3537_v25, %v3537_v25 }
  0xc4   :  { %v3641_v29 = vpack.c.bf16 %v3220_v26, %v3220_v26  ;;  %v3747_v30 = vpack.c.bf16 %v3326_v27, %v3326_v27 }
  0xc5   :  { %4274 = vst.msk [vmem:[%s8773_s3 + $0x364] sm:$0xf] %vm4056_vm2, %v3852_v28  ;;  %v5661_v28 = vld [vmem:[%s8772_s0 + $0x3b8] sm:$0xff] }
  0xc6   :  { %4063 = vst.msk [vmem:[%s8773_s3 + $0x18] sm:$0xf] %vm4056_vm2, %v3641_v29  ;;  %v2705_v32 = vpop.f32.mrf.mxu2  ;;  %v2970_v33 = vpop.f32.mrf.mxu3 }
  0xc7   :  { %4169 = vst.msk [vmem:[%s8773_s3 + $0x1c0] sm:$0xf] %vm4056_vm2, %v3747_v30  ;;  %v2706_v34 = vadd.f32 %v5928_v38, %v2705_v32  ;;  %v2177_v35 = vpop.f32.mrf.mxu0  ;;  %v2442_v36 = vpop.f32.mrf.mxu1  ;;  %v2971_v37 = vadd.f32 %v5928_v38, %v2970_v33  ;;  %v5714_v30 = vld [vmem:[%s8772_s0 + $0x560] sm:$0xff] }
  0xc8   :  { %v2178_v39 = vadd.f32 %v5928_v38, %v2177_v35  ;;  %v2443_v40 = vadd.f32 %v5928_v38, %v2442_v36  ;;  %4380 = vst.msk [vmem:[%s8773_s3 + $0x50c] sm:$0xf] %vm4056_vm2, %v3958_v31 }
  0xc9   :  { %v3432_v41 = vmax.f32 %v2706_v34, 0.0  ;;  %v3538_v42 = vmax.f32 %v2971_v37, 0.0 }
  0xca   :  { %v3221_v43 = vmax.f32 %v2178_v39, 0.0  ;;  %v3327_v44 = vmax.f32 %v2443_v40, 0.0 }
  0xcb   :  { %v3853_v45 = vpack.c.bf16 %v3432_v41, %v3432_v41  ;;  %v3959_v48 = vpack.c.bf16 %v3538_v42, %v3538_v42 }
  0xcc   :  { %v3642_v46 = vpack.c.bf16 %v3221_v43, %v3221_v43  ;;  %v3748_v47 = vpack.c.bf16 %v3327_v44, %v3327_v44 }
  0xcd   :  { %4275 = vst.msk [vmem:[%s8773_s3 + $0x368] sm:$0xf] %vm4056_vm2, %v3853_v45 }
  0xce   :  { %4064 = vst.msk [vmem:[%s8773_s3 + $0x1c] sm:$0xf] %vm4056_vm2, %v3642_v46  ;;  %v2707_v49 = vpop.f32.mrf.mxu2  ;;  %v2972_v52 = vpop.f32.mrf.mxu3 }
  0xcf   :  { %4170 = vst.msk [vmem:[%s8773_s3 + $0x1c4] sm:$0xf] %vm4056_vm2, %v3748_v47  ;;  %v2708_v53 = vadd.f32 %v5928_v38, %v2707_v49  ;;  %v2180_v54 = vpop.f32.mrf.mxu0  ;;  %v2445_v55 = vpop.f32.mrf.mxu1  ;;  %v2973_v57 = vadd.f32 %v5928_v38, %v2972_v52 }
  0xd0   :  { %v2181_v59 = vadd.f32 %v5928_v38, %v2180_v54  ;;  %v2446_v60 = vadd.f32 %v5928_v38, %v2445_v55  ;;  %4381 = vst.msk [vmem:[%s8773_s3 + $0x510] sm:$0xf] %vm4056_vm2, %v3959_v48 }
  0xd1   :  { %v3433_v61 = vmax.f32 %v2708_v53, 0.0  ;;  %v3539_v62 = vmax.f32 %v2973_v57, 0.0 }
  0xd2   :  { %v3222_v63 = vmax.f32 %v2181_v59, 0.0  ;;  %v3328_v0 = vmax.f32 %v2446_v60, 0.0  ;;  %5343 = vmatmul.msk.bf16.gmra.mxu0 %vm1513_vm1, %v5554_v50  ;;  %5396 = vmatmul.msk.bf16.gmra.mxu1 %vm1513_vm1, %v5607_v51  ;;  %v5556_v59 = vld [vmem:[%s8772_s0 + $0x70] sm:$0xff]  ;;  %v5609_v60 = vld [vmem:[%s8772_s0 + $0x218] sm:$0xff] }
  0xd3   :  { %v3854_v1 = vpack.c.bf16 %v3433_v61, %v3433_v61  ;;  %5449 = vmatmul.msk.bf16.gmra.mxu2 %vm1513_vm1, %v5660_v56  ;;  %5502 = vmatmul.msk.bf16.gmra.mxu3 %vm1513_vm1, %v5713_v58  ;;  %v3960_v4 = vpack.c.bf16 %v3539_v62, %v3539_v62 }
  0xd4   :  { %v3643_v2 = vpack.c.bf16 %v3222_v63, %v3222_v63  ;;  %v3749_v3 = vpack.c.bf16 %v3328_v0, %v3328_v0 }
  0xd5   :  { %4276 = vst.msk [vmem:[%s8773_s3 + $0x36c] sm:$0xf] %vm4056_vm2, %v3854_v1  ;;  %v5662_v1 = vld [vmem:[%s8772_s0 + $0x3c0] sm:$0xff] }
  0xd6   :  { %4065 = vst.msk [vmem:[%s8773_s3 + $0x20] sm:$0xf] %vm4056_vm2, %v3643_v2  ;;  %v2710_v5 = vpop.f32.mrf.mxu2  ;;  %v2975_v6 = vpop.f32.mrf.mxu3 }
  0xd7   :  { %4171 = vst.msk [vmem:[%s8773_s3 + $0x1c8] sm:$0xf] %vm4056_vm2, %v3749_v3  ;;  %v2711_v7 = vadd.f32 %v5928_v38, %v2710_v5  ;;  %v2182_v8 = vpop.f32.mrf.mxu0  ;;  %v2447_v9 = vpop.f32.mrf.mxu1  ;;  %v2976_v10 = vadd.f32 %v5928_v38, %v2975_v6  ;;  %v5715_v3 = vld [vmem:[%s8772_s0 + $0x568] sm:$0xff] }
  0xd8   :  { %v2183_v11 = vadd.f32 %v5928_v38, %v2182_v8  ;;  %v2448_v12 = vadd.f32 %v5928_v38, %v2447_v9  ;;  %4382 = vst.msk [vmem:[%s8773_s3 + $0x514] sm:$0xf] %vm4056_vm2, %v3960_v4 }
  0xd9   :  { %v3434_v13 = vmax.f32 %v2711_v7, 0.0  ;;  %v3540_v14 = vmax.f32 %v2976_v10, 0.0 }
  0xda   :  { %v3223_v15 = vmax.f32 %v2183_v11, 0.0  ;;  %v3329_v16 = vmax.f32 %v2448_v12, 0.0 }
  0xdb   :  { %v3855_v17 = vpack.c.bf16 %v3434_v13, %v3434_v13  ;;  %v3961_v20 = vpack.c.bf16 %v3540_v14, %v3540_v14 }
  0xdc   :  { %v3644_v18 = vpack.c.bf16 %v3223_v15, %v3223_v15  ;;  %v3750_v19 = vpack.c.bf16 %v3329_v16, %v3329_v16 }
  0xdd   :  { %4277 = vst.msk [vmem:[%s8773_s3 + $0x370] sm:$0xf] %vm4056_vm2, %v3855_v17 }
  0xde   :  { %4066 = vst.msk [vmem:[%s8773_s3 + $0x24] sm:$0xf] %vm4056_vm2, %v3644_v18  ;;  %v2712_v21 = vpop.f32.mrf.mxu2  ;;  %v2977_v24 = vpop.f32.mrf.mxu3 }
  0xdf   :  { %4172 = vst.msk [vmem:[%s8773_s3 + $0x1cc] sm:$0xf] %vm4056_vm2, %v3750_v19  ;;  %v2713_v25 = vadd.f32 %v5928_v38, %v2712_v21  ;;  %v2185_v26 = vpop.f32.mrf.mxu0  ;;  %v2450_v27 = vpop.f32.mrf.mxu1  ;;  %v2978_v29 = vadd.f32 %v5928_v38, %v2977_v24 }
  0xe0   :  { %v2186_v31 = vadd.f32 %v5928_v38, %v2185_v26  ;;  %v2451_v32 = vadd.f32 %v5928_v38, %v2450_v27  ;;  %4383 = vst.msk [vmem:[%s8773_s3 + $0x518] sm:$0xf] %vm4056_vm2, %v3961_v20 }
  0xe1   :  { %v3435_v33 = vmax.f32 %v2713_v25, 0.0  ;;  %v3541_v34 = vmax.f32 %v2978_v29, 0.0 }
  0xe2   :  { %v3224_v35 = vmax.f32 %v2186_v31, 0.0  ;;  %v3330_v36 = vmax.f32 %v2451_v32, 0.0  ;;  %5344 = vmatmul.msk.bf16.gmra.mxu0 %vm1513_vm1, %v5555_v22  ;;  %5397 = vmatmul.msk.bf16.gmra.mxu1 %vm1513_vm1, %v5608_v23  ;;  %v5557_v31 = vld [vmem:[%s8772_s0 + $0x78] sm:$0xff]  ;;  %v5610_v32 = vld [vmem:[%s8772_s0 + $0x220] sm:$0xff] }
  0xe3   :  { %v3856_v37 = vpack.c.bf16 %v3435_v33, %v3435_v33  ;;  %5450 = vmatmul.msk.bf16.gmra.mxu2 %vm1513_vm1, %v5661_v28  ;;  %5503 = vmatmul.msk.bf16.gmra.mxu3 %vm1513_vm1, %v5714_v30  ;;  %v3962_v41 = vpack.c.bf16 %v3541_v34, %v3541_v34 }
  0xe4   :  { %v3645_v39 = vpack.c.bf16 %v3224_v35, %v3224_v35  ;;  %v3751_v40 = vpack.c.bf16 %v3330_v36, %v3330_v36 }
  0xe5   :  { %4278 = vst.msk [vmem:[%s8773_s3 + $0x374] sm:$0xf] %vm4056_vm2, %v3856_v37  ;;  %v5663_v37 = vld [vmem:[%s8772_s0 + $0x3c8] sm:$0xff] }
  0xe6   :  { %4067 = vst.msk [vmem:[%s8773_s3 + $0x28] sm:$0xf] %vm4056_vm2, %v3645_v39  ;;  %v2715_v42 = vpop.f32.mrf.mxu2  ;;  %v2980_v43 = vpop.f32.mrf.mxu3 }
  0xe7   :  { %4173 = vst.msk [vmem:[%s8773_s3 + $0x1d0] sm:$0xf] %vm4056_vm2, %v3751_v40  ;;  %v2716_v44 = vadd.f32 %v5928_v38, %v2715_v42  ;;  %v2187_v45 = vpop.f32.mrf.mxu0  ;;  %v2452_v46 = vpop.f32.mrf.mxu1  ;;  %v2981_v47 = vadd.f32 %v5928_v38, %v2980_v43  ;;  %v5716_v40 = vld [vmem:[%s8772_s0 + $0x570] sm:$0xff] }
  0xe8   :  { %v2188_v48 = vadd.f32 %v5928_v38, %v2187_v45  ;;  %v2453_v49 = vadd.f32 %v5928_v38, %v2452_v46  ;;  %4384 = vst.msk [vmem:[%s8773_s3 + $0x51c] sm:$0xf] %vm4056_vm2, %v3962_v41 }
  0xe9   :  { %v3436_v50 = vmax.f32 %v2716_v44, 0.0  ;;  %v3542_v51 = vmax.f32 %v2981_v47, 0.0 }
  0xea   :  { %v3225_v52 = vmax.f32 %v2188_v48, 0.0  ;;  %v3331_v53 = vmax.f32 %v2453_v49, 0.0 }
  0xeb   :  { %v3857_v54 = vpack.c.bf16 %v3436_v50, %v3436_v50  ;;  %v3963_v57 = vpack.c.bf16 %v3542_v51, %v3542_v51 }
  0xec   :  { %v3646_v55 = vpack.c.bf16 %v3225_v52, %v3225_v52  ;;  %v3752_v56 = vpack.c.bf16 %v3331_v53, %v3331_v53 }
  0xed   :  { %4279 = vst.msk [vmem:[%s8773_s3 + $0x378] sm:$0xf] %vm4056_vm2, %v3857_v54 }
  0xee   :  { %4068 = vst.msk [vmem:[%s8773_s3 + $0x2c] sm:$0xf] %vm4056_vm2, %v3646_v55  ;;  %v2717_v58 = vpop.f32.mrf.mxu2  ;;  %v2982_v61 = vpop.f32.mrf.mxu3 }
  0xef   :  { %4174 = vst.msk [vmem:[%s8773_s3 + $0x1d4] sm:$0xf] %vm4056_vm2, %v3752_v56  ;;  %v2718_v62 = vadd.f32 %v5928_v38, %v2717_v58  ;;  %v2190_v63 = vpop.f32.mrf.mxu0  ;;  %v2455_v0 = vpop.f32.mrf.mxu1  ;;  %v2983_v2 = vadd.f32 %v5928_v38, %v2982_v61 }
  0xf0   :  { %v2191_v4 = vadd.f32 %v5928_v38, %v2190_v63  ;;  %v2456_v5 = vadd.f32 %v5928_v38, %v2455_v0  ;;  %4385 = vst.msk [vmem:[%s8773_s3 + $0x520] sm:$0xf] %vm4056_vm2, %v3963_v57 }
  0xf1   :  { %v3437_v6 = vmax.f32 %v2718_v62, 0.0  ;;  %v3543_v7 = vmax.f32 %v2983_v2, 0.0 }
  0xf2   :  { %v3226_v8 = vmax.f32 %v2191_v4, 0.0  ;;  %v3332_v9 = vmax.f32 %v2456_v5, 0.0  ;;  %5345 = vmatmul.msk.bf16.gmra.mxu0 %vm1513_vm1, %v5556_v59  ;;  %5398 = vmatmul.msk.bf16.gmra.mxu1 %vm1513_vm1, %v5609_v60  ;;  %v5558_v4 = vld [vmem:[%s8772_s0 + $0x80] sm:$0xff]  ;;  %v5611_v5 = vld [vmem:[%s8772_s0 + $0x228] sm:$0xff] }
  0xf3   :  { %v3858_v10 = vpack.c.bf16 %v3437_v6, %v3437_v6  ;;  %5451 = vmatmul.msk.bf16.gmra.mxu2 %vm1513_vm1, %v5662_v1  ;;  %5504 = vmatmul.msk.bf16.gmra.mxu3 %vm1513_vm1, %v5715_v3  ;;  %v3964_v13 = vpack.c.bf16 %v3543_v7, %v3543_v7 }
  0xf4   :  { %v3647_v11 = vpack.c.bf16 %v3226_v8, %v3226_v8  ;;  %v3753_v12 = vpack.c.bf16 %v3332_v9, %v3332_v9 }
  0xf5   :  { %4280 = vst.msk [vmem:[%s8773_s3 + $0x37c] sm:$0xf] %vm4056_vm2, %v3858_v10  ;;  %v5664_v10 = vld [vmem:[%s8772_s0 + $0x3d0] sm:$0xff] }
  0xf6   :  { %4069 = vst.msk [vmem:[%s8773_s3 + $0x30] sm:$0xf] %vm4056_vm2, %v3647_v11  ;;  %v2720_v14 = vpop.f32.mrf.mxu2  ;;  %v2985_v15 = vpop.f32.mrf.mxu3 }
  0xf7   :  { %4175 = vst.msk [vmem:[%s8773_s3 + $0x1d8] sm:$0xf] %vm4056_vm2, %v3753_v12  ;;  %v2721_v16 = vadd.f32 %v5928_v38, %v2720_v14  ;;  %v2192_v17 = vpop.f32.mrf.mxu0  ;;  %v2457_v18 = vpop.f32.mrf.mxu1  ;;  %v2986_v19 = vadd.f32 %v5928_v38, %v2985_v15  ;;  %v5717_v12 = vld [vmem:[%s8772_s0 + $0x578] sm:$0xff] }
  0xf8   :  { %v2193_v20 = vadd.f32 %v5928_v38, %v2192_v17  ;;  %v2458_v21 = vadd.f32 %v5928_v38, %v2457_v18  ;;  %4386 = vst.msk [vmem:[%s8773_s3 + $0x524] sm:$0xf] %vm4056_vm2, %v3964_v13 }
  0xf9   :  { %v3438_v22 = vmax.f32 %v2721_v16, 0.0  ;;  %v3544_v23 = vmax.f32 %v2986_v19, 0.0 }
  0xfa   :  { %v3227_v24 = vmax.f32 %v2193_v20, 0.0  ;;  %v3333_v25 = vmax.f32 %v2458_v21, 0.0 }
  0xfb   :  { %v3859_v26 = vpack.c.bf16 %v3438_v22, %v3438_v22  ;;  %v3965_v29 = vpack.c.bf16 %v3544_v23, %v3544_v23 }
  0xfc   :  { %v3648_v27 = vpack.c.bf16 %v3227_v24, %v3227_v24  ;;  %v3754_v28 = vpack.c.bf16 %v3333_v25, %v3333_v25 }
  0xfd   :  { %4281 = vst.msk [vmem:[%s8773_s3 + $0x380] sm:$0xf] %vm4056_vm2, %v3859_v26 }
  0xfe   :  { %4070 = vst.msk [vmem:[%s8773_s3 + $0x34] sm:$0xf] %vm4056_vm2, %v3648_v27  ;;  %v2722_v30 = vpop.f32.mrf.mxu2  ;;  %v2987_v33 = vpop.f32.mrf.mxu3 }
  0xff   :  { %4176 = vst.msk [vmem:[%s8773_s3 + $0x1dc] sm:$0xf] %vm4056_vm2, %v3754_v28  ;;  %v2723_v34 = vadd.f32 %v5928_v38, %v2722_v30  ;;  %v2195_v35 = vpop.f32.mrf.mxu0  ;;  %v2460_v36 = vpop.f32.mrf.mxu1  ;;  %v2988_v39 = vadd.f32 %v5928_v38, %v2987_v33 }
 0x100   :  { %v2196_v41 = vadd.f32 %v5928_v38, %v2195_v35  ;;  %v2461_v42 = vadd.f32 %v5928_v38, %v2460_v36  ;;  %4387 = vst.msk [vmem:[%s8773_s3 + $0x528] sm:$0xf] %vm4056_vm2, %v3965_v29 }
 0x101   :  { %v3439_v43 = vmax.f32 %v2723_v34, 0.0  ;;  %v3545_v44 = vmax.f32 %v2988_v39, 0.0 }
 0x102   :  { %v3228_v45 = vmax.f32 %v2196_v41, 0.0  ;;  %v3334_v46 = vmax.f32 %v2461_v42, 0.0  ;;  %5346 = vmatmul.msk.bf16.gmra.mxu0 %vm1513_vm1, %v5557_v31  ;;  %5399 = vmatmul.msk.bf16.gmra.mxu1 %vm1513_vm1, %v5610_v32  ;;  %v5559_v41 = vld [vmem:[%s8772_s0 + $0x88] sm:$0xff]  ;;  %v5612_v42 = vld [vmem:[%s8772_s0 + $0x230] sm:$0xff] }
 0x103   :  { %v3860_v47 = vpack.c.bf16 %v3439_v43, %v3439_v43  ;;  %5452 = vmatmul.msk.bf16.gmra.mxu2 %vm1513_vm1, %v5663_v37  ;;  %5505 = vmatmul.msk.bf16.gmra.mxu3 %vm1513_vm1, %v5716_v40  ;;  %v3966_v50 = vpack.c.bf16 %v3545_v44, %v3545_v44 }
 0x104   :  { %v3649_v48 = vpack.c.bf16 %v3228_v45, %v3228_v45  ;;  %v3755_v49 = vpack.c.bf16 %v3334_v46, %v3334_v46 }
 0x105   :  { %4282 = vst.msk [vmem:[%s8773_s3 + $0x384] sm:$0xf] %vm4056_vm2, %v3860_v47  ;;  %v5665_v47 = vld [vmem:[%s8772_s0 + $0x3d8] sm:$0xff] }
 0x106   :  { %4071 = vst.msk [vmem:[%s8773_s3 + $0x38] sm:$0xf] %vm4056_vm2, %v3649_v48  ;;  %v2725_v51 = vpop.f32.mrf.mxu2  ;;  %v2990_v52 = vpop.f32.mrf.mxu3 }
 0x107   :  { %4177 = vst.msk [vmem:[%s8773_s3 + $0x1e0] sm:$0xf] %vm4056_vm2, %v3755_v49  ;;  %v2726_v53 = vadd.f32 %v5928_v38, %v2725_v51  ;;  %v2197_v54 = vpop.f32.mrf.mxu0  ;;  %v2462_v55 = vpop.f32.mrf.mxu1  ;;  %v2991_v56 = vadd.f32 %v5928_v38, %v2990_v52  ;;  %v5718_v49 = vld [vmem:[%s8772_s0 + $0x580] sm:$0xff] }
 0x108   :  { %v2198_v57 = vadd.f32 %v5928_v38, %v2197_v54  ;;  %v2463_v58 = vadd.f32 %v5928_v38, %v2462_v55  ;;  %4388 = vst.msk [vmem:[%s8773_s3 + $0x52c] sm:$0xf] %vm4056_vm2, %v3966_v50 }
 0x109   :  { %v3440_v59 = vmax.f32 %v2726_v53, 0.0  ;;  %v3546_v60 = vmax.f32 %v2991_v56, 0.0 }
 0x10a   :  { %v3229_v61 = vmax.f32 %v2198_v57, 0.0  ;;  %v3335_v62 = vmax.f32 %v2463_v58, 0.0 }
 0x10b   :  { %v3861_v63 = vpack.c.bf16 %v3440_v59, %v3440_v59  ;;  %v3967_v2 = vpack.c.bf16 %v3546_v60, %v3546_v60 }
 0x10c   :  { %v3650_v0 = vpack.c.bf16 %v3229_v61, %v3229_v61  ;;  %v3756_v1 = vpack.c.bf16 %v3335_v62, %v3335_v62 }
 0x10d   :  { %4283 = vst.msk [vmem:[%s8773_s3 + $0x388] sm:$0xf] %vm4056_vm2, %v3861_v63 }
 0x10e   :  { %4072 = vst.msk [vmem:[%s8773_s3 + $0x3c] sm:$0xf] %vm4056_vm2, %v3650_v0  ;;  %v2727_v3 = vpop.f32.mrf.mxu2  ;;  %v2992_v6 = vpop.f32.mrf.mxu3 }
 0x10f   :  { %4178 = vst.msk [vmem:[%s8773_s3 + $0x1e4] sm:$0xf] %vm4056_vm2, %v3756_v1  ;;  %v2728_v7 = vadd.f32 %v5928_v38, %v2727_v3  ;;  %v2200_v8 = vpop.f32.mrf.mxu0  ;;  %v2465_v9 = vpop.f32.mrf.mxu1  ;;  %v2993_v11 = vadd.f32 %v5928_v38, %v2992_v6 }
 0x110   :  { %v2201_v13 = vadd.f32 %v5928_v38, %v2200_v8  ;;  %v2466_v14 = vadd.f32 %v5928_v38, %v2465_v9  ;;  %4389 = vst.msk [vmem:[%s8773_s3 + $0x530] sm:$0xf] %vm4056_vm2, %v3967_v2 }
 0x111   :  { %v3441_v15 = vmax.f32 %v2728_v7, 0.0  ;;  %v3547_v16 = vmax.f32 %v2993_v11, 0.0 }
 0x112   :  { %v3230_v17 = vmax.f32 %v2201_v13, 0.0  ;;  %v3336_v18 = vmax.f32 %v2466_v14, 0.0  ;;  %5347 = vmatmul.msk.bf16.gmra.mxu0 %vm1513_vm1, %v5558_v4  ;;  %5400 = vmatmul.msk.bf16.gmra.mxu1 %vm1513_vm1, %v5611_v5  ;;  %v5560_v13 = vld [vmem:[%s8772_s0 + $0x90] sm:$0xff]  ;;  %v5613_v14 = vld [vmem:[%s8772_s0 + $0x238] sm:$0xff] }
 0x113   :  { %v3862_v19 = vpack.c.bf16 %v3441_v15, %v3441_v15  ;;  %5453 = vmatmul.msk.bf16.gmra.mxu2 %vm1513_vm1, %v5664_v10  ;;  %5506 = vmatmul.msk.bf16.gmra.mxu3 %vm1513_vm1, %v5717_v12  ;;  %v3968_v22 = vpack.c.bf16 %v3547_v16, %v3547_v16 }
 0x114   :  { %v3651_v20 = vpack.c.bf16 %v3230_v17, %v3230_v17  ;;  %v3757_v21 = vpack.c.bf16 %v3336_v18, %v3336_v18 }
 0x115   :  { %4284 = vst.msk [vmem:[%s8773_s3 + $0x38c] sm:$0xf] %vm4056_vm2, %v3862_v19  ;;  %v5666_v19 = vld [vmem:[%s8772_s0 + $0x3e0] sm:$0xff] }
 0x116   :  { %4073 = vst.msk [vmem:[%s8773_s3 + $0x40] sm:$0xf] %vm4056_vm2, %v3651_v20  ;;  %v2730_v23 = vpop.f32.mrf.mxu2  ;;  %v2995_v24 = vpop.f32.mrf.mxu3 }
 0x117   :  { %4179 = vst.msk [vmem:[%s8773_s3 + $0x1e8] sm:$0xf] %vm4056_vm2, %v3757_v21  ;;  %v2731_v25 = vadd.f32 %v5928_v38, %v2730_v23  ;;  %v2202_v26 = vpop.f32.mrf.mxu0  ;;  %v2467_v27 = vpop.f32.mrf.mxu1  ;;  %v2996_v28 = vadd.f32 %v5928_v38, %v2995_v24  ;;  %v5719_v21 = vld [vmem:[%s8772_s0 + $0x588] sm:$0xff] }
 0x118   :  { %v2203_v29 = vadd.f32 %v5928_v38, %v2202_v26  ;;  %v2468_v30 = vadd.f32 %v5928_v38, %v2467_v27  ;;  %4390 = vst.msk [vmem:[%s8773_s3 + $0x534] sm:$0xf] %vm4056_vm2, %v3968_v22 }
 0x119   :  { %v3442_v31 = vmax.f32 %v2731_v25, 0.0  ;;  %v3548_v32 = vmax.f32 %v2996_v28, 0.0 }
 0x11a   :  { %v3231_v33 = vmax.f32 %v2203_v29, 0.0  ;;  %v3337_v34 = vmax.f32 %v2468_v30, 0.0 }
 0x11b   :  { %v3863_v35 = vpack.c.bf16 %v3442_v31, %v3442_v31  ;;  %v3969_v39 = vpack.c.bf16 %v3548_v32, %v3548_v32 }
 0x11c   :  { %v3652_v36 = vpack.c.bf16 %v3231_v33, %v3231_v33  ;;  %v3758_v37 = vpack.c.bf16 %v3337_v34, %v3337_v34 }
 0x11d   :  { %4285 = vst.msk [vmem:[%s8773_s3 + $0x390] sm:$0xf] %vm4056_vm2, %v3863_v35 }
 0x11e   :  { %4074 = vst.msk [vmem:[%s8773_s3 + $0x44] sm:$0xf] %vm4056_vm2, %v3652_v36  ;;  %v2732_v40 = vpop.f32.mrf.mxu2  ;;  %v2997_v43 = vpop.f32.mrf.mxu3 }
 0x11f   :  { %4180 = vst.msk [vmem:[%s8773_s3 + $0x1ec] sm:$0xf] %vm4056_vm2, %v3758_v37  ;;  %v2733_v44 = vadd.f32 %v5928_v38, %v2732_v40  ;;  %v2205_v45 = vpop.f32.mrf.mxu0  ;;  %v2470_v46 = vpop.f32.mrf.mxu1  ;;  %v2998_v48 = vadd.f32 %v5928_v38, %v2997_v43 }
 0x120   :  { %v2206_v50 = vadd.f32 %v5928_v38, %v2205_v45  ;;  %v2471_v51 = vadd.f32 %v5928_v38, %v2470_v46  ;;  %4391 = vst.msk [vmem:[%s8773_s3 + $0x538] sm:$0xf] %vm4056_vm2, %v3969_v39 }
 0x121   :  { %v3443_v52 = vmax.f32 %v2733_v44, 0.0  ;;  %v3549_v53 = vmax.f32 %v2998_v48, 0.0 }
 0x122   :  { %v3232_v54 = vmax.f32 %v2206_v50, 0.0  ;;  %v3338_v55 = vmax.f32 %v2471_v51, 0.0  ;;  %5348 = vmatmul.msk.bf16.gmra.mxu0 %vm1513_vm1, %v5559_v41  ;;  %5401 = vmatmul.msk.bf16.gmra.mxu1 %vm1513_vm1, %v5612_v42  ;;  %v5614_v50 = vld [vmem:[%s8772_s0 + $0x240] sm:$0xff] }
 0x123   :  { %v3864_v56 = vpack.c.bf16 %v3443_v52, %v3443_v52  ;;  %5454 = vmatmul.msk.bf16.gmra.mxu2 %vm1513_vm1, %v5665_v47  ;;  %5507 = vmatmul.msk.bf16.gmra.mxu3 %vm1513_vm1, %v5718_v49  ;;  %v3970_v59 = vpack.c.bf16 %v3549_v53, %v3549_v53  ;;  %v5561_v49 = vld [vmem:[%s8772_s0 + $0x98] sm:$0xff]  ;;  %v6541_v52 = vld [vmem:[%s8771_s2] ss:$0 sm:$0xff] }
 0x124   :  { %v3653_v57 = vpack.c.bf16 %v3232_v54, %v3232_v54  ;;  %v3759_v58 = vpack.c.bf16 %v3338_v55, %v3338_v55 }
 0x125   :  { %4286 = vst.msk [vmem:[%s8773_s3 + $0x394] sm:$0xf] %vm4056_vm2, %v3864_v56  ;;  %v5667_v56 = vld [vmem:[%s8772_s0 + $0x3e8] sm:$0xff] }
 0x126   :  { %4075 = vst.msk [vmem:[%s8773_s3 + $0x48] sm:$0xf] %vm4056_vm2, %v3653_v57  ;;  %v2735_v60 = vpop.f32.mrf.mxu2  ;;  %v3000_v61 = vpop.f32.mrf.mxu3 }
 0x127   :  { %4181 = vst.msk [vmem:[%s8773_s3 + $0x1f0] sm:$0xf] %vm4056_vm2, %v3759_v58  ;;  %v2736_v62 = vadd.f32 %v5928_v38, %v2735_v60  ;;  %v2207_v63 = vpop.f32.mrf.mxu0  ;;  %v2472_v0 = vpop.f32.mrf.mxu1  ;;  %v3001_v1 = vadd.f32 %v5928_v38, %v3000_v61  ;;  %v5720_v58 = vld [vmem:[%s8772_s0 + $0x590] sm:$0xff] }
 0x128   :  { %v2208_v2 = vadd.f32 %v5928_v38, %v2207_v63  ;;  %v2473_v3 = vadd.f32 %v5928_v38, %v2472_v0  ;;  %4392 = vst.msk [vmem:[%s8773_s3 + $0x53c] sm:$0xf] %vm4056_vm2, %v3970_v59 }
 0x129   :  { %v3444_v4 = vmax.f32 %v2736_v62, 0.0  ;;  %v3550_v5 = vmax.f32 %v3001_v1, 0.0 }
 0x12a   :  { %v3233_v6 = vmax.f32 %v2208_v2, 0.0  ;;  %v3339_v7 = vmax.f32 %v2473_v3, 0.0 }
 0x12b   :  { %v3865_v8 = vpack.c.bf16 %v3444_v4, %v3444_v4  ;;  %v3971_v11 = vpack.c.bf16 %v3550_v5, %v3550_v5 }
 0x12c   :  { %v3654_v9 = vpack.c.bf16 %v3233_v6, %v3233_v6  ;;  %v3760_v10 = vpack.c.bf16 %v3339_v7, %v3339_v7 }
 0x12d   :  { %4287 = vst.msk [vmem:[%s8773_s3 + $0x398] sm:$0xf] %vm4056_vm2, %v3865_v8 }
 0x12e   :  { %4076 = vst.msk [vmem:[%s8773_s3 + $0x4c] sm:$0xf] %vm4056_vm2, %v3654_v9  ;;  %v2737_v12 = vpop.f32.mrf.mxu2  ;;  %v3002_v15 = vpop.f32.mrf.mxu3 }
 0x12f   :  { %4182 = vst.msk [vmem:[%s8773_s3 + $0x1f4] sm:$0xf] %vm4056_vm2, %v3760_v10  ;;  %v2738_v16 = vadd.f32 %v5928_v38, %v2737_v12  ;;  %v2210_v17 = vpop.f32.mrf.mxu0  ;;  %v2475_v18 = vpop.f32.mrf.mxu1  ;;  %v3003_v20 = vadd.f32 %v5928_v38, %v3002_v15 }
 0x130   :  { %v2211_v22 = vadd.f32 %v5928_v38, %v2210_v17  ;;  %v2476_v23 = vadd.f32 %v5928_v38, %v2475_v18  ;;  %4393 = vst.msk [vmem:[%s8773_s3 + $0x540] sm:$0xf] %vm4056_vm2, %v3971_v11 }
 0x131   :  { %v3445_v24 = vmax.f32 %v2738_v16, 0.0  ;;  %v3551_v25 = vmax.f32 %v3003_v20, 0.0 }
 0x132   :  { %v3234_v26 = vmax.f32 %v2211_v22, 0.0  ;;  %v3340_v27 = vmax.f32 %v2476_v23, 0.0  ;;  %5349 = vmatmul.msk.bf16.gmra.mxu0 %vm1513_vm1, %v5560_v13  ;;  %5402 = vmatmul.msk.bf16.gmra.mxu1 %vm1513_vm1, %v5613_v14  ;;  %v5562_v22 = vld [vmem:[%s8772_s0 + $0xa0] sm:$0xff]  ;;  %v5615_v23 = vld [vmem:[%s8772_s0 + $0x248] sm:$0xff] }
 0x133   :  { %v3866_v28 = vpack.c.bf16 %v3445_v24, %v3445_v24  ;;  %5455 = vmatmul.msk.bf16.gmra.mxu2 %vm1513_vm1, %v5666_v19  ;;  %5508 = vmatmul.msk.bf16.gmra.mxu3 %vm1513_vm1, %v5719_v21  ;;  %v3972_v31 = vpack.c.bf16 %v3551_v25, %v3551_v25 }
 0x134   :  { %v3655_v29 = vpack.c.bf16 %v3234_v26, %v3234_v26  ;;  %v3761_v30 = vpack.c.bf16 %v3340_v27, %v3340_v27 }
 0x135   :  { %4288 = vst.msk [vmem:[%s8773_s3 + $0x39c] sm:$0xf] %vm4056_vm2, %v3866_v28  ;;  %v5668_v28 = vld [vmem:[%s8772_s0 + $0x3f0] sm:$0xff] }
 0x136   :  { %4077 = vst.msk [vmem:[%s8773_s3 + $0x50] sm:$0xf] %vm4056_vm2, %v3655_v29  ;;  %v2740_v32 = vpop.f32.mrf.mxu2  ;;  %v3005_v33 = vpop.f32.mrf.mxu3 }
 0x137   :  { %4183 = vst.msk [vmem:[%s8773_s3 + $0x1f8] sm:$0xf] %vm4056_vm2, %v3761_v30  ;;  %v2741_v34 = vadd.f32 %v5928_v38, %v2740_v32  ;;  %v2212_v35 = vpop.f32.mrf.mxu0  ;;  %v2477_v36 = vpop.f32.mrf.mxu1  ;;  %v3006_v37 = vadd.f32 %v5928_v38, %v3005_v33  ;;  %v5721_v30 = vld [vmem:[%s8772_s0 + $0x598] sm:$0xff] }
 0x138   :  { %v2213_v39 = vadd.f32 %v5928_v38, %v2212_v35  ;;  %v2478_v40 = vadd.f32 %v5928_v38, %v2477_v36  ;;  %4394 = vst.msk [vmem:[%s8773_s3 + $0x544] sm:$0xf] %vm4056_vm2, %v3972_v31 }
 0x139   :  { %v3446_v41 = vmax.f32 %v2741_v34, 0.0  ;;  %v3552_v42 = vmax.f32 %v3006_v37, 0.0 }
 0x13a   :  { %v3235_v43 = vmax.f32 %v2213_v39, 0.0  ;;  %v3341_v44 = vmax.f32 %v2478_v40, 0.0 }
 0x13b   :  { %v3867_v45 = vpack.c.bf16 %v3446_v41, %v3446_v41  ;;  %v3973_v48 = vpack.c.bf16 %v3552_v42, %v3552_v42 }
 0x13c   :  { %v3656_v46 = vpack.c.bf16 %v3235_v43, %v3235_v43  ;;  %v3762_v47 = vpack.c.bf16 %v3341_v44, %v3341_v44 }
 0x13d   :  { %4289 = vst.msk [vmem:[%s8773_s3 + $0x3a0] sm:$0xf] %vm4056_vm2, %v3867_v45 }
 0x13e   :  { %4078 = vst.msk [vmem:[%s8773_s3 + $0x54] sm:$0xf] %vm4056_vm2, %v3656_v46  ;;  %v2742_v38 = vpop.f32.mrf.mxu2  ;;  %v3007_v51 = vpop.f32.mrf.mxu3 }
 0x13f   :  { %4184 = vst.msk [vmem:[%s8773_s3 + $0x1fc] sm:$0xf] %vm4056_vm2, %v3762_v47  ;;  %v2743_v53 = vadd.f32 %v6541_v52, %v2742_v38  ;;  %v2215_v54 = vpop.f32.mrf.mxu0  ;;  %v2480_v55 = vpop.f32.mrf.mxu1  ;;  %v3008_v57 = vadd.f32 %v6541_v52, %v3007_v51 }
 0x140   :  { %v2216_v59 = vadd.f32 %v6541_v52, %v2215_v54  ;;  %v2481_v60 = vadd.f32 %v6541_v52, %v2480_v55  ;;  %4395 = vst.msk [vmem:[%s8773_s3 + $0x548] sm:$0xf] %vm4056_vm2, %v3973_v48 }
 0x141   :  { %v3447_v61 = vmax.f32 %v2743_v53, 0.0  ;;  %v3553_v62 = vmax.f32 %v3008_v57, 0.0 }
 0x142   :  { %v3236_v63 = vmax.f32 %v2216_v59, 0.0  ;;  %v3342_v0 = vmax.f32 %v2481_v60, 0.0  ;;  %5350 = vmatmul.msk.bf16.gmra.mxu0 %vm1513_vm1, %v5561_v49  ;;  %5403 = vmatmul.msk.bf16.gmra.mxu1 %vm1513_vm1, %v5614_v50  ;;  %v5563_v59 = vld [vmem:[%s8772_s0 + $0xa8] sm:$0xff]  ;;  %v5616_v60 = vld [vmem:[%s8772_s0 + $0x250] sm:$0xff] }
 0x143   :  { %v3868_v1 = vpack.c.bf16 %v3447_v61, %v3447_v61  ;;  %5456 = vmatmul.msk.bf16.gmra.mxu2 %vm1513_vm1, %v5667_v56  ;;  %5509 = vmatmul.msk.bf16.gmra.mxu3 %vm1513_vm1, %v5720_v58  ;;  %v3974_v4 = vpack.c.bf16 %v3553_v62, %v3553_v62 }
 0x144   :  { %v3657_v2 = vpack.c.bf16 %v3236_v63, %v3236_v63  ;;  %v3763_v3 = vpack.c.bf16 %v3342_v0, %v3342_v0 }
 0x145   :  { %4290 = vst.msk [vmem:[%s8773_s3 + $0x3a4] sm:$0xf] %vm4056_vm2, %v3868_v1  ;;  %v5669_v1 = vld [vmem:[%s8772_s0 + $0x3f8] sm:$0xff] }
 0x146   :  { %4079 = vst.msk [vmem:[%s8773_s3 + $0x58] sm:$0xf] %vm4056_vm2, %v3657_v2  ;;  %v2745_v5 = vpop.f32.mrf.mxu2  ;;  %v3010_v6 = vpop.f32.mrf.mxu3 }
 0x147   :  { %4185 = vst.msk [vmem:[%s8773_s3 + $0x200] sm:$0xf] %vm4056_vm2, %v3763_v3  ;;  %v2746_v7 = vadd.f32 %v6541_v52, %v2745_v5  ;;  %v2217_v8 = vpop.f32.mrf.mxu0  ;;  %v2482_v9 = vpop.f32.mrf.mxu1  ;;  %v3011_v10 = vadd.f32 %v6541_v52, %v3010_v6  ;;  %v5722_v3 = vld [vmem:[%s8772_s0 + $0x5a0] sm:$0xff] }
 0x148   :  { %v2218_v11 = vadd.f32 %v6541_v52, %v2217_v8  ;;  %v2483_v12 = vadd.f32 %v6541_v52, %v2482_v9  ;;  %4396 = vst.msk [vmem:[%s8773_s3 + $0x54c] sm:$0xf] %vm4056_vm2, %v3974_v4 }
 0x149   :  { %v3448_v13 = vmax.f32 %v2746_v7, 0.0  ;;  %v3554_v14 = vmax.f32 %v3011_v10, 0.0 }
 0x14a   :  { %v3237_v15 = vmax.f32 %v2218_v11, 0.0  ;;  %v3343_v16 = vmax.f32 %v2483_v12, 0.0 }
 0x14b   :  { %v3869_v17 = vpack.c.bf16 %v3448_v13, %v3448_v13  ;;  %v3975_v20 = vpack.c.bf16 %v3554_v14, %v3554_v14 }
 0x14c   :  { %v3658_v18 = vpack.c.bf16 %v3237_v15, %v3237_v15  ;;  %v3764_v19 = vpack.c.bf16 %v3343_v16, %v3343_v16 }
 0x14d   :  { %4291 = vst.msk [vmem:[%s8773_s3 + $0x3a8] sm:$0xf] %vm4056_vm2, %v3869_v17 }
 0x14e   :  { %4080 = vst.msk [vmem:[%s8773_s3 + $0x5c] sm:$0xf] %vm4056_vm2, %v3658_v18  ;;  %v2747_v21 = vpop.f32.mrf.mxu2  ;;  %v3012_v24 = vpop.f32.mrf.mxu3 }
 0x14f   :  { %4186 = vst.msk [vmem:[%s8773_s3 + $0x204] sm:$0xf] %vm4056_vm2, %v3764_v19  ;;  %v2748_v25 = vadd.f32 %v6541_v52, %v2747_v21  ;;  %v2220_v26 = vpop.f32.mrf.mxu0  ;;  %v2485_v27 = vpop.f32.mrf.mxu1  ;;  %v3013_v29 = vadd.f32 %v6541_v52, %v3012_v24 }
 0x150   :  { %v2221_v31 = vadd.f32 %v6541_v52, %v2220_v26  ;;  %v2486_v32 = vadd.f32 %v6541_v52, %v2485_v27  ;;  %4397 = vst.msk [vmem:[%s8773_s3 + $0x550] sm:$0xf] %vm4056_vm2, %v3975_v20 }
 0x151   :  { %v3449_v33 = vmax.f32 %v2748_v25, 0.0  ;;  %v3555_v34 = vmax.f32 %v3013_v29, 0.0 }
 0x152   :  { %v3238_v35 = vmax.f32 %v2221_v31, 0.0  ;;  %v3344_v36 = vmax.f32 %v2486_v32, 0.0  ;;  %5351 = vmatmul.msk.bf16.gmra.mxu0 %vm1513_vm1, %v5562_v22  ;;  %5404 = vmatmul.msk.bf16.gmra.mxu1 %vm1513_vm1, %v5615_v23  ;;  %v5564_v31 = vld [vmem:[%s8772_s0 + $0xb0] sm:$0xff]  ;;  %v5617_v32 = vld [vmem:[%s8772_s0 + $0x258] sm:$0xff] }
 0x153   :  { %v3870_v37 = vpack.c.bf16 %v3449_v33, %v3449_v33  ;;  %5457 = vmatmul.msk.bf16.gmra.mxu2 %vm1513_vm1, %v5668_v28  ;;  %5510 = vmatmul.msk.bf16.gmra.mxu3 %vm1513_vm1, %v5721_v30  ;;  %v3976_v41 = vpack.c.bf16 %v3555_v34, %v3555_v34 }
 0x154   :  { %v3659_v39 = vpack.c.bf16 %v3238_v35, %v3238_v35  ;;  %v3765_v40 = vpack.c.bf16 %v3344_v36, %v3344_v36 }
 0x155   :  { %4292 = vst.msk [vmem:[%s8773_s3 + $0x3ac] sm:$0xf] %vm4056_vm2, %v3870_v37  ;;  %v5670_v37 = vld [vmem:[%s8772_s0 + $0x400] sm:$0xff] }
 0x156   :  { %4081 = vst.msk [vmem:[%s8773_s3 + $0x60] sm:$0xf] %vm4056_vm2, %v3659_v39  ;;  %v2750_v42 = vpop.f32.mrf.mxu2  ;;  %v3015_v43 = vpop.f32.mrf.mxu3 }
 0x157   :  { %4187 = vst.msk [vmem:[%s8773_s3 + $0x208] sm:$0xf] %vm4056_vm2, %v3765_v40  ;;  %v2751_v44 = vadd.f32 %v6541_v52, %v2750_v42  ;;  %v2222_v45 = vpop.f32.mrf.mxu0  ;;  %v2487_v46 = vpop.f32.mrf.mxu1  ;;  %v3016_v47 = vadd.f32 %v6541_v52, %v3015_v43  ;;  %v5723_v40 = vld [vmem:[%s8772_s0 + $0x5a8] sm:$0xff] }
 0x158   :  { %v2223_v48 = vadd.f32 %v6541_v52, %v2222_v45  ;;  %v2488_v38 = vadd.f32 %v6541_v52, %v2487_v46  ;;  %4398 = vst.msk [vmem:[%s8773_s3 + $0x554] sm:$0xf] %vm4056_vm2, %v3976_v41 }
 0x159   :  { %v3450_v49 = vmax.f32 %v2751_v44, 0.0  ;;  %v3556_v50 = vmax.f32 %v3016_v47, 0.0 }
 0x15a   :  { %v3239_v51 = vmax.f32 %v2223_v48, 0.0  ;;  %v3345_v53 = vmax.f32 %v2488_v38, 0.0 }
 0x15b   :  { %v3871_v54 = vpack.c.bf16 %v3450_v49, %v3450_v49  ;;  %v3977_v57 = vpack.c.bf16 %v3556_v50, %v3556_v50 }
 0x15c   :  { %v3660_v55 = vpack.c.bf16 %v3239_v51, %v3239_v51  ;;  %v3766_v56 = vpack.c.bf16 %v3345_v53, %v3345_v53 }
 0x15d   :  { %4293 = vst.msk [vmem:[%s8773_s3 + $0x3b0] sm:$0xf] %vm4056_vm2, %v3871_v54 }
 0x15e   :  { %4082 = vst.msk [vmem:[%s8773_s3 + $0x64] sm:$0xf] %vm4056_vm2, %v3660_v55  ;;  %v2752_v58 = vpop.f32.mrf.mxu2  ;;  %v3017_v61 = vpop.f32.mrf.mxu3 }
 0x15f   :  { %4188 = vst.msk [vmem:[%s8773_s3 + $0x20c] sm:$0xf] %vm4056_vm2, %v3766_v56  ;;  %v2753_v62 = vadd.f32 %v6541_v52, %v2752_v58  ;;  %v2225_v63 = vpop.f32.mrf.mxu0  ;;  %v2490_v0 = vpop.f32.mrf.mxu1  ;;  %v3018_v2 = vadd.f32 %v6541_v52, %v3017_v61 }
 0x160   :  { %v2226_v4 = vadd.f32 %v6541_v52, %v2225_v63  ;;  %v2491_v5 = vadd.f32 %v6541_v52, %v2490_v0  ;;  %4399 = vst.msk [vmem:[%s8773_s3 + $0x558] sm:$0xf] %vm4056_vm2, %v3977_v57 }
 0x161   :  { %v3451_v6 = vmax.f32 %v2753_v62, 0.0  ;;  %v3557_v7 = vmax.f32 %v3018_v2, 0.0 }
 0x162   :  { %v3240_v8 = vmax.f32 %v2226_v4, 0.0  ;;  %v3346_v9 = vmax.f32 %v2491_v5, 0.0  ;;  %5352 = vmatmul.msk.bf16.gmra.mxu0 %vm1513_vm1, %v5563_v59  ;;  %5405 = vmatmul.msk.bf16.gmra.mxu1 %vm1513_vm1, %v5616_v60  ;;  %v5565_v4 = vld [vmem:[%s8772_s0 + $0xb8] sm:$0xff]  ;;  %v5618_v5 = vld [vmem:[%s8772_s0 + $0x260] sm:$0xff] }
 0x163   :  { %v3872_v10 = vpack.c.bf16 %v3451_v6, %v3451_v6  ;;  %5458 = vmatmul.msk.bf16.gmra.mxu2 %vm1513_vm1, %v5669_v1  ;;  %5511 = vmatmul.msk.bf16.gmra.mxu3 %vm1513_vm1, %v5722_v3  ;;  %v3978_v13 = vpack.c.bf16 %v3557_v7, %v3557_v7 }
 0x164   :  { %v3661_v11 = vpack.c.bf16 %v3240_v8, %v3240_v8  ;;  %v3767_v12 = vpack.c.bf16 %v3346_v9, %v3346_v9 }
 0x165   :  { %4294 = vst.msk [vmem:[%s8773_s3 + $0x3b4] sm:$0xf] %vm4056_vm2, %v3872_v10  ;;  %v5671_v10 = vld [vmem:[%s8772_s0 + $0x408] sm:$0xff] }
 0x166   :  { %4083 = vst.msk [vmem:[%s8773_s3 + $0x68] sm:$0xf] %vm4056_vm2, %v3661_v11  ;;  %v2755_v14 = vpop.f32.mrf.mxu2  ;;  %v3020_v15 = vpop.f32.mrf.mxu3 }
 0x167   :  { %4189 = vst.msk [vmem:[%s8773_s3 + $0x210] sm:$0xf] %vm4056_vm2, %v3767_v12  ;;  %v2756_v16 = vadd.f32 %v6541_v52, %v2755_v14  ;;  %v2227_v17 = vpop.f32.mrf.mxu0  ;;  %v2492_v18 = vpop.f32.mrf.mxu1  ;;  %v3021_v19 = vadd.f32 %v6541_v52, %v3020_v15  ;;  %v5724_v12 = vld [vmem:[%s8772_s0 + $0x5b0] sm:$0xff] }
 0x168   :  { %v2228_v20 = vadd.f32 %v6541_v52, %v2227_v17  ;;  %v2493_v21 = vadd.f32 %v6541_v52, %v2492_v18  ;;  %4400 = vst.msk [vmem:[%s8773_s3 + $0x55c] sm:$0xf] %vm4056_vm2, %v3978_v13 }
 0x169   :  { %v3452_v22 = vmax.f32 %v2756_v16, 0.0  ;;  %v3558_v23 = vmax.f32 %v3021_v19, 0.0 }
 0x16a   :  { %v3241_v24 = vmax.f32 %v2228_v20, 0.0  ;;  %v3347_v25 = vmax.f32 %v2493_v21, 0.0 }
 0x16b   :  { %v3873_v26 = vpack.c.bf16 %v3452_v22, %v3452_v22  ;;  %v3979_v29 = vpack.c.bf16 %v3558_v23, %v3558_v23 }
 0x16c   :  { %v3662_v27 = vpack.c.bf16 %v3241_v24, %v3241_v24  ;;  %v3768_v28 = vpack.c.bf16 %v3347_v25, %v3347_v25 }
 0x16d   :  { %4295 = vst.msk [vmem:[%s8773_s3 + $0x3b8] sm:$0xf] %vm4056_vm2, %v3873_v26 }
 0x16e   :  { %4084 = vst.msk [vmem:[%s8773_s3 + $0x6c] sm:$0xf] %vm4056_vm2, %v3662_v27  ;;  %v2757_v30 = vpop.f32.mrf.mxu2  ;;  %v3022_v33 = vpop.f32.mrf.mxu3 }
 0x16f   :  { %4190 = vst.msk [vmem:[%s8773_s3 + $0x214] sm:$0xf] %vm4056_vm2, %v3768_v28  ;;  %v2758_v34 = vadd.f32 %v6541_v52, %v2757_v30  ;;  %v2230_v35 = vpop.f32.mrf.mxu0  ;;  %v2495_v36 = vpop.f32.mrf.mxu1  ;;  %v3023_v39 = vadd.f32 %v6541_v52, %v3022_v33 }
 0x170   :  { %v2231_v41 = vadd.f32 %v6541_v52, %v2230_v35  ;;  %v2496_v42 = vadd.f32 %v6541_v52, %v2495_v36  ;;  %4401 = vst.msk [vmem:[%s8773_s3 + $0x560] sm:$0xf] %vm4056_vm2, %v3979_v29 }
 0x171   :  { %v3453_v43 = vmax.f32 %v2758_v34, 0.0  ;;  %v3559_v44 = vmax.f32 %v3023_v39, 0.0 }
 0x172   :  { %v3242_v45 = vmax.f32 %v2231_v41, 0.0  ;;  %v3348_v46 = vmax.f32 %v2496_v42, 0.0  ;;  %5353 = vmatmul.msk.bf16.gmra.mxu0 %vm1513_vm1, %v5564_v31  ;;  %5406 = vmatmul.msk.bf16.gmra.mxu1 %vm1513_vm1, %v5617_v32  ;;  %v5566_v41 = vld [vmem:[%s8772_s0 + $0xc0] sm:$0xff]  ;;  %v5619_v42 = vld [vmem:[%s8772_s0 + $0x268] sm:$0xff] }
 0x173   :  { %v3874_v47 = vpack.c.bf16 %v3453_v43, %v3453_v43  ;;  %5459 = vmatmul.msk.bf16.gmra.mxu2 %vm1513_vm1, %v5670_v37  ;;  %5512 = vmatmul.msk.bf16.gmra.mxu3 %vm1513_vm1, %v5723_v40  ;;  %v3980_v49 = vpack.c.bf16 %v3559_v44, %v3559_v44 }
 0x174   :  { %v3663_v48 = vpack.c.bf16 %v3242_v45, %v3242_v45  ;;  %v3769_v38 = vpack.c.bf16 %v3348_v46, %v3348_v46 }
 0x175   :  { %4296 = vst.msk [vmem:[%s8773_s3 + $0x3bc] sm:$0xf] %vm4056_vm2, %v3874_v47  ;;  %v5672_v47 = vld [vmem:[%s8772_s0 + $0x410] sm:$0xff] }
 0x176   :  { %4085 = vst.msk [vmem:[%s8773_s3 + $0x70] sm:$0xf] %vm4056_vm2, %v3663_v48  ;;  %v2760_v50 = vpop.f32.mrf.mxu2  ;;  %v3025_v51 = vpop.f32.mrf.mxu3 }
 0x177   :  { %4191 = vst.msk [vmem:[%s8773_s3 + $0x218] sm:$0xf] %vm4056_vm2, %v3769_v38  ;;  %v2761_v53 = vadd.f32 %v6541_v52, %v2760_v50  ;;  %v2232_v54 = vpop.f32.mrf.mxu0  ;;  %v2497_v55 = vpop.f32.mrf.mxu1  ;;  %v3026_v56 = vadd.f32 %v6541_v52, %v3025_v51  ;;  %v5725_v38 = vld [vmem:[%s8772_s0 + $0x5b8] sm:$0xff] }
 0x178   :  { %v2233_v57 = vadd.f32 %v6541_v52, %v2232_v54  ;;  %v2498_v58 = vadd.f32 %v6541_v52, %v2497_v55  ;;  %4402 = vst.msk [vmem:[%s8773_s3 + $0x564] sm:$0xf] %vm4056_vm2, %v3980_v49 }
 0x179   :  { %v3454_v59 = vmax.f32 %v2761_v53, 0.0  ;;  %v3560_v60 = vmax.f32 %v3026_v56, 0.0 }
 0x17a   :  { %v3243_v61 = vmax.f32 %v2233_v57, 0.0  ;;  %v3349_v62 = vmax.f32 %v2498_v58, 0.0 }
 0x17b   :  { %v3875_v63 = vpack.c.bf16 %v3454_v59, %v3454_v59  ;;  %v3981_v2 = vpack.c.bf16 %v3560_v60, %v3560_v60 }
 0x17c   :  { %v3664_v0 = vpack.c.bf16 %v3243_v61, %v3243_v61  ;;  %v3770_v1 = vpack.c.bf16 %v3349_v62, %v3349_v62 }
 0x17d   :  { %4297 = vst.msk [vmem:[%s8773_s3 + $0x3c0] sm:$0xf] %vm4056_vm2, %v3875_v63 }
 0x17e   :  { %4086 = vst.msk [vmem:[%s8773_s3 + $0x74] sm:$0xf] %vm4056_vm2, %v3664_v0  ;;  %v2762_v3 = vpop.f32.mrf.mxu2  ;;  %v3027_v6 = vpop.f32.mrf.mxu3 }
 0x17f   :  { %4192 = vst.msk [vmem:[%s8773_s3 + $0x21c] sm:$0xf] %vm4056_vm2, %v3770_v1  ;;  %v2763_v7 = vadd.f32 %v6541_v52, %v2762_v3  ;;  %v2235_v8 = vpop.f32.mrf.mxu0  ;;  %v2500_v9 = vpop.f32.mrf.mxu1  ;;  %v3028_v11 = vadd.f32 %v6541_v52, %v3027_v6 }
 0x180   :  { %v2236_v13 = vadd.f32 %v6541_v52, %v2235_v8  ;;  %v2501_v14 = vadd.f32 %v6541_v52, %v2500_v9  ;;  %4403 = vst.msk [vmem:[%s8773_s3 + $0x568] sm:$0xf] %vm4056_vm2, %v3981_v2 }
 0x181   :  { %v3455_v15 = vmax.f32 %v2763_v7, 0.0  ;;  %v3561_v16 = vmax.f32 %v3028_v11, 0.0 }
 0x182   :  { %v3244_v17 = vmax.f32 %v2236_v13, 0.0  ;;  %v3350_v18 = vmax.f32 %v2501_v14, 0.0  ;;  %5354 = vmatmul.msk.bf16.gmra.mxu0 %vm1513_vm1, %v5565_v4  ;;  %5407 = vmatmul.msk.bf16.gmra.mxu1 %vm1513_vm1, %v5618_v5  ;;  %v5567_v13 = vld [vmem:[%s8772_s0 + $0xc8] sm:$0xff]  ;;  %v5620_v14 = vld [vmem:[%s8772_s0 + $0x270] sm:$0xff] }
 0x183   :  { %v3876_v19 = vpack.c.bf16 %v3455_v15, %v3455_v15  ;;  %5460 = vmatmul.msk.bf16.gmra.mxu2 %vm1513_vm1, %v5671_v10  ;;  %5513 = vmatmul.msk.bf16.gmra.mxu3 %vm1513_vm1, %v5724_v12  ;;  %v3982_v22 = vpack.c.bf16 %v3561_v16, %v3561_v16 }
 0x184   :  { %v3665_v20 = vpack.c.bf16 %v3244_v17, %v3244_v17  ;;  %v3771_v21 = vpack.c.bf16 %v3350_v18, %v3350_v18 }
 0x185   :  { %4298 = vst.msk [vmem:[%s8773_s3 + $0x3c4] sm:$0xf] %vm4056_vm2, %v3876_v19  ;;  %v5673_v19 = vld [vmem:[%s8772_s0 + $0x418] sm:$0xff] }
 0x186   :  { %4087 = vst.msk [vmem:[%s8773_s3 + $0x78] sm:$0xf] %vm4056_vm2, %v3665_v20  ;;  %v2765_v23 = vpop.f32.mrf.mxu2  ;;  %v3030_v24 = vpop.f32.mrf.mxu3 }
 0x187   :  { %4193 = vst.msk [vmem:[%s8773_s3 + $0x220] sm:$0xf] %vm4056_vm2, %v3771_v21  ;;  %v2766_v25 = vadd.f32 %v6541_v52, %v2765_v23  ;;  %v2237_v26 = vpop.f32.mrf.mxu0  ;;  %v2502_v27 = vpop.f32.mrf.mxu1  ;;  %v3031_v28 = vadd.f32 %v6541_v52, %v3030_v24  ;;  %v5726_v21 = vld [vmem:[%s8772_s0 + $0x5c0] sm:$0xff] }
 0x188   :  { %v2238_v29 = vadd.f32 %v6541_v52, %v2237_v26  ;;  %v2503_v30 = vadd.f32 %v6541_v52, %v2502_v27  ;;  %4404 = vst.msk [vmem:[%s8773_s3 + $0x56c] sm:$0xf] %vm4056_vm2, %v3982_v22 }
 0x189   :  { %v3456_v31 = vmax.f32 %v2766_v25, 0.0  ;;  %v3562_v32 = vmax.f32 %v3031_v28, 0.0 }
 0x18a   :  { %v3245_v33 = vmax.f32 %v2238_v29, 0.0  ;;  %v3351_v34 = vmax.f32 %v2503_v30, 0.0 }
 0x18b   :  { %v3877_v35 = vpack.c.bf16 %v3456_v31, %v3456_v31  ;;  %v3983_v39 = vpack.c.bf16 %v3562_v32, %v3562_v32 }
 0x18c   :  { %v3666_v36 = vpack.c.bf16 %v3245_v33, %v3245_v33  ;;  %v3772_v37 = vpack.c.bf16 %v3351_v34, %v3351_v34 }
 0x18d   :  { %4299 = vst.msk [vmem:[%s8773_s3 + $0x3c8] sm:$0xf] %vm4056_vm2, %v3877_v35 }
 0x18e   :  { %4088 = vst.msk [vmem:[%s8773_s3 + $0x7c] sm:$0xf] %vm4056_vm2, %v3666_v36  ;;  %v2767_v40 = vpop.f32.mrf.mxu2  ;;  %v3032_v43 = vpop.f32.mrf.mxu3 }
 0x18f   :  { %4194 = vst.msk [vmem:[%s8773_s3 + $0x224] sm:$0xf] %vm4056_vm2, %v3772_v37  ;;  %v2768_v44 = vadd.f32 %v6541_v52, %v2767_v40  ;;  %v2240_v45 = vpop.f32.mrf.mxu0  ;;  %v2505_v46 = vpop.f32.mrf.mxu1  ;;  %v3033_v48 = vadd.f32 %v6541_v52, %v3032_v43 }
 0x190   :  { %v2241_v49 = vadd.f32 %v6541_v52, %v2240_v45  ;;  %v2506_v50 = vadd.f32 %v6541_v52, %v2505_v46  ;;  %4405 = vst.msk [vmem:[%s8773_s3 + $0x570] sm:$0xf] %vm4056_vm2, %v3983_v39 }
 0x191   :  { %v3457_v51 = vmax.f32 %v2768_v44, 0.0  ;;  %v3563_v53 = vmax.f32 %v3033_v48, 0.0 }
 0x192   :  { %v3246_v54 = vmax.f32 %v2241_v49, 0.0  ;;  %v3352_v55 = vmax.f32 %v2506_v50, 0.0  ;;  %5355 = vmatmul.msk.bf16.gmra.mxu0 %vm1513_vm1, %v5566_v41  ;;  %5408 = vmatmul.msk.bf16.gmra.mxu1 %vm1513_vm1, %v5619_v42  ;;  %v5568_v49 = vld [vmem:[%s8772_s0 + $0xd0] sm:$0xff]  ;;  %v5621_v50 = vld [vmem:[%s8772_s0 + $0x278] sm:$0xff] }
 0x193   :  { %v3878_v56 = vpack.c.bf16 %v3457_v51, %v3457_v51  ;;  %5461 = vmatmul.msk.bf16.gmra.mxu2 %vm1513_vm1, %v5672_v47  ;;  %5514 = vmatmul.msk.bf16.gmra.mxu3 %vm1513_vm1, %v5725_v38  ;;  %v3984_v59 = vpack.c.bf16 %v3563_v53, %v3563_v53 }
 0x194   :  { %v3667_v57 = vpack.c.bf16 %v3246_v54, %v3246_v54  ;;  %v3773_v58 = vpack.c.bf16 %v3352_v55, %v3352_v55 }
 0x195   :  { %4300 = vst.msk [vmem:[%s8773_s3 + $0x3cc] sm:$0xf] %vm4056_vm2, %v3878_v56  ;;  %v5674_v56 = vld [vmem:[%s8772_s0 + $0x420] sm:$0xff] }
 0x196   :  { %4089 = vst.msk [vmem:[%s8773_s3 + $0x80] sm:$0xf] %vm4056_vm2, %v3667_v57  ;;  %v2770_v60 = vpop.f32.mrf.mxu2  ;;  %v3035_v61 = vpop.f32.mrf.mxu3 }
 0x197   :  { %4195 = vst.msk [vmem:[%s8773_s3 + $0x228] sm:$0xf] %vm4056_vm2, %v3773_v58  ;;  %v2771_v62 = vadd.f32 %v6541_v52, %v2770_v60  ;;  %v2242_v63 = vpop.f32.mrf.mxu0  ;;  %v2507_v0 = vpop.f32.mrf.mxu1  ;;  %v3036_v1 = vadd.f32 %v6541_v52, %v3035_v61  ;;  %v5727_v58 = vld [vmem:[%s8772_s0 + $0x5c8] sm:$0xff] }
 0x198   :  { %v2243_v2 = vadd.f32 %v6541_v52, %v2242_v63  ;;  %v2508_v3 = vadd.f32 %v6541_v52, %v2507_v0  ;;  %4406 = vst.msk [vmem:[%s8773_s3 + $0x574] sm:$0xf] %vm4056_vm2, %v3984_v59 }
 0x199   :  { %v3458_v4 = vmax.f32 %v2771_v62, 0.0  ;;  %v3564_v5 = vmax.f32 %v3036_v1, 0.0 }
 0x19a   :  { %v3247_v6 = vmax.f32 %v2243_v2, 0.0  ;;  %v3353_v7 = vmax.f32 %v2508_v3, 0.0 }
 0x19b   :  { %v3879_v8 = vpack.c.bf16 %v3458_v4, %v3458_v4  ;;  %v3985_v11 = vpack.c.bf16 %v3564_v5, %v3564_v5 }
 0x19c   :  { %v3668_v9 = vpack.c.bf16 %v3247_v6, %v3247_v6  ;;  %v3774_v10 = vpack.c.bf16 %v3353_v7, %v3353_v7 }
 0x19d   :  { %4301 = vst.msk [vmem:[%s8773_s3 + $0x3d0] sm:$0xf] %vm4056_vm2, %v3879_v8 }
 0x19e   :  { %4090 = vst.msk [vmem:[%s8773_s3 + $0x84] sm:$0xf] %vm4056_vm2, %v3668_v9  ;;  %v2772_v12 = vpop.f32.mrf.mxu2  ;;  %v3037_v15 = vpop.f32.mrf.mxu3 }
 0x19f   :  { %4196 = vst.msk [vmem:[%s8773_s3 + $0x22c] sm:$0xf] %vm4056_vm2, %v3774_v10  ;;  %v2773_v16 = vadd.f32 %v6541_v52, %v2772_v12  ;;  %v2245_v17 = vpop.f32.mrf.mxu0  ;;  %v2510_v18 = vpop.f32.mrf.mxu1  ;;  %v3038_v20 = vadd.f32 %v6541_v52, %v3037_v15 }
 0x1a0   :  { %v2246_v22 = vadd.f32 %v6541_v52, %v2245_v17  ;;  %v2511_v23 = vadd.f32 %v6541_v52, %v2510_v18  ;;  %4407 = vst.msk [vmem:[%s8773_s3 + $0x578] sm:$0xf] %vm4056_vm2, %v3985_v11 }
 0x1a1   :  { %v3459_v24 = vmax.f32 %v2773_v16, 0.0  ;;  %v3565_v25 = vmax.f32 %v3038_v20, 0.0 }
 0x1a2   :  { %v3248_v26 = vmax.f32 %v2246_v22, 0.0  ;;  %v3354_v27 = vmax.f32 %v2511_v23, 0.0  ;;  %5356 = vmatmul.msk.bf16.gmra.mxu0 %vm1513_vm1, %v5567_v13  ;;  %5409 = vmatmul.msk.bf16.gmra.mxu1 %vm1513_vm1, %v5620_v14  ;;  %v5569_v22 = vld [vmem:[%s8772_s0 + $0xd8] sm:$0xff]  ;;  %v5622_v23 = vld [vmem:[%s8772_s0 + $0x280] sm:$0xff] }
 0x1a3   :  { %v3880_v28 = vpack.c.bf16 %v3459_v24, %v3459_v24  ;;  %5462 = vmatmul.msk.bf16.gmra.mxu2 %vm1513_vm1, %v5673_v19  ;;  %5515 = vmatmul.msk.bf16.gmra.mxu3 %vm1513_vm1, %v5726_v21  ;;  %v3986_v31 = vpack.c.bf16 %v3565_v25, %v3565_v25 }
 0x1a4   :  { %v3669_v29 = vpack.c.bf16 %v3248_v26, %v3248_v26  ;;  %v3775_v30 = vpack.c.bf16 %v3354_v27, %v3354_v27 }
 0x1a5   :  { %4302 = vst.msk [vmem:[%s8773_s3 + $0x3d4] sm:$0xf] %vm4056_vm2, %v3880_v28  ;;  %v5675_v28 = vld [vmem:[%s8772_s0 + $0x428] sm:$0xff] }
 0x1a6   :  { %4091 = vst.msk [vmem:[%s8773_s3 + $0x88] sm:$0xf] %vm4056_vm2, %v3669_v29  ;;  %v2775_v32 = vpop.f32.mrf.mxu2  ;;  %v3040_v33 = vpop.f32.mrf.mxu3 }
 0x1a7   :  { %4197 = vst.msk [vmem:[%s8773_s3 + $0x230] sm:$0xf] %vm4056_vm2, %v3775_v30  ;;  %v2776_v34 = vadd.f32 %v6541_v52, %v2775_v32  ;;  %v2247_v35 = vpop.f32.mrf.mxu0  ;;  %v2512_v36 = vpop.f32.mrf.mxu1  ;;  %v3041_v37 = vadd.f32 %v6541_v52, %v3040_v33  ;;  %v5728_v30 = vld [vmem:[%s8772_s0 + $0x5d0] sm:$0xff] }
 0x1a8   :  { %v2248_v39 = vadd.f32 %v6541_v52, %v2247_v35  ;;  %v2513_v40 = vadd.f32 %v6541_v52, %v2512_v36  ;;  %4408 = vst.msk [vmem:[%s8773_s3 + $0x57c] sm:$0xf] %vm4056_vm2, %v3986_v31 }
 0x1a9   :  { %v3460_v41 = vmax.f32 %v2776_v34, 0.0  ;;  %v3566_v42 = vmax.f32 %v3041_v37, 0.0 }
 0x1aa   :  { %v3249_v43 = vmax.f32 %v2248_v39, 0.0  ;;  %v3355_v44 = vmax.f32 %v2513_v40, 0.0 }
 0x1ab   :  { %v3881_v45 = vpack.c.bf16 %v3460_v41, %v3460_v41  ;;  %v3987_v48 = vpack.c.bf16 %v3566_v42, %v3566_v42 }
 0x1ac   :  { %v3670_v46 = vpack.c.bf16 %v3249_v43, %v3249_v43  ;;  %v3776_v47 = vpack.c.bf16 %v3355_v44, %v3355_v44 }
 0x1ad   :  { %4303 = vst.msk [vmem:[%s8773_s3 + $0x3d8] sm:$0xf] %vm4056_vm2, %v3881_v45 }
 0x1ae   :  { %4092 = vst.msk [vmem:[%s8773_s3 + $0x8c] sm:$0xf] %vm4056_vm2, %v3670_v46  ;;  %v2777_v38 = vpop.f32.mrf.mxu2  ;;  %v3042_v51 = vpop.f32.mrf.mxu3 }
 0x1af   :  { %4198 = vst.msk [vmem:[%s8773_s3 + $0x234] sm:$0xf] %vm4056_vm2, %v3776_v47  ;;  %v2778_v53 = vadd.f32 %v6541_v52, %v2777_v38  ;;  %v2250_v54 = vpop.f32.mrf.mxu0  ;;  %v2515_v55 = vpop.f32.mrf.mxu1  ;;  %v3043_v57 = vadd.f32 %v6541_v52, %v3042_v51 }
 0x1b0   :  { %v2251_v59 = vadd.f32 %v6541_v52, %v2250_v54  ;;  %v2516_v60 = vadd.f32 %v6541_v52, %v2515_v55  ;;  %4409 = vst.msk [vmem:[%s8773_s3 + $0x580] sm:$0xf] %vm4056_vm2, %v3987_v48 }
 0x1b1   :  { %v3461_v61 = vmax.f32 %v2778_v53, 0.0  ;;  %v3567_v62 = vmax.f32 %v3043_v57, 0.0 }
 0x1b2   :  { %v3250_v63 = vmax.f32 %v2251_v59, 0.0  ;;  %v3356_v0 = vmax.f32 %v2516_v60, 0.0  ;;  %5357 = vmatmul.msk.bf16.gmra.mxu0 %vm1513_vm1, %v5568_v49  ;;  %5410 = vmatmul.msk.bf16.gmra.mxu1 %vm1513_vm1, %v5621_v50  ;;  %v5570_v59 = vld [vmem:[%s8772_s0 + $0xe0] sm:$0xff]  ;;  %v5623_v60 = vld [vmem:[%s8772_s0 + $0x288] sm:$0xff] }
 0x1b3   :  { %v3882_v1 = vpack.c.bf16 %v3461_v61, %v3461_v61  ;;  %5463 = vmatmul.msk.bf16.gmra.mxu2 %vm1513_vm1, %v5674_v56  ;;  %5516 = vmatmul.msk.bf16.gmra.mxu3 %vm1513_vm1, %v5727_v58  ;;  %v3988_v4 = vpack.c.bf16 %v3567_v62, %v3567_v62 }
 0x1b4   :  { %v3671_v2 = vpack.c.bf16 %v3250_v63, %v3250_v63  ;;  %v3777_v3 = vpack.c.bf16 %v3356_v0, %v3356_v0 }
 0x1b5   :  { %4304 = vst.msk [vmem:[%s8773_s3 + $0x3dc] sm:$0xf] %vm4056_vm2, %v3882_v1  ;;  %v5676_v1 = vld [vmem:[%s8772_s0 + $0x430] sm:$0xff] }
 0x1b6   :  { %4093 = vst.msk [vmem:[%s8773_s3 + $0x90] sm:$0xf] %vm4056_vm2, %v3671_v2  ;;  %v2780_v5 = vpop.f32.mrf.mxu2  ;;  %v3045_v6 = vpop.f32.mrf.mxu3 }
 0x1b7   :  { %4199 = vst.msk [vmem:[%s8773_s3 + $0x238] sm:$0xf] %vm4056_vm2, %v3777_v3  ;;  %v2781_v7 = vadd.f32 %v6541_v52, %v2780_v5  ;;  %v2252_v8 = vpop.f32.mrf.mxu0  ;;  %v2517_v9 = vpop.f32.mrf.mxu1  ;;  %v3046_v10 = vadd.f32 %v6541_v52, %v3045_v6  ;;  %v5729_v3 = vld [vmem:[%s8772_s0 + $0x5d8] sm:$0xff] }
 0x1b8   :  { %v2253_v11 = vadd.f32 %v6541_v52, %v2252_v8  ;;  %v2518_v12 = vadd.f32 %v6541_v52, %v2517_v9  ;;  %4410 = vst.msk [vmem:[%s8773_s3 + $0x584] sm:$0xf] %vm4056_vm2, %v3988_v4 }
 0x1b9   :  { %v3462_v13 = vmax.f32 %v2781_v7, 0.0  ;;  %v3568_v14 = vmax.f32 %v3046_v10, 0.0 }
 0x1ba   :  { %v3251_v15 = vmax.f32 %v2253_v11, 0.0  ;;  %v3357_v16 = vmax.f32 %v2518_v12, 0.0 }
 0x1bb   :  { %v3883_v17 = vpack.c.bf16 %v3462_v13, %v3462_v13  ;;  %v3989_v20 = vpack.c.bf16 %v3568_v14, %v3568_v14 }
 0x1bc   :  { %v3672_v18 = vpack.c.bf16 %v3251_v15, %v3251_v15  ;;  %v3778_v19 = vpack.c.bf16 %v3357_v16, %v3357_v16 }
 0x1bd   :  { %4305 = vst.msk [vmem:[%s8773_s3 + $0x3e0] sm:$0xf] %vm4056_vm2, %v3883_v17 }
 0x1be   :  { %4094 = vst.msk [vmem:[%s8773_s3 + $0x94] sm:$0xf] %vm4056_vm2, %v3672_v18  ;;  %v2782_v21 = vpop.f32.mrf.mxu2  ;;  %v3047_v24 = vpop.f32.mrf.mxu3 }
 0x1bf   :  { %4200 = vst.msk [vmem:[%s8773_s3 + $0x23c] sm:$0xf] %vm4056_vm2, %v3778_v19  ;;  %v2783_v25 = vadd.f32 %v6541_v52, %v2782_v21  ;;  %v2255_v26 = vpop.f32.mrf.mxu0  ;;  %v2520_v27 = vpop.f32.mrf.mxu1  ;;  %v3048_v29 = vadd.f32 %v6541_v52, %v3047_v24 }
 0x1c0   :  { %v2256_v31 = vadd.f32 %v6541_v52, %v2255_v26  ;;  %v2521_v32 = vadd.f32 %v6541_v52, %v2520_v27  ;;  %4411 = vst.msk [vmem:[%s8773_s3 + $0x588] sm:$0xf] %vm4056_vm2, %v3989_v20 }
 0x1c1   :  { %v3463_v33 = vmax.f32 %v2783_v25, 0.0  ;;  %v3569_v34 = vmax.f32 %v3048_v29, 0.0 }
 0x1c2   :  { %v3252_v35 = vmax.f32 %v2256_v31, 0.0  ;;  %v3358_v36 = vmax.f32 %v2521_v32, 0.0  ;;  %5358 = vmatmul.msk.bf16.gmra.mxu0 %vm1513_vm1, %v5569_v22  ;;  %5411 = vmatmul.msk.bf16.gmra.mxu1 %vm1513_vm1, %v5622_v23  ;;  %v5571_v31 = vld [vmem:[%s8772_s0 + $0xe8] sm:$0xff]  ;;  %v5624_v32 = vld [vmem:[%s8772_s0 + $0x290] sm:$0xff] }
 0x1c3   :  { %v3884_v37 = vpack.c.bf16 %v3463_v33, %v3463_v33  ;;  %5464 = vmatmul.msk.bf16.gmra.mxu2 %vm1513_vm1, %v5675_v28  ;;  %5517 = vmatmul.msk.bf16.gmra.mxu3 %vm1513_vm1, %v5728_v30  ;;  %v3990_v41 = vpack.c.bf16 %v3569_v34, %v3569_v34 }
 0x1c4   :  { %v3673_v39 = vpack.c.bf16 %v3252_v35, %v3252_v35  ;;  %v3779_v40 = vpack.c.bf16 %v3358_v36, %v3358_v36 }
 0x1c5   :  { %4306 = vst.msk [vmem:[%s8773_s3 + $0x3e4] sm:$0xf] %vm4056_vm2, %v3884_v37  ;;  %v5677_v37 = vld [vmem:[%s8772_s0 + $0x438] sm:$0xff] }
 0x1c6   :  { %4095 = vst.msk [vmem:[%s8773_s3 + $0x98] sm:$0xf] %vm4056_vm2, %v3673_v39  ;;  %v2785_v42 = vpop.f32.mrf.mxu2  ;;  %v3050_v43 = vpop.f32.mrf.mxu3 }
 0x1c7   :  { %4201 = vst.msk [vmem:[%s8773_s3 + $0x240] sm:$0xf] %vm4056_vm2, %v3779_v40  ;;  %v2786_v44 = vadd.f32 %v6541_v52, %v2785_v42  ;;  %v2257_v45 = vpop.f32.mrf.mxu0  ;;  %v2522_v46 = vpop.f32.mrf.mxu1  ;;  %v3051_v47 = vadd.f32 %v6541_v52, %v3050_v43  ;;  %v5730_v40 = vld [vmem:[%s8772_s0 + $0x5e0] sm:$0xff] }
 0x1c8   :  { %v2258_v48 = vadd.f32 %v6541_v52, %v2257_v45  ;;  %v2523_v38 = vadd.f32 %v6541_v52, %v2522_v46  ;;  %4412 = vst.msk [vmem:[%s8773_s3 + $0x58c] sm:$0xf] %vm4056_vm2, %v3990_v41 }
 0x1c9   :  { %v3464_v49 = vmax.f32 %v2786_v44, 0.0  ;;  %v3570_v50 = vmax.f32 %v3051_v47, 0.0 }
 0x1ca   :  { %v3253_v51 = vmax.f32 %v2258_v48, 0.0  ;;  %v3359_v53 = vmax.f32 %v2523_v38, 0.0 }
 0x1cb   :  { %v3885_v54 = vpack.c.bf16 %v3464_v49, %v3464_v49  ;;  %v3991_v57 = vpack.c.bf16 %v3570_v50, %v3570_v50 }
 0x1cc   :  { %v3674_v55 = vpack.c.bf16 %v3253_v51, %v3253_v51  ;;  %v3780_v56 = vpack.c.bf16 %v3359_v53, %v3359_v53 }
 0x1cd   :  { %4307 = vst.msk [vmem:[%s8773_s3 + $0x3e8] sm:$0xf] %vm4056_vm2, %v3885_v54 }
 0x1ce   :  { %4096 = vst.msk [vmem:[%s8773_s3 + $0x9c] sm:$0xf] %vm4056_vm2, %v3674_v55  ;;  %v2787_v58 = vpop.f32.mrf.mxu2  ;;  %v3052_v61 = vpop.f32.mrf.mxu3 }
 0x1cf   :  { %4202 = vst.msk [vmem:[%s8773_s3 + $0x244] sm:$0xf] %vm4056_vm2, %v3780_v56  ;;  %v2788_v62 = vadd.f32 %v6541_v52, %v2787_v58  ;;  %v2260_v63 = vpop.f32.mrf.mxu0  ;;  %v2525_v0 = vpop.f32.mrf.mxu1  ;;  %v3053_v2 = vadd.f32 %v6541_v52, %v3052_v61 }
 0x1d0   :  { %v2261_v4 = vadd.f32 %v6541_v52, %v2260_v63  ;;  %v2526_v5 = vadd.f32 %v6541_v52, %v2525_v0  ;;  %4413 = vst.msk [vmem:[%s8773_s3 + $0x590] sm:$0xf] %vm4056_vm2, %v3991_v57 }
 0x1d1   :  { %v3465_v6 = vmax.f32 %v2788_v62, 0.0  ;;  %v3571_v7 = vmax.f32 %v3053_v2, 0.0 }
 0x1d2   :  { %v3254_v8 = vmax.f32 %v2261_v4, 0.0  ;;  %v3360_v9 = vmax.f32 %v2526_v5, 0.0  ;;  %5359 = vmatmul.msk.bf16.gmra.mxu0 %vm1513_vm1, %v5570_v59  ;;  %5412 = vmatmul.msk.bf16.gmra.mxu1 %vm1513_vm1, %v5623_v60  ;;  %v5625_v4 = vld [vmem:[%s8772_s0 + $0x298] sm:$0xff] }
 0x1d3   :  { %v3886_v10 = vpack.c.bf16 %v3465_v6, %v3465_v6  ;;  %5465 = vmatmul.msk.bf16.gmra.mxu2 %vm1513_vm1, %v5676_v1  ;;  %5518 = vmatmul.msk.bf16.gmra.mxu3 %vm1513_vm1, %v5729_v3  ;;  %v3992_v13 = vpack.c.bf16 %v3571_v7, %v3571_v7  ;;  %v5572_v3 = vld [vmem:[%s8772_s0 + $0xf0] sm:$0xff]  ;;  %v7162_v6 = vld [vmem:[%s8771_s2] ss:$0 sm:$0xff] }
 0x1d4   :  { %v3675_v11 = vpack.c.bf16 %v3254_v8, %v3254_v8  ;;  %v3781_v12 = vpack.c.bf16 %v3360_v9, %v3360_v9 }
 0x1d5   :  { %4308 = vst.msk [vmem:[%s8773_s3 + $0x3ec] sm:$0xf] %vm4056_vm2, %v3886_v10  ;;  %v5678_v10 = vld [vmem:[%s8772_s0 + $0x440] sm:$0xff] }
 0x1d6   :  { %4097 = vst.msk [vmem:[%s8773_s3 + $0xa0] sm:$0xf] %vm4056_vm2, %v3675_v11  ;;  %v2790_v14 = vpop.f32.mrf.mxu2  ;;  %v3055_v15 = vpop.f32.mrf.mxu3 }
 0x1d7   :  { %4203 = vst.msk [vmem:[%s8773_s3 + $0x248] sm:$0xf] %vm4056_vm2, %v3781_v12  ;;  %v2791_v16 = vadd.f32 %v6541_v52, %v2790_v14  ;;  %v2262_v17 = vpop.f32.mrf.mxu0  ;;  %v2527_v18 = vpop.f32.mrf.mxu1  ;;  %v3056_v19 = vadd.f32 %v6541_v52, %v3055_v15  ;;  %v5731_v12 = vld [vmem:[%s8772_s0 + $0x5e8] sm:$0xff] }
 0x1d8   :  { %v2263_v20 = vadd.f32 %v6541_v52, %v2262_v17  ;;  %v2528_v21 = vadd.f32 %v6541_v52, %v2527_v18  ;;  %4414 = vst.msk [vmem:[%s8773_s3 + $0x594] sm:$0xf] %vm4056_vm2, %v3992_v13 }
 0x1d9   :  { %v3466_v22 = vmax.f32 %v2791_v16, 0.0  ;;  %v3572_v23 = vmax.f32 %v3056_v19, 0.0 }
 0x1da   :  { %v3255_v24 = vmax.f32 %v2263_v20, 0.0  ;;  %v3361_v25 = vmax.f32 %v2528_v21, 0.0 }
 0x1db   :  { %v3887_v26 = vpack.c.bf16 %v3466_v22, %v3466_v22  ;;  %v3993_v29 = vpack.c.bf16 %v3572_v23, %v3572_v23 }
 0x1dc   :  { %v3676_v27 = vpack.c.bf16 %v3255_v24, %v3255_v24  ;;  %v3782_v28 = vpack.c.bf16 %v3361_v25, %v3361_v25 }
 0x1dd   :  { %4309 = vst.msk [vmem:[%s8773_s3 + $0x3f0] sm:$0xf] %vm4056_vm2, %v3887_v26 }
 0x1de   :  { %4098 = vst.msk [vmem:[%s8773_s3 + $0xa4] sm:$0xf] %vm4056_vm2, %v3676_v27  ;;  %v2792_v30 = vpop.f32.mrf.mxu2  ;;  %v3057_v33 = vpop.f32.mrf.mxu3 }
 0x1df   :  { %4204 = vst.msk [vmem:[%s8773_s3 + $0x24c] sm:$0xf] %vm4056_vm2, %v3782_v28  ;;  %v2793_v34 = vadd.f32 %v6541_v52, %v2792_v30  ;;  %v2265_v35 = vpop.f32.mrf.mxu0  ;;  %v2530_v36 = vpop.f32.mrf.mxu1  ;;  %v3058_v39 = vadd.f32 %v6541_v52, %v3057_v33 }
 0x1e0   :  { %v2266_v41 = vadd.f32 %v6541_v52, %v2265_v35  ;;  %v2531_v42 = vadd.f32 %v6541_v52, %v2530_v36  ;;  %4415 = vst.msk [vmem:[%s8773_s3 + $0x598] sm:$0xf] %vm4056_vm2, %v3993_v29 }
 0x1e1   :  { %v3467_v43 = vmax.f32 %v2793_v34, 0.0  ;;  %v3573_v44 = vmax.f32 %v3058_v39, 0.0 }
 0x1e2   :  { %v3256_v45 = vmax.f32 %v2266_v41, 0.0  ;;  %v3362_v46 = vmax.f32 %v2531_v42, 0.0  ;;  %5360 = vmatmul.msk.bf16.gmra.mxu0 %vm1513_vm1, %v5571_v31  ;;  %5413 = vmatmul.msk.bf16.gmra.mxu1 %vm1513_vm1, %v5624_v32  ;;  %v5573_v41 = vld [vmem:[%s8772_s0 + $0xf8] sm:$0xff]  ;;  %v5626_v42 = vld [vmem:[%s8772_s0 + $0x2a0] sm:$0xff] }
 0x1e3   :  { %v3888_v47 = vpack.c.bf16 %v3467_v43, %v3467_v43  ;;  %5466 = vmatmul.msk.bf16.gmra.mxu2 %vm1513_vm1, %v5677_v37  ;;  %5519 = vmatmul.msk.bf16.gmra.mxu3 %vm1513_vm1, %v5730_v40  ;;  %v3994_v49 = vpack.c.bf16 %v3573_v44, %v3573_v44 }
 0x1e4   :  { %v3677_v48 = vpack.c.bf16 %v3256_v45, %v3256_v45  ;;  %v3783_v38 = vpack.c.bf16 %v3362_v46, %v3362_v46 }
 0x1e5   :  { %4310 = vst.msk [vmem:[%s8773_s3 + $0x3f4] sm:$0xf] %vm4056_vm2, %v3888_v47  ;;  %v5679_v47 = vld [vmem:[%s8772_s0 + $0x448] sm:$0xff] }
 0x1e6   :  { %4099 = vst.msk [vmem:[%s8773_s3 + $0xa8] sm:$0xf] %vm4056_vm2, %v3677_v48  ;;  %v2795_v50 = vpop.f32.mrf.mxu2  ;;  %v3060_v51 = vpop.f32.mrf.mxu3 }
 0x1e7   :  { %4205 = vst.msk [vmem:[%s8773_s3 + $0x250] sm:$0xf] %vm4056_vm2, %v3783_v38  ;;  %v2796_v53 = vadd.f32 %v6541_v52, %v2795_v50  ;;  %v2267_v54 = vpop.f32.mrf.mxu0  ;;  %v2532_v55 = vpop.f32.mrf.mxu1  ;;  %v3061_v56 = vadd.f32 %v6541_v52, %v3060_v51  ;;  %v5732_v38 = vld [vmem:[%s8772_s0 + $0x5f0] sm:$0xff] }
 0x1e8   :  { %v2268_v57 = vadd.f32 %v6541_v52, %v2267_v54  ;;  %v2533_v58 = vadd.f32 %v6541_v52, %v2532_v55  ;;  %4416 = vst.msk [vmem:[%s8773_s3 + $0x59c] sm:$0xf] %vm4056_vm2, %v3994_v49 }
 0x1e9   :  { %v3468_v59 = vmax.f32 %v2796_v53, 0.0  ;;  %v3574_v60 = vmax.f32 %v3061_v56, 0.0 }
 0x1ea   :  { %v3257_v61 = vmax.f32 %v2268_v57, 0.0  ;;  %v3363_v62 = vmax.f32 %v2533_v58, 0.0 }
 0x1eb   :  { %v3889_v63 = vpack.c.bf16 %v3468_v59, %v3468_v59  ;;  %v3995_v2 = vpack.c.bf16 %v3574_v60, %v3574_v60 }
 0x1ec   :  { %v3678_v0 = vpack.c.bf16 %v3257_v61, %v3257_v61  ;;  %v3784_v1 = vpack.c.bf16 %v3363_v62, %v3363_v62 }
 0x1ed   :  { %4311 = vst.msk [vmem:[%s8773_s3 + $0x3f8] sm:$0xf] %vm4056_vm2, %v3889_v63 }
 0x1ee   :  { %4100 = vst.msk [vmem:[%s8773_s3 + $0xac] sm:$0xf] %vm4056_vm2, %v3678_v0  ;;  %v2797_v52 = vpop.f32.mrf.mxu2  ;;  %v3062_v5 = vpop.f32.mrf.mxu3 }
 0x1ef   :  { %4206 = vst.msk [vmem:[%s8773_s3 + $0x254] sm:$0xf] %vm4056_vm2, %v3784_v1  ;;  %v2798_v7 = vadd.f32 %v7162_v6, %v2797_v52  ;;  %v2270_v8 = vpop.f32.mrf.mxu0  ;;  %v2535_v9 = vpop.f32.mrf.mxu1  ;;  %v3063_v11 = vadd.f32 %v7162_v6, %v3062_v5 }
 0x1f0   :  { %v2271_v13 = vadd.f32 %v7162_v6, %v2270_v8  ;;  %v2536_v14 = vadd.f32 %v7162_v6, %v2535_v9  ;;  %4417 = vst.msk [vmem:[%s8773_s3 + $0x5a0] sm:$0xf] %vm4056_vm2, %v3995_v2 }
 0x1f1   :  { %v3469_v15 = vmax.f32 %v2798_v7, 0.0  ;;  %v3575_v16 = vmax.f32 %v3063_v11, 0.0 }
 0x1f2   :  { %v3258_v17 = vmax.f32 %v2271_v13, 0.0  ;;  %v3364_v18 = vmax.f32 %v2536_v14, 0.0  ;;  %5361 = vmatmul.msk.bf16.gmra.mxu0 %vm1513_vm1, %v5572_v3  ;;  %5414 = vmatmul.msk.bf16.gmra.mxu1 %vm1513_vm1, %v5625_v4  ;;  %v5574_v13 = vld [vmem:[%s8772_s0 + $0x100] sm:$0xff]  ;;  %v5627_v14 = vld [vmem:[%s8772_s0 + $0x2a8] sm:$0xff] }
 0x1f3   :  { %v3890_v19 = vpack.c.bf16 %v3469_v15, %v3469_v15  ;;  %5467 = vmatmul.msk.bf16.gmra.mxu2 %vm1513_vm1, %v5678_v10  ;;  %5520 = vmatmul.msk.bf16.gmra.mxu3 %vm1513_vm1, %v5731_v12  ;;  %v3996_v22 = vpack.c.bf16 %v3575_v16, %v3575_v16 }
 0x1f4   :  { %v3679_v20 = vpack.c.bf16 %v3258_v17, %v3258_v17  ;;  %v3785_v21 = vpack.c.bf16 %v3364_v18, %v3364_v18 }
 0x1f5   :  { %4312 = vst.msk [vmem:[%s8773_s3 + $0x3fc] sm:$0xf] %vm4056_vm2, %v3890_v19  ;;  %v5680_v19 = vld [vmem:[%s8772_s0 + $0x450] sm:$0xff] }
 0x1f6   :  { %4101 = vst.msk [vmem:[%s8773_s3 + $0xb0] sm:$0xf] %vm4056_vm2, %v3679_v20  ;;  %v2800_v23 = vpop.f32.mrf.mxu2  ;;  %v3065_v24 = vpop.f32.mrf.mxu3 }
 0x1f7   :  { %4207 = vst.msk [vmem:[%s8773_s3 + $0x258] sm:$0xf] %vm4056_vm2, %v3785_v21  ;;  %v2801_v25 = vadd.f32 %v7162_v6, %v2800_v23  ;;  %v2272_v26 = vpop.f32.mrf.mxu0  ;;  %v2537_v27 = vpop.f32.mrf.mxu1  ;;  %v3066_v28 = vadd.f32 %v7162_v6, %v3065_v24  ;;  %v5733_v21 = vld [vmem:[%s8772_s0 + $0x5f8] sm:$0xff] }
 0x1f8   :  { %v2273_v29 = vadd.f32 %v7162_v6, %v2272_v26  ;;  %v2538_v30 = vadd.f32 %v7162_v6, %v2537_v27  ;;  %4418 = vst.msk [vmem:[%s8773_s3 + $0x5a4] sm:$0xf] %vm4056_vm2, %v3996_v22 }
 0x1f9   :  { %v3470_v31 = vmax.f32 %v2801_v25, 0.0  ;;  %v3576_v32 = vmax.f32 %v3066_v28, 0.0 }
 0x1fa   :  { %v3259_v33 = vmax.f32 %v2273_v29, 0.0  ;;  %v3365_v34 = vmax.f32 %v2538_v30, 0.0 }
 0x1fb   :  { %v3891_v35 = vpack.c.bf16 %v3470_v31, %v3470_v31  ;;  %v3997_v39 = vpack.c.bf16 %v3576_v32, %v3576_v32 }
 0x1fc   :  { %v3680_v36 = vpack.c.bf16 %v3259_v33, %v3259_v33  ;;  %v3786_v37 = vpack.c.bf16 %v3365_v34, %v3365_v34 }
 0x1fd   :  { %4313 = vst.msk [vmem:[%s8773_s3 + $0x400] sm:$0xf] %vm4056_vm2, %v3891_v35 }
 0x1fe   :  { %4102 = vst.msk [vmem:[%s8773_s3 + $0xb4] sm:$0xf] %vm4056_vm2, %v3680_v36  ;;  %v2802_v40 = vpop.f32.mrf.mxu2  ;;  %v3067_v43 = vpop.f32.mrf.mxu3 }
 0x1ff   :  { %4208 = vst.msk [vmem:[%s8773_s3 + $0x25c] sm:$0xf] %vm4056_vm2, %v3786_v37  ;;  %v2803_v44 = vadd.f32 %v7162_v6, %v2802_v40  ;;  %v2275_v45 = vpop.f32.mrf.mxu0  ;;  %v2540_v46 = vpop.f32.mrf.mxu1  ;;  %v3068_v48 = vadd.f32 %v7162_v6, %v3067_v43 }
 0x200   :  { %v2276_v49 = vadd.f32 %v7162_v6, %v2275_v45  ;;  %v2541_v50 = vadd.f32 %v7162_v6, %v2540_v46  ;;  %4419 = vst.msk [vmem:[%s8773_s3 + $0x5a8] sm:$0xf] %vm4056_vm2, %v3997_v39 }
 0x201   :  { %v3471_v51 = vmax.f32 %v2803_v44, 0.0  ;;  %v3577_v53 = vmax.f32 %v3068_v48, 0.0 }
 0x202   :  { %v3260_v54 = vmax.f32 %v2276_v49, 0.0  ;;  %v3366_v55 = vmax.f32 %v2541_v50, 0.0  ;;  %5362 = vmatmul.msk.bf16.gmra.mxu0 %vm1513_vm1, %v5573_v41  ;;  %5415 = vmatmul.msk.bf16.gmra.mxu1 %vm1513_vm1, %v5626_v42  ;;  %v5575_v49 = vld [vmem:[%s8772_s0 + $0x108] sm:$0xff]  ;;  %v5628_v50 = vld [vmem:[%s8772_s0 + $0x2b0] sm:$0xff] }
 0x203   :  { %v3892_v56 = vpack.c.bf16 %v3471_v51, %v3471_v51  ;;  %5468 = vmatmul.msk.bf16.gmra.mxu2 %vm1513_vm1, %v5679_v47  ;;  %5521 = vmatmul.msk.bf16.gmra.mxu3 %vm1513_vm1, %v5732_v38  ;;  %v3998_v59 = vpack.c.bf16 %v3577_v53, %v3577_v53 }
 0x204   :  { %v3681_v57 = vpack.c.bf16 %v3260_v54, %v3260_v54  ;;  %v3787_v58 = vpack.c.bf16 %v3366_v55, %v3366_v55 }
 0x205   :  { %4314 = vst.msk [vmem:[%s8773_s3 + $0x404] sm:$0xf] %vm4056_vm2, %v3892_v56  ;;  %v5681_v56 = vld [vmem:[%s8772_s0 + $0x458] sm:$0xff] }
 0x206   :  { %4103 = vst.msk [vmem:[%s8773_s3 + $0xb8] sm:$0xf] %vm4056_vm2, %v3681_v57  ;;  %v2805_v60 = vpop.f32.mrf.mxu2  ;;  %v3070_v61 = vpop.f32.mrf.mxu3 }
 0x207   :  { %4209 = vst.msk [vmem:[%s8773_s3 + $0x260] sm:$0xf] %vm4056_vm2, %v3787_v58  ;;  %v2806_v62 = vadd.f32 %v7162_v6, %v2805_v60  ;;  %v2277_v63 = vpop.f32.mrf.mxu0  ;;  %v2542_v0 = vpop.f32.mrf.mxu1  ;;  %v3071_v1 = vadd.f32 %v7162_v6, %v3070_v61  ;;  %v5734_v58 = vld [vmem:[%s8772_s0 + $0x600] sm:$0xff] }
 0x208   :  { %v2278_v2 = vadd.f32 %v7162_v6, %v2277_v63  ;;  %v2543_v52 = vadd.f32 %v7162_v6, %v2542_v0  ;;  %4420 = vst.msk [vmem:[%s8773_s3 + $0x5ac] sm:$0xf] %vm4056_vm2, %v3998_v59 }
 0x209   :  { %v3472_v3 = vmax.f32 %v2806_v62, 0.0  ;;  %v3578_v4 = vmax.f32 %v3071_v1, 0.0 }
 0x20a   :  { %v3261_v5 = vmax.f32 %v2278_v2, 0.0  ;;  %v3367_v7 = vmax.f32 %v2543_v52, 0.0 }
 0x20b   :  { %v3893_v8 = vpack.c.bf16 %v3472_v3, %v3472_v3  ;;  %v3999_v11 = vpack.c.bf16 %v3578_v4, %v3578_v4 }
 0x20c   :  { %v3682_v9 = vpack.c.bf16 %v3261_v5, %v3261_v5  ;;  %v3788_v10 = vpack.c.bf16 %v3367_v7, %v3367_v7 }
 0x20d   :  { %4315 = vst.msk [vmem:[%s8773_s3 + $0x408] sm:$0xf] %vm4056_vm2, %v3893_v8 }
 0x20e   :  { %4104 = vst.msk [vmem:[%s8773_s3 + $0xbc] sm:$0xf] %vm4056_vm2, %v3682_v9  ;;  %v2807_v12 = vpop.f32.mrf.mxu2  ;;  %v3072_v15 = vpop.f32.mrf.mxu3 }
 0x20f   :  { %4210 = vst.msk [vmem:[%s8773_s3 + $0x264] sm:$0xf] %vm4056_vm2, %v3788_v10  ;;  %v2808_v16 = vadd.f32 %v7162_v6, %v2807_v12  ;;  %v2280_v17 = vpop.f32.mrf.mxu0  ;;  %v2545_v18 = vpop.f32.mrf.mxu1  ;;  %v3073_v20 = vadd.f32 %v7162_v6, %v3072_v15 }
 0x210   :  { %v2281_v22 = vadd.f32 %v7162_v6, %v2280_v17  ;;  %v2546_v23 = vadd.f32 %v7162_v6, %v2545_v18  ;;  %4421 = vst.msk [vmem:[%s8773_s3 + $0x5b0] sm:$0xf] %vm4056_vm2, %v3999_v11 }
 0x211   :  { %v3473_v24 = vmax.f32 %v2808_v16, 0.0  ;;  %v3579_v25 = vmax.f32 %v3073_v20, 0.0 }
 0x212   :  { %v3262_v26 = vmax.f32 %v2281_v22, 0.0  ;;  %v3368_v27 = vmax.f32 %v2546_v23, 0.0  ;;  %5363 = vmatmul.msk.bf16.gmra.mxu0 %vm1513_vm1, %v5574_v13  ;;  %5416 = vmatmul.msk.bf16.gmra.mxu1 %vm1513_vm1, %v5627_v14  ;;  %v5576_v22 = vld [vmem:[%s8772_s0 + $0x110] sm:$0xff]  ;;  %v5629_v23 = vld [vmem:[%s8772_s0 + $0x2b8] sm:$0xff] }
 0x213   :  { %v3894_v28 = vpack.c.bf16 %v3473_v24, %v3473_v24  ;;  %5469 = vmatmul.msk.bf16.gmra.mxu2 %vm1513_vm1, %v5680_v19  ;;  %5522 = vmatmul.msk.bf16.gmra.mxu3 %vm1513_vm1, %v5733_v21  ;;  %v4000_v31 = vpack.c.bf16 %v3579_v25, %v3579_v25 }
 0x214   :  { %v3683_v29 = vpack.c.bf16 %v3262_v26, %v3262_v26  ;;  %v3789_v30 = vpack.c.bf16 %v3368_v27, %v3368_v27 }
 0x215   :  { %4316 = vst.msk [vmem:[%s8773_s3 + $0x40c] sm:$0xf] %vm4056_vm2, %v3894_v28  ;;  %v5682_v28 = vld [vmem:[%s8772_s0 + $0x460] sm:$0xff] }
 0x216   :  { %4105 = vst.msk [vmem:[%s8773_s3 + $0xc0] sm:$0xf] %vm4056_vm2, %v3683_v29  ;;  %v2810_v32 = vpop.f32.mrf.mxu2  ;;  %v3075_v33 = vpop.f32.mrf.mxu3 }
 0x217   :  { %4211 = vst.msk [vmem:[%s8773_s3 + $0x268] sm:$0xf] %vm4056_vm2, %v3789_v30  ;;  %v2811_v34 = vadd.f32 %v7162_v6, %v2810_v32  ;;  %v2282_v35 = vpop.f32.mrf.mxu0  ;;  %v2547_v36 = vpop.f32.mrf.mxu1  ;;  %v3076_v37 = vadd.f32 %v7162_v6, %v3075_v33  ;;  %v5735_v30 = vld [vmem:[%s8772_s0 + $0x608] sm:$0xff] }
 0x218   :  { %v2283_v39 = vadd.f32 %v7162_v6, %v2282_v35  ;;  %v2548_v40 = vadd.f32 %v7162_v6, %v2547_v36  ;;  %4422 = vst.msk [vmem:[%s8773_s3 + $0x5b4] sm:$0xf] %vm4056_vm2, %v4000_v31 }
 0x219   :  { %v3474_v41 = vmax.f32 %v2811_v34, 0.0  ;;  %v3580_v42 = vmax.f32 %v3076_v37, 0.0 }
 0x21a   :  { %v3263_v43 = vmax.f32 %v2283_v39, 0.0  ;;  %v3369_v44 = vmax.f32 %v2548_v40, 0.0 }
 0x21b   :  { %v3895_v45 = vpack.c.bf16 %v3474_v41, %v3474_v41  ;;  %v4001_v48 = vpack.c.bf16 %v3580_v42, %v3580_v42 }
 0x21c   :  { %v3684_v46 = vpack.c.bf16 %v3263_v43, %v3263_v43  ;;  %v3790_v47 = vpack.c.bf16 %v3369_v44, %v3369_v44 }
 0x21d   :  { %4317 = vst.msk [vmem:[%s8773_s3 + $0x410] sm:$0xf] %vm4056_vm2, %v3895_v45 }
 0x21e   :  { %4106 = vst.msk [vmem:[%s8773_s3 + $0xc4] sm:$0xf] %vm4056_vm2, %v3684_v46  ;;  %v2812_v38 = vpop.f32.mrf.mxu2  ;;  %v3077_v51 = vpop.f32.mrf.mxu3 }
 0x21f   :  { %4212 = vst.msk [vmem:[%s8773_s3 + $0x26c] sm:$0xf] %vm4056_vm2, %v3790_v47  ;;  %v2813_v53 = vadd.f32 %v7162_v6, %v2812_v38  ;;  %v2285_v54 = vpop.f32.mrf.mxu0  ;;  %v2550_v55 = vpop.f32.mrf.mxu1  ;;  %v3078_v57 = vadd.f32 %v7162_v6, %v3077_v51 }
 0x220   :  { %v2286_v59 = vadd.f32 %v7162_v6, %v2285_v54  ;;  %v2551_v60 = vadd.f32 %v7162_v6, %v2550_v55  ;;  %4423 = vst.msk [vmem:[%s8773_s3 + $0x5b8] sm:$0xf] %vm4056_vm2, %v4001_v48 }
 0x221   :  { %v3475_v61 = vmax.f32 %v2813_v53, 0.0  ;;  %v3581_v62 = vmax.f32 %v3078_v57, 0.0 }
 0x222   :  { %v3264_v63 = vmax.f32 %v2286_v59, 0.0  ;;  %v3370_v0 = vmax.f32 %v2551_v60, 0.0  ;;  %5364 = vmatmul.msk.bf16.gmra.mxu0 %vm1513_vm1, %v5575_v49  ;;  %5417 = vmatmul.msk.bf16.gmra.mxu1 %vm1513_vm1, %v5628_v50  ;;  %v5577_v59 = vld [vmem:[%s8772_s0 + $0x118] sm:$0xff]  ;;  %v5630_v60 = vld [vmem:[%s8772_s0 + $0x2c0] sm:$0xff] }
 0x223   :  { %v3896_v1 = vpack.c.bf16 %v3475_v61, %v3475_v61  ;;  %5470 = vmatmul.msk.bf16.gmra.mxu2 %vm1513_vm1, %v5681_v56  ;;  %5523 = vmatmul.msk.bf16.gmra.mxu3 %vm1513_vm1, %v5734_v58  ;;  %v4002_v3 = vpack.c.bf16 %v3581_v62, %v3581_v62 }
 0x224   :  { %v3685_v2 = vpack.c.bf16 %v3264_v63, %v3264_v63  ;;  %v3791_v52 = vpack.c.bf16 %v3370_v0, %v3370_v0 }
 0x225   :  { %4318 = vst.msk [vmem:[%s8773_s3 + $0x414] sm:$0xf] %vm4056_vm2, %v3896_v1  ;;  %v5683_v1 = vld [vmem:[%s8772_s0 + $0x468] sm:$0xff] }
 0x226   :  { %4107 = vst.msk [vmem:[%s8773_s3 + $0xc8] sm:$0xf] %vm4056_vm2, %v3685_v2  ;;  %v2815_v4 = vpop.f32.mrf.mxu2  ;;  %v3080_v5 = vpop.f32.mrf.mxu3 }
 0x227   :  { %4213 = vst.msk [vmem:[%s8773_s3 + $0x270] sm:$0xf] %vm4056_vm2, %v3791_v52  ;;  %v2816_v7 = vadd.f32 %v7162_v6, %v2815_v4  ;;  %v2287_v8 = vpop.f32.mrf.mxu0  ;;  %v2552_v9 = vpop.f32.mrf.mxu1  ;;  %v3081_v10 = vadd.f32 %v7162_v6, %v3080_v5  ;;  %v5736_v52 = vld [vmem:[%s8772_s0 + $0x610] sm:$0xff] }
 0x228   :  { %v2288_v11 = vadd.f32 %v7162_v6, %v2287_v8  ;;  %v2553_v12 = vadd.f32 %v7162_v6, %v2552_v9  ;;  %4424 = vst.msk [vmem:[%s8773_s3 + $0x5bc] sm:$0xf] %vm4056_vm2, %v4002_v3 }
 0x229   :  { %v3476_v13 = vmax.f32 %v2816_v7, 0.0  ;;  %v3582_v14 = vmax.f32 %v3081_v10, 0.0 }
 0x22a   :  { %v3265_v15 = vmax.f32 %v2288_v11, 0.0  ;;  %v3371_v16 = vmax.f32 %v2553_v12, 0.0 }
 0x22b   :  { %v3897_v17 = vpack.c.bf16 %v3476_v13, %v3476_v13  ;;  %v4003_v20 = vpack.c.bf16 %v3582_v14, %v3582_v14 }
 0x22c   :  { %v3686_v18 = vpack.c.bf16 %v3265_v15, %v3265_v15  ;;  %v3792_v19 = vpack.c.bf16 %v3371_v16, %v3371_v16 }
 0x22d   :  { %4319 = vst.msk [vmem:[%s8773_s3 + $0x418] sm:$0xf] %vm4056_vm2, %v3897_v17 }
 0x22e   :  { %4108 = vst.msk [vmem:[%s8773_s3 + $0xcc] sm:$0xf] %vm4056_vm2, %v3686_v18  ;;  %v2817_v21 = vpop.f32.mrf.mxu2  ;;  %v3082_v24 = vpop.f32.mrf.mxu3 }
 0x22f   :  { %4214 = vst.msk [vmem:[%s8773_s3 + $0x274] sm:$0xf] %vm4056_vm2, %v3792_v19  ;;  %v2818_v25 = vadd.f32 %v7162_v6, %v2817_v21  ;;  %v2290_v26 = vpop.f32.mrf.mxu0  ;;  %v2555_v27 = vpop.f32.mrf.mxu1  ;;  %v3083_v29 = vadd.f32 %v7162_v6, %v3082_v24 }
 0x230   :  { %v2291_v31 = vadd.f32 %v7162_v6, %v2290_v26  ;;  %v2556_v32 = vadd.f32 %v7162_v6, %v2555_v27  ;;  %4425 = vst.msk [vmem:[%s8773_s3 + $0x5c0] sm:$0xf] %vm4056_vm2, %v4003_v20 }
 0x231   :  { %v3477_v33 = vmax.f32 %v2818_v25, 0.0  ;;  %v3583_v34 = vmax.f32 %v3083_v29, 0.0 }
 0x232   :  { %v3266_v35 = vmax.f32 %v2291_v31, 0.0  ;;  %v3372_v36 = vmax.f32 %v2556_v32, 0.0  ;;  %5365 = vmatmul.msk.bf16.gmra.mxu0 %vm1513_vm1, %v5576_v22  ;;  %5418 = vmatmul.msk.bf16.gmra.mxu1 %vm1513_vm1, %v5629_v23  ;;  %v5578_v31 = vld [vmem:[%s8772_s0 + $0x120] sm:$0xff]  ;;  %v5631_v32 = vld [vmem:[%s8772_s0 + $0x2c8] sm:$0xff] }
 0x233   :  { %v3898_v37 = vpack.c.bf16 %v3477_v33, %v3477_v33  ;;  %5471 = vmatmul.msk.bf16.gmra.mxu2 %vm1513_vm1, %v5682_v28  ;;  %5524 = vmatmul.msk.bf16.gmra.mxu3 %vm1513_vm1, %v5735_v30  ;;  %v4004_v41 = vpack.c.bf16 %v3583_v34, %v3583_v34 }
 0x234   :  { %v3687_v39 = vpack.c.bf16 %v3266_v35, %v3266_v35  ;;  %v3793_v40 = vpack.c.bf16 %v3372_v36, %v3372_v36 }
 0x235   :  { %4320 = vst.msk [vmem:[%s8773_s3 + $0x41c] sm:$0xf] %vm4056_vm2, %v3898_v37  ;;  %v5684_v37 = vld [vmem:[%s8772_s0 + $0x470] sm:$0xff] }
 0x236   :  { %4109 = vst.msk [vmem:[%s8773_s3 + $0xd0] sm:$0xf] %vm4056_vm2, %v3687_v39  ;;  %v2820_v42 = vpop.f32.mrf.mxu2  ;;  %v3085_v43 = vpop.f32.mrf.mxu3 }
 0x237   :  { %4215 = vst.msk [vmem:[%s8773_s3 + $0x278] sm:$0xf] %vm4056_vm2, %v3793_v40  ;;  %v2821_v44 = vadd.f32 %v7162_v6, %v2820_v42  ;;  %v2292_v45 = vpop.f32.mrf.mxu0  ;;  %v2557_v46 = vpop.f32.mrf.mxu1  ;;  %v3086_v47 = vadd.f32 %v7162_v6, %v3085_v43  ;;  %v5737_v40 = vld [vmem:[%s8772_s0 + $0x618] sm:$0xff] }
 0x238   :  { %v2293_v48 = vadd.f32 %v7162_v6, %v2292_v45  ;;  %v2558_v38 = vadd.f32 %v7162_v6, %v2557_v46  ;;  %4426 = vst.msk [vmem:[%s8773_s3 + $0x5c4] sm:$0xf] %vm4056_vm2, %v4004_v41 }
 0x239   :  { %v3478_v49 = vmax.f32 %v2821_v44, 0.0  ;;  %v3584_v50 = vmax.f32 %v3086_v47, 0.0 }
 0x23a   :  { %v3267_v51 = vmax.f32 %v2293_v48, 0.0  ;;  %v3373_v53 = vmax.f32 %v2558_v38, 0.0 }
 0x23b   :  { %v3899_v54 = vpack.c.bf16 %v3478_v49, %v3478_v49  ;;  %v4005_v57 = vpack.c.bf16 %v3584_v50, %v3584_v50 }
 0x23c   :  { %v3688_v55 = vpack.c.bf16 %v3267_v51, %v3267_v51  ;;  %v3794_v56 = vpack.c.bf16 %v3373_v53, %v3373_v53 }
 0x23d   :  { %4321 = vst.msk [vmem:[%s8773_s3 + $0x420] sm:$0xf] %vm4056_vm2, %v3899_v54 }
 0x23e   :  { %4110 = vst.msk [vmem:[%s8773_s3 + $0xd4] sm:$0xf] %vm4056_vm2, %v3688_v55  ;;  %v2822_v58 = vpop.f32.mrf.mxu2  ;;  %v3087_v61 = vpop.f32.mrf.mxu3 }
 0x23f   :  { %4216 = vst.msk [vmem:[%s8773_s3 + $0x27c] sm:$0xf] %vm4056_vm2, %v3794_v56  ;;  %v2823_v62 = vadd.f32 %v7162_v6, %v2822_v58  ;;  %v2295_v63 = vpop.f32.mrf.mxu0  ;;  %v2560_v0 = vpop.f32.mrf.mxu1  ;;  %v3088_v2 = vadd.f32 %v7162_v6, %v3087_v61 }
 0x240   :  { %v2296_v3 = vadd.f32 %v7162_v6, %v2295_v63  ;;  %v2561_v4 = vadd.f32 %v7162_v6, %v2560_v0  ;;  %4427 = vst.msk [vmem:[%s8773_s3 + $0x5c8] sm:$0xf] %vm4056_vm2, %v4005_v57 }
 0x241   :  { %v3479_v5 = vmax.f32 %v2823_v62, 0.0  ;;  %v3585_v7 = vmax.f32 %v3088_v2, 0.0 }
 0x242   :  { %v3268_v8 = vmax.f32 %v2296_v3, 0.0  ;;  %v3374_v9 = vmax.f32 %v2561_v4, 0.0  ;;  %5366 = vmatmul.msk.bf16.gmra.mxu0 %vm1513_vm1, %v5577_v59  ;;  %5419 = vmatmul.msk.bf16.gmra.mxu1 %vm1513_vm1, %v5630_v60  ;;  %v5579_v3 = vld [vmem:[%s8772_s0 + $0x128] sm:$0xff]  ;;  %v5632_v4 = vld [vmem:[%s8772_s0 + $0x2d0] sm:$0xff] }
 0x243   :  { %v3900_v10 = vpack.c.bf16 %v3479_v5, %v3479_v5  ;;  %5472 = vmatmul.msk.bf16.gmra.mxu2 %vm1513_vm1, %v5683_v1  ;;  %5525 = vmatmul.msk.bf16.gmra.mxu3 %vm1513_vm1, %v5736_v52  ;;  %v4006_v13 = vpack.c.bf16 %v3585_v7, %v3585_v7 }
 0x244   :  { %v3689_v11 = vpack.c.bf16 %v3268_v8, %v3268_v8  ;;  %v3795_v12 = vpack.c.bf16 %v3374_v9, %v3374_v9 }
 0x245   :  { %4322 = vst.msk [vmem:[%s8773_s3 + $0x424] sm:$0xf] %vm4056_vm2, %v3900_v10  ;;  %v5685_v10 = vld [vmem:[%s8772_s0 + $0x478] sm:$0xff] }
 0x246   :  { %4111 = vst.msk [vmem:[%s8773_s3 + $0xd8] sm:$0xf] %vm4056_vm2, %v3689_v11  ;;  %v2825_v14 = vpop.f32.mrf.mxu2  ;;  %v3090_v15 = vpop.f32.mrf.mxu3 }
 0x247   :  { %4217 = vst.msk [vmem:[%s8773_s3 + $0x280] sm:$0xf] %vm4056_vm2, %v3795_v12  ;;  %v2826_v16 = vadd.f32 %v7162_v6, %v2825_v14  ;;  %v2297_v17 = vpop.f32.mrf.mxu0  ;;  %v2562_v18 = vpop.f32.mrf.mxu1  ;;  %v3091_v19 = vadd.f32 %v7162_v6, %v3090_v15  ;;  %v5738_v12 = vld [vmem:[%s8772_s0 + $0x620] sm:$0xff] }
 0x248   :  { %v2298_v20 = vadd.f32 %v7162_v6, %v2297_v17  ;;  %v2563_v21 = vadd.f32 %v7162_v6, %v2562_v18  ;;  %4428 = vst.msk [vmem:[%s8773_s3 + $0x5cc] sm:$0xf] %vm4056_vm2, %v4006_v13 }
 0x249   :  { %v3480_v22 = vmax.f32 %v2826_v16, 0.0  ;;  %v3586_v23 = vmax.f32 %v3091_v19, 0.0 }
 0x24a   :  { %v3269_v24 = vmax.f32 %v2298_v20, 0.0  ;;  %v3375_v25 = vmax.f32 %v2563_v21, 0.0 }
 0x24b   :  { %v3901_v26 = vpack.c.bf16 %v3480_v22, %v3480_v22  ;;  %v4007_v29 = vpack.c.bf16 %v3586_v23, %v3586_v23 }
 0x24c   :  { %v3690_v27 = vpack.c.bf16 %v3269_v24, %v3269_v24  ;;  %v3796_v28 = vpack.c.bf16 %v3375_v25, %v3375_v25 }
 0x24d   :  { %4323 = vst.msk [vmem:[%s8773_s3 + $0x428] sm:$0xf] %vm4056_vm2, %v3901_v26 }
 0x24e   :  { %4112 = vst.msk [vmem:[%s8773_s3 + $0xdc] sm:$0xf] %vm4056_vm2, %v3690_v27  ;;  %v2827_v30 = vpop.f32.mrf.mxu2  ;;  %v3092_v33 = vpop.f32.mrf.mxu3 }
 0x24f   :  { %4218 = vst.msk [vmem:[%s8773_s3 + $0x284] sm:$0xf] %vm4056_vm2, %v3796_v28  ;;  %v2828_v34 = vadd.f32 %v7162_v6, %v2827_v30  ;;  %v2300_v35 = vpop.f32.mrf.mxu0  ;;  %v2565_v36 = vpop.f32.mrf.mxu1  ;;  %v3093_v39 = vadd.f32 %v7162_v6, %v3092_v33 }
 0x250   :  { %v2301_v41 = vadd.f32 %v7162_v6, %v2300_v35  ;;  %v2566_v42 = vadd.f32 %v7162_v6, %v2565_v36  ;;  %4429 = vst.msk [vmem:[%s8773_s3 + $0x5d0] sm:$0xf] %vm4056_vm2, %v4007_v29 }
 0x251   :  { %v3481_v43 = vmax.f32 %v2828_v34, 0.0  ;;  %v3587_v44 = vmax.f32 %v3093_v39, 0.0 }
 0x252   :  { %v3270_v45 = vmax.f32 %v2301_v41, 0.0  ;;  %v3376_v46 = vmax.f32 %v2566_v42, 0.0  ;;  %5367 = vmatmul.msk.bf16.gmra.mxu0 %vm1513_vm1, %v5578_v31  ;;  %5420 = vmatmul.msk.bf16.gmra.mxu1 %vm1513_vm1, %v5631_v32  ;;  %v5580_v41 = vld [vmem:[%s8772_s0 + $0x130] sm:$0xff]  ;;  %v5633_v42 = vld [vmem:[%s8772_s0 + $0x2d8] sm:$0xff] }
 0x253   :  { %v3902_v47 = vpack.c.bf16 %v3481_v43, %v3481_v43  ;;  %5473 = vmatmul.msk.bf16.gmra.mxu2 %vm1513_vm1, %v5684_v37  ;;  %5526 = vmatmul.msk.bf16.gmra.mxu3 %vm1513_vm1, %v5737_v40  ;;  %v4008_v49 = vpack.c.bf16 %v3587_v44, %v3587_v44 }
 0x254   :  { %v3691_v48 = vpack.c.bf16 %v3270_v45, %v3270_v45  ;;  %v3797_v38 = vpack.c.bf16 %v3376_v46, %v3376_v46 }
 0x255   :  { %4324 = vst.msk [vmem:[%s8773_s3 + $0x42c] sm:$0xf] %vm4056_vm2, %v3902_v47  ;;  %v5686_v47 = vld [vmem:[%s8772_s0 + $0x480] sm:$0xff] }
 0x256   :  { %4113 = vst.msk [vmem:[%s8773_s3 + $0xe0] sm:$0xf] %vm4056_vm2, %v3691_v48  ;;  %v2830_v50 = vpop.f32.mrf.mxu2  ;;  %v3095_v51 = vpop.f32.mrf.mxu3 }
 0x257   :  { %4219 = vst.msk [vmem:[%s8773_s3 + $0x288] sm:$0xf] %vm4056_vm2, %v3797_v38  ;;  %v2831_v53 = vadd.f32 %v7162_v6, %v2830_v50  ;;  %v2302_v54 = vpop.f32.mrf.mxu0  ;;  %v2567_v55 = vpop.f32.mrf.mxu1  ;;  %v3096_v56 = vadd.f32 %v7162_v6, %v3095_v51  ;;  %v5739_v38 = vld [vmem:[%s8772_s0 + $0x628] sm:$0xff] }
 0x258   :  { %v2303_v57 = vadd.f32 %v7162_v6, %v2302_v54  ;;  %v2568_v58 = vadd.f32 %v7162_v6, %v2567_v55  ;;  %4430 = vst.msk [vmem:[%s8773_s3 + $0x5d4] sm:$0xf] %vm4056_vm2, %v4008_v49 }
 0x259   :  { %v3482_v59 = vmax.f32 %v2831_v53, 0.0  ;;  %v3588_v60 = vmax.f32 %v3096_v56, 0.0 }
 0x25a   :  { %v3271_v61 = vmax.f32 %v2303_v57, 0.0  ;;  %v3377_v62 = vmax.f32 %v2568_v58, 0.0 }
 0x25b   :  { %v3903_v63 = vpack.c.bf16 %v3482_v59, %v3482_v59  ;;  %v4009_v2 = vpack.c.bf16 %v3588_v60, %v3588_v60 }
 0x25c   :  { %v3692_v0 = vpack.c.bf16 %v3271_v61, %v3271_v61  ;;  %v3798_v1 = vpack.c.bf16 %v3377_v62, %v3377_v62 }
 0x25d   :  { %4325 = vst.msk [vmem:[%s8773_s3 + $0x430] sm:$0xf] %vm4056_vm2, %v3903_v63 }
 0x25e   :  { %4114 = vst.msk [vmem:[%s8773_s3 + $0xe4] sm:$0xf] %vm4056_vm2, %v3692_v0  ;;  %v2832_v52 = vpop.f32.mrf.mxu2  ;;  %v3097_v5 = vpop.f32.mrf.mxu3 }
 0x25f   :  { %4220 = vst.msk [vmem:[%s8773_s3 + $0x28c] sm:$0xf] %vm4056_vm2, %v3798_v1  ;;  %v2833_v7 = vadd.f32 %v7162_v6, %v2832_v52  ;;  %v2305_v8 = vpop.f32.mrf.mxu0  ;;  %v2570_v9 = vpop.f32.mrf.mxu1  ;;  %v3098_v11 = vadd.f32 %v7162_v6, %v3097_v5 }
 0x260   :  { %v2306_v13 = vadd.f32 %v7162_v6, %v2305_v8  ;;  %v2571_v14 = vadd.f32 %v7162_v6, %v2570_v9  ;;  %4431 = vst.msk [vmem:[%s8773_s3 + $0x5d8] sm:$0xf] %vm4056_vm2, %v4009_v2 }
 0x261   :  { %v3483_v15 = vmax.f32 %v2833_v7, 0.0  ;;  %v3589_v16 = vmax.f32 %v3098_v11, 0.0 }
 0x262   :  { %v3272_v17 = vmax.f32 %v2306_v13, 0.0  ;;  %v3378_v18 = vmax.f32 %v2571_v14, 0.0  ;;  %5368 = vmatmul.msk.bf16.gmra.mxu0 %vm1513_vm1, %v5579_v3  ;;  %5421 = vmatmul.msk.bf16.gmra.mxu1 %vm1513_vm1, %v5632_v4  ;;  %v5581_v13 = vld [vmem:[%s8772_s0 + $0x138] sm:$0xff]  ;;  %v5634_v14 = vld [vmem:[%s8772_s0 + $0x2e0] sm:$0xff] }
 0x263   :  { %v3904_v19 = vpack.c.bf16 %v3483_v15, %v3483_v15  ;;  %5474 = vmatmul.msk.bf16.gmra.mxu2 %vm1513_vm1, %v5685_v10  ;;  %5527 = vmatmul.msk.bf16.gmra.mxu3 %vm1513_vm1, %v5738_v12  ;;  %v4010_v22 = vpack.c.bf16 %v3589_v16, %v3589_v16 }
 0x264   :  { %v3693_v20 = vpack.c.bf16 %v3272_v17, %v3272_v17  ;;  %v3799_v21 = vpack.c.bf16 %v3378_v18, %v3378_v18 }
 0x265   :  { %4326 = vst.msk [vmem:[%s8773_s3 + $0x434] sm:$0xf] %vm4056_vm2, %v3904_v19  ;;  %v5687_v19 = vld [vmem:[%s8772_s0 + $0x488] sm:$0xff] }
 0x266   :  { %4115 = vst.msk [vmem:[%s8773_s3 + $0xe8] sm:$0xf] %vm4056_vm2, %v3693_v20  ;;  %v2835_v23 = vpop.f32.mrf.mxu2  ;;  %v3100_v24 = vpop.f32.mrf.mxu3 }
 0x267   :  { %4221 = vst.msk [vmem:[%s8773_s3 + $0x290] sm:$0xf] %vm4056_vm2, %v3799_v21  ;;  %v2836_v25 = vadd.f32 %v7162_v6, %v2835_v23  ;;  %v2307_v26 = vpop.f32.mrf.mxu0  ;;  %v2572_v27 = vpop.f32.mrf.mxu1  ;;  %v3101_v28 = vadd.f32 %v7162_v6, %v3100_v24  ;;  %v5740_v21 = vld [vmem:[%s8772_s0 + $0x630] sm:$0xff] }
 0x268   :  { %v2308_v29 = vadd.f32 %v7162_v6, %v2307_v26  ;;  %v2573_v30 = vadd.f32 %v7162_v6, %v2572_v27  ;;  %4432 = vst.msk [vmem:[%s8773_s3 + $0x5dc] sm:$0xf] %vm4056_vm2, %v4010_v22 }
 0x269   :  { %v3484_v31 = vmax.f32 %v2836_v25, 0.0  ;;  %v3590_v32 = vmax.f32 %v3101_v28, 0.0 }
 0x26a   :  { %v3273_v33 = vmax.f32 %v2308_v29, 0.0  ;;  %v3379_v34 = vmax.f32 %v2573_v30, 0.0 }
 0x26b   :  { %v3905_v35 = vpack.c.bf16 %v3484_v31, %v3484_v31  ;;  %v4011_v39 = vpack.c.bf16 %v3590_v32, %v3590_v32 }
 0x26c   :  { %v3694_v36 = vpack.c.bf16 %v3273_v33, %v3273_v33  ;;  %v3800_v37 = vpack.c.bf16 %v3379_v34, %v3379_v34 }
 0x26d   :  { %4327 = vst.msk [vmem:[%s8773_s3 + $0x438] sm:$0xf] %vm4056_vm2, %v3905_v35 }
 0x26e   :  { %4116 = vst.msk [vmem:[%s8773_s3 + $0xec] sm:$0xf] %vm4056_vm2, %v3694_v36  ;;  %v2837_v40 = vpop.f32.mrf.mxu2  ;;  %v3102_v43 = vpop.f32.mrf.mxu3 }
 0x26f   :  { %4222 = vst.msk [vmem:[%s8773_s3 + $0x294] sm:$0xf] %vm4056_vm2, %v3800_v37  ;;  %v2838_v44 = vadd.f32 %v7162_v6, %v2837_v40  ;;  %v2310_v45 = vpop.f32.mrf.mxu0  ;;  %v2575_v46 = vpop.f32.mrf.mxu1  ;;  %v3103_v48 = vadd.f32 %v7162_v6, %v3102_v43 }
 0x270   :  { %v2311_v49 = vadd.f32 %v7162_v6, %v2310_v45  ;;  %v2576_v50 = vadd.f32 %v7162_v6, %v2575_v46  ;;  %4433 = vst.msk [vmem:[%s8773_s3 + $0x5e0] sm:$0xf] %vm4056_vm2, %v4011_v39 }
 0x271   :  { %v3485_v51 = vmax.f32 %v2838_v44, 0.0  ;;  %v3591_v53 = vmax.f32 %v3103_v48, 0.0 }
 0x272   :  { %v3274_v54 = vmax.f32 %v2311_v49, 0.0  ;;  %v3380_v55 = vmax.f32 %v2576_v50, 0.0  ;;  %5369 = vmatmul.msk.bf16.gmra.mxu0 %vm1513_vm1, %v5580_v41  ;;  %5422 = vmatmul.msk.bf16.gmra.mxu1 %vm1513_vm1, %v5633_v42  ;;  %v5582_v49 = vld [vmem:[%s8772_s0 + $0x140] sm:$0xff]  ;;  %v5635_v50 = vld [vmem:[%s8772_s0 + $0x2e8] sm:$0xff] }
 0x273   :  { %v3906_v56 = vpack.c.bf16 %v3485_v51, %v3485_v51  ;;  %5475 = vmatmul.msk.bf16.gmra.mxu2 %vm1513_vm1, %v5686_v47  ;;  %5528 = vmatmul.msk.bf16.gmra.mxu3 %vm1513_vm1, %v5739_v38  ;;  %v4012_v59 = vpack.c.bf16 %v3591_v53, %v3591_v53 }
 0x274   :  { %v3695_v57 = vpack.c.bf16 %v3274_v54, %v3274_v54  ;;  %v3801_v58 = vpack.c.bf16 %v3380_v55, %v3380_v55 }
 0x275   :  { %4328 = vst.msk [vmem:[%s8773_s3 + $0x43c] sm:$0xf] %vm4056_vm2, %v3906_v56  ;;  %v5688_v56 = vld [vmem:[%s8772_s0 + $0x490] sm:$0xff] }
 0x276   :  { %4117 = vst.msk [vmem:[%s8773_s3 + $0xf0] sm:$0xf] %vm4056_vm2, %v3695_v57  ;;  %v2840_v60 = vpop.f32.mrf.mxu2  ;;  %v3105_v61 = vpop.f32.mrf.mxu3 }
 0x277   :  { %4223 = vst.msk [vmem:[%s8773_s3 + $0x298] sm:$0xf] %vm4056_vm2, %v3801_v58  ;;  %v2841_v62 = vadd.f32 %v7162_v6, %v2840_v60  ;;  %v2312_v63 = vpop.f32.mrf.mxu0  ;;  %v2577_v0 = vpop.f32.mrf.mxu1  ;;  %v3106_v1 = vadd.f32 %v7162_v6, %v3105_v61  ;;  %v5741_v58 = vld [vmem:[%s8772_s0 + $0x638] sm:$0xff] }
 0x278   :  { %v2313_v2 = vadd.f32 %v7162_v6, %v2312_v63  ;;  %v2578_v52 = vadd.f32 %v7162_v6, %v2577_v0  ;;  %4434 = vst.msk [vmem:[%s8773_s3 + $0x5e4] sm:$0xf] %vm4056_vm2, %v4012_v59 }
 0x279   :  { %v3486_v3 = vmax.f32 %v2841_v62, 0.0  ;;  %v3592_v4 = vmax.f32 %v3106_v1, 0.0 }
 0x27a   :  { %v3275_v5 = vmax.f32 %v2313_v2, 0.0  ;;  %v3381_v7 = vmax.f32 %v2578_v52, 0.0 }
 0x27b   :  { %v3907_v8 = vpack.c.bf16 %v3486_v3, %v3486_v3  ;;  %v4013_v11 = vpack.c.bf16 %v3592_v4, %v3592_v4 }
 0x27c   :  { %v3696_v9 = vpack.c.bf16 %v3275_v5, %v3275_v5  ;;  %v3802_v10 = vpack.c.bf16 %v3381_v7, %v3381_v7 }
 0x27d   :  { %4329 = vst.msk [vmem:[%s8773_s3 + $0x440] sm:$0xf] %vm4056_vm2, %v3907_v8 }
 0x27e   :  { %4118 = vst.msk [vmem:[%s8773_s3 + $0xf4] sm:$0xf] %vm4056_vm2, %v3696_v9  ;;  %v2842_v12 = vpop.f32.mrf.mxu2  ;;  %v3107_v15 = vpop.f32.mrf.mxu3 }
 0x27f   :  { %4224 = vst.msk [vmem:[%s8773_s3 + $0x29c] sm:$0xf] %vm4056_vm2, %v3802_v10  ;;  %v2843_v16 = vadd.f32 %v7162_v6, %v2842_v12  ;;  %v2315_v17 = vpop.f32.mrf.mxu0  ;;  %v2580_v18 = vpop.f32.mrf.mxu1  ;;  %v3108_v20 = vadd.f32 %v7162_v6, %v3107_v15 }
 0x280   :  { %v2316_v22 = vadd.f32 %v7162_v6, %v2315_v17  ;;  %v2581_v23 = vadd.f32 %v7162_v6, %v2580_v18  ;;  %4435 = vst.msk [vmem:[%s8773_s3 + $0x5e8] sm:$0xf] %vm4056_vm2, %v4013_v11 }
 0x281   :  { %v3487_v24 = vmax.f32 %v2843_v16, 0.0  ;;  %v3593_v25 = vmax.f32 %v3108_v20, 0.0 }
 0x282   :  { %v3276_v26 = vmax.f32 %v2316_v22, 0.0  ;;  %v3382_v27 = vmax.f32 %v2581_v23, 0.0  ;;  %5370 = vmatmul.msk.bf16.gmra.mxu0 %vm1513_vm1, %v5581_v13  ;;  %5423 = vmatmul.msk.bf16.gmra.mxu1 %vm1513_vm1, %v5634_v14  ;;  %v5636_v22 = vld [vmem:[%s8772_s0 + $0x2f0] sm:$0xff] }
 0x283   :  { %v3908_v28 = vpack.c.bf16 %v3487_v24, %v3487_v24  ;;  %5476 = vmatmul.msk.bf16.gmra.mxu2 %vm1513_vm1, %v5687_v19  ;;  %5529 = vmatmul.msk.bf16.gmra.mxu3 %vm1513_vm1, %v5740_v21  ;;  %v4014_v31 = vpack.c.bf16 %v3593_v25, %v3593_v25  ;;  %v5583_v21 = vld [vmem:[%s8772_s0 + $0x148] sm:$0xff]  ;;  %v7783_v24 = vld [vmem:[%s8771_s2] ss:$0 sm:$0xff] }
 0x284   :  { %v3697_v29 = vpack.c.bf16 %v3276_v26, %v3276_v26  ;;  %v3803_v30 = vpack.c.bf16 %v3382_v27, %v3382_v27 }
 0x285   :  { %4330 = vst.msk [vmem:[%s8773_s3 + $0x444] sm:$0xf] %vm4056_vm2, %v3908_v28  ;;  %v5689_v28 = vld [vmem:[%s8772_s0 + $0x498] sm:$0xff] }
 0x286   :  { %4119 = vst.msk [vmem:[%s8773_s3 + $0xf8] sm:$0xf] %vm4056_vm2, %v3697_v29  ;;  %v2845_v32 = vpop.f32.mrf.mxu2  ;;  %v3110_v33 = vpop.f32.mrf.mxu3 }
 0x287   :  { %4225 = vst.msk [vmem:[%s8773_s3 + $0x2a0] sm:$0xf] %vm4056_vm2, %v3803_v30  ;;  %v2846_v34 = vadd.f32 %v7162_v6, %v2845_v32  ;;  %v2317_v35 = vpop.f32.mrf.mxu0  ;;  %v2582_v36 = vpop.f32.mrf.mxu1  ;;  %v3111_v37 = vadd.f32 %v7162_v6, %v3110_v33  ;;  %v5742_v30 = vld [vmem:[%s8772_s0 + $0x640] sm:$0xff] }
 0x288   :  { %v2318_v39 = vadd.f32 %v7162_v6, %v2317_v35  ;;  %v2583_v40 = vadd.f32 %v7162_v6, %v2582_v36  ;;  %4436 = vst.msk [vmem:[%s8773_s3 + $0x5ec] sm:$0xf] %vm4056_vm2, %v4014_v31 }
 0x289   :  { %v3488_v41 = vmax.f32 %v2846_v34, 0.0  ;;  %v3594_v42 = vmax.f32 %v3111_v37, 0.0 }
 0x28a   :  { %v3277_v43 = vmax.f32 %v2318_v39, 0.0  ;;  %v3383_v44 = vmax.f32 %v2583_v40, 0.0 }
 0x28b   :  { %v3909_v45 = vpack.c.bf16 %v3488_v41, %v3488_v41  ;;  %v4015_v48 = vpack.c.bf16 %v3594_v42, %v3594_v42 }
 0x28c   :  { %v3698_v46 = vpack.c.bf16 %v3277_v43, %v3277_v43  ;;  %v3804_v47 = vpack.c.bf16 %v3383_v44, %v3383_v44 }
 0x28d   :  { %4331 = vst.msk [vmem:[%s8773_s3 + $0x448] sm:$0xf] %vm4056_vm2, %v3909_v45 }
 0x28e   :  { %4120 = vst.msk [vmem:[%s8773_s3 + $0xfc] sm:$0xf] %vm4056_vm2, %v3698_v46  ;;  %v2847_v38 = vpop.f32.mrf.mxu2  ;;  %v3112_v51 = vpop.f32.mrf.mxu3 }
 0x28f   :  { %4226 = vst.msk [vmem:[%s8773_s3 + $0x2a4] sm:$0xf] %vm4056_vm2, %v3804_v47  ;;  %v2848_v53 = vadd.f32 %v7162_v6, %v2847_v38  ;;  %v2320_v54 = vpop.f32.mrf.mxu0  ;;  %v2585_v55 = vpop.f32.mrf.mxu1  ;;  %v3113_v57 = vadd.f32 %v7162_v6, %v3112_v51 }
 0x290   :  { %v2321_v59 = vadd.f32 %v7162_v6, %v2320_v54  ;;  %v2586_v60 = vadd.f32 %v7162_v6, %v2585_v55  ;;  %4437 = vst.msk [vmem:[%s8773_s3 + $0x5f0] sm:$0xf] %vm4056_vm2, %v4015_v48 }
 0x291   :  { %v3489_v61 = vmax.f32 %v2848_v53, 0.0  ;;  %v3595_v62 = vmax.f32 %v3113_v57, 0.0 }
 0x292   :  { %v3278_v63 = vmax.f32 %v2321_v59, 0.0  ;;  %v3384_v0 = vmax.f32 %v2586_v60, 0.0  ;;  %5371 = vmatmul.msk.bf16.gmra.mxu0 %vm1513_vm1, %v5582_v49  ;;  %5424 = vmatmul.msk.bf16.gmra.mxu1 %vm1513_vm1, %v5635_v50  ;;  %v5584_v59 = vld [vmem:[%s8772_s0 + $0x150] sm:$0xff]  ;;  %v5637_v60 = vld [vmem:[%s8772_s0 + $0x2f8] sm:$0xff] }
 0x293   :  { %v3910_v1 = vpack.c.bf16 %v3489_v61, %v3489_v61  ;;  %5477 = vmatmul.msk.bf16.gmra.mxu2 %vm1513_vm1, %v5688_v56  ;;  %5530 = vmatmul.msk.bf16.gmra.mxu3 %vm1513_vm1, %v5741_v58  ;;  %v4016_v3 = vpack.c.bf16 %v3595_v62, %v3595_v62 }
 0x294   :  { %v3699_v2 = vpack.c.bf16 %v3278_v63, %v3278_v63  ;;  %v3805_v52 = vpack.c.bf16 %v3384_v0, %v3384_v0 }
 0x295   :  { %4332 = vst.msk [vmem:[%s8773_s3 + $0x44c] sm:$0xf] %vm4056_vm2, %v3910_v1  ;;  %v5690_v1 = vld [vmem:[%s8772_s0 + $0x4a0] sm:$0xff] }
 0x296   :  { %4121 = vst.msk [vmem:[%s8773_s3 + $0x100] sm:$0xf] %vm4056_vm2, %v3699_v2  ;;  %v2850_v4 = vpop.f32.mrf.mxu2  ;;  %v3115_v5 = vpop.f32.mrf.mxu3 }
 0x297   :  { %4227 = vst.msk [vmem:[%s8773_s3 + $0x2a8] sm:$0xf] %vm4056_vm2, %v3805_v52  ;;  %v2851_v7 = vadd.f32 %v7162_v6, %v2850_v4  ;;  %v2322_v8 = vpop.f32.mrf.mxu0  ;;  %v2587_v9 = vpop.f32.mrf.mxu1  ;;  %v3116_v10 = vadd.f32 %v7162_v6, %v3115_v5  ;;  %v5743_v52 = vld [vmem:[%s8772_s0 + $0x648] sm:$0xff] }
 0x298   :  { %v2323_v11 = vadd.f32 %v7162_v6, %v2322_v8  ;;  %v2588_v12 = vadd.f32 %v7162_v6, %v2587_v9  ;;  %4438 = vst.msk [vmem:[%s8773_s3 + $0x5f4] sm:$0xf] %vm4056_vm2, %v4016_v3 }
 0x299   :  { %v3490_v13 = vmax.f32 %v2851_v7, 0.0  ;;  %v3596_v14 = vmax.f32 %v3116_v10, 0.0 }
 0x29a   :  { %v3279_v15 = vmax.f32 %v2323_v11, 0.0  ;;  %v3385_v16 = vmax.f32 %v2588_v12, 0.0 }
 0x29b   :  { %v3911_v17 = vpack.c.bf16 %v3490_v13, %v3490_v13  ;;  %v4017_v20 = vpack.c.bf16 %v3596_v14, %v3596_v14 }
 0x29c   :  { %v3700_v18 = vpack.c.bf16 %v3279_v15, %v3279_v15  ;;  %v3806_v19 = vpack.c.bf16 %v3385_v16, %v3385_v16 }
 0x29d   :  { %4333 = vst.msk [vmem:[%s8773_s3 + $0x450] sm:$0xf] %vm4056_vm2, %v3911_v17 }
 0x29e   :  { %4122 = vst.msk [vmem:[%s8773_s3 + $0x104] sm:$0xf] %vm4056_vm2, %v3700_v18  ;;  %v2852_v6 = vpop.f32.mrf.mxu2  ;;  %v3117_v23 = vpop.f32.mrf.mxu3 }
 0x29f   :  { %4228 = vst.msk [vmem:[%s8773_s3 + $0x2ac] sm:$0xf] %vm4056_vm2, %v3806_v19  ;;  %v2853_v25 = vadd.f32 %v7783_v24, %v2852_v6  ;;  %v2325_v26 = vpop.f32.mrf.mxu0  ;;  %v2590_v27 = vpop.f32.mrf.mxu1  ;;  %v3118_v29 = vadd.f32 %v7783_v24, %v3117_v23 }
 0x2a0   :  { %v2326_v31 = vadd.f32 %v7783_v24, %v2325_v26  ;;  %v2591_v32 = vadd.f32 %v7783_v24, %v2590_v27  ;;  %4439 = vst.msk [vmem:[%s8773_s3 + $0x5f8] sm:$0xf] %vm4056_vm2, %v4017_v20 }
 0x2a1   :  { %v3491_v33 = vmax.f32 %v2853_v25, 0.0  ;;  %v3597_v34 = vmax.f32 %v3118_v29, 0.0 }
 0x2a2   :  { %v3280_v35 = vmax.f32 %v2326_v31, 0.0  ;;  %v3386_v36 = vmax.f32 %v2591_v32, 0.0  ;;  %5372 = vmatmul.msk.bf16.gmra.mxu0 %vm1513_vm1, %v5583_v21  ;;  %5425 = vmatmul.msk.bf16.gmra.mxu1 %vm1513_vm1, %v5636_v22  ;;  %v5585_v31 = vld [vmem:[%s8772_s0 + $0x158] sm:$0xff]  ;;  %v5638_v32 = vld [vmem:[%s8772_s0 + $0x300] sm:$0xff] }
 0x2a3   :  { %v3912_v37 = vpack.c.bf16 %v3491_v33, %v3491_v33  ;;  %5478 = vmatmul.msk.bf16.gmra.mxu2 %vm1513_vm1, %v5689_v28  ;;  %5531 = vmatmul.msk.bf16.gmra.mxu3 %vm1513_vm1, %v5742_v30  ;;  %v4018_v41 = vpack.c.bf16 %v3597_v34, %v3597_v34 }
 0x2a4   :  { %v3701_v39 = vpack.c.bf16 %v3280_v35, %v3280_v35  ;;  %v3807_v40 = vpack.c.bf16 %v3386_v36, %v3386_v36 }
 0x2a5   :  { %4334 = vst.msk [vmem:[%s8773_s3 + $0x454] sm:$0xf] %vm4056_vm2, %v3912_v37  ;;  %v5691_v37 = vld [vmem:[%s8772_s0 + $0x4a8] sm:$0xff] }
 0x2a6   :  { %4123 = vst.msk [vmem:[%s8773_s3 + $0x108] sm:$0xf] %vm4056_vm2, %v3701_v39  ;;  %v2855_v42 = vpop.f32.mrf.mxu2  ;;  %v3120_v43 = vpop.f32.mrf.mxu3 }
 0x2a7   :  { %4229 = vst.msk [vmem:[%s8773_s3 + $0x2b0] sm:$0xf] %vm4056_vm2, %v3807_v40  ;;  %v2856_v44 = vadd.f32 %v7783_v24, %v2855_v42  ;;  %v2327_v45 = vpop.f32.mrf.mxu0  ;;  %v2592_v46 = vpop.f32.mrf.mxu1  ;;  %v3121_v47 = vadd.f32 %v7783_v24, %v3120_v43  ;;  %v5744_v40 = vld [vmem:[%s8772_s0 + $0x650] sm:$0xff] }
 0x2a8   :  { %v2328_v48 = vadd.f32 %v7783_v24, %v2327_v45  ;;  %v2593_v38 = vadd.f32 %v7783_v24, %v2592_v46  ;;  %4440 = vst.msk [vmem:[%s8773_s3 + $0x5fc] sm:$0xf] %vm4056_vm2, %v4018_v41 }
 0x2a9   :  { %v3492_v49 = vmax.f32 %v2856_v44, 0.0  ;;  %v3598_v50 = vmax.f32 %v3121_v47, 0.0 }
 0x2aa   :  { %v3281_v51 = vmax.f32 %v2328_v48, 0.0  ;;  %v3387_v53 = vmax.f32 %v2593_v38, 0.0 }
 0x2ab   :  { %v3913_v54 = vpack.c.bf16 %v3492_v49, %v3492_v49  ;;  %v4019_v57 = vpack.c.bf16 %v3598_v50, %v3598_v50 }
 0x2ac   :  { %v3702_v55 = vpack.c.bf16 %v3281_v51, %v3281_v51  ;;  %v3808_v56 = vpack.c.bf16 %v3387_v53, %v3387_v53 }
 0x2ad   :  { %4335 = vst.msk [vmem:[%s8773_s3 + $0x458] sm:$0xf] %vm4056_vm2, %v3913_v54 }
 0x2ae   :  { %4124 = vst.msk [vmem:[%s8773_s3 + $0x10c] sm:$0xf] %vm4056_vm2, %v3702_v55  ;;  %v2857_v58 = vpop.f32.mrf.mxu2  ;;  %v3122_v61 = vpop.f32.mrf.mxu3 }
 0x2af   :  { %4230 = vst.msk [vmem:[%s8773_s3 + $0x2b4] sm:$0xf] %vm4056_vm2, %v3808_v56  ;;  %v2858_v62 = vadd.f32 %v7783_v24, %v2857_v58  ;;  %v2330_v63 = vpop.f32.mrf.mxu0  ;;  %v2595_v0 = vpop.f32.mrf.mxu1  ;;  %v3123_v2 = vadd.f32 %v7783_v24, %v3122_v61 }
 0x2b0   :  { %v2331_v3 = vadd.f32 %v7783_v24, %v2330_v63  ;;  %v2596_v4 = vadd.f32 %v7783_v24, %v2595_v0  ;;  %4441 = vst.msk [vmem:[%s8773_s3 + $0x600] sm:$0xf] %vm4056_vm2, %v4019_v57 }
 0x2b1   :  { %v3493_v5 = vmax.f32 %v2858_v62, 0.0  ;;  %v3599_v7 = vmax.f32 %v3123_v2, 0.0 }
 0x2b2   :  { %v3282_v8 = vmax.f32 %v2331_v3, 0.0  ;;  %v3388_v9 = vmax.f32 %v2596_v4, 0.0  ;;  %5373 = vmatmul.msk.bf16.gmra.mxu0 %vm1513_vm1, %v5584_v59  ;;  %5426 = vmatmul.msk.bf16.gmra.mxu1 %vm1513_vm1, %v5637_v60  ;;  %v5586_v3 = vld [vmem:[%s8772_s0 + $0x160] sm:$0xff]  ;;  %v5639_v4 = vld [vmem:[%s8772_s0 + $0x308] sm:$0xff] }
 0x2b3   :  { %v3914_v10 = vpack.c.bf16 %v3493_v5, %v3493_v5  ;;  %5479 = vmatmul.msk.bf16.gmra.mxu2 %vm1513_vm1, %v5690_v1  ;;  %5532 = vmatmul.msk.bf16.gmra.mxu3 %vm1513_vm1, %v5743_v52  ;;  %v4020_v13 = vpack.c.bf16 %v3599_v7, %v3599_v7 }
 0x2b4   :  { %v3703_v11 = vpack.c.bf16 %v3282_v8, %v3282_v8  ;;  %v3809_v12 = vpack.c.bf16 %v3388_v9, %v3388_v9 }
 0x2b5   :  { %4336 = vst.msk [vmem:[%s8773_s3 + $0x45c] sm:$0xf] %vm4056_vm2, %v3914_v10  ;;  %v5692_v10 = vld [vmem:[%s8772_s0 + $0x4b0] sm:$0xff] }
 0x2b6   :  { %4125 = vst.msk [vmem:[%s8773_s3 + $0x110] sm:$0xf] %vm4056_vm2, %v3703_v11  ;;  %v2860_v14 = vpop.f32.mrf.mxu2  ;;  %v3125_v15 = vpop.f32.mrf.mxu3 }
 0x2b7   :  { %4231 = vst.msk [vmem:[%s8773_s3 + $0x2b8] sm:$0xf] %vm4056_vm2, %v3809_v12  ;;  %v2861_v16 = vadd.f32 %v7783_v24, %v2860_v14  ;;  %v2332_v17 = vpop.f32.mrf.mxu0  ;;  %v2597_v18 = vpop.f32.mrf.mxu1  ;;  %v3126_v19 = vadd.f32 %v7783_v24, %v3125_v15  ;;  %v5745_v12 = vld [vmem:[%s8772_s0 + $0x658] sm:$0xff] }
 0x2b8   :  { %v2333_v20 = vadd.f32 %v7783_v24, %v2332_v17  ;;  %v2598_v6 = vadd.f32 %v7783_v24, %v2597_v18  ;;  %4442 = vst.msk [vmem:[%s8773_s3 + $0x604] sm:$0xf] %vm4056_vm2, %v4020_v13 }
 0x2b9   :  { %v3494_v21 = vmax.f32 %v2861_v16, 0.0  ;;  %v3600_v22 = vmax.f32 %v3126_v19, 0.0 }
 0x2ba   :  { %v3283_v23 = vmax.f32 %v2333_v20, 0.0  ;;  %v3389_v25 = vmax.f32 %v2598_v6, 0.0 }
 0x2bb   :  { %v3915_v26 = vpack.c.bf16 %v3494_v21, %v3494_v21  ;;  %v4021_v29 = vpack.c.bf16 %v3600_v22, %v3600_v22 }
 0x2bc   :  { %v3704_v27 = vpack.c.bf16 %v3283_v23, %v3283_v23  ;;  %v3810_v28 = vpack.c.bf16 %v3389_v25, %v3389_v25 }
 0x2bd   :  { %4337 = vst.msk [vmem:[%s8773_s3 + $0x460] sm:$0xf] %vm4056_vm2, %v3915_v26 }
 0x2be   :  { %4126 = vst.msk [vmem:[%s8773_s3 + $0x114] sm:$0xf] %vm4056_vm2, %v3704_v27  ;;  %v2862_v30 = vpop.f32.mrf.mxu2  ;;  %v3127_v33 = vpop.f32.mrf.mxu3 }
 0x2bf   :  { %4232 = vst.msk [vmem:[%s8773_s3 + $0x2bc] sm:$0xf] %vm4056_vm2, %v3810_v28  ;;  %v2863_v34 = vadd.f32 %v7783_v24, %v2862_v30  ;;  %v2335_v35 = vpop.f32.mrf.mxu0  ;;  %v2600_v36 = vpop.f32.mrf.mxu1  ;;  %v3128_v39 = vadd.f32 %v7783_v24, %v3127_v33 }
 0x2c0   :  { %v2336_v41 = vadd.f32 %v7783_v24, %v2335_v35  ;;  %v2601_v42 = vadd.f32 %v7783_v24, %v2600_v36  ;;  %4443 = vst.msk [vmem:[%s8773_s3 + $0x608] sm:$0xf] %vm4056_vm2, %v4021_v29 }
 0x2c1   :  { %v3495_v43 = vmax.f32 %v2863_v34, 0.0  ;;  %v3601_v44 = vmax.f32 %v3128_v39, 0.0 }
 0x2c2   :  { %v3284_v45 = vmax.f32 %v2336_v41, 0.0  ;;  %v3390_v46 = vmax.f32 %v2601_v42, 0.0  ;;  %5374 = vmatmul.msk.bf16.gmra.mxu0 %vm1513_vm1, %v5585_v31  ;;  %5427 = vmatmul.msk.bf16.gmra.mxu1 %vm1513_vm1, %v5638_v32  ;;  %v5587_v41 = vld [vmem:[%s8772_s0 + $0x168] sm:$0xff]  ;;  %v5640_v42 = vld [vmem:[%s8772_s0 + $0x310] sm:$0xff] }
 0x2c3   :  { %v3916_v47 = vpack.c.bf16 %v3495_v43, %v3495_v43  ;;  %5480 = vmatmul.msk.bf16.gmra.mxu2 %vm1513_vm1, %v5691_v37  ;;  %5533 = vmatmul.msk.bf16.gmra.mxu3 %vm1513_vm1, %v5744_v40  ;;  %v4022_v49 = vpack.c.bf16 %v3601_v44, %v3601_v44 }
 0x2c4   :  { %v3705_v48 = vpack.c.bf16 %v3284_v45, %v3284_v45  ;;  %v3811_v38 = vpack.c.bf16 %v3390_v46, %v3390_v46 }
 0x2c5   :  { %4338 = vst.msk [vmem:[%s8773_s3 + $0x464] sm:$0xf] %vm4056_vm2, %v3916_v47  ;;  %v5693_v47 = vld [vmem:[%s8772_s0 + $0x4b8] sm:$0xff] }
 0x2c6   :  { %4127 = vst.msk [vmem:[%s8773_s3 + $0x118] sm:$0xf] %vm4056_vm2, %v3705_v48  ;;  %v2865_v50 = vpop.f32.mrf.mxu2  ;;  %v3130_v51 = vpop.f32.mrf.mxu3 }
 0x2c7   :  { %4233 = vst.msk [vmem:[%s8773_s3 + $0x2c0] sm:$0xf] %vm4056_vm2, %v3811_v38  ;;  %v2866_v53 = vadd.f32 %v7783_v24, %v2865_v50  ;;  %v2337_v54 = vpop.f32.mrf.mxu0  ;;  %v2602_v55 = vpop.f32.mrf.mxu1  ;;  %v3131_v56 = vadd.f32 %v7783_v24, %v3130_v51  ;;  %v5746_v38 = vld [vmem:[%s8772_s0 + $0x660] sm:$0xff] }
 0x2c8   :  { %v2338_v57 = vadd.f32 %v7783_v24, %v2337_v54  ;;  %v2603_v58 = vadd.f32 %v7783_v24, %v2602_v55  ;;  %4444 = vst.msk [vmem:[%s8773_s3 + $0x60c] sm:$0xf] %vm4056_vm2, %v4022_v49 }
 0x2c9   :  { %v3496_v59 = vmax.f32 %v2866_v53, 0.0  ;;  %v3602_v60 = vmax.f32 %v3131_v56, 0.0 }
 0x2ca   :  { %v3285_v61 = vmax.f32 %v2338_v57, 0.0  ;;  %v3391_v62 = vmax.f32 %v2603_v58, 0.0 }
 0x2cb   :  { %v3917_v63 = vpack.c.bf16 %v3496_v59, %v3496_v59  ;;  %v4023_v2 = vpack.c.bf16 %v3602_v60, %v3602_v60 }
 0x2cc   :  { %v3706_v0 = vpack.c.bf16 %v3285_v61, %v3285_v61  ;;  %v3812_v1 = vpack.c.bf16 %v3391_v62, %v3391_v62 }
 0x2cd   :  { %4339 = vst.msk [vmem:[%s8773_s3 + $0x468] sm:$0xf] %vm4056_vm2, %v3917_v63 }
 0x2ce   :  { %4128 = vst.msk [vmem:[%s8773_s3 + $0x11c] sm:$0xf] %vm4056_vm2, %v3706_v0  ;;  %v2867_v52 = vpop.f32.mrf.mxu2  ;;  %v3132_v5 = vpop.f32.mrf.mxu3 }
 0x2cf   :  { %4234 = vst.msk [vmem:[%s8773_s3 + $0x2c4] sm:$0xf] %vm4056_vm2, %v3812_v1  ;;  %v2868_v7 = vadd.f32 %v7783_v24, %v2867_v52  ;;  %v2340_v8 = vpop.f32.mrf.mxu0  ;;  %v2605_v9 = vpop.f32.mrf.mxu1  ;;  %v3133_v11 = vadd.f32 %v7783_v24, %v3132_v5 }
 0x2d0   :  { %v2341_v13 = vadd.f32 %v7783_v24, %v2340_v8  ;;  %v2606_v14 = vadd.f32 %v7783_v24, %v2605_v9  ;;  %4445 = vst.msk [vmem:[%s8773_s3 + $0x610] sm:$0xf] %vm4056_vm2, %v4023_v2 }
 0x2d1   :  { %v3497_v15 = vmax.f32 %v2868_v7, 0.0  ;;  %v3603_v16 = vmax.f32 %v3133_v11, 0.0 }
 0x2d2   :  { %v3286_v17 = vmax.f32 %v2341_v13, 0.0  ;;  %v3392_v18 = vmax.f32 %v2606_v14, 0.0  ;;  %5375 = vmatmul.msk.bf16.gmra.mxu0 %vm1513_vm1, %v5586_v3  ;;  %5428 = vmatmul.msk.bf16.gmra.mxu1 %vm1513_vm1, %v5639_v4  ;;  %v5588_v13 = vld [vmem:[%s8772_s0 + $0x170] sm:$0xff]  ;;  %v5641_v14 = vld [vmem:[%s8772_s0 + $0x318] sm:$0xff] }
 0x2d3   :  { %v3918_v19 = vpack.c.bf16 %v3497_v15, %v3497_v15  ;;  %5481 = vmatmul.msk.bf16.gmra.mxu2 %vm1513_vm1, %v5692_v10  ;;  %5534 = vmatmul.msk.bf16.gmra.mxu3 %vm1513_vm1, %v5745_v12  ;;  %v4024_v21 = vpack.c.bf16 %v3603_v16, %v3603_v16 }
 0x2d4   :  { %v3707_v20 = vpack.c.bf16 %v3286_v17, %v3286_v17  ;;  %v3813_v6 = vpack.c.bf16 %v3392_v18, %v3392_v18 }
 0x2d5   :  { %4340 = vst.msk [vmem:[%s8773_s3 + $0x46c] sm:$0xf] %vm4056_vm2, %v3918_v19  ;;  %v5694_v19 = vld [vmem:[%s8772_s0 + $0x4c0] sm:$0xff] }
 0x2d6   :  { %4129 = vst.msk [vmem:[%s8773_s3 + $0x120] sm:$0xf] %vm4056_vm2, %v3707_v20  ;;  %v2870_v22 = vpop.f32.mrf.mxu2  ;;  %v3135_v23 = vpop.f32.mrf.mxu3 }
 0x2d7   :  { %4235 = vst.msk [vmem:[%s8773_s3 + $0x2c8] sm:$0xf] %vm4056_vm2, %v3813_v6  ;;  %v2871_v25 = vadd.f32 %v7783_v24, %v2870_v22  ;;  %v2342_v26 = vpop.f32.mrf.mxu0  ;;  %v2607_v27 = vpop.f32.mrf.mxu1  ;;  %v3136_v28 = vadd.f32 %v7783_v24, %v3135_v23  ;;  %v5747_v6 = vld [vmem:[%s8772_s0 + $0x668] sm:$0xff] }
 0x2d8   :  { %v2343_v29 = vadd.f32 %v7783_v24, %v2342_v26  ;;  %v2608_v30 = vadd.f32 %v7783_v24, %v2607_v27  ;;  %4446 = vst.msk [vmem:[%s8773_s3 + $0x614] sm:$0xf] %vm4056_vm2, %v4024_v21 }
 0x2d9   :  { %v3498_v31 = vmax.f32 %v2871_v25, 0.0  ;;  %v3604_v32 = vmax.f32 %v3136_v28, 0.0 }
 0x2da   :  { %v3287_v33 = vmax.f32 %v2343_v29, 0.0  ;;  %v3393_v34 = vmax.f32 %v2608_v30, 0.0 }
 0x2db   :  { %v3919_v35 = vpack.c.bf16 %v3498_v31, %v3498_v31  ;;  %v4025_v39 = vpack.c.bf16 %v3604_v32, %v3604_v32 }
 0x2dc   :  { %v3708_v36 = vpack.c.bf16 %v3287_v33, %v3287_v33  ;;  %v3814_v37 = vpack.c.bf16 %v3393_v34, %v3393_v34 }
 0x2dd   :  { %4341 = vst.msk [vmem:[%s8773_s3 + $0x470] sm:$0xf] %vm4056_vm2, %v3919_v35 }
 0x2de   :  { %4130 = vst.msk [vmem:[%s8773_s3 + $0x124] sm:$0xf] %vm4056_vm2, %v3708_v36  ;;  %v2872_v40 = vpop.f32.mrf.mxu2  ;;  %v3137_v43 = vpop.f32.mrf.mxu3 }
 0x2df   :  { %4236 = vst.msk [vmem:[%s8773_s3 + $0x2cc] sm:$0xf] %vm4056_vm2, %v3814_v37  ;;  %v2873_v44 = vadd.f32 %v7783_v24, %v2872_v40  ;;  %v2345_v45 = vpop.f32.mrf.mxu0  ;;  %v2610_v46 = vpop.f32.mrf.mxu1  ;;  %v3138_v48 = vadd.f32 %v7783_v24, %v3137_v43 }
 0x2e0   :  { %v2346_v49 = vadd.f32 %v7783_v24, %v2345_v45  ;;  %v2611_v50 = vadd.f32 %v7783_v24, %v2610_v46  ;;  %4447 = vst.msk [vmem:[%s8773_s3 + $0x618] sm:$0xf] %vm4056_vm2, %v4025_v39 }
 0x2e1   :  { %v3499_v51 = vmax.f32 %v2873_v44, 0.0  ;;  %v3605_v53 = vmax.f32 %v3138_v48, 0.0 }
 0x2e2   :  { %v3288_v54 = vmax.f32 %v2346_v49, 0.0  ;;  %v3394_v55 = vmax.f32 %v2611_v50, 0.0  ;;  %5376 = vmatmul.msk.bf16.gmra.mxu0 %vm1513_vm1, %v5587_v41  ;;  %5429 = vmatmul.msk.bf16.gmra.mxu1 %vm1513_vm1, %v5640_v42  ;;  %v5589_v49 = vld [vmem:[%s8772_s0 + $0x178] sm:$0xff]  ;;  %v5642_v50 = vld [vmem:[%s8772_s0 + $0x320] sm:$0xff] }
 0x2e3   :  { %v3920_v56 = vpack.c.bf16 %v3499_v51, %v3499_v51  ;;  %5482 = vmatmul.msk.bf16.gmra.mxu2 %vm1513_vm1, %v5693_v47  ;;  %5535 = vmatmul.msk.bf16.gmra.mxu3 %vm1513_vm1, %v5746_v38  ;;  %v4026_v59 = vpack.c.bf16 %v3605_v53, %v3605_v53 }
 0x2e4   :  { %v3709_v57 = vpack.c.bf16 %v3288_v54, %v3288_v54  ;;  %v3815_v58 = vpack.c.bf16 %v3394_v55, %v3394_v55 }
 0x2e5   :  { %4342 = vst.msk [vmem:[%s8773_s3 + $0x474] sm:$0xf] %vm4056_vm2, %v3920_v56  ;;  %v5695_v56 = vld [vmem:[%s8772_s0 + $0x4c8] sm:$0xff] }
 0x2e6   :  { %4131 = vst.msk [vmem:[%s8773_s3 + $0x128] sm:$0xf] %vm4056_vm2, %v3709_v57  ;;  %v2875_v60 = vpop.f32.mrf.mxu2  ;;  %v3140_v61 = vpop.f32.mrf.mxu3 }
 0x2e7   :  { %4237 = vst.msk [vmem:[%s8773_s3 + $0x2d0] sm:$0xf] %vm4056_vm2, %v3815_v58  ;;  %v2876_v62 = vadd.f32 %v7783_v24, %v2875_v60  ;;  %v2347_v63 = vpop.f32.mrf.mxu0  ;;  %v2612_v0 = vpop.f32.mrf.mxu1  ;;  %v3141_v1 = vadd.f32 %v7783_v24, %v3140_v61  ;;  %v5748_v58 = vld [vmem:[%s8772_s0 + $0x670] sm:$0xff] }
 0x2e8   :  { %v2348_v2 = vadd.f32 %v7783_v24, %v2347_v63  ;;  %v2613_v52 = vadd.f32 %v7783_v24, %v2612_v0  ;;  %4448 = vst.msk [vmem:[%s8773_s3 + $0x61c] sm:$0xf] %vm4056_vm2, %v4026_v59 }
 0x2e9   :  { %v3500_v3 = vmax.f32 %v2876_v62, 0.0  ;;  %v3606_v4 = vmax.f32 %v3141_v1, 0.0 }
 0x2ea   :  { %v3289_v5 = vmax.f32 %v2348_v2, 0.0  ;;  %v3395_v7 = vmax.f32 %v2613_v52, 0.0 }
 0x2eb   :  { %v3921_v8 = vpack.c.bf16 %v3500_v3, %v3500_v3  ;;  %v4027_v11 = vpack.c.bf16 %v3606_v4, %v3606_v4 }
 0x2ec   :  { %v3710_v9 = vpack.c.bf16 %v3289_v5, %v3289_v5  ;;  %v3816_v10 = vpack.c.bf16 %v3395_v7, %v3395_v7 }
 0x2ed   :  { %4343 = vst.msk [vmem:[%s8773_s3 + $0x478] sm:$0xf] %vm4056_vm2, %v3921_v8 }
 0x2ee   :  { %4132 = vst.msk [vmem:[%s8773_s3 + $0x12c] sm:$0xf] %vm4056_vm2, %v3710_v9  ;;  %v2877_v12 = vpop.f32.mrf.mxu2  ;;  %v3142_v15 = vpop.f32.mrf.mxu3 }
 0x2ef   :  { %4238 = vst.msk [vmem:[%s8773_s3 + $0x2d4] sm:$0xf] %vm4056_vm2, %v3816_v10  ;;  %v2878_v16 = vadd.f32 %v7783_v24, %v2877_v12  ;;  %v2350_v17 = vpop.f32.mrf.mxu0  ;;  %v2615_v18 = vpop.f32.mrf.mxu1  ;;  %v3143_v20 = vadd.f32 %v7783_v24, %v3142_v15 }
 0x2f0   :  { %v2351_v21 = vadd.f32 %v7783_v24, %v2350_v17  ;;  %v2616_v22 = vadd.f32 %v7783_v24, %v2615_v18  ;;  %4449 = vst.msk [vmem:[%s8773_s3 + $0x620] sm:$0xf] %vm4056_vm2, %v4027_v11 }
 0x2f1   :  { %v3501_v23 = vmax.f32 %v2878_v16, 0.0  ;;  %v3607_v25 = vmax.f32 %v3143_v20, 0.0 }
 0x2f2   :  { %v3290_v26 = vmax.f32 %v2351_v21, 0.0  ;;  %v3396_v27 = vmax.f32 %v2616_v22, 0.0  ;;  %5377 = vmatmul.msk.bf16.gmra.mxu0 %vm1513_vm1, %v5588_v13  ;;  %5430 = vmatmul.msk.bf16.gmra.mxu1 %vm1513_vm1, %v5641_v14  ;;  %v5590_v21 = vld [vmem:[%s8772_s0 + $0x180] sm:$0xff]  ;;  %v5643_v22 = vld [vmem:[%s8772_s0 + $0x328] sm:$0xff] }
 0x2f3   :  { %v3922_v28 = vpack.c.bf16 %v3501_v23, %v3501_v23  ;;  %5483 = vmatmul.msk.bf16.gmra.mxu2 %vm1513_vm1, %v5694_v19  ;;  %5536 = vmatmul.msk.bf16.gmra.mxu3 %vm1513_vm1, %v5747_v6  ;;  %v4028_v31 = vpack.c.bf16 %v3607_v25, %v3607_v25 }
 0x2f4   :  { %v3711_v29 = vpack.c.bf16 %v3290_v26, %v3290_v26  ;;  %v3817_v30 = vpack.c.bf16 %v3396_v27, %v3396_v27 }
 0x2f5   :  { %4344 = vst.msk [vmem:[%s8773_s3 + $0x47c] sm:$0xf] %vm4056_vm2, %v3922_v28  ;;  %v5696_v28 = vld [vmem:[%s8772_s0 + $0x4d0] sm:$0xff] }
 0x2f6   :  { %4133 = vst.msk [vmem:[%s8773_s3 + $0x130] sm:$0xf] %vm4056_vm2, %v3711_v29  ;;  %v2880_v32 = vpop.f32.mrf.mxu2  ;;  %v3145_v33 = vpop.f32.mrf.mxu3 }
 0x2f7   :  { %4239 = vst.msk [vmem:[%s8773_s3 + $0x2d8] sm:$0xf] %vm4056_vm2, %v3817_v30  ;;  %v2881_v34 = vadd.f32 %v7783_v24, %v2880_v32  ;;  %v2352_v35 = vpop.f32.mrf.mxu0  ;;  %v2617_v36 = vpop.f32.mrf.mxu1  ;;  %v3146_v37 = vadd.f32 %v7783_v24, %v3145_v33  ;;  %v5749_v30 = vld [vmem:[%s8772_s0 + $0x678] sm:$0xff] }
 0x2f8   :  { %v2353_v39 = vadd.f32 %v7783_v24, %v2352_v35  ;;  %v2618_v40 = vadd.f32 %v7783_v24, %v2617_v36  ;;  %4450 = vst.msk [vmem:[%s8773_s3 + $0x624] sm:$0xf] %vm4056_vm2, %v4028_v31 }
 0x2f9   :  { %v3502_v41 = vmax.f32 %v2881_v34, 0.0  ;;  %v3608_v42 = vmax.f32 %v3146_v37, 0.0 }
 0x2fa   :  { %v3291_v43 = vmax.f32 %v2353_v39, 0.0  ;;  %v3397_v44 = vmax.f32 %v2618_v40, 0.0 }
 0x2fb   :  { %v3923_v45 = vpack.c.bf16 %v3502_v41, %v3502_v41  ;;  %v4029_v48 = vpack.c.bf16 %v3608_v42, %v3608_v42 }
 0x2fc   :  { %v3712_v46 = vpack.c.bf16 %v3291_v43, %v3291_v43  ;;  %v3818_v47 = vpack.c.bf16 %v3397_v44, %v3397_v44 }
 0x2fd   :  { %4345 = vst.msk [vmem:[%s8773_s3 + $0x480] sm:$0xf] %vm4056_vm2, %v3923_v45 }
 0x2fe   :  { %4134 = vst.msk [vmem:[%s8773_s3 + $0x134] sm:$0xf] %vm4056_vm2, %v3712_v46  ;;  %v2882_v38 = vpop.f32.mrf.mxu2  ;;  %v3147_v51 = vpop.f32.mrf.mxu3 }
 0x2ff   :  { %4240 = vst.msk [vmem:[%s8773_s3 + $0x2dc] sm:$0xf] %vm4056_vm2, %v3818_v47  ;;  %v2883_v53 = vadd.f32 %v7783_v24, %v2882_v38  ;;  %v2355_v54 = vpop.f32.mrf.mxu0  ;;  %v2620_v55 = vpop.f32.mrf.mxu1  ;;  %v3148_v57 = vadd.f32 %v7783_v24, %v3147_v51 }
 0x300   :  { %v2356_v59 = vadd.f32 %v7783_v24, %v2355_v54  ;;  %v2621_v60 = vadd.f32 %v7783_v24, %v2620_v55  ;;  %4451 = vst.msk [vmem:[%s8773_s3 + $0x628] sm:$0xf] %vm4056_vm2, %v4029_v48 }
 0x301   :  { %v3503_v61 = vmax.f32 %v2883_v53, 0.0  ;;  %v3609_v62 = vmax.f32 %v3148_v57, 0.0 }
 0x302   :  { %v3292_v63 = vmax.f32 %v2356_v59, 0.0  ;;  %v3398_v0 = vmax.f32 %v2621_v60, 0.0  ;;  %5378 = vmatmul.msk.bf16.gmra.mxu0 %vm1513_vm1, %v5589_v49  ;;  %5431 = vmatmul.msk.bf16.gmra.mxu1 %vm1513_vm1, %v5642_v50  ;;  %v5591_v59 = vld [vmem:[%s8772_s0 + $0x188] sm:$0xff]  ;;  %v5644_v60 = vld [vmem:[%s8772_s0 + $0x330] sm:$0xff] }
 0x303   :  { %v3924_v1 = vpack.c.bf16 %v3503_v61, %v3503_v61  ;;  %5484 = vmatmul.msk.bf16.gmra.mxu2 %vm1513_vm1, %v5695_v56  ;;  %5537 = vmatmul.msk.bf16.gmra.mxu3 %vm1513_vm1, %v5748_v58  ;;  %v4030_v3 = vpack.c.bf16 %v3609_v62, %v3609_v62 }
 0x304   :  { %v3713_v2 = vpack.c.bf16 %v3292_v63, %v3292_v63  ;;  %v3819_v52 = vpack.c.bf16 %v3398_v0, %v3398_v0 }
 0x305   :  { %4346 = vst.msk [vmem:[%s8773_s3 + $0x484] sm:$0xf] %vm4056_vm2, %v3924_v1  ;;  %v5697_v1 = vld [vmem:[%s8772_s0 + $0x4d8] sm:$0xff] }
 0x306   :  { %4135 = vst.msk [vmem:[%s8773_s3 + $0x138] sm:$0xf] %vm4056_vm2, %v3713_v2  ;;  %v2885_v4 = vpop.f32.mrf.mxu2  ;;  %v3150_v5 = vpop.f32.mrf.mxu3 }
 0x307   :  { %4241 = vst.msk [vmem:[%s8773_s3 + $0x2e0] sm:$0xf] %vm4056_vm2, %v3819_v52  ;;  %v2886_v7 = vadd.f32 %v7783_v24, %v2885_v4  ;;  %v2357_v8 = vpop.f32.mrf.mxu0  ;;  %v2622_v9 = vpop.f32.mrf.mxu1  ;;  %v3151_v10 = vadd.f32 %v7783_v24, %v3150_v5  ;;  %v5750_v52 = vld [vmem:[%s8772_s0 + $0x680] sm:$0xff] }
 0x308   :  { %v2358_v11 = vadd.f32 %v7783_v24, %v2357_v8  ;;  %v2623_v12 = vadd.f32 %v7783_v24, %v2622_v9  ;;  %4452 = vst.msk [vmem:[%s8773_s3 + $0x62c] sm:$0xf] %vm4056_vm2, %v4030_v3 }
 0x309   :  { %v3504_v13 = vmax.f32 %v2886_v7, 0.0  ;;  %v3610_v14 = vmax.f32 %v3151_v10, 0.0 }
 0x30a   :  { %v3293_v15 = vmax.f32 %v2358_v11, 0.0  ;;  %v3399_v16 = vmax.f32 %v2623_v12, 0.0 }
 0x30b   :  { %v3925_v17 = vpack.c.bf16 %v3504_v13, %v3504_v13  ;;  %v4031_v20 = vpack.c.bf16 %v3610_v14, %v3610_v14 }
 0x30c   :  { %v3714_v18 = vpack.c.bf16 %v3293_v15, %v3293_v15  ;;  %v3820_v19 = vpack.c.bf16 %v3399_v16, %v3399_v16 }
 0x30d   :  { %4347 = vst.msk [vmem:[%s8773_s3 + $0x488] sm:$0xf] %vm4056_vm2, %v3925_v17 }
 0x30e   :  { %4136 = vst.msk [vmem:[%s8773_s3 + $0x13c] sm:$0xf] %vm4056_vm2, %v3714_v18  ;;  %v2887_v6 = vpop.f32.mrf.mxu2  ;;  %v3152_v23 = vpop.f32.mrf.mxu3 }
 0x30f   :  { %4242 = vst.msk [vmem:[%s8773_s3 + $0x2e4] sm:$0xf] %vm4056_vm2, %v3820_v19  ;;  %v2888_v25 = vadd.f32 %v7783_v24, %v2887_v6  ;;  %v2360_v26 = vpop.f32.mrf.mxu0  ;;  %v2625_v27 = vpop.f32.mrf.mxu1  ;;  %v3153_v29 = vadd.f32 %v7783_v24, %v3152_v23 }
 0x310   :  { %v2361_v31 = vadd.f32 %v7783_v24, %v2360_v26  ;;  %v2626_v32 = vadd.f32 %v7783_v24, %v2625_v27  ;;  %4453 = vst.msk [vmem:[%s8773_s3 + $0x630] sm:$0xf] %vm4056_vm2, %v4031_v20 }
 0x311   :  { %v3505_v33 = vmax.f32 %v2888_v25, 0.0  ;;  %v3611_v34 = vmax.f32 %v3153_v29, 0.0 }
 0x312   :  { %v3294_v35 = vmax.f32 %v2361_v31, 0.0  ;;  %v3400_v36 = vmax.f32 %v2626_v32, 0.0  ;;  %5379 = vmatmul.msk.bf16.gmra.mxu0 %vm1513_vm1, %v5590_v21  ;;  %5432 = vmatmul.msk.bf16.gmra.mxu1 %vm1513_vm1, %v5643_v22  ;;  %v5592_v31 = vld [vmem:[%s8772_s0 + $0x190] sm:$0xff]  ;;  %v5645_v32 = vld [vmem:[%s8772_s0 + $0x338] sm:$0xff] }
 0x313   :  { %v3926_v37 = vpack.c.bf16 %v3505_v33, %v3505_v33  ;;  %5485 = vmatmul.msk.bf16.gmra.mxu2 %vm1513_vm1, %v5696_v28  ;;  %5538 = vmatmul.msk.bf16.gmra.mxu3 %vm1513_vm1, %v5749_v30  ;;  %v4032_v41 = vpack.c.bf16 %v3611_v34, %v3611_v34 }
 0x314   :  { %v3715_v39 = vpack.c.bf16 %v3294_v35, %v3294_v35  ;;  %v3821_v40 = vpack.c.bf16 %v3400_v36, %v3400_v36 }
 0x315   :  { %4348 = vst.msk [vmem:[%s8773_s3 + $0x48c] sm:$0xf] %vm4056_vm2, %v3926_v37  ;;  %v5698_v37 = vld [vmem:[%s8772_s0 + $0x4e0] sm:$0xff] }
 0x316   :  { %4137 = vst.msk [vmem:[%s8773_s3 + $0x140] sm:$0xf] %vm4056_vm2, %v3715_v39  ;;  %v2890_v42 = vpop.f32.mrf.mxu2  ;;  %v3155_v43 = vpop.f32.mrf.mxu3 }
 0x317   :  { %4243 = vst.msk [vmem:[%s8773_s3 + $0x2e8] sm:$0xf] %vm4056_vm2, %v3821_v40  ;;  %v2891_v44 = vadd.f32 %v7783_v24, %v2890_v42  ;;  %v2362_v45 = vpop.f32.mrf.mxu0  ;;  %v2627_v46 = vpop.f32.mrf.mxu1  ;;  %v3156_v47 = vadd.f32 %v7783_v24, %v3155_v43  ;;  %v5751_v40 = vld [vmem:[%s8772_s0 + $0x688] sm:$0xff] }
 0x318   :  { %v2363_v48 = vadd.f32 %v7783_v24, %v2362_v45  ;;  %v2628_v38 = vadd.f32 %v7783_v24, %v2627_v46  ;;  %4454 = vst.msk [vmem:[%s8773_s3 + $0x634] sm:$0xf] %vm4056_vm2, %v4032_v41 }
 0x319   :  { %v3506_v49 = vmax.f32 %v2891_v44, 0.0  ;;  %v3612_v50 = vmax.f32 %v3156_v47, 0.0 }
 0x31a   :  { %v3295_v51 = vmax.f32 %v2363_v48, 0.0  ;;  %v3401_v53 = vmax.f32 %v2628_v38, 0.0 }
 0x31b   :  { %v3927_v54 = vpack.c.bf16 %v3506_v49, %v3506_v49  ;;  %v4033_v57 = vpack.c.bf16 %v3612_v50, %v3612_v50 }
 0x31c   :  { %v3716_v55 = vpack.c.bf16 %v3295_v51, %v3295_v51  ;;  %v3822_v56 = vpack.c.bf16 %v3401_v53, %v3401_v53 }
 0x31d   :  { %4349 = vst.msk [vmem:[%s8773_s3 + $0x490] sm:$0xf] %vm4056_vm2, %v3927_v54 }
 0x31e   :  { %4138 = vst.msk [vmem:[%s8773_s3 + $0x144] sm:$0xf] %vm4056_vm2, %v3716_v55  ;;  %v2892_v58 = vpop.f32.mrf.mxu2  ;;  %v3157_v61 = vpop.f32.mrf.mxu3 }
 0x31f   :  { %4244 = vst.msk [vmem:[%s8773_s3 + $0x2ec] sm:$0xf] %vm4056_vm2, %v3822_v56  ;;  %v2893_v62 = vadd.f32 %v7783_v24, %v2892_v58  ;;  %v2365_v63 = vpop.f32.mrf.mxu0  ;;  %v2630_v0 = vpop.f32.mrf.mxu1  ;;  %v3158_v2 = vadd.f32 %v7783_v24, %v3157_v61 }
 0x320   :  { %v2366_v3 = vadd.f32 %v7783_v24, %v2365_v63  ;;  %v2631_v4 = vadd.f32 %v7783_v24, %v2630_v0  ;;  %4455 = vst.msk [vmem:[%s8773_s3 + $0x638] sm:$0xf] %vm4056_vm2, %v4033_v57 }
 0x321   :  { %v3507_v5 = vmax.f32 %v2893_v62, 0.0  ;;  %v3613_v7 = vmax.f32 %v3158_v2, 0.0 }
 0x322   :  { %v3296_v8 = vmax.f32 %v2366_v3, 0.0  ;;  %v3402_v9 = vmax.f32 %v2631_v4, 0.0  ;;  %5380 = vmatmul.msk.bf16.gmra.mxu0 %vm1513_vm1, %v5591_v59  ;;  %5433 = vmatmul.msk.bf16.gmra.mxu1 %vm1513_vm1, %v5644_v60  ;;  %v435_v59 = vld [vmem:[%s8772_s0 + $0x690] sm:$0x1] }
 0x323   :  { %v3928_v10 = vpack.c.bf16 %v3507_v5, %v3507_v5  ;;  %5486 = vmatmul.msk.bf16.gmra.mxu2 %vm1513_vm1, %v5697_v1  ;;  %5539 = vmatmul.msk.bf16.gmra.mxu3 %vm1513_vm1, %v5750_v52  ;;  %v4034_v13 = vpack.c.bf16 %v3613_v7, %v3613_v7  ;;  %v1286_v1 = vunpack.c.l.b16 %v435_v59  ;;  %v5593_v5 = vld [vmem:[%s8772_s0 + $0x198] sm:$0xff]  ;;  %v5646_v7 = vld [vmem:[%s8772_s0 + $0x340] sm:$0xff] }
 0x324   :  { %v3717_v11 = vpack.c.bf16 %v3296_v8, %v3296_v8  ;;  %v3823_v12 = vpack.c.bf16 %v3402_v9, %v3402_v9 }
 0x325   :  { %4350 = vst.msk [vmem:[%s8773_s3 + $0x494] sm:$0xf] %vm4056_vm2, %v3928_v10 }
 0x326   :  { %4139 = vst.msk [vmem:[%s8773_s3 + $0x148] sm:$0xf] %vm4056_vm2, %v3717_v11  ;;  %v2895_v14 = vpop.f32.mrf.mxu2  ;;  %v3160_v15 = vpop.f32.mrf.mxu3 }
 0x327   :  { %4245 = vst.msk [vmem:[%s8773_s3 + $0x2f0] sm:$0xf] %vm4056_vm2, %v3823_v12  ;;  %v2896_v16 = vadd.f32 %v7783_v24, %v2895_v14  ;;  %v2367_v17 = vpop.f32.mrf.mxu0  ;;  %v2632_v18 = vpop.f32.mrf.mxu1  ;;  %v3161_v19 = vadd.f32 %v7783_v24, %v3160_v15  ;;  %v5699_v12 = vld [vmem:[%s8772_s0 + $0x4e8] sm:$0xff]  ;;  %v1497_v14 = vpack.c.b16 %v1286_v1, %v1286_v1 }
 0x328   :  { %v2368_v20 = vadd.f32 %v7783_v24, %v2367_v17  ;;  %v2633_v6 = vadd.f32 %v7783_v24, %v2632_v18  ;;  %4456 = vst.msk [vmem:[%s8773_s3 + $0x63c] sm:$0xf] %vm4056_vm2, %v4034_v13 }
 0x329   :  { %v3508_v21 = vmax.f32 %v2896_v16, 0.0  ;;  %v3614_v22 = vmax.f32 %v3161_v19, 0.0 }
 0x32a   :  { %v3297_v23 = vmax.f32 %v2368_v20, 0.0  ;;  %v3403_v25 = vmax.f32 %v2633_v6, 0.0 }
 0x32b   :  { %v3929_v26 = vpack.c.bf16 %v3508_v21, %v3508_v21  ;;  %v4035_v29 = vpack.c.bf16 %v3614_v22, %v3614_v22 }
 0x32c   :  { %v3718_v27 = vpack.c.bf16 %v3297_v23, %v3297_v23  ;;  %v3824_v28 = vpack.c.bf16 %v3403_v25, %v3403_v25 }
 0x32d   :  { %4351 = vst.msk [vmem:[%s8773_s3 + $0x498] sm:$0xf] %vm4056_vm2, %v3929_v26 }
 0x32e   :  { %4140 = vst.msk [vmem:[%s8773_s3 + $0x14c] sm:$0xf] %vm4056_vm2, %v3718_v27  ;;  %v2897_v30 = vpop.f32.mrf.mxu2  ;;  %v3162_v33 = vpop.f32.mrf.mxu3 }
 0x32f   :  { %4246 = vst.msk [vmem:[%s8773_s3 + $0x2f4] sm:$0xf] %vm4056_vm2, %v3824_v28  ;;  %v2898_v34 = vadd.f32 %v7783_v24, %v2897_v30  ;;  %v2370_v35 = vpop.f32.mrf.mxu0  ;;  %v2635_v36 = vpop.f32.mrf.mxu1  ;;  %v3163_v39 = vadd.f32 %v7783_v24, %v3162_v33 }
 0x330   :  { %v2371_v41 = vadd.f32 %v7783_v24, %v2370_v35  ;;  %v2636_v42 = vadd.f32 %v7783_v24, %v2635_v36  ;;  %4457 = vst.msk [vmem:[%s8773_s3 + $0x640] sm:$0xf] %vm4056_vm2, %v4035_v29 }
 0x331   :  { %v3509_v43 = vmax.f32 %v2898_v34, 0.0  ;;  %v3615_v44 = vmax.f32 %v3163_v39, 0.0 }
 0x332   :  { %v3298_v45 = vmax.f32 %v2371_v41, 0.0  ;;  %v3404_v46 = vmax.f32 %v2636_v42, 0.0  ;;  %5381 = vmatmul.msk.bf16.gmra.mxu0 %vm1513_vm1, %v5592_v31  ;;  %5434 = vmatmul.msk.bf16.gmra.mxu1 %vm1513_vm1, %v5645_v32  ;;  %v8380_v31 = vld [vmem:[%s8771_s2] ss:$0 sm:$0xff] }
 0x333   :  { %v3930_v47 = vpack.c.bf16 %v3509_v43, %v3509_v43  ;;  %5487 = vmatmul.msk.bf16.gmra.mxu2 %vm1513_vm1, %v5698_v37  ;;  %5540 = vmatmul.msk.bf16.gmra.mxu3 %vm1513_vm1, %v5751_v40  ;;  %v4036_v49 = vpack.c.bf16 %v3615_v44, %v3615_v44  ;;  %v5594_v43 = vld [vmem:[%s8772_s0 + $0x1a0] sm:$0xff]  ;;  %v5647_v44 = vld [vmem:[%s8772_s0 + $0x348] sm:$0xff] }
 0x334   :  { %v3719_v48 = vpack.c.bf16 %v3298_v45, %v3298_v45  ;;  %v3825_v38 = vpack.c.bf16 %v3404_v46, %v3404_v46 }
 0x335   :  { %4352 = vst.msk [vmem:[%s8773_s3 + $0x49c] sm:$0xf] %vm4056_vm2, %v3930_v47 }
 0x336   :  { %4141 = vst.msk [vmem:[%s8773_s3 + $0x150] sm:$0xf] %vm4056_vm2, %v3719_v48  ;;  %v2900_v50 = vpop.f32.mrf.mxu2  ;;  %v3165_v51 = vpop.f32.mrf.mxu3 }
 0x337   :  { %4247 = vst.msk [vmem:[%s8773_s3 + $0x2f8] sm:$0xf] %vm4056_vm2, %v3825_v38  ;;  %v2901_v53 = vadd.f32 %v7783_v24, %v2900_v50  ;;  %v2372_v54 = vpop.f32.mrf.mxu0  ;;  %v2637_v55 = vpop.f32.mrf.mxu1  ;;  %v3166_v56 = vadd.f32 %v7783_v24, %v3165_v51  ;;  %v5700_v38 = vld [vmem:[%s8772_s0 + $0x4f0] sm:$0xff] }
 0x338   :  { %v2373_v57 = vadd.f32 %v7783_v24, %v2372_v54  ;;  %v2638_v58 = vadd.f32 %v7783_v24, %v2637_v55  ;;  %4458 = vst.msk [vmem:[%s8773_s3 + $0x644] sm:$0xf] %vm4056_vm2, %v4036_v49 }
 0x339   :  { %v3510_v60 = vmax.f32 %v2901_v53, 0.0  ;;  %v3616_v61 = vmax.f32 %v3166_v56, 0.0 }
 0x33a   :  { %v3299_v62 = vmax.f32 %v2373_v57, 0.0  ;;  %v3405_v63 = vmax.f32 %v2638_v58, 0.0 }
 0x33b   :  { %v3931_v0 = vpack.c.bf16 %v3510_v60, %v3510_v60  ;;  %v4037_v3 = vpack.c.bf16 %v3616_v61, %v3616_v61 }
 0x33c   :  { %v3720_v2 = vpack.c.bf16 %v3299_v62, %v3299_v62  ;;  %v3826_v52 = vpack.c.bf16 %v3405_v63, %v3405_v63 }
 0x33d   :  { %4353 = vst.msk [vmem:[%s8773_s3 + $0x4a0] sm:$0xf] %vm4056_vm2, %v3931_v0 }
 0x33e   :  { %4142 = vst.msk [vmem:[%s8773_s3 + $0x154] sm:$0xf] %vm4056_vm2, %v3720_v2  ;;  %v2902_v4 = vpop.f32.mrf.mxu2  ;;  %v3167_v8 = vpop.f32.mrf.mxu3 }
 0x33f   :  { %4248 = vst.msk [vmem:[%s8773_s3 + $0x2fc] sm:$0xf] %vm4056_vm2, %v3826_v52  ;;  %v2903_v9 = vadd.f32 %v7783_v24, %v2902_v4  ;;  %v2375_v10 = vpop.f32.mrf.mxu0  ;;  %v2640_v11 = vpop.f32.mrf.mxu1  ;;  %v3168_v13 = vadd.f32 %v7783_v24, %v3167_v8 }
 0x340   :  { %v2376_v15 = vadd.f32 %v7783_v24, %v2375_v10  ;;  %v2641_v16 = vadd.f32 %v7783_v24, %v2640_v11  ;;  %4459 = vst.msk [vmem:[%s8773_s3 + $0x648] sm:$0xf] %vm4056_vm2, %v4037_v3 }
 0x341   :  { %v3511_v17 = vmax.f32 %v2903_v9, 0.0  ;;  %v3617_v18 = vmax.f32 %v3168_v13, 0.0 }
 0x342   :  { %v3300_v19 = vmax.f32 %v2376_v15, 0.0  ;;  %v3406_v20 = vmax.f32 %v2641_v16, 0.0  ;;  %5382 = vmatmul.msk.bf16.gmra.mxu0 %vm1513_vm1, %v5593_v5  ;;  %5435 = vmatmul.msk.bf16.gmra.mxu1 %vm1513_vm1, %v5646_v7 }
 0x343   :  { %v3932_v6 = vpack.c.bf16 %v3511_v17, %v3511_v17  ;;  %5488 = vmatmul.msk.bf16.gmra.mxu2 %vm1513_vm1, %v5699_v12  ;;  %5541 = vmatmul.msk.bf16.gmra.mxu3 %vm1513_vm1, %v1497_v14  ;;  %v4038_v23 = vpack.c.bf16 %v3617_v18, %v3617_v18 }
 0x344   :  { %v3721_v21 = vpack.c.bf16 %v3300_v19, %v3300_v19  ;;  %v3827_v22 = vpack.c.bf16 %v3406_v20, %v3406_v20 }
 0x345   :  { %4354 = vst.msk [vmem:[%s8773_s3 + $0x4a4] sm:$0xf] %vm4056_vm2, %v3932_v6 }
 0x346   :  { %4143 = vst.msk [vmem:[%s8773_s3 + $0x158] sm:$0xf] %vm4056_vm2, %v3721_v21  ;;  %v2905_v25 = vpop.f32.mrf.mxu2  ;;  %v3170_v26 = vpop.f32.mrf.mxu3 }
 0x347   :  { %4249 = vst.msk [vmem:[%s8773_s3 + $0x300] sm:$0xf] %vm4056_vm2, %v3827_v22  ;;  %v2906_v27 = vadd.f32 %v7783_v24, %v2905_v25  ;;  %v2377_v28 = vpop.f32.mrf.mxu0  ;;  %v2642_v29 = vpop.f32.mrf.mxu1  ;;  %v3171_v30 = vadd.f32 %v7783_v24, %v3170_v26 }
 0x348   :  { %v2378_v32 = vadd.f32 %v8380_v31, %v2377_v28  ;;  %v2643_v33 = vadd.f32 %v8380_v31, %v2642_v29  ;;  %4460 = vst.msk [vmem:[%s8773_s3 + $0x64c] sm:$0xf] %vm4056_vm2, %v4038_v23 }
 0x349   :  { %v3512_v34 = vmax.f32 %v2906_v27, 0.0  ;;  %v3618_v35 = vmax.f32 %v3171_v30, 0.0 }
 0x34a   :  { %v3301_v36 = vmax.f32 %v2378_v32, 0.0  ;;  %v3407_v37 = vmax.f32 %v2643_v33, 0.0 }
 0x34b   :  { %v3933_v39 = vpack.c.bf16 %v3512_v34, %v3512_v34  ;;  %v4039_v41 = vpack.c.bf16 %v3618_v35, %v3618_v35 }
 0x34c   :  { %v3722_v24 = vpack.c.bf16 %v3301_v36, %v3301_v36  ;;  %v3828_v40 = vpack.c.bf16 %v3407_v37, %v3407_v37 }
 0x34d   :  { %4355 = vst.msk [vmem:[%s8773_s3 + $0x4a8] sm:$0xf] %vm4056_vm2, %v3933_v39 }
 0x34e   :  { %4144 = vst.msk [vmem:[%s8773_s3 + $0x15c] sm:$0xf] %vm4056_vm2, %v3722_v24  ;;  %v2907_v42 = vpop.f32.mrf.mxu2  ;;  %v3172_v45 = vpop.f32.mrf.mxu3 }
 0x34f   :  { %4250 = vst.msk [vmem:[%s8773_s3 + $0x304] sm:$0xf] %vm4056_vm2, %v3828_v40  ;;  %v2908_v46 = vadd.f32 %v8380_v31, %v2907_v42  ;;  %v2380_v47 = vpop.f32.mrf.mxu0  ;;  %v2645_v48 = vpop.f32.mrf.mxu1  ;;  %v3173_v49 = vadd.f32 %v8380_v31, %v3172_v45 }
 0x350   :  { %v2381_v50 = vadd.f32 %v8380_v31, %v2380_v47  ;;  %v2646_v51 = vadd.f32 %v8380_v31, %v2645_v48  ;;  %4461 = vst.msk [vmem:[%s8773_s3 + $0x650] sm:$0xf] %vm4056_vm2, %v4039_v41 }
 0x351   :  { %v3513_v53 = vmax.f32 %v2908_v46, 0.0  ;;  %v3619_v54 = vmax.f32 %v3173_v49, 0.0 }
 0x352   :  { %v3302_v55 = vmax.f32 %v2381_v50, 0.0  ;;  %v3408_v56 = vmax.f32 %v2646_v51, 0.0  ;;  %5383 = vmatmul.msk.bf16.gmra.mxu0 %vm1513_vm1, %v5594_v43  ;;  %5436 = vmatmul.msk.bf16.gmra.mxu1 %vm1513_vm1, %v5647_v44 }
 0x353   :  { %v3934_v57 = vpack.c.bf16 %v3513_v53, %v3513_v53  ;;  %5489 = vmatmul.msk.bf16.gmra.mxu2 %vm1513_vm1, %v5700_v38  ;;  %v4040_v60 = vpack.c.bf16 %v3619_v54, %v3619_v54 }
 0x354   :  { %v3723_v58 = vpack.c.bf16 %v3302_v55, %v3302_v55  ;;  %v3829_v59 = vpack.c.bf16 %v3408_v56, %v3408_v56 }
 0x355   :  { %4356 = vst.msk [vmem:[%s8773_s3 + $0x4ac] sm:$0xf] %vm4056_vm2, %v3934_v57 }
 0x356   :  { %4145 = vst.msk [vmem:[%s8773_s3 + $0x160] sm:$0xf] %vm4056_vm2, %v3723_v58  ;;  %v2910_v61 = vpop.f32.mrf.mxu2  ;;  %v3175_v62 = vpop.f32.mrf.mxu3 }
 0x357   :  { %4251 = vst.msk [vmem:[%s8773_s3 + $0x308] sm:$0xf] %vm4056_vm2, %v3829_v59  ;;  %v2911_v63 = vadd.f32 %v8380_v31, %v2910_v61  ;;  %v2382_v0 = vpop.f32.mrf.mxu0  ;;  %v2647_v1 = vpop.f32.mrf.mxu1  ;;  %v3176_v2 = vadd.f32 %v8380_v31, %v3175_v62 }
 0x358   :  { %v2383_v52 = vadd.f32 %v8380_v31, %v2382_v0  ;;  %v2648_v3 = vadd.f32 %v8380_v31, %v2647_v1  ;;  %4462 = vst.msk [vmem:[%s8773_s3 + $0x654] sm:$0xf] %vm4056_vm2, %v4040_v60 }
 0x359   :  { %v3514_v4 = vmax.f32 %v2911_v63, 0.0  ;;  %v3620_v5 = vmax.f32 %v3176_v2, 0.0 }
 0x35a   :  { %v3303_v7 = vmax.f32 %v2383_v52, 0.0  ;;  %v3409_v8 = vmax.f32 %v2648_v3, 0.0 }
 0x35b   :  { %v3935_v9 = vpack.c.bf16 %v3514_v4, %v3514_v4  ;;  %v4041_v12 = vpack.c.bf16 %v3620_v5, %v3620_v5 }
 0x35c   :  { %v3724_v10 = vpack.c.bf16 %v3303_v7, %v3303_v7  ;;  %v3830_v11 = vpack.c.bf16 %v3409_v8, %v3409_v8 }
 0x35d   :  { %4357 = vst.msk [vmem:[%s8773_s3 + $0x4b0] sm:$0xf] %vm4056_vm2, %v3935_v9 }
 0x35e   :  { %4146 = vst.msk [vmem:[%s8773_s3 + $0x164] sm:$0xf] %vm4056_vm2, %v3724_v10  ;;  %v2912_v13 = vpop.f32.mrf.mxu2  ;;  %v3177_v14 = vpop.f32.mrf.mxu3 }
 0x35f   :  { %4252 = vst.msk [vmem:[%s8773_s3 + $0x30c] sm:$0xf] %vm4056_vm2, %v3830_v11  ;;  %v2913_v15 = vadd.f32 %v8380_v31, %v2912_v13  ;;  %v2385_v16 = vpop.f32.mrf.mxu0  ;;  %v2650_v17 = vpop.f32.mrf.mxu1  ;;  %v3178_v18 = vadd.f32 %v8380_v31, %v3177_v14 }
 0x360   :  { %v2386_v19 = vadd.f32 %v8380_v31, %v2385_v16  ;;  %v2651_v20 = vadd.f32 %v8380_v31, %v2650_v17  ;;  %4463 = vst.msk [vmem:[%s8773_s3 + $0x658] sm:$0xf] %vm4056_vm2, %v4041_v12 }
 0x361   :  { %v3515_v6 = vmax.f32 %v2913_v15, 0.0  ;;  %v3621_v21 = vmax.f32 %v3178_v18, 0.0 }
 0x362   :  { %v3304_v22 = vmax.f32 %v2386_v19, 0.0  ;;  %v3410_v23 = vmax.f32 %v2651_v20, 0.0 }
 0x363   :  { %v3936_v25 = vpack.c.bf16 %v3515_v6, %v3515_v6  ;;  %v4042_v28 = vpack.c.bf16 %v3621_v21, %v3621_v21 }
 0x364   :  { %v3725_v26 = vpack.c.bf16 %v3304_v22, %v3304_v22  ;;  %v3831_v27 = vpack.c.bf16 %v3410_v23, %v3410_v23 }
 0x365   :  { %4358 = vst.msk [vmem:[%s8773_s3 + $0x4b4] sm:$0xf] %vm4056_vm2, %v3936_v25 }
 0x366   :  { %4147 = vst.msk [vmem:[%s8773_s3 + $0x168] sm:$0xf] %vm4056_vm2, %v3725_v26  ;;  %v2915_v29 = vpop.f32.mrf.mxu2  ;;  %v3180_v30 = vpop.f32.mrf.mxu3 }
 0x367   :  { %4253 = vst.msk [vmem:[%s8773_s3 + $0x310] sm:$0xf] %vm4056_vm2, %v3831_v27  ;;  %v2916_v32 = vadd.f32 %v8380_v31, %v2915_v29  ;;  %v2387_v33 = vpop.f32.mrf.mxu0  ;;  %v2652_v34 = vpop.f32.mrf.mxu1  ;;  %v3181_v35 = vadd.f32 %v8380_v31, %v3180_v30 }
 0x368   :  { %v2388_v36 = vadd.f32 %v8380_v31, %v2387_v33  ;;  %v2653_v37 = vadd.f32 %v8380_v31, %v2652_v34  ;;  %4464 = vst.msk [vmem:[%s8773_s3 + $0x65c] sm:$0xf] %vm4056_vm2, %v4042_v28 }
 0x369   :  { %v3516_v39 = vmax.f32 %v2916_v32, 0.0  ;;  %v3622_v24 = vmax.f32 %v3181_v35, 0.0 }
 0x36a   :  { %v3305_v40 = vmax.f32 %v2388_v36, 0.0  ;;  %v3411_v41 = vmax.f32 %v2653_v37, 0.0 }
 0x36b   :  { %v3937_v42 = vpack.c.bf16 %v3516_v39, %v3516_v39  ;;  %v4043_v45 = vpack.c.bf16 %v3622_v24, %v3622_v24 }
 0x36c   :  { %v3726_v43 = vpack.c.bf16 %v3305_v40, %v3305_v40  ;;  %v3832_v44 = vpack.c.bf16 %v3411_v41, %v3411_v41 }
 0x36d   :  { %4359 = vst.msk [vmem:[%s8773_s3 + $0x4b8] sm:$0xf] %vm4056_vm2, %v3937_v42 }
 0x36e   :  { %4148 = vst.msk [vmem:[%s8773_s3 + $0x16c] sm:$0xf] %vm4056_vm2, %v3726_v43  ;;  %v2917_v46 = vpop.f32.mrf.mxu2  ;;  %v3182_v47 = vpop.f32.mrf.mxu3 }
 0x36f   :  { %4254 = vst.msk [vmem:[%s8773_s3 + $0x314] sm:$0xf] %vm4056_vm2, %v3832_v44  ;;  %v2918_v48 = vadd.f32 %v8380_v31, %v2917_v46  ;;  %v2390_v38 = vpop.f32.mrf.mxu0  ;;  %v2655_v49 = vpop.f32.mrf.mxu1  ;;  %v3183_v50 = vadd.f32 %v8380_v31, %v3182_v47 }
 0x370   :  { %v2391_v51 = vadd.f32 %v8380_v31, %v2390_v38  ;;  %v2656_v53 = vadd.f32 %v8380_v31, %v2655_v49  ;;  %4465 = vst.msk [vmem:[%s8773_s3 + $0x660] sm:$0xf] %vm4056_vm2, %v4043_v45 }
 0x371   :  { %v3517_v54 = vmax.f32 %v2918_v48, 0.0  ;;  %v3623_v55 = vmax.f32 %v3183_v50, 0.0 }
 0x372   :  { %v3306_v56 = vmax.f32 %v2391_v51, 0.0  ;;  %v3412_v57 = vmax.f32 %v2656_v53, 0.0 }
 0x373   :  { %v3938_v58 = vpack.c.bf16 %v3517_v54, %v3517_v54  ;;  %v4044_v61 = vpack.c.bf16 %v3623_v55, %v3623_v55 }
 0x374   :  { %v3727_v59 = vpack.c.bf16 %v3306_v56, %v3306_v56  ;;  %v3833_v60 = vpack.c.bf16 %v3412_v57, %v3412_v57 }
 0x375   :  { %4360 = vst.msk [vmem:[%s8773_s3 + $0x4bc] sm:$0xf] %vm4056_vm2, %v3938_v58 }
 0x376   :  { %4149 = vst.msk [vmem:[%s8773_s3 + $0x170] sm:$0xf] %vm4056_vm2, %v3727_v59  ;;  %v2920_v62 = vpop.f32.mrf.mxu2  ;;  %v3185_v63 = vpop.f32.mrf.mxu3 }
 0x377   :  { %4255 = vst.msk [vmem:[%s8773_s3 + $0x318] sm:$0xf] %vm4056_vm2, %v3833_v60  ;;  %v2921_v0 = vadd.f32 %v8380_v31, %v2920_v62  ;;  %v2392_v1 = vpop.f32.mrf.mxu0  ;;  %v2657_v2 = vpop.f32.mrf.mxu1  ;;  %v3186_v52 = vadd.f32 %v8380_v31, %v3185_v63 }
 0x378   :  { %v2393_v3 = vadd.f32 %v8380_v31, %v2392_v1  ;;  %v2658_v4 = vadd.f32 %v8380_v31, %v2657_v2  ;;  %4466 = vst.msk [vmem:[%s8773_s3 + $0x664] sm:$0xf] %vm4056_vm2, %v4044_v61 }
 0x379   :  { %v3518_v5 = vmax.f32 %v2921_v0, 0.0  ;;  %v3624_v7 = vmax.f32 %v3186_v52, 0.0 }
 0x37a   :  { %v3307_v8 = vmax.f32 %v2393_v3, 0.0  ;;  %v3413_v9 = vmax.f32 %v2658_v4, 0.0 }
 0x37b   :  { %v3939_v10 = vpack.c.bf16 %v3518_v5, %v3518_v5  ;;  %v4045_v13 = vpack.c.bf16 %v3624_v7, %v3624_v7 }
 0x37c   :  { %v3728_v11 = vpack.c.bf16 %v3307_v8, %v3307_v8  ;;  %v3834_v12 = vpack.c.bf16 %v3413_v9, %v3413_v9 }
 0x37d   :  { %4361 = vst.msk [vmem:[%s8773_s3 + $0x4c0] sm:$0xf] %vm4056_vm2, %v3939_v10 }
 0x37e   :  { %4150 = vst.msk [vmem:[%s8773_s3 + $0x174] sm:$0xf] %vm4056_vm2, %v3728_v11  ;;  %v2922_v14 = vpop.f32.mrf.mxu2  ;;  %v3187_v15 = vpop.f32.mrf.mxu3 }
 0x37f   :  { %4256 = vst.msk [vmem:[%s8773_s3 + $0x31c] sm:$0xf] %vm4056_vm2, %v3834_v12  ;;  %v2923_v16 = vadd.f32 %v8380_v31, %v2922_v14  ;;  %v2395_v17 = vpop.f32.mrf.mxu0  ;;  %v2660_v18 = vpop.f32.mrf.mxu1  ;;  %v3188_v19 = vadd.f32 %v8380_v31, %v3187_v15 }
 0x380   :  { %v2396_v20 = vadd.f32 %v8380_v31, %v2395_v17  ;;  %v2661_v6 = vadd.f32 %v8380_v31, %v2660_v18  ;;  %4467 = vst.msk [vmem:[%s8773_s3 + $0x668] sm:$0xf] %vm4056_vm2, %v4045_v13 }
 0x381   :  { %v3519_v21 = vmax.f32 %v2923_v16, 0.0  ;;  %v3625_v22 = vmax.f32 %v3188_v19, 0.0 }
 0x382   :  { %v3308_v23 = vmax.f32 %v2396_v20, 0.0  ;;  %v3414_v25 = vmax.f32 %v2661_v6, 0.0 }
 0x383   :  { %v3940_v26 = vpack.c.bf16 %v3519_v21, %v3519_v21  ;;  %v4046_v29 = vpack.c.bf16 %v3625_v22, %v3625_v22 }
 0x384   :  { %v3729_v27 = vpack.c.bf16 %v3308_v23, %v3308_v23  ;;  %v3835_v28 = vpack.c.bf16 %v3414_v25, %v3414_v25 }
 0x385   :  { %4362 = vst.msk [vmem:[%s8773_s3 + $0x4c4] sm:$0xf] %vm4056_vm2, %v3940_v26 }
 0x386   :  { %4151 = vst.msk [vmem:[%s8773_s3 + $0x178] sm:$0xf] %vm4056_vm2, %v3729_v27  ;;  %v2925_v30 = vpop.f32.mrf.mxu2  ;;  %v3190_v32 = vpop.f32.mrf.mxu3 }
 0x387   :  { %4257 = vst.msk [vmem:[%s8773_s3 + $0x320] sm:$0xf] %vm4056_vm2, %v3835_v28  ;;  %v2926_v33 = vadd.f32 %v8380_v31, %v2925_v30  ;;  %v2397_v34 = vpop.f32.mrf.mxu0  ;;  %v2662_v35 = vpop.f32.mrf.mxu1  ;;  %v3191_v36 = vadd.f32 %v8380_v31, %v3190_v32 }
 0x388   :  { %v2398_v37 = vadd.f32 %v8380_v31, %v2397_v34  ;;  %v2663_v39 = vadd.f32 %v8380_v31, %v2662_v35  ;;  %4468 = vst.msk [vmem:[%s8773_s3 + $0x66c] sm:$0xf] %vm4056_vm2, %v4046_v29 }
 0x389   :  { %v3520_v24 = vmax.f32 %v2926_v33, 0.0  ;;  %v3626_v40 = vmax.f32 %v3191_v36, 0.0 }
 0x38a   :  { %v3309_v41 = vmax.f32 %v2398_v37, 0.0  ;;  %v3415_v42 = vmax.f32 %v2663_v39, 0.0 }
 0x38b   :  { %v3941_v43 = vpack.c.bf16 %v3520_v24, %v3520_v24  ;;  %v4047_v46 = vpack.c.bf16 %v3626_v40, %v3626_v40 }
 0x38c   :  { %v3730_v44 = vpack.c.bf16 %v3309_v41, %v3309_v41  ;;  %v3836_v45 = vpack.c.bf16 %v3415_v42, %v3415_v42 }
 0x38d   :  { %4363 = vst.msk [vmem:[%s8773_s3 + $0x4c8] sm:$0xf] %vm4056_vm2, %v3941_v43 }
 0x38e   :  { %4152 = vst.msk [vmem:[%s8773_s3 + $0x17c] sm:$0xf] %vm4056_vm2, %v3730_v44  ;;  %v2927_v47 = vpop.f32.mrf.mxu2  ;;  %v3192_v48 = vpop.f32.mrf.mxu3 }
 0x38f   :  { %4258 = vst.msk [vmem:[%s8773_s3 + $0x324] sm:$0xf] %vm4056_vm2, %v3836_v45  ;;  %v2928_v38 = vadd.f32 %v8380_v31, %v2927_v47  ;;  %v2400_v49 = vpop.f32.mrf.mxu0  ;;  %v2665_v50 = vpop.f32.mrf.mxu1  ;;  %v3193_v51 = vadd.f32 %v8380_v31, %v3192_v48 }
 0x390   :  { %v2401_v53 = vadd.f32 %v8380_v31, %v2400_v49  ;;  %v2666_v54 = vadd.f32 %v8380_v31, %v2665_v50  ;;  %4469 = vst.msk [vmem:[%s8773_s3 + $0x670] sm:$0xf] %vm4056_vm2, %v4047_v46 }
 0x391   :  { %v3521_v55 = vmax.f32 %v2928_v38, 0.0  ;;  %v3627_v56 = vmax.f32 %v3193_v51, 0.0 }
 0x392   :  { %v3310_v57 = vmax.f32 %v2401_v53, 0.0  ;;  %v3416_v58 = vmax.f32 %v2666_v54, 0.0 }
 0x393   :  { %v3942_v59 = vpack.c.bf16 %v3521_v55, %v3521_v55  ;;  %v4048_v62 = vpack.c.bf16 %v3627_v56, %v3627_v56 }
 0x394   :  { %v3731_v60 = vpack.c.bf16 %v3310_v57, %v3310_v57  ;;  %v3837_v61 = vpack.c.bf16 %v3416_v58, %v3416_v58 }
 0x395   :  { %4364 = vst.msk [vmem:[%s8773_s3 + $0x4cc] sm:$0xf] %vm4056_vm2, %v3942_v59 }
 0x396   :  { %4153 = vst.msk [vmem:[%s8773_s3 + $0x180] sm:$0xf] %vm4056_vm2, %v3731_v60  ;;  %v2930_v63 = vpop.f32.mrf.mxu2  ;;  %v3195_v0 = vpop.f32.mrf.mxu3 }
 0x397   :  { %4259 = vst.msk [vmem:[%s8773_s3 + $0x328] sm:$0xf] %vm4056_vm2, %v3837_v61  ;;  %v2931_v1 = vadd.f32 %v8380_v31, %v2930_v63  ;;  %v2402_v2 = vpop.f32.mrf.mxu0  ;;  %v2667_v52 = vpop.f32.mrf.mxu1  ;;  %v3196_v3 = vadd.f32 %v8380_v31, %v3195_v0 }
 0x398   :  { %v2403_v4 = vadd.f32 %v8380_v31, %v2402_v2  ;;  %v2668_v5 = vadd.f32 %v8380_v31, %v2667_v52  ;;  %4470 = vst.msk [vmem:[%s8773_s3 + $0x674] sm:$0xf] %vm4056_vm2, %v4048_v62 }
 0x399   :  { %v3522_v7 = vmax.f32 %v2931_v1, 0.0  ;;  %v3628_v8 = vmax.f32 %v3196_v3, 0.0 }
 0x39a   :  { %v3311_v9 = vmax.f32 %v2403_v4, 0.0  ;;  %v3417_v10 = vmax.f32 %v2668_v5, 0.0 }
 0x39b   :  { %v3943_v11 = vpack.c.bf16 %v3522_v7, %v3522_v7  ;;  %v4049_v14 = vpack.c.bf16 %v3628_v8, %v3628_v8 }
 0x39c   :  { %v3732_v12 = vpack.c.bf16 %v3311_v9, %v3311_v9  ;;  %v3838_v13 = vpack.c.bf16 %v3417_v10, %v3417_v10 }
 0x39d   :  { %4365 = vst.msk [vmem:[%s8773_s3 + $0x4d0] sm:$0xf] %vm4056_vm2, %v3943_v11 }
 0x39e   :  { %4154 = vst.msk [vmem:[%s8773_s3 + $0x184] sm:$0xf] %vm4056_vm2, %v3732_v12  ;;  %v2932_v15 = vpop.f32.mrf.mxu2  ;;  %v3197_v16 = vpop.f32.mrf.mxu3 }
 0x39f   :  { %4260 = vst.msk [vmem:[%s8773_s3 + $0x32c] sm:$0xf] %vm4056_vm2, %v3838_v13  ;;  %v2933_v17 = vadd.f32 %v8380_v31, %v2932_v15  ;;  %v2405_v18 = vpop.f32.mrf.mxu0  ;;  %v2670_v19 = vpop.f32.mrf.mxu1  ;;  %v3198_v20 = vadd.f32 %v8380_v31, %v3197_v16 }
 0x3a0   :  { %v2406_v6 = vadd.f32 %v8380_v31, %v2405_v18  ;;  %v2671_v21 = vadd.f32 %v8380_v31, %v2670_v19  ;;  %4471 = vst.msk [vmem:[%s8773_s3 + $0x678] sm:$0xf] %vm4056_vm2, %v4049_v14 }
 0x3a1   :  { %v3523_v22 = vmax.f32 %v2933_v17, 0.0  ;;  %v3629_v23 = vmax.f32 %v3198_v20, 0.0 }
 0x3a2   :  { %v3312_v25 = vmax.f32 %v2406_v6, 0.0  ;;  %v3418_v26 = vmax.f32 %v2671_v21, 0.0 }
 0x3a3   :  { %v3944_v27 = vpack.c.bf16 %v3523_v22, %v3523_v22  ;;  %v4050_v30 = vpack.c.bf16 %v3629_v23, %v3629_v23 }
 0x3a4   :  { %v3733_v28 = vpack.c.bf16 %v3312_v25, %v3312_v25  ;;  %v3839_v29 = vpack.c.bf16 %v3418_v26, %v3418_v26 }
 0x3a5   :  { %4366 = vst.msk [vmem:[%s8773_s3 + $0x4d4] sm:$0xf] %vm4056_vm2, %v3944_v27 }
 0x3a6   :  { %4155 = vst.msk [vmem:[%s8773_s3 + $0x188] sm:$0xf] %vm4056_vm2, %v3733_v28  ;;  %v2935_v32 = vpop.f32.mrf.mxu2  ;;  %v3200_v33 = vpop.f32.mrf.mxu3 }
 0x3a7   :  { %4261 = vst.msk [vmem:[%s8773_s3 + $0x330] sm:$0xf] %vm4056_vm2, %v3839_v29  ;;  %v2936_v34 = vadd.f32 %v8380_v31, %v2935_v32  ;;  %v2407_v35 = vpop.f32.mrf.mxu0  ;;  %v2672_v36 = vpop.f32.mrf.mxu1  ;;  %v3201_v37 = vadd.f32 %v8380_v31, %v3200_v33 }
 0x3a8   :  { %v2408_v39 = vadd.f32 %v8380_v31, %v2407_v35  ;;  %v2673_v24 = vadd.f32 %v8380_v31, %v2672_v36  ;;  %4472 = vst.msk [vmem:[%s8773_s3 + $0x67c] sm:$0xf] %vm4056_vm2, %v4050_v30 }
 0x3a9   :  { %v3524_v40 = vmax.f32 %v2936_v34, 0.0  ;;  %v3630_v41 = vmax.f32 %v3201_v37, 0.0 }
 0x3aa   :  { %v3313_v42 = vmax.f32 %v2408_v39, 0.0  ;;  %v3419_v43 = vmax.f32 %v2673_v24, 0.0 }
 0x3ab   :  { %v3945_v44 = vpack.c.bf16 %v3524_v40, %v3524_v40  ;;  %v4051_v47 = vpack.c.bf16 %v3630_v41, %v3630_v41 }
 0x3ac   :  { %v3734_v45 = vpack.c.bf16 %v3313_v42, %v3313_v42  ;;  %v3840_v46 = vpack.c.bf16 %v3419_v43, %v3419_v43 }
 0x3ad   :  { %4367 = vst.msk [vmem:[%s8773_s3 + $0x4d8] sm:$0xf] %vm4056_vm2, %v3945_v44 }
 0x3ae   :  { %4156 = vst.msk [vmem:[%s8773_s3 + $0x18c] sm:$0xf] %vm4056_vm2, %v3734_v45  ;;  %v2937_v48 = vpop.f32.mrf.mxu2  ;;  %v3202_v38 = vpop.f32.mrf.mxu3 }
 0x3af   :  { %4262 = vst.msk [vmem:[%s8773_s3 + $0x334] sm:$0xf] %vm4056_vm2, %v3840_v46  ;;  %v2938_v49 = vadd.f32 %v8380_v31, %v2937_v48  ;;  %v2410_v50 = vpop.f32.mrf.mxu0  ;;  %v2675_v51 = vpop.f32.mrf.mxu1  ;;  %v3203_v53 = vadd.f32 %v8380_v31, %v3202_v38 }
 0x3b0   :  { %v2411_v54 = vadd.f32 %v8380_v31, %v2410_v50  ;;  %v2676_v55 = vadd.f32 %v8380_v31, %v2675_v51  ;;  %4473 = vst.msk [vmem:[%s8773_s3 + $0x680] sm:$0xf] %vm4056_vm2, %v4051_v47 }
 0x3b1   :  { %v3525_v56 = vmax.f32 %v2938_v49, 0.0  ;;  %v3631_v57 = vmax.f32 %v3203_v53, 0.0 }
 0x3b2   :  { %v3314_v58 = vmax.f32 %v2411_v54, 0.0  ;;  %v3420_v59 = vmax.f32 %v2676_v55, 0.0 }
 0x3b3   :  { %v3946_v60 = vpack.c.bf16 %v3525_v56, %v3525_v56  ;;  %v4052_v63 = vpack.c.bf16 %v3631_v57, %v3631_v57 }
 0x3b4   :  { %v3735_v61 = vpack.c.bf16 %v3314_v58, %v3314_v58  ;;  %v3841_v62 = vpack.c.bf16 %v3420_v59, %v3420_v59 }
 0x3b5   :  { %4368 = vst.msk [vmem:[%s8773_s3 + $0x4dc] sm:$0xf] %vm4056_vm2, %v3946_v60 }
 0x3b6   :  { %4157 = vst.msk [vmem:[%s8773_s3 + $0x190] sm:$0xf] %vm4056_vm2, %v3735_v61  ;;  %v2940_v0 = vpop.f32.mrf.mxu2  ;;  %v3205_v1 = vpop.f32.mrf.mxu3 }
 0x3b7   :  { %4263 = vst.msk [vmem:[%s8773_s3 + $0x338] sm:$0xf] %vm4056_vm2, %v3841_v62  ;;  %v2941_v2 = vadd.f32 %v8380_v31, %v2940_v0  ;;  %v2412_v52 = vpop.f32.mrf.mxu0  ;;  %v2677_v3 = vpop.f32.mrf.mxu1  ;;  %v3206_v4 = vadd.f32 %v8380_v31, %v3205_v1 }
 0x3b8   :  { %v2413_v5 = vadd.f32 %v8380_v31, %v2412_v52  ;;  %v2678_v7 = vadd.f32 %v8380_v31, %v2677_v3  ;;  %4474 = vst.msk [vmem:[%s8773_s3 + $0x684] sm:$0xf] %vm4056_vm2, %v4052_v63 }
 0x3b9   :  { %v3526_v8 = vmax.f32 %v2941_v2, 0.0  ;;  %v3632_v9 = vmax.f32 %v3206_v4, 0.0 }
 0x3ba   :  { %v3315_v10 = vmax.f32 %v2413_v5, 0.0  ;;  %v3421_v11 = vmax.f32 %v2678_v7, 0.0 }
 0x3bb   :  { %v3947_v12 = vpack.c.bf16 %v3526_v8, %v3526_v8  ;;  %v4053_v15 = vpack.c.bf16 %v3632_v9, %v3632_v9 }
 0x3bc   :  { %v3736_v13 = vpack.c.bf16 %v3315_v10, %v3315_v10  ;;  %v3842_v14 = vpack.c.bf16 %v3421_v11, %v3421_v11 }
 0x3bd   :  { %4369 = vst.msk [vmem:[%s8773_s3 + $0x4e0] sm:$0xf] %vm4056_vm2, %v3947_v12 }
 0x3be   :  { %4158 = vst.msk [vmem:[%s8773_s3 + $0x194] sm:$0xf] %vm4056_vm2, %v3736_v13  ;;  %v2942_v16 = vpop.f32.mrf.mxu2  ;;  %v3207_v17 = vpop.f32.mrf.mxu3 }
 0x3bf   :  { %4264 = vst.msk [vmem:[%s8773_s3 + $0x33c] sm:$0xf] %vm4056_vm2, %v3842_v14  ;;  %v2943_v18 = vadd.f32 %v8380_v31, %v2942_v16  ;;  %v2415_v19 = vpop.f32.mrf.mxu0  ;;  %v2680_v20 = vpop.f32.mrf.mxu1  ;;  %v3208_v6 = vadd.f32 %v8380_v31, %v3207_v17 }
 0x3c0   :  { %v2416_v21 = vadd.f32 %v8380_v31, %v2415_v19  ;;  %v2681_v22 = vadd.f32 %v8380_v31, %v2680_v20  ;;  %4475 = vst.msk [vmem:[%s8773_s3 + $0x688] sm:$0xf] %vm4056_vm2, %v4053_v15 }
 0x3c1   :  { %v3527_v23 = vmax.f32 %v2943_v18, 0.0  ;;  %v3633_v25 = vmax.f32 %v3208_v6, 0.0 }
 0x3c2   :  { %v3316_v26 = vmax.f32 %v2416_v21, 0.0  ;;  %v3422_v27 = vmax.f32 %v2681_v22, 0.0 }
 0x3c3   :  { %v3948_v28 = vpack.c.bf16 %v3527_v23, %v3527_v23  ;;  %v4054_v32 = vpack.c.bf16 %v3633_v25, %v3633_v25 }
 0x3c4   :  { %v3737_v29 = vpack.c.bf16 %v3316_v26, %v3316_v26  ;;  %v3843_v30 = vpack.c.bf16 %v3422_v27, %v3422_v27 }
 0x3c5   :  { %4370 = vst.msk [vmem:[%s8773_s3 + $0x4e4] sm:$0xf] %vm4056_vm2, %v3948_v28 }
 0x3c6   :  { %4159 = vst.msk [vmem:[%s8773_s3 + $0x198] sm:$0xf] %vm4056_vm2, %v3737_v29  ;;  %v2945_v33 = vpop.f32.mrf.mxu2  ;;  %v3210_v34 = vpop.f32.mrf.mxu3 }
 0x3c7   :  { %4265 = vst.msk [vmem:[%s8773_s3 + $0x340] sm:$0xf] %vm4056_vm2, %v3843_v30  ;;  %v2946_v35 = vadd.f32 %v8380_v31, %v2945_v33  ;;  %v2417_v36 = vpop.f32.mrf.mxu0  ;;  %v2682_v37 = vpop.f32.mrf.mxu1  ;;  %v3211_v39 = vadd.f32 %v8380_v31, %v3210_v34 }
 0x3c8   :  { %v2418_v24 = vadd.f32 %v8380_v31, %v2417_v36  ;;  %v2683_v40 = vadd.f32 %v8380_v31, %v2682_v37  ;;  %4476 = vst.msk [vmem:[%s8773_s3 + $0x68c] sm:$0xf] %vm4056_vm2, %v4054_v32 }
 0x3c9   :  { %v3528_v41 = vmax.f32 %v2946_v35, 0.0  ;;  %v3634_v42 = vmax.f32 %v3211_v39, 0.0 }
 0x3ca   :  { %v3317_v43 = vmax.f32 %v2418_v24, 0.0  ;;  %v3423_v44 = vmax.f32 %v2683_v40, 0.0 }
 0x3cb   :  { %v3949_v45 = vpack.c.bf16 %v3528_v41, %v3528_v41  ;;  %v4055_v48 = vpack.c.bf16 %v3634_v42, %v3634_v42 }
 0x3cc   :  { %v3738_v46 = vpack.c.bf16 %v3317_v43, %v3317_v43  ;;  %v3844_v47 = vpack.c.bf16 %v3423_v44, %v3423_v44 }
 0x3cd   :  { %4371 = vst.msk [vmem:[%s8773_s3 + $0x4e8] sm:$0xf] %vm4056_vm2, %v3949_v45 }
 0x3ce   :  { %4160 = vst.msk [vmem:[%s8773_s3 + $0x19c] sm:$0xf] %vm4056_vm2, %v3738_v46  ;;  %v2947_v38 = vpop.f32.mrf.mxu2  ;;  %v3212_v49 = vpop.f32.mrf.mxu3 }
 0x3cf   :  { %4266 = vst.msk [vmem:[%s8773_s3 + $0x344] sm:$0xf] %vm4056_vm2, %v3844_v47  ;;  %v2948_v50 = vadd.f32 %v8380_v31, %v2947_v38  ;;  %v2420_v51 = vpop.f32.mrf.mxu0  ;;  %v2685_v53 = vpop.f32.mrf.mxu1 }
 0x3d0   :  { %v2421_v54 = vadd.f32 %v8380_v31, %v2420_v51  ;;  %v2686_v55 = vadd.f32 %v8380_v31, %v2685_v53  ;;  %4478 = vst.msk [vmem:[%s8773_s3 + $0x690] sm:$0x1] %vm4477_vm3, %v4055_v48 }
 0x3d1   :  { %v3529_v56 = vmax.f32 %v2948_v50, 0.0 }
 0x3d2   :  { %v3318_v57 = vmax.f32 %v2421_v54, 0.0  ;;  %v3424_v58 = vmax.f32 %v2686_v55, 0.0 }
 0x3d3   :  { %v3950_v59 = vpack.c.bf16 %v3529_v56, %v3529_v56 }
 0x3d4   :  { %v3739_v60 = vpack.c.bf16 %v3318_v57, %v3318_v57  ;;  %v3845_v61 = vpack.c.bf16 %v3424_v58, %v3424_v58 }
 0x3d5   :  { %4372 = vst.msk [vmem:[%s8773_s3 + $0x4ec] sm:$0xf] %vm4056_vm2, %v3950_v59 }
 0x3d6   :  { %4161 = vst.msk [vmem:[%s8773_s3 + $0x1a0] sm:$0xf] %vm4056_vm2, %v3739_v60  ;;  %v2950_v62 = vpop.f32.mrf.mxu2 }
 0x3d7   :  { %4267 = vst.msk [vmem:[%s8773_s3 + $0x348] sm:$0xf] %vm4056_vm2, %v3845_v61  ;;  %v2951_v63 = vadd.f32 %v8380_v31, %v2950_v62  ;;  %v2422_v0 = vpop.f32.mrf.mxu0  ;;  %v2687_v1 = vpop.f32.mrf.mxu1 }
 0x3d8   :  { %v2423_v2 = vadd.f32 %v8380_v31, %v2422_v0  ;;  %v2688_v52 = vadd.f32 %v8380_v31, %v2687_v1 }
 0x3d9   :  { %v3530_v3 = vmax.f32 %v2951_v63, 0.0 }
 0x3da   :  { %v3319_v4 = vmax.f32 %v2423_v2, 0.0  ;;  %v3425_v5 = vmax.f32 %v2688_v52, 0.0 }
 0x3db   :  { %v3951_v7 = vpack.c.bf16 %v3530_v3, %v3530_v3 }
 0x3dc   :  { %v3740_v8 = vpack.c.bf16 %v3319_v4, %v3319_v4  ;;  %v3846_v9 = vpack.c.bf16 %v3425_v5, %v3425_v5 }
 0x3dd   :  { %4373 = vst.msk [vmem:[%s8773_s3 + $0x4f0] sm:$0xf] %vm4056_vm2, %v3951_v7 }
 0x3de   :  { %4162 = vst.msk [vmem:[%s8773_s3 + $0x1a4] sm:$0xf] %vm4056_vm2, %v3740_v8  ;;  %v2952_v10 = vpop.f32.mrf.mxu2 }
 0x3df   :  { %4268 = vst.msk [vmem:[%s8773_s3 + $0x34c] sm:$0xf] %vm4056_vm2, %v3846_v9  ;;  %v2953_v11 = vadd.f32 %v8380_v31, %v2952_v10 }
 0x3e1   :  { %v3531_v12 = vmax.f32 %v2953_v11, 0.0 }
 0x3e3   :  { %v3952_v13 = vpack.c.bf16 %v3531_v12, %v3531_v12 }
 0x3e5   :  { %4374 = vst.msk [vmem:[%s8773_s3 + $0x4f4] sm:$0xf] %vm4056_vm2, %v3952_v13 }

// kernel: neural_network2_forward.5
= control target key start
LH: loop header
LB: loop body
LE: loop exit
PB: predicated region body
PF: predicated region fallthrough
CT: control target
= control target key end

     0   :  { %vm1113_vm0 = vcmask 261120   ;;  %vm2241_vm1 = vcmask 257024   ;;  %s4948_s1 = inlined_call_operand.vmem [shape: bf16[288,32], index: 1, kind: input, shape index: {}]   ;;  %s4949_s0 = inlined_call_operand.vmem [shape: bf16[800,288], index: 0, kind: input, shape index: {}]   ;;  %s4950_s2 = inlined_call_operand.vmem [shape: f32[1,32], index: 2, kind: input, shape index: {}]   ;;  %s4951_s3 = inlined_call_operand.vmem [shape: bf16[800,32], index: 3, kind: output, shape index: {}]  }
   0x1   :  { %v3225_v0 = vld [vmem:[%s4948_s1 + $0x38] sm:$0xff]  ;;  %v3286_v2 = vld [vmem:[%s4948_s1 + $0x88] sm:$0xff]  ;;  %v3224_v3 = vld [vmem:[%s4948_s1 + $0x30] sm:$0xff] }
   0x2   :  { %v3233_v1 = vld [vmem:[%s4948_s1 + $0x78] sm:$0xff]  ;;  %1264 = vmatpush.bf16.msra.mxu0 %v3225_v0  ;;  %3236 = vmatpush.bf16.msra.mxu3 %v3225_v0  ;;  %v3232_v4 = vld [vmem:[%s4948_s1 + $0x70] sm:$0xff]  ;;  %v3298_v5 = vld [vmem:[%s4948_s1 + $0x80] sm:$0xff] }
   0x3   :  { %1523 = vmatpush.bf16.msra.mxu1 %v3233_v1  ;;  %1788 = vmatpush.bf16.msra.mxu2 %v3286_v2  ;;  %v2356_v6 = vld [vmem:[%s4949_s0 + $0x8] sm:$0xf]  ;;  %v3070_v7 = vld [vmem:[%s4949_s0 + $0x10] sm:$0xf0]  ;;  %v3222_v11 = vld [vmem:[%s4948_s1 + $0x20] sm:$0xff] }
   0x4   :  { %v2357_v8 = vor.u32 %v3070_v7, %v2356_v6  ;;  %v3223_v9 = vld [vmem:[%s4948_s1 + $0x28] sm:$0xff]  ;;  %v3230_v12 = vld [vmem:[%s4948_s1 + $0x60] sm:$0xff]  ;;  %v3221_v13 = vld [vmem:[%s4948_s1 + $0x18] sm:$0xff] }
   0x5   :  { %v3231_v10 = vld [vmem:[%s4948_s1 + $0x68] sm:$0xff]  ;;  %v3229_v14 = vld [vmem:[%s4948_s1 + $0x58] sm:$0xff]  ;;  %v3220_v15 = vld [vmem:[%s4948_s1 + $0x10] sm:$0xff] }
   0x6   :  { %1265 = vmatpush.bf16.msra.mxu0 %v3224_v3  ;;  %3237 = vmatpush.bf16.msra.mxu3 %v3224_v3  ;;  %v3228_v16 = vld [vmem:[%s4948_s1 + $0x50] sm:$0xff]  ;;  %v2368_v17 = vld [vmem:[%s4949_s0 + $0x20] sm:$0xf]  ;;  %v3073_v18 = vld [vmem:[%s4949_s0 + $0x28] sm:$0xf0] }
   0x7   :  { %1524 = vmatpush.bf16.msra.mxu1 %v3232_v4  ;;  %1789 = vmatpush.bf16.msra.mxu2 %v3298_v5  ;;  %v2369_v19 = vor.u32 %v3073_v18, %v2368_v17  ;;  %v3219_v20 = vld [vmem:[%s4948_s1 + $0x8] sm:$0xff]  ;;  %v3218_v22 = vld [vmem:[%s4948_s1] sm:$0xff]  ;;  %v2804_v26 = vld [vmem:[%s4949_s0 + $0x390] sm:$0xf] }
   0x8   :  { %v3227_v21 = vld [vmem:[%s4948_s1 + $0x48] sm:$0xff]  ;;  %v3226_v23 = vld [vmem:[%s4948_s1 + $0x40] sm:$0xff]  ;;  %v3183_v27 = vld [vmem:[%s4949_s0 + $0x398] sm:$0xf0] }
   0x9   :  { %v2348_v24 = vld [vmem:[%s4949_s0] sm:$0xf]  ;;  %v3069_v25 = vld [vmem:[%s4949_s0 + $0x8] sm:$0xf0]  ;;  %v3068_v28 = vld [vmem:[%s4949_s0 + $0x4] sm:$0xf]  ;;  %v2805_v31 = vor.u32 %v3183_v27, %v2804_v26 }
   0xa   :  { %3018 = vmatmul.msk.bf16.vlgmr.msra.gmra.mxu2 %vm1113_vm0, %v2357_v8  ;;  %1266 = vmatpush.bf16.msra.mxu0 %v3223_v9  ;;  %v2350_v29 = vld [vmem:[%s4949_s0 + $0xc] sm:$0xf0]  ;;  %v2349_v30 = vor.u32 %v3069_v25, %v2348_v24  ;;  %v2380_v33 = vld [vmem:[%s4949_s0 + $0x38] sm:$0xf]  ;;  %v3076_v34 = vld [vmem:[%s4949_s0 + $0x40] sm:$0xf0] }
   0xb   :  { %3238 = vmatpush.bf16.msra.mxu3 %v3223_v9  ;;  %1525 = vmatpush.bf16.msra.mxu1 %v3231_v10  ;;  %v2353_v32 = vor.u32 %v3068_v28, %v2350_v29  ;;  %v2381_v35 = vor.u32 %v3076_v34, %v2380_v33  ;;  %v2360_v36 = vld [vmem:[%s4949_s0 + $0x18] sm:$0xf]  ;;  %v3072_v37 = vld [vmem:[%s4949_s0 + $0x20] sm:$0xf0]  ;;  %v2816_v38 = vld [vmem:[%s4949_s0 + $0x3a8] sm:$0xf] }
   0xc   :  { %v3186_v39 = vld [vmem:[%s4949_s0 + $0x3b0] sm:$0xf0]  ;;  %v3071_v40 = vld [vmem:[%s4949_s0 + $0x1c] sm:$0xf]  ;;  %v2362_v41 = vld [vmem:[%s4949_s0 + $0x24] sm:$0xf0]  ;;  %v2361_v42 = vor.u32 %v3072_v37, %v2360_v36 }
   0xd   :  { %v2817_v43 = vor.u32 %v3186_v39, %v2816_v38  ;;  %v2365_v44 = vor.u32 %v3071_v40, %v2362_v41  ;;  %v2392_v45 = vld [vmem:[%s4949_s0 + $0x50] sm:$0xf]  ;;  %v3079_v46 = vld [vmem:[%s4949_s0 + $0x58] sm:$0xf0]  ;;  %v2828_v50 = vld [vmem:[%s4949_s0 + $0x3c0] sm:$0xf] }
   0xe   :  { %1267 = vmatpush.bf16.msra.mxu0 %v3222_v11  ;;  %v2393_v47 = vor.u32 %v3079_v46, %v2392_v45  ;;  %v2372_v48 = vld [vmem:[%s4949_s0 + $0x30] sm:$0xf]  ;;  %v3075_v49 = vld [vmem:[%s4949_s0 + $0x38] sm:$0xf0]  ;;  %v3189_v51 = vld [vmem:[%s4949_s0 + $0x3c8] sm:$0xf0] }
   0xf   :  { %3239 = vmatpush.bf16.msra.mxu3 %v3222_v11  ;;  %1526 = vmatpush.bf16.msra.mxu1 %v3230_v12  ;;  %v3074_v52 = vld [vmem:[%s4949_s0 + $0x34] sm:$0xf]  ;;  %v2374_v53 = vld [vmem:[%s4949_s0 + $0x3c] sm:$0xf0]  ;;  %v2373_v54 = vor.u32 %v3075_v49, %v2372_v48  ;;  %v2829_v55 = vor.u32 %v3189_v51, %v2828_v50  ;;  %v2404_v57 = vld [vmem:[%s4949_s0 + $0x68] sm:$0xf] }
  0x10   :  { %v2377_v56 = vor.u32 %v3074_v52, %v2374_v53  ;;  %v3082_v58 = vld [vmem:[%s4949_s0 + $0x70] sm:$0xf0]  ;;  %v2384_v60 = vld [vmem:[%s4949_s0 + $0x48] sm:$0xf]  ;;  %v2840_v62 = vld [vmem:[%s4949_s0 + $0x3d8] sm:$0xf] }
  0x11   :  { %v2405_v59 = vor.u32 %v3082_v58, %v2404_v57  ;;  %v3078_v61 = vld [vmem:[%s4949_s0 + $0x50] sm:$0xf0]  ;;  %v3192_v63 = vld [vmem:[%s4949_s0 + $0x3e0] sm:$0xf0]  ;;  %v3077_v0 = vld [vmem:[%s4949_s0 + $0x4c] sm:$0xf] }
  0x12   :  { %1268 = vmatpush.bf16.msra.mxu0 %v3221_v13  ;;  %v2841_v3 = vor.u32 %v3192_v63, %v2840_v62  ;;  %v3085_v6 = vld [vmem:[%s4949_s0 + $0x88] sm:$0xf0]  ;;  %v2396_v8 = vld [vmem:[%s4949_s0 + $0x60] sm:$0xf]  ;;  %v3195_v11 = vld [vmem:[%s4949_s0 + $0x3f8] sm:$0xf0] }
  0x13   :  { %3240 = vmatpush.bf16.msra.mxu3 %v3221_v13  ;;  %1527 = vmatpush.bf16.msra.mxu1 %v3229_v14  ;;  %v3081_v9 = vld [vmem:[%s4949_s0 + $0x68] sm:$0xf0]  ;;  %v2398_v13 = vld [vmem:[%s4949_s0 + $0x6c] sm:$0xf0]  ;;  %v2428_v17 = vld [vmem:[%s4949_s0 + $0x98] sm:$0xf] }
  0x14   :  { %v3088_v18 = vld [vmem:[%s4949_s0 + $0xa0] sm:$0xf0]  ;;  %v3083_v24 = vld [vmem:[%s4949_s0 + $0x7c] sm:$0xf]  ;;  %v2410_v25 = vld [vmem:[%s4949_s0 + $0x84] sm:$0xf0] }
  0x15   :  { %v2413_v28 = vor.u32 %v3083_v24, %v2410_v25  ;;  %v2440_v29 = vld [vmem:[%s4949_s0 + $0xb0] sm:$0xf]  ;;  %v3087_v33 = vld [vmem:[%s4949_s0 + $0x98] sm:$0xf0]  ;;  %v2876_v34 = vld [vmem:[%s4949_s0 + $0x420] sm:$0xf] }
  0x16   :  { %1269 = vmatpush.bf16.msra.mxu0 %v3220_v15  ;;  %v3086_v36 = vld [vmem:[%s4949_s0 + $0x94] sm:$0xf]  ;;  %v2422_v37 = vld [vmem:[%s4949_s0 + $0x9c] sm:$0xf0]  ;;  %v2452_v41 = vld [vmem:[%s4949_s0 + $0xc8] sm:$0xf] }
  0x17   :  { %3241 = vmatpush.bf16.msra.mxu3 %v3220_v15  ;;  %1528 = vmatpush.bf16.msra.mxu1 %v3228_v16  ;;  %v2425_v40 = vor.u32 %v3086_v36, %v2422_v37  ;;  %v3090_v45 = vld [vmem:[%s4949_s0 + $0xb0] sm:$0xf0]  ;;  %v2888_v46 = vld [vmem:[%s4949_s0 + $0x438] sm:$0xf]  ;;  %v3089_v48 = vld [vmem:[%s4949_s0 + $0xac] sm:$0xf] }
  0x18   :  { %v2434_v49 = vld [vmem:[%s4949_s0 + $0xb4] sm:$0xf0]  ;;  %v3555_v58 = vld [vmem:[%s4950_s2] ss:$0 sm:$0xff]  ;;  %v3207_v62 = vld [vmem:[%s4949_s0 + $0x458] sm:$0xf0] }
  0x19   :  { %v2437_v53 = vor.u32 %v3089_v48, %v2434_v49  ;;  %v3092_v63 = vld [vmem:[%s4949_s0 + $0xc4] sm:$0xf]  ;;  %v3210_v25 = vld [vmem:[%s4949_s0 + $0x470] sm:$0xf0] }
  0x1a   :  { %3019 = vmatmul.msk.bf16.gmra.mxu2 %vm1113_vm0, %v2369_v19  ;;  %1270 = vmatpush.bf16.msra.mxu0 %v3219_v20  ;;  %v2429_v19 = vor.u32 %v3088_v18, %v2428_v17 }
  0x1b   :  { %3242 = vmatpush.bf16.msra.mxu3 %v3219_v20  ;;  %1529 = vmatpush.bf16.msra.mxu1 %v3227_v21  ;;  %v2408_v20 = vld [vmem:[%s4949_s0 + $0x78] sm:$0xf] }
  0x1e   :  { %1271 = vmatpush.bf16.msra.mxu0 %v3218_v22 }
  0x1f   :  { %3243 = vmatpush.bf16.msra.mxu3 %v3218_v22  ;;  %1530 = vmatpush.bf16.msra.mxu1 %v3226_v23  ;;  %v2864_v22 = vld [vmem:[%s4949_s0 + $0x408] sm:$0xf] }
  0x21   :  { %1272 = vmatmul.bf16.vlgmr.msra.gmra.mxu0 %v2349_v30  ;;  %v3091_v30 = vld [vmem:[%s4949_s0 + $0xb8] sm:$0xf0] }
  0x22   :  { %1462 = vmatmul.bf16.vlgmr.msra.gmra.mxu3 %v2805_v31  ;;  %1531 = vmatmul.bf16.vlgmr.msra.gmra.mxu1 %v2353_v32  ;;  %v2441_v31 = vor.u32 %v3091_v30, %v2440_v29  ;;  %v2420_v32 = vld [vmem:[%s4949_s0 + $0x90] sm:$0xf] }
  0x23   :  { %3244 = vmatpush.bf16.msrb.mxu3 %v3233_v1  ;;  %v2386_v1 = vld [vmem:[%s4949_s0 + $0x54] sm:$0xf0]  ;;  %v2421_v38 = vor.u32 %v3087_v33, %v2420_v32 }
  0x27   :  { %3245 = vmatpush.bf16.msrb.mxu3 %v3232_v4  ;;  %v2389_v4 = vor.u32 %v3077_v0, %v2386_v1  ;;  %v2446_v0 = vld [vmem:[%s4949_s0 + $0xcc] sm:$0xf0] }
  0x2a   :  { %3020 = vmatmul.msk.bf16.gmra.mxu2 %vm1113_vm0, %v2381_v35  ;;  %v3201_v35 = vld [vmem:[%s4949_s0 + $0x428] sm:$0xf0] }
  0x2b   :  { %3246 = vmatpush.bf16.msrb.mxu3 %v3231_v10  ;;  %v2852_v10 = vld [vmem:[%s4949_s0 + $0x3f0] sm:$0xf]  ;;  %v2877_v39 = vor.u32 %v3201_v35, %v2876_v34 }
  0x2c   :  { %v2853_v15 = vor.u32 %v3195_v11, %v2852_v10  ;;  %v2476_v10 = vld [vmem:[%s4949_s0 + $0xf8] sm:$0xf]  ;;  %v3100_v11 = vld [vmem:[%s4949_s0 + $0x100] sm:$0xf0] }
  0x2f   :  { %3247 = vmatpush.bf16.msrb.mxu3 %v3230_v12  ;;  %v3080_v12 = vld [vmem:[%s4949_s0 + $0x64] sm:$0xf] }
  0x31   :  { %1277 = vmatmul.bf16.gmra.mxu0 %v2361_v42  ;;  %v3094_v42 = vld [vmem:[%s4949_s0 + $0xd0] sm:$0xf0] }
  0x32   :  { %1467 = vmatmul.bf16.gmra.mxu3 %v2817_v43  ;;  %1536 = vmatmul.bf16.gmra.mxu1 %v2365_v44  ;;  %v2453_v43 = vor.u32 %v3094_v42, %v2452_v41  ;;  %v2432_v44 = vld [vmem:[%s4949_s0 + $0xa8] sm:$0xf]  ;;  %v3103_v41 = vld [vmem:[%s4949_s0 + $0x118] sm:$0xf0] }
  0x33   :  { %3248 = vmatpush.bf16.msrb.mxu3 %v3229_v14  ;;  %v2397_v14 = vor.u32 %v3081_v9, %v2396_v8  ;;  %v2433_v51 = vor.u32 %v3090_v45, %v2432_v44 }
  0x37   :  { %3249 = vmatpush.bf16.msrb.mxu3 %v3228_v16  ;;  %v2401_v16 = vor.u32 %v3080_v12, %v2398_v13 }
  0x3a   :  { %3021 = vmatmul.msk.bf16.gmra.mxu2 %vm1113_vm0, %v2393_v47  ;;  %v3204_v47 = vld [vmem:[%s4949_s0 + $0x440] sm:$0xf0] }
  0x3b   :  { %3250 = vmatpush.bf16.msrb.mxu3 %v3227_v21  ;;  %v3084_v21 = vld [vmem:[%s4949_s0 + $0x80] sm:$0xf0]  ;;  %v2889_v52 = vor.u32 %v3204_v47, %v2888_v46 }
  0x3c   :  { %v2409_v26 = vor.u32 %v3084_v21, %v2408_v20  ;;  %v2456_v21 = vld [vmem:[%s4949_s0 + $0xd8] sm:$0xf] }
  0x3f   :  { %3251 = vmatpush.bf16.msrb.mxu3 %v3226_v23  ;;  %v3198_v23 = vld [vmem:[%s4949_s0 + $0x410] sm:$0xf0] }
  0x40   :  { %v2865_v27 = vor.u32 %v3198_v23, %v2864_v22  ;;  %v3096_v22 = vld [vmem:[%s4949_s0 + $0xe0] sm:$0xf0]  ;;  %v2912_v23 = vld [vmem:[%s4949_s0 + $0x468] sm:$0xf] }
  0x41   :  { %1282 = vmatmul.bf16.gmra.mxu0 %v2373_v54  ;;  %v2464_v54 = vld [vmem:[%s4949_s0 + $0xe0] sm:$0xf]  ;;  %v2913_v33 = vor.u32 %v3210_v25, %v2912_v23  ;;  %v3216_v23 = vld [vmem:[%s4949_s0 + $0x4a0] sm:$0xf0]  ;;  %v2482_v25 = vld [vmem:[%s4949_s0 + $0x114] sm:$0xf0] }
  0x42   :  { %1472 = vmatmul.bf16.gmra.mxu3 %v2829_v55  ;;  %1541 = vmatmul.bf16.gmra.mxu1 %v2377_v56  ;;  %v3097_v55 = vld [vmem:[%s4949_s0 + $0xe8] sm:$0xf0] }
  0x43   :  { %3252 = vmatpush.bf16.msra.mxu3 %v3286_v2  ;;  %v2385_v2 = vor.u32 %v3078_v61, %v2384_v60  ;;  %v2465_v57 = vor.u32 %v3097_v55, %v2464_v54  ;;  %v3093_v60 = vld [vmem:[%s4949_s0 + $0xc8] sm:$0xf0]  ;;  %v2900_v61 = vld [vmem:[%s4949_s0 + $0x450] sm:$0xf] }
  0x44   :  { %v3213_v55 = vld [vmem:[%s4949_s0 + $0x488] sm:$0xf0] }
  0x47   :  { %3253 = vmatpush.bf16.msra.mxu3 %v3298_v5  ;;  %v2416_v5 = vld [vmem:[%s4949_s0 + $0x80] sm:$0xf] }
  0x48   :  { %v2417_v7 = vor.u32 %v3085_v6, %v2416_v5  ;;  %v2449_v5 = vor.u32 %v3092_v63, %v2446_v0 }
  0x4a   :  { %3022 = vmatmul.msk.bf16.gmra.mxu2 %vm1113_vm0, %v2405_v59  ;;  %v2444_v59 = vld [vmem:[%s4949_s0 + $0xc0] sm:$0xf] }
  0x51   :  { %1287 = vmatmul.bf16.gmra.mxu0 %v2385_v2  ;;  %v2445_v2 = vor.u32 %v3093_v60, %v2444_v59 }
  0x52   :  { %1477 = vmatmul.bf16.gmra.mxu3 %v2841_v3  ;;  %1546 = vmatmul.bf16.gmra.mxu1 %v2389_v4  ;;  %v2901_v4 = vor.u32 %v3207_v62, %v2900_v61 }
  0x5a   :  { %3023 = vmatmul.msk.bf16.gmra.mxu2 %vm1113_vm0, %v2417_v7 }
  0x61   :  { %1292 = vmatmul.bf16.gmra.mxu0 %v2397_v14 }
  0x62   :  { %1482 = vmatmul.bf16.gmra.mxu3 %v2853_v15  ;;  %1551 = vmatmul.bf16.gmra.mxu1 %v2401_v16  ;;  %v2477_v16 = vor.u32 %v3100_v11, %v2476_v10 }
  0x6a   :  { %3024 = vmatmul.msk.bf16.gmra.mxu2 %vm1113_vm0, %v2429_v19 }
  0x71   :  { %1297 = vmatmul.bf16.gmra.mxu0 %v2409_v26  ;;  %v3095_v26 = vld [vmem:[%s4949_s0 + $0xdc] sm:$0xf] }
  0x72   :  { %1487 = vmatmul.bf16.gmra.mxu3 %v2865_v27  ;;  %1556 = vmatmul.bf16.gmra.mxu1 %v2413_v28  ;;  %v2458_v27 = vld [vmem:[%s4949_s0 + $0xe4] sm:$0xf0] }
  0x73   :  { %v2461_v34 = vor.u32 %v3095_v26, %v2458_v27 }
  0x7a   :  { %3025 = vmatmul.msk.bf16.gmra.mxu2 %vm1113_vm0, %v2441_v31  ;;  %v2457_v31 = vor.u32 %v3096_v22, %v2456_v21  ;;  %v2936_v21 = vld [vmem:[%s4949_s0 + $0x498] sm:$0xf] }
  0x81   :  { %1302 = vmatmul.bf16.gmra.mxu0 %v2421_v38 }
  0x82   :  { %1492 = vmatmul.bf16.gmra.mxu3 %v2877_v39  ;;  %1561 = vmatmul.bf16.gmra.mxu1 %v2425_v40  ;;  %v2488_v40 = vld [vmem:[%s4949_s0 + $0x110] sm:$0xf] }
  0x83   :  { %v2489_v46 = vor.u32 %v3103_v41, %v2488_v40  ;;  %v3109_v40 = vld [vmem:[%s4949_s0 + $0x148] sm:$0xf0] }
  0x8a   :  { %3026 = vmatmul.msk.bf16.gmra.mxu2 %vm1113_vm0, %v2453_v43 }
  0x8d   :  { %v1791_v50 = vpop.f32.mrf.mxu2 }
  0x91   :  { %1307 = vmatmul.bf16.gmra.mxu0 %v2433_v51  ;;  %v2468_v51 = vld [vmem:[%s4949_s0 + $0xf0] sm:$0xf] }
  0x92   :  { %1497 = vmatmul.bf16.gmra.mxu3 %v2889_v52  ;;  %1566 = vmatmul.bf16.gmra.mxu1 %v2437_v53  ;;  %v3099_v52 = vld [vmem:[%s4949_s0 + $0xf8] sm:$0xf0]  ;;  %v2924_v53 = vld [vmem:[%s4949_s0 + $0x480] sm:$0xf] }
  0x93   :  { %v2469_v62 = vor.u32 %v3099_v52, %v2468_v51  ;;  %v2925_v0 = vor.u32 %v3213_v55, %v2924_v53  ;;  %v2492_v51 = vld [vmem:[%s4949_s0 + $0x120] sm:$0xf]  ;;  %v3105_v52 = vld [vmem:[%s4949_s0 + $0x128] sm:$0xf0]  ;;  %v3104_v53 = vld [vmem:[%s4949_s0 + $0x124] sm:$0xf] }
  0x94   :  { %v2494_v55 = vld [vmem:[%s4949_s0 + $0x12c] sm:$0xf0] }
  0x95   :  { %v1793_v56 = vpop.f32.mrf.mxu2 }
  0x9a   :  { %3027 = vmatmul.msk.bf16.gmra.mxu2 %vm1113_vm0, %v2465_v57  ;;  %v2470_v57 = vld [vmem:[%s4949_s0 + $0xfc] sm:$0xf0] }
  0x9d   :  { %v1796_v1 = vpop.f32.mrf.mxu2 }
  0x9e   :  { %v1273_v3 = vpop.f32.mrf.mxu0 }
  0x9f   :  { %v1274_v6 = vadd.f32 %v3555_v58, %v1273_v3  ;;  %v1532_v7 = vpop.f32.mrf.mxu1 }
  0xa1   :  { %v1533_v8 = vadd.f32 %v1532_v7, %v1274_v6  ;;  %1312 = vmatmul.bf16.gmra.mxu0 %v2445_v2  ;;  %v2500_v7 = vld [vmem:[%s4949_s0 + $0x128] sm:$0xf] }
  0xa2   :  { %1502 = vmatmul.bf16.gmra.mxu3 %v2901_v4  ;;  %1571 = vmatmul.bf16.gmra.mxu1 %v2449_v5 }
  0xa3   :  { %v1792_v9 = vadd.f32 %v1791_v50, %v1533_v8  ;;  %v3106_v8 = vld [vmem:[%s4949_s0 + $0x130] sm:$0xf0] }
  0xa5   :  { %v2041_v12 = vmax.f32 %v1792_v9, 0.0  ;;  %v3583_v13 = vpop.f32.mrf.mxu3  ;;  %v1798_v14 = vpop.f32.mrf.mxu2 }
  0xa6   :  { %v1275_v15 = vpop.f32.mrf.mxu0 }
  0xa7   :  { %v2141_v17 = vpack.c.bf16 %v2041_v12, %v2041_v12  ;;  %v1276_v18 = vadd.f32 %v3555_v58, %v1275_v15  ;;  %v1534_v19 = vpop.f32.mrf.mxu1 }
  0xa9   :  { %2242 = vst.msk [vmem:[%s4951_s3] sm:$0xf] %vm2241_vm1, %v2141_v17  ;;  %v1535_v20 = vadd.f32 %v1534_v19, %v1276_v18  ;;  %v2480_v19 = vld [vmem:[%s4949_s0 + $0x108] sm:$0xf] }
  0xaa   :  { %3028 = vmatmul.msk.bf16.gmra.mxu2 %vm1113_vm0, %v2477_v16 }
  0xab   :  { %v1794_v24 = vadd.f32 %v1793_v56, %v1535_v20  ;;  %v3098_v56 = vld [vmem:[%s4949_s0 + $0xf4] sm:$0xf] }
  0xac   :  { %v3102_v20 = vld [vmem:[%s4949_s0 + $0x110] sm:$0xf0] }
  0xad   :  { %v2042_v28 = vmax.f32 %v1794_v24, 0.0  ;;  %v3609_v29 = vpop.f32.mrf.mxu3  ;;  %v1801_v30 = vpop.f32.mrf.mxu2  ;;  %v3101_v24 = vld [vmem:[%s4949_s0 + $0x10c] sm:$0xf] }
  0xae   :  { %v1278_v32 = vpop.f32.mrf.mxu0 }
  0xaf   :  { %v2142_v35 = vpack.c.bf16 %v2042_v28, %v2042_v28  ;;  %v1279_v36 = vadd.f32 %v3555_v58, %v1278_v32  ;;  %v1537_v37 = vpop.f32.mrf.mxu1  ;;  %v2937_v32 = vor.u32 %v3216_v23, %v2936_v21  ;;  %v2504_v21 = vld [vmem:[%s4949_s0 + $0x138] sm:$0xf]  ;;  %v3107_v23 = vld [vmem:[%s4949_s0 + $0x13c] sm:$0xf] }
  0xb1   :  { %2243 = vst.msk [vmem:[%s4951_s3 + $0x4] sm:$0xf] %vm2241_vm1, %v2142_v35  ;;  %v1538_v38 = vadd.f32 %v1537_v37, %v1279_v36  ;;  %1317 = vmatmul.bf16.gmra.mxu0 %v2457_v31 }
  0xb2   :  { %1507 = vmatmul.bf16.gmra.mxu3 %v2913_v33  ;;  %1576 = vmatmul.bf16.gmra.mxu1 %v2461_v34  ;;  %v2485_v33 = vor.u32 %v3101_v24, %v2482_v25  ;;  %v2506_v25 = vld [vmem:[%s4949_s0 + $0x144] sm:$0xf0] }
  0xb3   :  { %v1797_v39 = vadd.f32 %v1796_v1, %v1538_v38  ;;  %v2473_v1 = vor.u32 %v3098_v56, %v2470_v57  ;;  %v3182_v56 = vld [vmem:[%s4949_s0 + $0x394] sm:$0xf]  ;;  %v2806_v57 = vld [vmem:[%s4949_s0 + $0x39c] sm:$0xf0] }
  0xb5   :  { %v2043_v42 = vmax.f32 %v1797_v39, 0.0  ;;  %v3622_v43 = vpop.f32.mrf.mxu3  ;;  %v1803_v44 = vpop.f32.mrf.mxu2  ;;  %v2512_v39 = vld [vmem:[%s4949_s0 + $0x140] sm:$0xf] }
  0xb6   :  { %v1280_v45 = vpop.f32.mrf.mxu0 }
  0xb7   :  { %v2143_v47 = vpack.c.bf16 %v2043_v42, %v2043_v42  ;;  %v1281_v48 = vadd.f32 %v3555_v58, %v1280_v45  ;;  %v1539_v49 = vpop.f32.mrf.mxu1 }
  0xb9   :  { %2244 = vst.msk [vmem:[%s4951_s3 + $0x8] sm:$0xf] %vm2241_vm1, %v2143_v47  ;;  %v1540_v50 = vadd.f32 %v1539_v49, %v1281_v48 }
  0xba   :  { %3029 = vmatmul.msk.bf16.gmra.mxu2 %vm1113_vm0, %v2489_v46  ;;  %v2513_v46 = vor.u32 %v3109_v40, %v2512_v39 }
  0xbb   :  { %v1799_v54 = vadd.f32 %v1798_v14, %v1540_v50  ;;  %v2501_v14 = vor.u32 %v3106_v8, %v2500_v7  ;;  %v2524_v8 = vld [vmem:[%s4949_s0 + $0x158] sm:$0xf] }
  0xbd   :  { %v2044_v59 = vmax.f32 %v1799_v54, 0.0  ;;  %v3648_v60 = vpop.f32.mrf.mxu3  ;;  %v1806_v61 = vpop.f32.mrf.mxu2 }
  0xbe   :  { %v1283_v63 = vpop.f32.mrf.mxu0 }
  0xbf   :  { %v2144_v2 = vpack.c.bf16 %v2044_v59, %v2044_v59  ;;  %v1284_v3 = vadd.f32 %v3555_v58, %v1283_v63  ;;  %v1542_v4 = vpop.f32.mrf.mxu1  ;;  %v2493_v63 = vor.u32 %v3105_v52, %v2492_v51 }
  0xc1   :  { %2245 = vst.msk [vmem:[%s4951_s3 + $0xc] sm:$0xf] %vm2241_vm1, %v2144_v2  ;;  %v1543_v5 = vadd.f32 %v1542_v4, %v1284_v3  ;;  %1322 = vmatmul.bf16.gmra.mxu0 %v2469_v62  ;;  %v2809_v2 = vor.u32 %v3182_v56, %v2806_v57  ;;  %v3111_v56 = vld [vmem:[%s4949_s0 + $0x158] sm:$0xf0]  ;;  %v3110_v57 = vld [vmem:[%s4949_s0 + $0x154] sm:$0xf] }
  0xc2   :  { %1512 = vmatmul.bf16.gmra.mxu3 %v2925_v0  ;;  %1581 = vmatmul.bf16.gmra.mxu1 %v2473_v1  ;;  %v2497_v1 = vor.u32 %v3104_v53, %v2494_v55  ;;  %v2516_v55 = vld [vmem:[%s4949_s0 + $0x150] sm:$0xf] }
  0xc3   :  { %v1802_v6 = vadd.f32 %v1801_v30, %v1543_v5  ;;  %v2481_v30 = vor.u32 %v3102_v20, %v2480_v19 }
  0xc5   :  { %v2045_v9 = vmax.f32 %v1802_v6, 0.0  ;;  %v3661_v10 = vpop.f32.mrf.mxu3  ;;  %v1808_v11 = vpop.f32.mrf.mxu2 }
  0xc6   :  { %v1285_v12 = vpop.f32.mrf.mxu0 }
  0xc7   :  { %v2145_v15 = vpack.c.bf16 %v2045_v9, %v2045_v9  ;;  %v1286_v16 = vadd.f32 %v3555_v58, %v1285_v12  ;;  %v1544_v17 = vpop.f32.mrf.mxu1  ;;  %v3112_v9 = vld [vmem:[%s4949_s0 + $0x160] sm:$0xf0] }
  0xc9   :  { %2246 = vst.msk [vmem:[%s4951_s3 + $0x10] sm:$0xf] %vm2241_vm1, %v2145_v15  ;;  %v1545_v18 = vadd.f32 %v1544_v17, %v1286_v16  ;;  %v2525_v16 = vor.u32 %v3112_v9, %v2524_v8 }
  0xca   :  { %3030 = vmatmul.msk.bf16.gmra.mxu2 %vm1113_vm0, %v2501_v14 }
  0xcb   :  { %v1804_v22 = vadd.f32 %v1803_v44, %v1545_v18 }
  0xcd   :  { %v2046_v26 = vmax.f32 %v1804_v22, 0.0  ;;  %v3687_v27 = vpop.f32.mrf.mxu3  ;;  %v1811_v28 = vpop.f32.mrf.mxu2  ;;  %v3108_v22 = vld [vmem:[%s4949_s0 + $0x140] sm:$0xf0] }
  0xce   :  { %v1288_v31 = vpop.f32.mrf.mxu0 }
  0xcf   :  { %v2146_v34 = vpack.c.bf16 %v2046_v26, %v2046_v26  ;;  %v1289_v35 = vadd.f32 %v3555_v58, %v1288_v31  ;;  %v1547_v36 = vpop.f32.mrf.mxu1  ;;  %v3185_v26 = vld [vmem:[%s4949_s0 + $0x3ac] sm:$0xf] }
  0xd1   :  { %2247 = vst.msk [vmem:[%s4951_s3 + $0x14] sm:$0xf] %vm2241_vm1, %v2146_v34  ;;  %v1548_v37 = vadd.f32 %v1547_v36, %v1289_v35  ;;  %1327 = vmatmul.bf16.gmra.mxu0 %v2481_v30  ;;  %v2509_v35 = vor.u32 %v3107_v23, %v2506_v25 }
  0xd2   :  { %1517 = vmatmul.bf16.gmra.mxu3 %v2937_v32  ;;  %1586 = vmatmul.bf16.gmra.mxu1 %v2485_v33  ;;  %v2505_v33 = vor.u32 %v3108_v22, %v2504_v21 }
  0xd3   :  { %v1807_v38 = vadd.f32 %v1806_v61, %v1548_v37 }
  0xd5   :  { %v2047_v41 = vmax.f32 %v1807_v38, 0.0  ;;  %v3700_v42 = vpop.f32.mrf.mxu3  ;;  %v1813_v44 = vpop.f32.mrf.mxu2 }
  0xd6   :  { %v1290_v45 = vpop.f32.mrf.mxu0 }
  0xd7   :  { %v2147_v47 = vpack.c.bf16 %v2047_v41, %v2047_v41  ;;  %v1291_v48 = vadd.f32 %v3555_v58, %v1290_v45  ;;  %v1549_v49 = vpop.f32.mrf.mxu1  ;;  %v3115_v45 = vld [vmem:[%s4949_s0 + $0x178] sm:$0xf0] }
  0xd9   :  { %2248 = vst.msk [vmem:[%s4951_s3 + $0x18] sm:$0xf] %vm2241_vm1, %v2147_v47  ;;  %v1550_v50 = vadd.f32 %v1549_v49, %v1291_v48 }
  0xda   :  { %3031 = vmatmul.msk.bf16.gmra.mxu2 %vm1113_vm0, %v2513_v46 }
  0xdb   :  { %v1809_v54 = vadd.f32 %v1808_v11, %v1550_v50 }
  0xdd   :  { %v2048_v59 = vmax.f32 %v1809_v54, 0.0  ;;  %v3726_v61 = vpop.f32.mrf.mxu3  ;;  %v1816_v62 = vpop.f32.mrf.mxu2 }
  0xde   :  { %v1293_v0 = vpop.f32.mrf.mxu0 }
  0xdf   :  { %v2148_v3 = vpack.c.bf16 %v2048_v59, %v2048_v59  ;;  %v1294_v4 = vadd.f32 %v3555_v58, %v1293_v0  ;;  %v1552_v5 = vpop.f32.mrf.mxu1  ;;  %v2830_v0 = vld [vmem:[%s4949_s0 + $0x3cc] sm:$0xf0] }
  0xe1   :  { %2249 = vst.msk [vmem:[%s4951_s3 + $0x1c] sm:$0xf] %vm2241_vm1, %v2148_v3  ;;  %v1553_v6 = vadd.f32 %v1552_v5, %v1294_v4  ;;  %1332 = vmatmul.bf16.gmra.mxu0 %v2493_v63  ;;  %v3188_v63 = vld [vmem:[%s4949_s0 + $0x3c4] sm:$0xf]  ;;  %v2517_v4 = vor.u32 %v3111_v56, %v2516_v55 }
  0xe2   :  { %1591 = vmatmul.bf16.gmra.mxu1 %v2497_v1  ;;  %1721 = vmatmul.bf16.vlgmr.msrb.gmra.mxu3 %v2809_v2 }
  0xe3   :  { %v1812_v7 = vadd.f32 %v1811_v28, %v1553_v6  ;;  %v2818_v28 = vld [vmem:[%s4949_s0 + $0x3b4] sm:$0xf0] }
  0xe4   :  { %v2821_v36 = vor.u32 %v3185_v26, %v2818_v28  ;;  %v2528_v28 = vld [vmem:[%s4949_s0 + $0x168] sm:$0xf] }
  0xe5   :  { %v2049_v11 = vmax.f32 %v1812_v7, 0.0  ;;  %v3739_v12 = vpop.f32.mrf.mxu3  ;;  %v1818_v14 = vpop.f32.mrf.mxu2  ;;  %v2833_v7 = vor.u32 %v3188_v63, %v2830_v0 }
  0xe6   :  { %v1295_v15 = vpop.f32.mrf.mxu0 }
  0xe7   :  { %v2149_v17 = vpack.c.bf16 %v2049_v11, %v2049_v11  ;;  %v1296_v18 = vadd.f32 %v3555_v58, %v1295_v15  ;;  %v1554_v19 = vpop.f32.mrf.mxu1 }
  0xe9   :  { %2250 = vst.msk [vmem:[%s4951_s3 + $0x20] sm:$0xf] %vm2241_vm1, %v2149_v17  ;;  %v1555_v20 = vadd.f32 %v1554_v19, %v1296_v18  ;;  %v3118_v17 = vld [vmem:[%s4949_s0 + $0x190] sm:$0xf0] }
  0xea   :  { %3032 = vmatmul.msk.bf16.gmra.mxu2 %vm1113_vm0, %v2525_v16  ;;  %v2548_v16 = vld [vmem:[%s4949_s0 + $0x188] sm:$0xf] }
  0xeb   :  { %v1814_v24 = vadd.f32 %v1813_v44, %v1555_v20  ;;  %v2536_v44 = vld [vmem:[%s4949_s0 + $0x170] sm:$0xf]  ;;  %v2549_v22 = vor.u32 %v3118_v17, %v2548_v16 }
  0xec   :  { %v2537_v50 = vor.u32 %v3115_v45, %v2536_v44 }
  0xed   :  { %v2050_v30 = vmax.f32 %v1814_v24, 0.0  ;;  %v3765_v31 = vpop.f32.mrf.mxu3  ;;  %v1821_v32 = vpop.f32.mrf.mxu2 }
  0xee   :  { %v1298_v34 = vpop.f32.mrf.mxu0 }
  0xef   :  { %v2150_v37 = vpack.c.bf16 %v2050_v30, %v2050_v30  ;;  %v1299_v38 = vadd.f32 %v3555_v58, %v1298_v34  ;;  %v1557_v39 = vpop.f32.mrf.mxu1  ;;  %v3114_v30 = vld [vmem:[%s4949_s0 + $0x170] sm:$0xf0]  ;;  %v2530_v34 = vld [vmem:[%s4949_s0 + $0x174] sm:$0xf0] }
  0xf1   :  { %2251 = vst.msk [vmem:[%s4951_s3 + $0x24] sm:$0xf] %vm2241_vm1, %v2150_v37  ;;  %v1558_v40 = vadd.f32 %v1557_v39, %v1299_v38  ;;  %1337 = vmatmul.bf16.gmra.mxu0 %v2505_v33 }
  0xf2   :  { %1596 = vmatmul.bf16.gmra.mxu1 %v2509_v35  ;;  %1726 = vmatmul.bf16.gmra.mxu3 %v2821_v36  ;;  %v3191_v35 = vld [vmem:[%s4949_s0 + $0x3dc] sm:$0xf]  ;;  %v2842_v36 = vld [vmem:[%s4949_s0 + $0x3e4] sm:$0xf0] }
  0xf3   :  { %v1817_v41 = vadd.f32 %v1816_v62, %v1558_v40  ;;  %v2518_v62 = vld [vmem:[%s4949_s0 + $0x15c] sm:$0xf0]  ;;  %v2529_v40 = vor.u32 %v3114_v30, %v2528_v28  ;;  %v2845_v45 = vor.u32 %v3191_v35, %v2842_v36  ;;  %v3124_v28 = vld [vmem:[%s4949_s0 + $0x1c0] sm:$0xf0] }
  0xf4   :  { %v2521_v6 = vor.u32 %v3110_v57, %v2518_v62 }
  0xf5   :  { %v2051_v46 = vmax.f32 %v1817_v41, 0.0  ;;  %v3778_v47 = vpop.f32.mrf.mxu3  ;;  %v1823_v48 = vpop.f32.mrf.mxu2 }
  0xf6   :  { %v1300_v49 = vpop.f32.mrf.mxu0 }
  0xf7   :  { %v2151_v51 = vpack.c.bf16 %v2051_v46, %v2051_v46  ;;  %v1301_v52 = vadd.f32 %v3555_v58, %v1300_v49  ;;  %v1559_v53 = vpop.f32.mrf.mxu1 }
  0xf9   :  { %2252 = vst.msk [vmem:[%s4951_s3 + $0x28] sm:$0xf] %vm2241_vm1, %v2151_v51  ;;  %v1560_v54 = vadd.f32 %v1559_v53, %v1301_v52  ;;  %v2560_v52 = vld [vmem:[%s4949_s0 + $0x1a0] sm:$0xf]  ;;  %v3121_v53 = vld [vmem:[%s4949_s0 + $0x1a8] sm:$0xf0] }
  0xfa   :  { %3033 = vmatmul.msk.bf16.gmra.mxu2 %vm1113_vm0, %v2537_v50 }
  0xfb   :  { %v1819_v59 = vadd.f32 %v1818_v14, %v1560_v54 }
  0xfd   :  { %v2052_v1 = vmax.f32 %v1819_v59, 0.0  ;;  %v3804_v2 = vpop.f32.mrf.mxu3  ;;  %v1826_v3 = vpop.f32.mrf.mxu2  ;;  %v2561_v59 = vor.u32 %v3121_v53, %v2560_v52 }
  0xfe   :  { %v1303_v5 = vpop.f32.mrf.mxu0 }
  0xff   :  { %v2152_v8 = vpack.c.bf16 %v2052_v1, %v2052_v1  ;;  %v1304_v9 = vadd.f32 %v3555_v58, %v1303_v5  ;;  %v1562_v11 = vpop.f32.mrf.mxu1  ;;  %v3116_v5 = vld [vmem:[%s4949_s0 + $0x184] sm:$0xf] }
 0x101   :  { %2253 = vst.msk [vmem:[%s4951_s3 + $0x2c] sm:$0xf] %vm2241_vm1, %v2152_v8  ;;  %v1563_v14 = vadd.f32 %v1562_v11, %v1304_v9  ;;  %1342 = vmatmul.bf16.gmra.mxu0 %v2517_v4  ;;  %v3117_v4 = vld [vmem:[%s4949_s0 + $0x188] sm:$0xf0]  ;;  %v3194_v8 = vld [vmem:[%s4949_s0 + $0x3f4] sm:$0xf] }
 0x102   :  { %1601 = vmatmul.bf16.gmra.mxu1 %v2521_v6  ;;  %1731 = vmatmul.bf16.gmra.mxu3 %v2833_v7  ;;  %v2542_v7 = vld [vmem:[%s4949_s0 + $0x18c] sm:$0xf0]  ;;  %v2854_v9 = vld [vmem:[%s4949_s0 + $0x3fc] sm:$0xf0] }
 0x103   :  { %v1822_v15 = vadd.f32 %v1821_v32, %v1563_v14  ;;  %v3113_v32 = vld [vmem:[%s4949_s0 + $0x16c] sm:$0xf] }
 0x104   :  { %v2533_v44 = vor.u32 %v3113_v32, %v2530_v34 }
 0x105   :  { %v2053_v18 = vmax.f32 %v1822_v15, 0.0  ;;  %v3817_v19 = vpop.f32.mrf.mxu3  ;;  %v1828_v20 = vpop.f32.mrf.mxu2 }
 0x106   :  { %v1305_v21 = vpop.f32.mrf.mxu0 }
 0x107   :  { %v2153_v23 = vpack.c.bf16 %v2053_v18, %v2053_v18  ;;  %v1306_v24 = vadd.f32 %v3555_v58, %v1305_v21  ;;  %v1564_v25 = vpop.f32.mrf.mxu1  ;;  %v2545_v18 = vor.u32 %v3116_v5, %v2542_v7  ;;  %v3127_v5 = vld [vmem:[%s4949_s0 + $0x1d8] sm:$0xf0] }
 0x109   :  { %2254 = vst.msk [vmem:[%s4951_s3 + $0x30] sm:$0xf] %vm2241_vm1, %v2153_v23  ;;  %v1565_v26 = vadd.f32 %v1564_v25, %v1306_v24 }
 0x10a   :  { %3034 = vmatmul.msk.bf16.gmra.mxu2 %vm1113_vm0, %v2549_v22 }
 0x10b   :  { %v1824_v33 = vadd.f32 %v1823_v48, %v1565_v26  ;;  %v2572_v26 = vld [vmem:[%s4949_s0 + $0x1b8] sm:$0xf] }
 0x10c   :  { %v2573_v35 = vor.u32 %v3124_v28, %v2572_v26  ;;  %v2878_v26 = vld [vmem:[%s4949_s0 + $0x42c] sm:$0xf0] }
 0x10d   :  { %v2054_v37 = vmax.f32 %v1824_v33, 0.0  ;;  %v3843_v38 = vpop.f32.mrf.mxu3  ;;  %v1831_v39 = vpop.f32.mrf.mxu2 }
 0x10e   :  { %v1308_v41 = vpop.f32.mrf.mxu0 }
 0x10f   :  { %v2154_v46 = vpack.c.bf16 %v2054_v37, %v2054_v37  ;;  %v1309_v48 = vadd.f32 %v3555_v58, %v1308_v41  ;;  %v1567_v49 = vpop.f32.mrf.mxu1  ;;  %v2552_v41 = vld [vmem:[%s4949_s0 + $0x198] sm:$0xf] }
 0x111   :  { %2255 = vst.msk [vmem:[%s4951_s3 + $0x34] sm:$0xf] %vm2241_vm1, %v2154_v46  ;;  %v1568_v50 = vadd.f32 %v1567_v49, %v1309_v48  ;;  %1347 = vmatmul.bf16.gmra.mxu0 %v2529_v40  ;;  %v2554_v48 = vld [vmem:[%s4949_s0 + $0x1a4] sm:$0xf0]  ;;  %v3197_v49 = vld [vmem:[%s4949_s0 + $0x40c] sm:$0xf] }
 0x112   :  { %1606 = vmatmul.bf16.gmra.mxu1 %v2533_v44  ;;  %1736 = vmatmul.bf16.gmra.mxu3 %v2845_v45  ;;  %v3120_v44 = vld [vmem:[%s4949_s0 + $0x1a0] sm:$0xf0]  ;;  %v3119_v45 = vld [vmem:[%s4949_s0 + $0x19c] sm:$0xf] }
 0x113   :  { %v1827_v51 = vadd.f32 %v1826_v3, %v1568_v50  ;;  %v2540_v3 = vld [vmem:[%s4949_s0 + $0x180] sm:$0xf]  ;;  %v2866_v50 = vld [vmem:[%s4949_s0 + $0x414] sm:$0xf0] }
 0x114   :  { %v2541_v16 = vor.u32 %v3117_v4, %v2540_v3  ;;  %v2584_v4 = vld [vmem:[%s4949_s0 + $0x1d0] sm:$0xf] }
 0x115   :  { %v2055_v54 = vmax.f32 %v1827_v51, 0.0  ;;  %v3856_v55 = vpop.f32.mrf.mxu3  ;;  %v1833_v56 = vpop.f32.mrf.mxu2 }
 0x116   :  { %v1310_v57 = vpop.f32.mrf.mxu0 }
 0x117   :  { %v2155_v62 = vpack.c.bf16 %v2055_v54, %v2055_v54  ;;  %v1311_v63 = vadd.f32 %v3555_v58, %v1310_v57  ;;  %v1569_v0 = vpop.f32.mrf.mxu1  ;;  %v2553_v54 = vor.u32 %v3120_v44, %v2552_v41 }
 0x119   :  { %2256 = vst.msk [vmem:[%s4951_s3 + $0x38] sm:$0xf] %vm2241_vm1, %v2155_v62  ;;  %v1570_v1 = vadd.f32 %v1569_v0, %v1311_v63 }
 0x11a   :  { %3035 = vmatmul.msk.bf16.gmra.mxu2 %vm1113_vm0, %v2561_v59  ;;  %v2557_v59 = vor.u32 %v3119_v45, %v2554_v48  ;;  %v3130_v48 = vld [vmem:[%s4949_s0 + $0x1f0] sm:$0xf0] }
 0x11b   :  { %v1829_v6 = vadd.f32 %v1828_v20, %v1570_v1  ;;  %v2857_v20 = vor.u32 %v3194_v8, %v2854_v9 }
 0x11d   :  { %v2056_v11 = vmax.f32 %v1829_v6, 0.0  ;;  %v3882_v14 = vpop.f32.mrf.mxu3  ;;  %v1836_v15 = vpop.f32.mrf.mxu2 }
 0x11e   :  { %v1313_v17 = vpop.f32.mrf.mxu0 }
 0x11f   :  { %v2156_v21 = vpack.c.bf16 %v2056_v11, %v2056_v11  ;;  %v1314_v22 = vadd.f32 %v3555_v58, %v1313_v17  ;;  %v1572_v23 = vpop.f32.mrf.mxu1  ;;  %v2585_v11 = vor.u32 %v3127_v5, %v2584_v4  ;;  %v2578_v4 = vld [vmem:[%s4949_s0 + $0x1d4] sm:$0xf0]  ;;  %v3203_v5 = vld [vmem:[%s4949_s0 + $0x43c] sm:$0xf] }
 0x121   :  { %2257 = vst.msk [vmem:[%s4951_s3 + $0x3c] sm:$0xf] %vm2241_vm1, %v2156_v21  ;;  %v1573_v24 = vadd.f32 %v1572_v23, %v1314_v22  ;;  %1352 = vmatmul.bf16.gmra.mxu0 %v2541_v16  ;;  %v3123_v21 = vld [vmem:[%s4949_s0 + $0x1b8] sm:$0xf0]  ;;  %v3122_v22 = vld [vmem:[%s4949_s0 + $0x1b4] sm:$0xf] }
 0x122   :  { %1611 = vmatmul.bf16.gmra.mxu1 %v2545_v18  ;;  %1741 = vmatmul.bf16.gmra.mxu3 %v2857_v20  ;;  %v2564_v20 = vld [vmem:[%s4949_s0 + $0x1b0] sm:$0xf] }
 0x123   :  { %v1832_v25 = vadd.f32 %v1831_v39, %v1573_v24  ;;  %v2566_v24 = vld [vmem:[%s4949_s0 + $0x1bc] sm:$0xf0] }
 0x125   :  { %v2057_v30 = vmax.f32 %v1832_v25, 0.0  ;;  %v3895_v32 = vpop.f32.mrf.mxu3  ;;  %v1838_v33 = vpop.f32.mrf.mxu2  ;;  %v3200_v25 = vld [vmem:[%s4949_s0 + $0x424] sm:$0xf] }
 0x126   :  { %v1315_v34 = vpop.f32.mrf.mxu0 }
 0x127   :  { %v2157_v36 = vpack.c.bf16 %v2057_v30, %v2057_v30  ;;  %v1316_v37 = vadd.f32 %v3555_v58, %v1315_v34  ;;  %v1574_v40 = vpop.f32.mrf.mxu1 }
 0x129   :  { %2258 = vst.msk [vmem:[%s4951_s3 + $0x40] sm:$0xf] %vm2241_vm1, %v2157_v36  ;;  %v1575_v39 = vadd.f32 %v1574_v40, %v1316_v37  ;;  %v2569_v37 = vor.u32 %v3122_v22, %v2566_v24 }
 0x12a   :  { %3036 = vmatmul.msk.bf16.gmra.mxu2 %vm1113_vm0, %v2573_v35  ;;  %v2565_v35 = vor.u32 %v3123_v21, %v2564_v20 }
 0x12b   :  { %v1834_v46 = vadd.f32 %v1833_v56, %v1575_v39  ;;  %v2869_v56 = vor.u32 %v3197_v49, %v2866_v50 }
 0x12d   :  { %v2058_v51 = vmax.f32 %v1834_v46, 0.0  ;;  %v3921_v52 = vpop.f32.mrf.mxu3  ;;  %v1841_v53 = vpop.f32.mrf.mxu2  ;;  %v2596_v46 = vld [vmem:[%s4949_s0 + $0x1e8] sm:$0xf] }
 0x12e   :  { %v1318_v57 = vpop.f32.mrf.mxu0 }
 0x12f   :  { %v2158_v62 = vpack.c.bf16 %v2058_v51, %v2058_v51  ;;  %v1319_v63 = vadd.f32 %v3555_v58, %v1318_v57  ;;  %v1577_v0 = vpop.f32.mrf.mxu1  ;;  %v2597_v57 = vor.u32 %v3130_v48, %v2596_v46  ;;  %v3128_v46 = vld [vmem:[%s4949_s0 + $0x1e4] sm:$0xf] }
 0x131   :  { %2259 = vst.msk [vmem:[%s4951_s3 + $0x44] sm:$0xf] %vm2241_vm1, %v2158_v62  ;;  %v1578_v1 = vadd.f32 %v1577_v0, %v1319_v63  ;;  %1357 = vmatmul.bf16.gmra.mxu0 %v2553_v54  ;;  %v2576_v63 = vld [vmem:[%s4949_s0 + $0x1c8] sm:$0xf]  ;;  %v3126_v0 = vld [vmem:[%s4949_s0 + $0x1d0] sm:$0xf0] }
 0x132   :  { %1616 = vmatmul.bf16.gmra.mxu1 %v2557_v59  ;;  %1746 = vmatmul.bf16.gmra.mxu3 %v2869_v56 }
 0x133   :  { %v1837_v3 = vadd.f32 %v1836_v15, %v1578_v1  ;;  %v3125_v1 = vld [vmem:[%s4949_s0 + $0x1cc] sm:$0xf] }
 0x135   :  { %v2059_v6 = vmax.f32 %v1837_v3, 0.0  ;;  %v3934_v7 = vpop.f32.mrf.mxu3  ;;  %v1843_v8 = vpop.f32.mrf.mxu2 }
 0x136   :  { %v1320_v9 = vpop.f32.mrf.mxu0 }
 0x137   :  { %v2159_v16 = vpack.c.bf16 %v2059_v6, %v2059_v6  ;;  %v1321_v17 = vadd.f32 %v3555_v58, %v1320_v9  ;;  %v1579_v18 = vpop.f32.mrf.mxu1  ;;  %v2890_v6 = vld [vmem:[%s4949_s0 + $0x444] sm:$0xf0] }
 0x139   :  { %2260 = vst.msk [vmem:[%s4951_s3 + $0x48] sm:$0xf] %vm2241_vm1, %v2159_v16  ;;  %v1580_v15 = vadd.f32 %v1579_v18, %v1321_v17  ;;  %v2577_v17 = vor.u32 %v3126_v0, %v2576_v63 }
 0x13a   :  { %3037 = vmatmul.msk.bf16.gmra.mxu2 %vm1113_vm0, %v2585_v11 }
 0x13b   :  { %v1839_v23 = vadd.f32 %v1838_v33, %v1580_v15  ;;  %v2881_v33 = vor.u32 %v3200_v25, %v2878_v26  ;;  %v2581_v15 = vor.u32 %v3125_v1, %v2578_v4  ;;  %v2608_v25 = vld [vmem:[%s4949_s0 + $0x200] sm:$0xf]  ;;  %v3133_v26 = vld [vmem:[%s4949_s0 + $0x208] sm:$0xf0] }
 0x13d   :  { %v2060_v28 = vmax.f32 %v1839_v23, 0.0  ;;  %v3960_v30 = vpop.f32.mrf.mxu3  ;;  %v1846_v34 = vpop.f32.mrf.mxu2 }
 0x13e   :  { %v1323_v36 = vpop.f32.mrf.mxu0 }
 0x13f   :  { %v2160_v40 = vpack.c.bf16 %v2060_v28, %v2060_v28  ;;  %v1324_v39 = vadd.f32 %v3555_v58, %v1323_v36  ;;  %v1582_v41 = vpop.f32.mrf.mxu1 }
 0x141   :  { %2261 = vst.msk [vmem:[%s4951_s3 + $0x4c] sm:$0xf] %vm2241_vm1, %v2160_v40  ;;  %v1583_v44 = vadd.f32 %v1582_v41, %v1324_v39  ;;  %1362 = vmatmul.bf16.gmra.mxu0 %v2565_v35 }
 0x142   :  { %1621 = vmatmul.bf16.gmra.mxu1 %v2569_v37  ;;  %1751 = vmatmul.bf16.gmra.mxu3 %v2881_v33  ;;  %v2609_v33 = vor.u32 %v3133_v26, %v2608_v25 }
 0x143   :  { %v1842_v45 = vadd.f32 %v1841_v53, %v1583_v44  ;;  %v2588_v44 = vld [vmem:[%s4949_s0 + $0x1e0] sm:$0xf] }
 0x145   :  { %v2061_v49 = vmax.f32 %v1842_v45, 0.0  ;;  %v3973_v50 = vpop.f32.mrf.mxu3  ;;  %v1848_v51 = vpop.f32.mrf.mxu2  ;;  %v3129_v45 = vld [vmem:[%s4949_s0 + $0x1e8] sm:$0xf0] }
 0x146   :  { %v1325_v54 = vpop.f32.mrf.mxu0 }
 0x147   :  { %v2161_v59 = vpack.c.bf16 %v2061_v49, %v2061_v49  ;;  %v1326_v56 = vadd.f32 %v3555_v58, %v1325_v54  ;;  %v1584_v62 = vpop.f32.mrf.mxu1  ;;  %v2590_v49 = vld [vmem:[%s4949_s0 + $0x1ec] sm:$0xf0]  ;;  %v3206_v54 = vld [vmem:[%s4949_s0 + $0x454] sm:$0xf] }
 0x148   :  { %v2593_v0 = vor.u32 %v3128_v46, %v2590_v49 }
 0x149   :  { %2262 = vst.msk [vmem:[%s4951_s3 + $0x50] sm:$0xf] %vm2241_vm1, %v2161_v59  ;;  %v1585_v53 = vadd.f32 %v1584_v62, %v1326_v56 }
 0x14a   :  { %3038 = vmatmul.msk.bf16.gmra.mxu2 %vm1113_vm0, %v2597_v57  ;;  %v2902_v57 = vld [vmem:[%s4949_s0 + $0x45c] sm:$0xf0] }
 0x14b   :  { %v1844_v3 = vadd.f32 %v1843_v8, %v1585_v53  ;;  %v2893_v8 = vor.u32 %v3203_v5, %v2890_v6  ;;  %v2589_v53 = vor.u32 %v3129_v45, %v2588_v44 }
 0x14d   :  { %v2062_v9 = vmax.f32 %v1844_v3, 0.0  ;;  %v3999_v11 = vpop.f32.mrf.mxu3  ;;  %v1851_v16 = vpop.f32.mrf.mxu2 }
 0x14e   :  { %v1328_v18 = vpop.f32.mrf.mxu0 }
 0x14f   :  { %v2162_v20 = vpack.c.bf16 %v2062_v9, %v2062_v9  ;;  %v1329_v21 = vadd.f32 %v3555_v58, %v1328_v18  ;;  %v1587_v22 = vpop.f32.mrf.mxu1  ;;  %v2620_v9 = vld [vmem:[%s4949_s0 + $0x218] sm:$0xf]  ;;  %v1464_v18 = vadd.f32 %v3555_v58, %v3583_v13 }
 0x150   :  { %v2600_v13 = vld [vmem:[%s4949_s0 + $0x1f8] sm:$0xf] }
 0x151   :  { %2263 = vst.msk [vmem:[%s4951_s3 + $0x54] sm:$0xf] %vm2241_vm1, %v2162_v20  ;;  %v1588_v23 = vadd.f32 %v1587_v22, %v1329_v21  ;;  %1367 = vmatmul.bf16.gmra.mxu0 %v2577_v17  ;;  %v3136_v17 = vld [vmem:[%s4949_s0 + $0x220] sm:$0xf0] }
 0x152   :  { %1626 = vmatmul.bf16.gmra.mxu1 %v2581_v15  ;;  %1756 = vmatmul.bf16.gmra.mxu3 %v2893_v8 }
 0x153   :  { %v1847_v24 = vadd.f32 %v1846_v34, %v1588_v23  ;;  %v2621_v23 = vor.u32 %v3136_v17, %v2620_v9 }
 0x155   :  { %v2063_v28 = vmax.f32 %v1847_v24, 0.0  ;;  %v4012_v35 = vpop.f32.mrf.mxu3  ;;  %v1853_v36 = vpop.f32.mrf.mxu2 }
 0x156   :  { %v1330_v37 = vpop.f32.mrf.mxu0 }
 0x157   :  { %v2163_v40 = vpack.c.bf16 %v2063_v28, %v2063_v28  ;;  %v1331_v39 = vadd.f32 %v3555_v58, %v1330_v37  ;;  %v1589_v41 = vpop.f32.mrf.mxu1  ;;  %v3132_v28 = vld [vmem:[%s4949_s0 + $0x200] sm:$0xf0]  ;;  %v3131_v37 = vld [vmem:[%s4949_s0 + $0x1fc] sm:$0xf] }
 0x159   :  { %2264 = vst.msk [vmem:[%s4951_s3 + $0x58] sm:$0xf] %vm2241_vm1, %v2163_v40  ;;  %v1590_v34 = vadd.f32 %v1589_v41, %v1331_v39  ;;  %v2602_v40 = vld [vmem:[%s4949_s0 + $0x204] sm:$0xf0]  ;;  %v3209_v39 = vld [vmem:[%s4949_s0 + $0x46c] sm:$0xf] }
 0x15a   :  { %3039 = vmatmul.msk.bf16.gmra.mxu2 %vm1113_vm0, %v2609_v33  ;;  %v2914_v41 = vld [vmem:[%s4949_s0 + $0x474] sm:$0xf0] }
 0x15b   :  { %v1849_v48 = vadd.f32 %v1848_v51, %v1590_v34  ;;  %v2905_v51 = vor.u32 %v3206_v54, %v2902_v57  ;;  %v1466_v34 = vadd.f32 %v3555_v58, %v3609_v29  ;;  %v2605_v54 = vor.u32 %v3131_v37, %v2602_v40 }
 0x15c   :  { %v2917_v57 = vor.u32 %v3209_v39, %v2914_v41 }
 0x15d   :  { %v2064_v59 = vmax.f32 %v1849_v48, 0.0  ;;  %v4038_v56 = vpop.f32.mrf.mxu3  ;;  %v1856_v62 = vpop.f32.mrf.mxu2  ;;  %v2601_v48 = vor.u32 %v3132_v28, %v2600_v13  ;;  %v4125_v13 = vld [vmem:[%s4950_s2] ss:$0 sm:$0xff] }
 0x15e   :  { %v1333_v63 = vpop.f32.mrf.mxu0 }
 0x15f   :  { %v2164_v1 = vpack.c.bf16 %v2064_v59, %v2064_v59  ;;  %v1334_v3 = vadd.f32 %v3555_v58, %v1333_v63  ;;  %v1592_v4 = vpop.f32.mrf.mxu1 }
 0x161   :  { %2265 = vst.msk [vmem:[%s4951_s3 + $0x5c] sm:$0xf] %vm2241_vm1, %v2164_v1  ;;  %v1593_v5 = vadd.f32 %v1592_v4, %v1334_v3  ;;  %1372 = vmatmul.bf16.gmra.mxu0 %v2589_v53  ;;  %v3139_v1 = vld [vmem:[%s4949_s0 + $0x238] sm:$0xf0]  ;;  %v1469_v3 = vadd.f32 %v3555_v58, %v3622_v43  ;;  %v2612_v43 = vld [vmem:[%s4949_s0 + $0x210] sm:$0xf] }
 0x162   :  { %1631 = vmatmul.bf16.gmra.mxu1 %v2593_v0  ;;  %1761 = vmatmul.bf16.gmra.mxu3 %v2905_v51  ;;  %v2632_v51 = vld [vmem:[%s4949_s0 + $0x230] sm:$0xf] }
 0x163   :  { %v1852_v6 = vadd.f32 %v1851_v16, %v1593_v5 }
 0x165   :  { %v2065_v15 = vmax.f32 %v1852_v6, 0.0  ;;  %v1722_v8 = vpop.f32.mrf.mxu3  ;;  %v1858_v20 = vpop.f32.mrf.mxu2 }
 0x166   :  { %v4053_v21 = vadd.f32 %v1722_v8, %v1464_v18  ;;  %v1335_v22 = vpop.f32.mrf.mxu0  ;;  %v2633_v18 = vor.u32 %v3139_v1, %v2632_v51 }
 0x167   :  { %v2165_v24 = vpack.c.bf16 %v2065_v15, %v2065_v15  ;;  %v1336_v16 = vadd.f32 %v3555_v58, %v1335_v22  ;;  %v1594_v25 = vpop.f32.mrf.mxu1 }
 0x169   :  { %2266 = vst.msk [vmem:[%s4951_s3 + $0x60] sm:$0xf] %vm2241_vm1, %v2165_v24  ;;  %v1595_v26 = vadd.f32 %v1594_v25, %v1336_v16  ;;  %v2614_v16 = vld [vmem:[%s4949_s0 + $0x21c] sm:$0xf0]  ;;  %v3212_v25 = vld [vmem:[%s4949_s0 + $0x484] sm:$0xf] }
 0x16a   :  { %3040 = vmatmul.msk.bf16.gmra.mxu2 %vm1113_vm0, %v2621_v23  ;;  %v3135_v23 = vld [vmem:[%s4949_s0 + $0x218] sm:$0xf0] }
 0x16b   :  { %v1854_v33 = vadd.f32 %v1853_v36, %v1595_v26  ;;  %v2926_v26 = vld [vmem:[%s4949_s0 + $0x48c] sm:$0xf0]  ;;  %v2613_v40 = vor.u32 %v3135_v23, %v2612_v43  ;;  %v2938_v43 = vld [vmem:[%s4949_s0 + $0x4a4] sm:$0xf0]  ;;  %v1476_v23 = vadd.f32 %v4125_v13, %v3687_v27 }
 0x16d   :  { %v2066_v44 = vmax.f32 %v1854_v33, 0.0  ;;  %v1724_v45 = vpop.f32.mrf.mxu3  ;;  %v1861_v46 = vpop.f32.mrf.mxu2 }
 0x16e   :  { %v4081_v36 = vadd.f32 %v1724_v45, %v1466_v34  ;;  %v1338_v49 = vpop.f32.mrf.mxu0 }
 0x16f   :  { %v2166_v59 = vpack.c.bf16 %v2066_v44, %v2066_v44  ;;  %v1339_v53 = vadd.f32 %v3555_v58, %v1338_v49  ;;  %v1597_v63 = vpop.f32.mrf.mxu1  ;;  %v2929_v44 = vor.u32 %v3212_v25, %v2926_v26 }
 0x171   :  { %2267 = vst.msk [vmem:[%s4951_s3 + $0x64] sm:$0xf] %vm2241_vm1, %v2166_v59  ;;  %v1598_v0 = vadd.f32 %v1597_v63, %v1339_v53  ;;  %1377 = vmatmul.bf16.gmra.mxu0 %v2601_v48  ;;  %v3142_v59 = vld [vmem:[%s4949_s0 + $0x250] sm:$0xf0]  ;;  %v1474_v53 = vadd.f32 %v4125_v13, %v3661_v10  ;;  %v2624_v10 = vld [vmem:[%s4949_s0 + $0x228] sm:$0xf] }
 0x172   :  { %1636 = vmatmul.bf16.gmra.mxu1 %v2605_v54  ;;  %1766 = vmatmul.bf16.gmra.mxu3 %v2917_v57  ;;  %v2644_v57 = vld [vmem:[%s4949_s0 + $0x248] sm:$0xf] }
 0x173   :  { %v1857_v29 = vadd.f32 %v1856_v62, %v1598_v0 }
 0x175   :  { %v2067_v4 = vmax.f32 %v1857_v29, 0.0  ;;  %v1727_v5 = vpop.f32.mrf.mxu3  ;;  %v1863_v6 = vpop.f32.mrf.mxu2 }
 0x176   :  { %v4096_v9 = vadd.f32 %v1727_v5, %v1469_v3  ;;  %v1340_v17 = vpop.f32.mrf.mxu0  ;;  %v2645_v3 = vor.u32 %v3142_v59, %v2644_v57 }
 0x177   :  { %v2167_v15 = vpack.c.bf16 %v2067_v4, %v2067_v4  ;;  %v1341_v62 = vadd.f32 %v3555_v58, %v1340_v17  ;;  %v1599_v8 = vpop.f32.mrf.mxu1  ;;  %v3134_v58 = vld [vmem:[%s4949_s0 + $0x214] sm:$0xf] }
 0x178   :  { %v2617_v34 = vor.u32 %v3134_v58, %v2614_v16 }
 0x179   :  { %2268 = vst.msk [vmem:[%s4951_s3 + $0x68] sm:$0xf] %vm2241_vm1, %v2167_v15  ;;  %v1600_v22 = vadd.f32 %v1599_v8, %v1341_v62  ;;  %v3137_v15 = vld [vmem:[%s4949_s0 + $0x22c] sm:$0xf]  ;;  %v2626_v8 = vld [vmem:[%s4949_s0 + $0x234] sm:$0xf0] }
 0x17a   :  { %3041 = vmatmul.msk.bf16.gmra.mxu2 %vm1113_vm0, %v2633_v18  ;;  %v3138_v18 = vld [vmem:[%s4949_s0 + $0x230] sm:$0xf0] }
 0x17b   :  { %v1859_v24 = vadd.f32 %v1858_v20, %v1600_v22  ;;  %v1471_v20 = vadd.f32 %v4125_v13, %v3648_v60  ;;  %v3215_v22 = vld [vmem:[%s4949_s0 + $0x49c] sm:$0xf]  ;;  %v2625_v25 = vor.u32 %v3138_v18, %v2624_v10  ;;  %v1481_v18 = vadd.f32 %v4125_v13, %v3726_v61 }
 0x17c   :  { %v3187_v10 = vld [vmem:[%s4949_s0 + $0x3b8] sm:$0xf0] }
 0x17d   :  { %v2068_v28 = vmax.f32 %v1859_v24, 0.0  ;;  %v1729_v37 = vpop.f32.mrf.mxu3  ;;  %v1866_v33 = vpop.f32.mrf.mxu2 }
 0x17e   :  { %v4129_v39 = vadd.f32 %v1729_v37, %v1471_v20  ;;  %v1343_v41 = vpop.f32.mrf.mxu0  ;;  %v2629_v20 = vor.u32 %v3137_v15, %v2626_v8 }
 0x17f   :  { %v2168_v45 = vpack.c.bf16 %v2068_v28, %v2068_v28  ;;  %v1344_v48 = vadd.f32 %v4125_v13, %v1343_v41  ;;  %v1602_v49 = vpop.f32.mrf.mxu1  ;;  %v2941_v28 = vor.u32 %v3215_v22, %v2938_v43 }
 0x181   :  { %2269 = vst.msk [vmem:[%s4951_s3 + $0x6c] sm:$0xf] %vm2241_vm1, %v2168_v45  ;;  %v1603_v54 = vadd.f32 %v1602_v49, %v1344_v48  ;;  %1382 = vmatmul.bf16.gmra.mxu0 %v2613_v40  ;;  %v3145_v45 = vld [vmem:[%s4949_s0 + $0x268] sm:$0xf0]  ;;  %v1479_v48 = vadd.f32 %v4125_v13, %v3700_v42  ;;  %v2636_v42 = vld [vmem:[%s4949_s0 + $0x240] sm:$0xf] }
 0x182   :  { %1641 = vmatmul.bf16.gmra.mxu1 %v2617_v34  ;;  %1771 = vmatmul.bf16.gmra.mxu3 %v2929_v44  ;;  %v2656_v44 = vld [vmem:[%s4949_s0 + $0x260] sm:$0xf] }
 0x183   :  { %v1862_v60 = vadd.f32 %v1861_v46, %v1603_v54 }
 0x185   :  { %v2069_v63 = vmax.f32 %v1862_v60, 0.0  ;;  %v1732_v0 = vpop.f32.mrf.mxu3  ;;  %v1868_v29 = vpop.f32.mrf.mxu2 }
 0x186   :  { %v4144_v51 = vadd.f32 %v1732_v0, %v1474_v53  ;;  %v1345_v1 = vpop.f32.mrf.mxu0  ;;  %v2657_v53 = vor.u32 %v3145_v45, %v2656_v44 }
 0x187   :  { %v2169_v4 = vpack.c.bf16 %v2069_v63, %v2069_v63  ;;  %v1346_v46 = vadd.f32 %v4125_v13, %v1345_v1  ;;  %v1604_v5 = vpop.f32.mrf.mxu1 }
 0x189   :  { %2270 = vst.msk [vmem:[%s4951_s3 + $0x70] sm:$0xf] %vm2241_vm1, %v2169_v4  ;;  %v1605_v17 = vadd.f32 %v1604_v5, %v1346_v46  ;;  %v3140_v4 = vld [vmem:[%s4949_s0 + $0x244] sm:$0xf]  ;;  %v2638_v5 = vld [vmem:[%s4949_s0 + $0x24c] sm:$0xf0] }
 0x18a   :  { %3042 = vmatmul.msk.bf16.gmra.mxu2 %vm1113_vm0, %v2645_v3  ;;  %v3141_v3 = vld [vmem:[%s4949_s0 + $0x248] sm:$0xf0] }
 0x18b   :  { %v1864_v62 = vadd.f32 %v1863_v6, %v1605_v17  ;;  %v2824_v17 = vld [vmem:[%s4949_s0 + $0x3b0] sm:$0xf]  ;;  %v2637_v22 = vor.u32 %v3141_v3, %v2636_v42  ;;  %v3190_v42 = vld [vmem:[%s4949_s0 + $0x3d0] sm:$0xf0]  ;;  %v1486_v3 = vadd.f32 %v4125_v13, %v3765_v31 }
 0x18d   :  { %v2070_v58 = vmax.f32 %v1864_v62, 0.0  ;;  %v1734_v24 = vpop.f32.mrf.mxu3  ;;  %v1871_v16 = vpop.f32.mrf.mxu2 }
 0x18e   :  { %v4172_v6 = vadd.f32 %v1734_v24, %v1476_v23  ;;  %v1348_v26 = vpop.f32.mrf.mxu0  ;;  %v2641_v23 = vor.u32 %v3140_v4, %v2638_v5 }
 0x18f   :  { %v2170_v37 = vpack.c.bf16 %v2070_v58, %v2070_v58  ;;  %v1349_v40 = vadd.f32 %v4125_v13, %v1348_v26  ;;  %v1607_v41 = vpop.f32.mrf.mxu1  ;;  %v2825_v58 = vor.u32 %v3187_v10, %v2824_v17 }
 0x191   :  { %2271 = vst.msk [vmem:[%s4951_s3 + $0x74] sm:$0xf] %vm2241_vm1, %v2170_v37  ;;  %v1608_v34 = vadd.f32 %v1607_v41, %v1349_v40  ;;  %1387 = vmatmul.bf16.gmra.mxu0 %v2625_v25  ;;  %v3148_v37 = vld [vmem:[%s4949_s0 + $0x280] sm:$0xf0]  ;;  %v1484_v40 = vadd.f32 %v4125_v13, %v3739_v12  ;;  %v2648_v12 = vld [vmem:[%s4949_s0 + $0x258] sm:$0xf] }
 0x192   :  { %1646 = vmatmul.bf16.gmra.mxu1 %v2629_v20  ;;  %1776 = vmatmul.bf16.gmra.mxu3 %v2941_v28  ;;  %v2668_v28 = vld [vmem:[%s4949_s0 + $0x278] sm:$0xf] }
 0x193   :  { %v1867_v27 = vadd.f32 %v1866_v33, %v1608_v34 }
 0x195   :  { %v2071_v49 = vmax.f32 %v1867_v27, 0.0  ;;  %v1737_v54 = vpop.f32.mrf.mxu3  ;;  %v1873_v60 = vpop.f32.mrf.mxu2 }
 0x196   :  { %v4187_v57 = vadd.f32 %v1737_v54, %v1479_v48  ;;  %v1350_v59 = vpop.f32.mrf.mxu0  ;;  %v2669_v48 = vor.u32 %v3148_v37, %v2668_v28 }
 0x197   :  { %v2171_v63 = vpack.c.bf16 %v2071_v49, %v2071_v49  ;;  %v1351_v33 = vadd.f32 %v4125_v13, %v1350_v59  ;;  %v1609_v0 = vpop.f32.mrf.mxu1 }
 0x199   :  { %2272 = vst.msk [vmem:[%s4951_s3 + $0x78] sm:$0xf] %vm2241_vm1, %v2171_v63  ;;  %v1610_v1 = vadd.f32 %v1609_v0, %v1351_v33  ;;  %v3143_v63 = vld [vmem:[%s4949_s0 + $0x25c] sm:$0xf]  ;;  %v2650_v0 = vld [vmem:[%s4949_s0 + $0x264] sm:$0xf0] }
 0x19a   :  { %3043 = vmatmul.msk.bf16.gmra.mxu2 %vm1113_vm0, %v2657_v53  ;;  %v3144_v53 = vld [vmem:[%s4949_s0 + $0x260] sm:$0xf0] }
 0x19b   :  { %v1869_v46 = vadd.f32 %v1868_v29, %v1610_v1  ;;  %v2836_v1 = vld [vmem:[%s4949_s0 + $0x3c8] sm:$0xf]  ;;  %v2649_v17 = vor.u32 %v3144_v53, %v2648_v12  ;;  %v3193_v12 = vld [vmem:[%s4949_s0 + $0x3e8] sm:$0xf0]  ;;  %v1491_v53 = vadd.f32 %v4125_v13, %v3804_v2 }
 0x19d   :  { %v2072_v15 = vmax.f32 %v1869_v46, 0.0  ;;  %v1739_v62 = vpop.f32.mrf.mxu3  ;;  %v1876_v8 = vpop.f32.mrf.mxu2 }
 0x19e   :  { %v4215_v29 = vadd.f32 %v1739_v62, %v1481_v18  ;;  %v1353_v43 = vpop.f32.mrf.mxu0  ;;  %v2653_v18 = vor.u32 %v3143_v63, %v2650_v0 }
 0x19f   :  { %v2172_v24 = vpack.c.bf16 %v2072_v15, %v2072_v15  ;;  %v1354_v25 = vadd.f32 %v4125_v13, %v1353_v43  ;;  %v1612_v26 = vpop.f32.mrf.mxu1  ;;  %v2837_v15 = vor.u32 %v3190_v42, %v2836_v1 }
 0x1a1   :  { %2273 = vst.msk [vmem:[%s4951_s3 + $0x7c] sm:$0xf] %vm2241_vm1, %v2172_v24  ;;  %v1613_v20 = vadd.f32 %v1612_v26, %v1354_v25  ;;  %1392 = vmatmul.bf16.gmra.mxu0 %v2637_v22  ;;  %v3151_v24 = vld [vmem:[%s4949_s0 + $0x298] sm:$0xf0]  ;;  %v1489_v25 = vadd.f32 %v4125_v13, %v3778_v47  ;;  %v2660_v47 = vld [vmem:[%s4949_s0 + $0x270] sm:$0xf] }
 0x1a2   :  { %1651 = vmatmul.bf16.gmra.mxu1 %v2641_v23  ;;  %3057 = vmatmul.msk.bf16.vlgmr.msra.gmra.mxu3 %vm1113_vm0, %v2825_v58  ;;  %v2680_v58 = vld [vmem:[%s4949_s0 + $0x290] sm:$0xf] }
 0x1a3   :  { %v1872_v61 = vadd.f32 %v1871_v16, %v1613_v20 }
 0x1a5   :  { %v2073_v41 = vmax.f32 %v1872_v61, 0.0  ;;  %v1742_v34 = vpop.f32.mrf.mxu3  ;;  %v1878_v27 = vpop.f32.mrf.mxu2 }
 0x1a6   :  { %v4231_v44 = vadd.f32 %v1742_v34, %v1484_v40  ;;  %v1355_v45 = vpop.f32.mrf.mxu0  ;;  %v2681_v40 = vor.u32 %v3151_v24, %v2680_v58 }
 0x1a7   :  { %v2173_v49 = vpack.c.bf16 %v2073_v41, %v2073_v41  ;;  %v1356_v16 = vadd.f32 %v4125_v13, %v1355_v45  ;;  %v1614_v54 = vpop.f32.mrf.mxu1 }
 0x1a9   :  { %2274 = vst.msk [vmem:[%s4951_s3 + $0x80] sm:$0xf] %vm2241_vm1, %v2173_v49  ;;  %v1615_v59 = vadd.f32 %v1614_v54, %v1356_v16  ;;  %v3146_v49 = vld [vmem:[%s4949_s0 + $0x274] sm:$0xf]  ;;  %v2662_v54 = vld [vmem:[%s4949_s0 + $0x27c] sm:$0xf0] }
 0x1aa   :  { %3044 = vmatmul.msk.bf16.gmra.mxu2 %vm1113_vm0, %v2669_v48  ;;  %v3147_v48 = vld [vmem:[%s4949_s0 + $0x278] sm:$0xf0] }
 0x1ab   :  { %v1874_v33 = vadd.f32 %v1873_v60, %v1615_v59  ;;  %v2848_v59 = vld [vmem:[%s4949_s0 + $0x3e0] sm:$0xf]  ;;  %v2661_v1 = vor.u32 %v3147_v48, %v2660_v47  ;;  %v3196_v47 = vld [vmem:[%s4949_s0 + $0x400] sm:$0xf0]  ;;  %v1496_v48 = vadd.f32 %v4125_v13, %v3843_v38 }
 0x1ad   :  { %v2074_v4 = vmax.f32 %v1874_v33, 0.0  ;;  %v1744_v46 = vpop.f32.mrf.mxu3  ;;  %v1881_v5 = vpop.f32.mrf.mxu2 }
 0x1ae   :  { %v4259_v60 = vadd.f32 %v1744_v46, %v1486_v3  ;;  %v1358_v10 = vpop.f32.mrf.mxu0  ;;  %v2665_v3 = vor.u32 %v3146_v49, %v2662_v54 }
 0x1af   :  { %v2174_v62 = vpack.c.bf16 %v2074_v4, %v2074_v4  ;;  %v1359_v22 = vadd.f32 %v4125_v13, %v1358_v10  ;;  %v1617_v43 = vpop.f32.mrf.mxu1  ;;  %v2849_v4 = vor.u32 %v3193_v12, %v2848_v59 }
 0x1b1   :  { %2275 = vst.msk [vmem:[%s4951_s3 + $0x84] sm:$0xf] %vm2241_vm1, %v2174_v62  ;;  %v1618_v23 = vadd.f32 %v1617_v43, %v1359_v22  ;;  %1397 = vmatmul.bf16.gmra.mxu0 %v2649_v17  ;;  %v3154_v62 = vld [vmem:[%s4949_s0 + $0x2b0] sm:$0xf0]  ;;  %v1494_v22 = vadd.f32 %v4125_v13, %v3817_v19  ;;  %v2672_v19 = vld [vmem:[%s4949_s0 + $0x288] sm:$0xf] }
 0x1b2   :  { %1656 = vmatmul.bf16.gmra.mxu1 %v2653_v18  ;;  %3058 = vmatmul.msk.bf16.gmra.mxu3 %vm1113_vm0, %v2837_v15  ;;  %v2692_v15 = vld [vmem:[%s4949_s0 + $0x2a8] sm:$0xf] }
 0x1b3   :  { %v1877_v31 = vadd.f32 %v1876_v8, %v1618_v23 }
 0x1b5   :  { %v2075_v26 = vmax.f32 %v1877_v31, 0.0  ;;  %v1747_v20 = vpop.f32.mrf.mxu3  ;;  %v1883_v61 = vpop.f32.mrf.mxu2 }
 0x1b6   :  { %v4275_v28 = vadd.f32 %v1747_v20, %v1489_v25  ;;  %v1360_v37 = vpop.f32.mrf.mxu0  ;;  %v2693_v25 = vor.u32 %v3154_v62, %v2692_v15 }
 0x1b7   :  { %v2175_v41 = vpack.c.bf16 %v2075_v26, %v2075_v26  ;;  %v1361_v8 = vadd.f32 %v4125_v13, %v1360_v37  ;;  %v1619_v34 = vpop.f32.mrf.mxu1 }
 0x1b9   :  { %2276 = vst.msk [vmem:[%s4951_s3 + $0x88] sm:$0xf] %vm2241_vm1, %v2175_v41  ;;  %v1620_v45 = vadd.f32 %v1619_v34, %v1361_v8  ;;  %v3149_v41 = vld [vmem:[%s4949_s0 + $0x28c] sm:$0xf]  ;;  %v2674_v34 = vld [vmem:[%s4949_s0 + $0x294] sm:$0xf0] }
 0x1ba   :  { %3045 = vmatmul.msk.bf16.gmra.mxu2 %vm1113_vm0, %v2681_v40  ;;  %v3150_v40 = vld [vmem:[%s4949_s0 + $0x290] sm:$0xf0] }
 0x1bb   :  { %v1879_v16 = vadd.f32 %v1878_v27, %v1620_v45  ;;  %v2860_v45 = vld [vmem:[%s4949_s0 + $0x3f8] sm:$0xf]  ;;  %v2673_v59 = vor.u32 %v3150_v40, %v2672_v19  ;;  %v3199_v19 = vld [vmem:[%s4949_s0 + $0x418] sm:$0xf0]  ;;  %v1501_v40 = vadd.f32 %v4125_v13, %v3882_v14 }
 0x1bd   :  { %v2076_v63 = vmax.f32 %v1879_v16, 0.0  ;;  %v1749_v33 = vpop.f32.mrf.mxu3  ;;  %v1886_v0 = vpop.f32.mrf.mxu2 }
 0x1be   :  { %v4303_v27 = vadd.f32 %v1749_v33, %v1491_v53  ;;  %v1363_v42 = vpop.f32.mrf.mxu0  ;;  %v2677_v53 = vor.u32 %v3149_v41, %v2674_v34 }
 0x1bf   :  { %v2176_v46 = vpack.c.bf16 %v2076_v63, %v2076_v63  ;;  %v1364_v17 = vadd.f32 %v4125_v13, %v1363_v42  ;;  %v1622_v10 = vpop.f32.mrf.mxu1  ;;  %v2861_v63 = vor.u32 %v3196_v47, %v2860_v45 }
 0x1c1   :  { %2277 = vst.msk [vmem:[%s4951_s3 + $0x8c] sm:$0xf] %vm2241_vm1, %v2176_v46  ;;  %v1623_v18 = vadd.f32 %v1622_v10, %v1364_v17  ;;  %1402 = vmatmul.bf16.gmra.mxu0 %v2661_v1  ;;  %v3157_v46 = vld [vmem:[%s4949_s0 + $0x2c8] sm:$0xf0]  ;;  %v1499_v17 = vadd.f32 %v4125_v13, %v3856_v55  ;;  %v2684_v55 = vld [vmem:[%s4949_s0 + $0x2a0] sm:$0xf] }
 0x1c2   :  { %1661 = vmatmul.bf16.gmra.mxu1 %v2665_v3  ;;  %3059 = vmatmul.msk.bf16.gmra.mxu3 %vm1113_vm0, %v2849_v4  ;;  %v2704_v4 = vld [vmem:[%s4949_s0 + $0x2c0] sm:$0xf] }
 0x1c3   :  { %v1882_v2 = vadd.f32 %v1881_v5, %v1623_v18 }
 0x1c5   :  { %v2077_v43 = vmax.f32 %v1882_v2, 0.0  ;;  %v1752_v23 = vpop.f32.mrf.mxu3  ;;  %v1888_v31 = vpop.f32.mrf.mxu2 }
 0x1c6   :  { %v4319_v58 = vadd.f32 %v1752_v23, %v1494_v22  ;;  %v1365_v24 = vpop.f32.mrf.mxu0  ;;  %v2705_v22 = vor.u32 %v3157_v46, %v2704_v4 }
 0x1c7   :  { %v2177_v26 = vpack.c.bf16 %v2077_v43, %v2077_v43  ;;  %v1366_v5 = vadd.f32 %v4125_v13, %v1365_v24  ;;  %v1624_v20 = vpop.f32.mrf.mxu1 }
 0x1c9   :  { %2278 = vst.msk [vmem:[%s4951_s3 + $0x90] sm:$0xf] %vm2241_vm1, %v2177_v26  ;;  %v1625_v37 = vadd.f32 %v1624_v20, %v1366_v5  ;;  %v3152_v26 = vld [vmem:[%s4949_s0 + $0x2a4] sm:$0xf]  ;;  %v2686_v20 = vld [vmem:[%s4949_s0 + $0x2ac] sm:$0xf0] }
 0x1ca   :  { %3046 = vmatmul.msk.bf16.gmra.mxu2 %vm1113_vm0, %v2693_v25  ;;  %v3153_v25 = vld [vmem:[%s4949_s0 + $0x2a8] sm:$0xf0] }
 0x1cb   :  { %v1884_v8 = vadd.f32 %v1883_v61, %v1625_v37  ;;  %v2872_v37 = vld [vmem:[%s4949_s0 + $0x410] sm:$0xf]  ;;  %v2685_v45 = vor.u32 %v3153_v25, %v2684_v55  ;;  %v3202_v55 = vld [vmem:[%s4949_s0 + $0x430] sm:$0xf0]  ;;  %v1506_v25 = vadd.f32 %v4125_v13, %v3921_v52 }
 0x1cd   :  { %v2078_v49 = vmax.f32 %v1884_v8, 0.0  ;;  %v1754_v16 = vpop.f32.mrf.mxu3  ;;  %v1891_v54 = vpop.f32.mrf.mxu2 }
 0x1ce   :  { %v4347_v61 = vadd.f32 %v1754_v16, %v1496_v48  ;;  %v1368_v12 = vpop.f32.mrf.mxu0  ;;  %v2689_v48 = vor.u32 %v3152_v26, %v2686_v20 }
 0x1cf   :  { %v2178_v33 = vpack.c.bf16 %v2078_v49, %v2078_v49  ;;  %v1369_v1 = vadd.f32 %v4125_v13, %v1368_v12  ;;  %v1627_v42 = vpop.f32.mrf.mxu1  ;;  %v2873_v49 = vor.u32 %v3199_v19, %v2872_v37 }
 0x1d1   :  { %2279 = vst.msk [vmem:[%s4951_s3 + $0x94] sm:$0xf] %vm2241_vm1, %v2178_v33  ;;  %v1628_v3 = vadd.f32 %v1627_v42, %v1369_v1  ;;  %1407 = vmatmul.bf16.gmra.mxu0 %v2673_v59  ;;  %v3160_v33 = vld [vmem:[%s4949_s0 + $0x2e0] sm:$0xf0]  ;;  %v1504_v1 = vadd.f32 %v4125_v13, %v3895_v32  ;;  %v2696_v32 = vld [vmem:[%s4949_s0 + $0x2b8] sm:$0xf] }
 0x1d2   :  { %1666 = vmatmul.bf16.gmra.mxu1 %v2677_v53  ;;  %3060 = vmatmul.msk.bf16.gmra.mxu3 %vm1113_vm0, %v2861_v63  ;;  %v2716_v63 = vld [vmem:[%s4949_s0 + $0x2d8] sm:$0xf] }
 0x1d3   :  { %v1887_v38 = vadd.f32 %v1886_v0, %v1628_v3 }
 0x1d5   :  { %v2079_v10 = vmax.f32 %v1887_v38, 0.0  ;;  %v1757_v18 = vpop.f32.mrf.mxu3  ;;  %v1893_v2 = vpop.f32.mrf.mxu2 }
 0x1d6   :  { %v4363_v15 = vadd.f32 %v1757_v18, %v1499_v17  ;;  %v1370_v62 = vpop.f32.mrf.mxu0  ;;  %v2717_v17 = vor.u32 %v3160_v33, %v2716_v63 }
 0x1d7   :  { %v2179_v43 = vpack.c.bf16 %v2079_v10, %v2079_v10  ;;  %v1371_v0 = vadd.f32 %v4125_v13, %v1370_v62  ;;  %v1629_v23 = vpop.f32.mrf.mxu1 }
 0x1d9   :  { %2280 = vst.msk [vmem:[%s4951_s3 + $0x98] sm:$0xf] %vm2241_vm1, %v2179_v43  ;;  %v1630_v24 = vadd.f32 %v1629_v23, %v1371_v0  ;;  %v3155_v43 = vld [vmem:[%s4949_s0 + $0x2bc] sm:$0xf]  ;;  %v2698_v23 = vld [vmem:[%s4949_s0 + $0x2c4] sm:$0xf0] }
 0x1da   :  { %3047 = vmatmul.msk.bf16.gmra.mxu2 %vm1113_vm0, %v2705_v22  ;;  %v3156_v22 = vld [vmem:[%s4949_s0 + $0x2c0] sm:$0xf0] }
 0x1db   :  { %v1889_v5 = vadd.f32 %v1888_v31, %v1630_v24  ;;  %v2884_v24 = vld [vmem:[%s4949_s0 + $0x428] sm:$0xf]  ;;  %v2697_v37 = vor.u32 %v3156_v22, %v2696_v32  ;;  %v3205_v32 = vld [vmem:[%s4949_s0 + $0x448] sm:$0xf0]  ;;  %v1511_v22 = vadd.f32 %v4125_v13, %v3960_v30 }
 0x1dd   :  { %v2080_v41 = vmax.f32 %v1889_v5, 0.0  ;;  %v1759_v8 = vpop.f32.mrf.mxu3  ;;  %v1896_v34 = vpop.f32.mrf.mxu2 }
 0x1de   :  { %v4391_v31 = vadd.f32 %v1759_v8, %v1501_v40  ;;  %v1373_v47 = vpop.f32.mrf.mxu0  ;;  %v2701_v40 = vor.u32 %v3155_v43, %v2698_v23 }
 0x1df   :  { %v2180_v16 = vpack.c.bf16 %v2080_v41, %v2080_v41  ;;  %v1374_v59 = vadd.f32 %v4125_v13, %v1373_v47  ;;  %v1632_v12 = vpop.f32.mrf.mxu1  ;;  %v2885_v41 = vor.u32 %v3202_v55, %v2884_v24 }
 0x1e1   :  { %2281 = vst.msk [vmem:[%s4951_s3 + $0x9c] sm:$0xf] %vm2241_vm1, %v2180_v16  ;;  %v1633_v53 = vadd.f32 %v1632_v12, %v1374_v59  ;;  %1412 = vmatmul.bf16.gmra.mxu0 %v2685_v45  ;;  %v3163_v16 = vld [vmem:[%s4949_s0 + $0x2f8] sm:$0xf0]  ;;  %v1509_v59 = vadd.f32 %v4125_v13, %v3934_v7  ;;  %v2708_v7 = vld [vmem:[%s4949_s0 + $0x2d0] sm:$0xf] }
 0x1e2   :  { %1671 = vmatmul.bf16.gmra.mxu1 %v2689_v48  ;;  %3061 = vmatmul.msk.bf16.gmra.mxu3 %vm1113_vm0, %v2873_v49  ;;  %v2728_v49 = vld [vmem:[%s4949_s0 + $0x2f0] sm:$0xf] }
 0x1e3   :  { %v1892_v14 = vadd.f32 %v1891_v54, %v1633_v53 }
 0x1e5   :  { %v2081_v42 = vmax.f32 %v1892_v14, 0.0  ;;  %v1762_v3 = vpop.f32.mrf.mxu3  ;;  %v1898_v38 = vpop.f32.mrf.mxu2 }
 0x1e6   :  { %v4407_v4 = vadd.f32 %v1762_v3, %v1504_v1  ;;  %v1375_v46 = vpop.f32.mrf.mxu0  ;;  %v2729_v1 = vor.u32 %v3163_v16, %v2728_v49 }
 0x1e7   :  { %v2181_v10 = vpack.c.bf16 %v2081_v42, %v2081_v42  ;;  %v1376_v54 = vadd.f32 %v4125_v13, %v1375_v46  ;;  %v1634_v18 = vpop.f32.mrf.mxu1 }
 0x1e9   :  { %2282 = vst.msk [vmem:[%s4951_s3 + $0xa0] sm:$0xf] %vm2241_vm1, %v2181_v10  ;;  %v1635_v62 = vadd.f32 %v1634_v18, %v1376_v54  ;;  %v3158_v10 = vld [vmem:[%s4949_s0 + $0x2d4] sm:$0xf]  ;;  %v2710_v18 = vld [vmem:[%s4949_s0 + $0x2dc] sm:$0xf0] }
 0x1ea   :  { %3048 = vmatmul.msk.bf16.gmra.mxu2 %vm1113_vm0, %v2717_v17  ;;  %v3159_v17 = vld [vmem:[%s4949_s0 + $0x2d8] sm:$0xf0] }
 0x1eb   :  { %v1894_v0 = vadd.f32 %v1893_v2, %v1635_v62  ;;  %v2896_v62 = vld [vmem:[%s4949_s0 + $0x440] sm:$0xf]  ;;  %v2709_v24 = vor.u32 %v3159_v17, %v2708_v7  ;;  %v3208_v7 = vld [vmem:[%s4949_s0 + $0x460] sm:$0xf0]  ;;  %v1516_v17 = vadd.f32 %v4125_v13, %v3999_v11 }
 0x1ed   :  { %v2082_v26 = vmax.f32 %v1894_v0, 0.0  ;;  %v1764_v5 = vpop.f32.mrf.mxu3  ;;  %v1901_v20 = vpop.f32.mrf.mxu2 }
 0x1ee   :  { %v4435_v2 = vadd.f32 %v1764_v5, %v1506_v25  ;;  %v1378_v19 = vpop.f32.mrf.mxu0  ;;  %v2713_v25 = vor.u32 %v3158_v10, %v2710_v18 }
 0x1ef   :  { %v2182_v8 = vpack.c.bf16 %v2082_v26, %v2082_v26  ;;  %v1379_v45 = vadd.f32 %v4125_v13, %v1378_v19  ;;  %v1637_v47 = vpop.f32.mrf.mxu1  ;;  %v2897_v26 = vor.u32 %v3205_v32, %v2896_v62 }
 0x1f1   :  { %2283 = vst.msk [vmem:[%s4951_s3 + $0xa4] sm:$0xf] %vm2241_vm1, %v2182_v8  ;;  %v1638_v48 = vadd.f32 %v1637_v47, %v1379_v45  ;;  %1417 = vmatmul.bf16.gmra.mxu0 %v2697_v37  ;;  %v3166_v8 = vld [vmem:[%s4949_s0 + $0x310] sm:$0xf0]  ;;  %v1514_v45 = vadd.f32 %v4125_v13, %v3973_v50  ;;  %v2720_v50 = vld [vmem:[%s4949_s0 + $0x2e8] sm:$0xf] }
 0x1f2   :  { %1676 = vmatmul.bf16.gmra.mxu1 %v2701_v40  ;;  %3062 = vmatmul.msk.bf16.gmra.mxu3 %vm1113_vm0, %v2885_v41  ;;  %v2740_v41 = vld [vmem:[%s4949_s0 + $0x308] sm:$0xf] }
 0x1f3   :  { %v1897_v52 = vadd.f32 %v1896_v34, %v1638_v48 }
 0x1f5   :  { %v2083_v12 = vmax.f32 %v1897_v52, 0.0  ;;  %v1767_v53 = vpop.f32.mrf.mxu3  ;;  %v1903_v14 = vpop.f32.mrf.mxu2 }
 0x1f6   :  { %v4451_v63 = vadd.f32 %v1767_v53, %v1509_v59  ;;  %v1380_v33 = vpop.f32.mrf.mxu0  ;;  %v2741_v59 = vor.u32 %v3166_v8, %v2740_v41 }
 0x1f7   :  { %v2183_v42 = vpack.c.bf16 %v2083_v12, %v2083_v12  ;;  %v1381_v34 = vadd.f32 %v4125_v13, %v1380_v33  ;;  %v1639_v3 = vpop.f32.mrf.mxu1 }
 0x1f9   :  { %2284 = vst.msk [vmem:[%s4951_s3 + $0xa8] sm:$0xf] %vm2241_vm1, %v2183_v42  ;;  %v1640_v46 = vadd.f32 %v1639_v3, %v1381_v34  ;;  %v3161_v42 = vld [vmem:[%s4949_s0 + $0x2ec] sm:$0xf]  ;;  %v2722_v3 = vld [vmem:[%s4949_s0 + $0x2f4] sm:$0xf0] }
 0x1fa   :  { %3049 = vmatmul.msk.bf16.gmra.mxu2 %vm1113_vm0, %v2729_v1  ;;  %v3162_v1 = vld [vmem:[%s4949_s0 + $0x2f0] sm:$0xf0] }
 0x1fb   :  { %v1899_v54 = vadd.f32 %v1898_v38, %v1640_v46  ;;  %v2908_v46 = vld [vmem:[%s4949_s0 + $0x458] sm:$0xf]  ;;  %v2721_v62 = vor.u32 %v3162_v1, %v2720_v50  ;;  %v3211_v50 = vld [vmem:[%s4949_s0 + $0x478] sm:$0xf0]  ;;  %v1521_v1 = vadd.f32 %v4125_v13, %v4038_v56 }
 0x1fd   :  { %v2084_v43 = vmax.f32 %v1899_v54, 0.0  ;;  %v1769_v0 = vpop.f32.mrf.mxu3  ;;  %v1906_v23 = vpop.f32.mrf.mxu2 }
 0x1fe   :  { %v4479_v38 = vadd.f32 %v1769_v0, %v1511_v22  ;;  %v1383_v55 = vpop.f32.mrf.mxu0  ;;  %v2725_v22 = vor.u32 %v3161_v42, %v2722_v3 }
 0x1ff   :  { %v2184_v5 = vpack.c.bf16 %v2084_v43, %v2084_v43  ;;  %v1384_v37 = vadd.f32 %v4125_v13, %v1383_v55  ;;  %v1642_v19 = vpop.f32.mrf.mxu1  ;;  %v2909_v43 = vor.u32 %v3208_v7, %v2908_v46 }
 0x201   :  { %2285 = vst.msk [vmem:[%s4951_s3 + $0xac] sm:$0xf] %vm2241_vm1, %v2184_v5  ;;  %v1643_v40 = vadd.f32 %v1642_v19, %v1384_v37  ;;  %1422 = vmatmul.bf16.gmra.mxu0 %v2709_v24  ;;  %v3169_v5 = vld [vmem:[%s4949_s0 + $0x328] sm:$0xf0]  ;;  %v1519_v37 = vadd.f32 %v4125_v13, %v4012_v35  ;;  %v2732_v35 = vld [vmem:[%s4949_s0 + $0x300] sm:$0xf] }
 0x202   :  { %1681 = vmatmul.bf16.gmra.mxu1 %v2713_v25  ;;  %3063 = vmatmul.msk.bf16.gmra.mxu3 %vm1113_vm0, %v2897_v26  ;;  %v2752_v26 = vld [vmem:[%s4949_s0 + $0x320] sm:$0xf] }
 0x203   :  { %v1902_v30 = vadd.f32 %v1901_v20, %v1643_v40 }
 0x205   :  { %v2085_v47 = vmax.f32 %v1902_v30, 0.0  ;;  %v1772_v48 = vpop.f32.mrf.mxu3  ;;  %v1908_v52 = vpop.f32.mrf.mxu2 }
 0x206   :  { %v4495_v49 = vadd.f32 %v1772_v48, %v1514_v45  ;;  %v1385_v16 = vpop.f32.mrf.mxu0  ;;  %v2753_v45 = vor.u32 %v3169_v5, %v2752_v26 }
 0x207   :  { %v2185_v12 = vpack.c.bf16 %v2085_v47, %v2085_v47  ;;  %v1386_v20 = vadd.f32 %v4125_v13, %v1385_v16  ;;  %v1644_v53 = vpop.f32.mrf.mxu1 }
 0x209   :  { %2286 = vst.msk [vmem:[%s4951_s3 + $0xb0] sm:$0xf] %vm2241_vm1, %v2185_v12  ;;  %v1645_v33 = vadd.f32 %v1644_v53, %v1386_v20  ;;  %v3164_v12 = vld [vmem:[%s4949_s0 + $0x304] sm:$0xf]  ;;  %v2734_v53 = vld [vmem:[%s4949_s0 + $0x30c] sm:$0xf0] }
 0x20a   :  { %3050 = vmatmul.msk.bf16.gmra.mxu2 %vm1113_vm0, %v2741_v59  ;;  %v3165_v59 = vld [vmem:[%s4949_s0 + $0x308] sm:$0xf0] }
 0x20b   :  { %v1904_v34 = vadd.f32 %v1903_v14, %v1645_v33  ;;  %v2920_v33 = vld [vmem:[%s4949_s0 + $0x470] sm:$0xf]  ;;  %v2733_v46 = vor.u32 %v3165_v59, %v2732_v35  ;;  %v2932_v35 = vld [vmem:[%s4949_s0 + $0x488] sm:$0xf]  ;;  %v3214_v59 = vld [vmem:[%s4949_s0 + $0x490] sm:$0xf0] }
 0x20d   :  { %v2086_v10 = vmax.f32 %v1904_v34, 0.0  ;;  %v1774_v54 = vpop.f32.mrf.mxu3  ;;  %v1911_v18 = vpop.f32.mrf.mxu2 }
 0x20e   :  { %v4523_v14 = vadd.f32 %v1774_v54, %v1516_v17  ;;  %v1388_v32 = vpop.f32.mrf.mxu0  ;;  %v2737_v17 = vor.u32 %v3164_v12, %v2734_v53 }
 0x20f   :  { %v2186_v0 = vpack.c.bf16 %v2086_v10, %v2086_v10  ;;  %v1389_v24 = vadd.f32 %v4125_v13, %v1388_v32  ;;  %v1647_v55 = vpop.f32.mrf.mxu1  ;;  %v2921_v10 = vor.u32 %v3211_v50, %v2920_v33 }
 0x211   :  { %2287 = vst.msk [vmem:[%s4951_s3 + $0xb4] sm:$0xf] %vm2241_vm1, %v2186_v0  ;;  %v1648_v25 = vadd.f32 %v1647_v55, %v1389_v24  ;;  %1427 = vmatmul.bf16.gmra.mxu0 %v2721_v62  ;;  %v3172_v0 = vld [vmem:[%s4949_s0 + $0x340] sm:$0xf0] }
 0x212   :  { %1686 = vmatmul.bf16.gmra.mxu1 %v2725_v22  ;;  %3064 = vmatmul.msk.bf16.gmra.mxu3 %vm1113_vm0, %v2909_v43  ;;  %v2764_v43 = vld [vmem:[%s4949_s0 + $0x338] sm:$0xf] }
 0x213   :  { %v1907_v11 = vadd.f32 %v1906_v23, %v1648_v25  ;;  %v2765_v5 = vor.u32 %v3172_v0, %v2764_v43 }
 0x215   :  { %v2087_v19 = vmax.f32 %v1907_v11, 0.0  ;;  %v1777_v40 = vpop.f32.mrf.mxu3  ;;  %v1913_v30 = vpop.f32.mrf.mxu2 }
 0x216   :  { %v4539_v41 = vadd.f32 %v1777_v40, %v1519_v37  ;;  %v1390_v8 = vpop.f32.mrf.mxu0 }
 0x217   :  { %v2187_v47 = vpack.c.bf16 %v2087_v19, %v2087_v19  ;;  %v1391_v23 = vadd.f32 %v4125_v13, %v1390_v8  ;;  %v1649_v48 = vpop.f32.mrf.mxu1 }
 0x219   :  { %2288 = vst.msk [vmem:[%s4951_s3 + $0xb8] sm:$0xf] %vm2241_vm1, %v2187_v47  ;;  %v1650_v16 = vadd.f32 %v1649_v48, %v1391_v23  ;;  %v3168_v47 = vld [vmem:[%s4949_s0 + $0x320] sm:$0xf0]  ;;  %v3167_v23 = vld [vmem:[%s4949_s0 + $0x31c] sm:$0xf] }
 0x21a   :  { %3051 = vmatmul.msk.bf16.gmra.mxu2 %vm1113_vm0, %v2753_v45 }
 0x21b   :  { %v1909_v20 = vadd.f32 %v1908_v52, %v1650_v16  ;;  %v2746_v16 = vld [vmem:[%s4949_s0 + $0x324] sm:$0xf0] }
 0x21d   :  { %v2088_v42 = vmax.f32 %v1909_v20, 0.0  ;;  %v1779_v34 = vpop.f32.mrf.mxu3  ;;  %v1916_v3 = vpop.f32.mrf.mxu2 }
 0x21e   :  { %v4567_v52 = vadd.f32 %v1779_v34, %v1521_v1  ;;  %v1393_v7 = vpop.f32.mrf.mxu0  ;;  %v2749_v1 = vor.u32 %v3167_v23, %v2746_v16 }
 0x21f   :  { %v2188_v54 = vpack.c.bf16 %v2088_v42, %v2088_v42  ;;  %v1394_v62 = vadd.f32 %v4125_v13, %v1393_v7  ;;  %v1652_v32 = vpop.f32.mrf.mxu1  ;;  %v2933_v42 = vor.u32 %v3214_v59, %v2932_v35 }
 0x221   :  { %2289 = vst.msk [vmem:[%s4951_s3 + $0xbc] sm:$0xf] %vm2241_vm1, %v2188_v54  ;;  %v1653_v22 = vadd.f32 %v1652_v32, %v1394_v62  ;;  %1432 = vmatmul.bf16.gmra.mxu0 %v2733_v46  ;;  %v2776_v62 = vld [vmem:[%s4949_s0 + $0x350] sm:$0xf]  ;;  %v3175_v32 = vld [vmem:[%s4949_s0 + $0x358] sm:$0xf0] }
 0x222   :  { %1691 = vmatmul.bf16.gmra.mxu1 %v2737_v17  ;;  %3065 = vmatmul.msk.bf16.gmra.mxu3 %vm1113_vm0, %v2921_v10 }
 0x223   :  { %v1912_v56 = vadd.f32 %v1911_v18, %v1653_v22 }
 0x225   :  { %v2089_v24 = vmax.f32 %v1912_v56, 0.0  ;;  %v1918_v55 = vpop.f32.mrf.mxu2  ;;  %v1986_v25 = vpop.f32.mrf.mxu3 }
 0x226   :  { %v1987_v11 = vadd.f32 %v1986_v25, %v4096_v9  ;;  %v1395_v26 = vpop.f32.mrf.mxu0  ;;  %v2744_v9 = vld [vmem:[%s4949_s0 + $0x318] sm:$0xf] }
 0x227   :  { %v2189_v37 = vpack.c.bf16 %v2089_v24, %v2089_v24  ;;  %v1396_v19 = vadd.f32 %v4125_v13, %v1395_v26  ;;  %v1654_v40 = vpop.f32.mrf.mxu1  ;;  %v2745_v53 = vor.u32 %v3168_v47, %v2744_v9  ;;  %v2944_v9 = vld [vmem:[%s4949_s0 + $0x4a0] sm:$0xf]  ;;  %v3217_v47 = vld [vmem:[%s4949_s0 + $0x4a8] sm:$0xf0] }
 0x228   :  { %v2119_v18 = vmax.f32 %v1987_v11, 0.0 }
 0x229   :  { %2290 = vst.msk [vmem:[%s4951_s3 + $0xc0] sm:$0xf] %vm2241_vm1, %v2189_v37  ;;  %v1655_v8 = vadd.f32 %v1654_v40, %v1396_v19  ;;  %v3171_v40 = vld [vmem:[%s4949_s0 + $0x338] sm:$0xf0] }
 0x22a   :  { %v2219_v45 = vpack.c.bf16 %v2119_v18, %v2119_v18  ;;  %3052 = vmatmul.msk.bf16.gmra.mxu2 %vm1113_vm0, %v2765_v5  ;;  %v3170_v18 = vld [vmem:[%s4949_s0 + $0x334] sm:$0xf] }
 0x22b   :  { %v1914_v48 = vadd.f32 %v1913_v30, %v1655_v8 }
 0x22c   :  { %2320 = vst.msk [vmem:[%s4951_s3 + $0x138] sm:$0xf] %vm2241_vm1, %v2219_v45  ;;  %v2758_v45 = vld [vmem:[%s4949_s0 + $0x33c] sm:$0xf0] }
 0x22d   :  { %v2090_v12 = vmax.f32 %v1914_v48, 0.0  ;;  %v1921_v20 = vpop.f32.mrf.mxu2  ;;  %v1988_v30 = vpop.f32.mrf.mxu3 }
 0x22e   :  { %v1989_v33 = vadd.f32 %v1988_v30, %v4129_v39  ;;  %v1398_v50 = vpop.f32.mrf.mxu0  ;;  %v2945_v30 = vor.u32 %v3217_v47, %v2944_v9 }
 0x22f   :  { %v2190_v34 = vpack.c.bf16 %v2090_v12, %v2090_v12  ;;  %v1399_v46 = vadd.f32 %v4125_v13, %v1398_v50  ;;  %v1657_v7 = vpop.f32.mrf.mxu1  ;;  %v2761_v12 = vor.u32 %v3170_v18, %v2758_v45 }
 0x230   :  { %v2120_v17 = vmax.f32 %v1989_v33, 0.0 }
 0x231   :  { %2291 = vst.msk [vmem:[%s4951_s3 + $0xc4] sm:$0xf] %vm2241_vm1, %v2190_v34  ;;  %v1658_v10 = vadd.f32 %v1657_v7, %v1399_v46  ;;  %1437 = vmatmul.bf16.gmra.mxu0 %v2745_v53  ;;  %v2788_v46 = vld [vmem:[%s4949_s0 + $0x368] sm:$0xf] }
 0x232   :  { %v2220_v54 = vpack.c.bf16 %v2120_v17, %v2120_v17  ;;  %1696 = vmatmul.bf16.gmra.mxu1 %v2749_v1  ;;  %3066 = vmatmul.msk.bf16.gmra.mxu3 %vm1113_vm0, %v2933_v42 }
 0x233   :  { %v1917_v39 = vadd.f32 %v1916_v3, %v1658_v10  ;;  %v2777_v3 = vor.u32 %v3175_v32, %v2776_v62  ;;  %v4677_v32 = vld [vmem:[%s4950_s2] ss:$0 sm:$0xff] }
 0x234   :  { %2321 = vst.msk [vmem:[%s4951_s3 + $0x13c] sm:$0xf] %vm2241_vm1, %v2220_v54 }
 0x235   :  { %v2091_v22 = vmax.f32 %v1917_v39, 0.0  ;;  %v1923_v56 = vpop.f32.mrf.mxu2  ;;  %v1991_v43 = vpop.f32.mrf.mxu3 }
 0x236   :  { %v1992_v0 = vadd.f32 %v1991_v43, %v4144_v51  ;;  %v1400_v24 = vpop.f32.mrf.mxu0  ;;  %v2756_v51 = vld [vmem:[%s4949_s0 + $0x330] sm:$0xf] }
 0x237   :  { %v2191_v25 = vpack.c.bf16 %v2091_v22, %v2091_v22  ;;  %v1401_v11 = vadd.f32 %v4125_v13, %v1400_v24  ;;  %v1659_v26 = vpop.f32.mrf.mxu1  ;;  %v2757_v16 = vor.u32 %v3171_v40, %v2756_v51 }
 0x238   :  { %v2121_v5 = vmax.f32 %v1992_v0, 0.0 }
 0x239   :  { %2292 = vst.msk [vmem:[%s4951_s3 + $0xc8] sm:$0xf] %vm2241_vm1, %v2191_v25  ;;  %v1660_v37 = vadd.f32 %v1659_v26, %v1401_v11  ;;  %v3174_v25 = vld [vmem:[%s4949_s0 + $0x350] sm:$0xf0]  ;;  %v3173_v26 = vld [vmem:[%s4949_s0 + $0x34c] sm:$0xf] }
 0x23a   :  { %v2221_v19 = vpack.c.bf16 %v2121_v5, %v2121_v5  ;;  %3053 = vmatmul.msk.bf16.gmra.mxu2 %vm1113_vm0, %v2777_v3  ;;  %v2770_v5 = vld [vmem:[%s4949_s0 + $0x354] sm:$0xf0] }
 0x23b   :  { %v1919_v8 = vadd.f32 %v1918_v55, %v1660_v37 }
 0x23c   :  { %2322 = vst.msk [vmem:[%s4951_s3 + $0x140] sm:$0xf] %vm2241_vm1, %v2221_v19 }
 0x23d   :  { %v2092_v23 = vmax.f32 %v1919_v8, 0.0  ;;  %v1926_v48 = vpop.f32.mrf.mxu2  ;;  %v1993_v55 = vpop.f32.mrf.mxu3  ;;  %v2773_v8 = vor.u32 %v3173_v26, %v2770_v5 }
 0x23e   :  { %v1994_v35 = vadd.f32 %v1993_v55, %v4172_v6  ;;  %v1403_v59 = vpop.f32.mrf.mxu0 }
 0x23f   :  { %v2192_v53 = vpack.c.bf16 %v2092_v23, %v2092_v23  ;;  %v1404_v33 = vadd.f32 %v4125_v13, %v1403_v59  ;;  %v1662_v50 = vpop.f32.mrf.mxu1  ;;  %v3178_v13 = vld [vmem:[%s4949_s0 + $0x370] sm:$0xf0]  ;;  %v3181_v59 = vld [vmem:[%s4949_s0 + $0x388] sm:$0xf0] }
 0x240   :  { %v2122_v1 = vmax.f32 %v1994_v35, 0.0 }
 0x241   :  { %2293 = vst.msk [vmem:[%s4951_s3 + $0xcc] sm:$0xf] %vm2241_vm1, %v2192_v53  ;;  %v1663_v42 = vadd.f32 %v1662_v50, %v1404_v33  ;;  %1442 = vmatmul.bf16.gmra.mxu0 %v2757_v16 }
 0x242   :  { %v2222_v34 = vpack.c.bf16 %v2122_v1, %v2122_v1  ;;  %1701 = vmatmul.bf16.gmra.mxu1 %v2761_v12  ;;  %3067 = vmatmul.msk.bf16.gmra.mxu3 %vm1113_vm0, %v2945_v30 }
 0x243   :  { %v1922_v6 = vadd.f32 %v1921_v20, %v1663_v42  ;;  %v2789_v20 = vor.u32 %v3178_v13, %v2788_v46 }
 0x244   :  { %2323 = vst.msk [vmem:[%s4951_s3 + $0x144] sm:$0xf] %vm2241_vm1, %v2222_v34 }
 0x245   :  { %v2093_v7 = vmax.f32 %v1922_v6, 0.0  ;;  %v1928_v17 = vpop.f32.mrf.mxu2  ;;  %v1996_v10 = vpop.f32.mrf.mxu3 }
 0x246   :  { %v1997_v54 = vadd.f32 %v1996_v10, %v4187_v57  ;;  %v1405_v39 = vpop.f32.mrf.mxu0  ;;  %v2768_v57 = vld [vmem:[%s4949_s0 + $0x348] sm:$0xf] }
 0x247   :  { %v2193_v62 = vpack.c.bf16 %v2093_v7, %v2093_v7  ;;  %v1406_v22 = vadd.f32 %v4677_v32, %v1405_v39  ;;  %v1664_v43 = vpop.f32.mrf.mxu1  ;;  %v2769_v40 = vor.u32 %v3174_v25, %v2768_v57  ;;  %v3177_v7 = vld [vmem:[%s4949_s0 + $0x368] sm:$0xf0]  ;;  %v2782_v39 = vld [vmem:[%s4949_s0 + $0x36c] sm:$0xf0] }
 0x248   :  { %v2123_v0 = vmax.f32 %v1997_v54, 0.0  ;;  %v3176_v54 = vld [vmem:[%s4949_s0 + $0x364] sm:$0xf] }
 0x249   :  { %2294 = vst.msk [vmem:[%s4951_s3 + $0xd0] sm:$0xf] %vm2241_vm1, %v2193_v62  ;;  %v1665_v24 = vadd.f32 %v1664_v43, %v1406_v22 }
 0x24a   :  { %v2223_v3 = vpack.c.bf16 %v2123_v0, %v2123_v0  ;;  %3054 = vmatmul.msk.bf16.gmra.mxu2 %vm1113_vm0, %v2789_v20 }
 0x24b   :  { %v1924_v11 = vadd.f32 %v1923_v56, %v1665_v24  ;;  %v2785_v24 = vor.u32 %v3176_v54, %v2782_v39 }
 0x24c   :  { %2324 = vst.msk [vmem:[%s4951_s3 + $0x148] sm:$0xf] %vm2241_vm1, %v2223_v3 }
 0x24d   :  { %v2094_v37 = vmax.f32 %v1924_v11, 0.0  ;;  %v1931_v19 = vpop.f32.mrf.mxu2  ;;  %v1998_v51 = vpop.f32.mrf.mxu3 }
 0x24e   :  { %v1999_v18 = vadd.f32 %v1998_v51, %v4215_v29  ;;  %v1408_v56 = vpop.f32.mrf.mxu0  ;;  %v2800_v29 = vld [vmem:[%s4949_s0 + $0x380] sm:$0xf]  ;;  %v3184_v51 = vld [vmem:[%s4949_s0 + $0x3a0] sm:$0xf0] }
 0x24f   :  { %v2194_v45 = vpack.c.bf16 %v2094_v37, %v2094_v37  ;;  %v1409_v9 = vadd.f32 %v4677_v32, %v1408_v56  ;;  %v1667_v47 = vpop.f32.mrf.mxu1 }
 0x250   :  { %v2124_v23 = vmax.f32 %v1999_v18, 0.0 }
 0x251   :  { %2295 = vst.msk [vmem:[%s4951_s3 + $0xd4] sm:$0xf] %vm2241_vm1, %v2194_v45  ;;  %v1668_v55 = vadd.f32 %v1667_v47, %v1409_v9  ;;  %1447 = vmatmul.bf16.gmra.mxu0 %v2769_v40 }
 0x252   :  { %v2224_v16 = vpack.c.bf16 %v2124_v23, %v2124_v23  ;;  %1706 = vmatmul.bf16.gmra.mxu1 %v2773_v8 }
 0x253   :  { %v1927_v35 = vadd.f32 %v1926_v48, %v1668_v55  ;;  %v2801_v48 = vor.u32 %v3181_v59, %v2800_v29  ;;  %v3180_v29 = vld [vmem:[%s4949_s0 + $0x380] sm:$0xf0] }
 0x254   :  { %2325 = vst.msk [vmem:[%s4951_s3 + $0x14c] sm:$0xf] %vm2241_vm1, %v2224_v16 }
 0x255   :  { %v2095_v12 = vmax.f32 %v1927_v35, 0.0  ;;  %v1933_v30 = vpop.f32.mrf.mxu2  ;;  %v2001_v53 = vpop.f32.mrf.mxu3 }
 0x256   :  { %v2002_v33 = vadd.f32 %v2001_v53, %v4231_v44  ;;  %v1410_v50 = vpop.f32.mrf.mxu0  ;;  %v2780_v44 = vld [vmem:[%s4949_s0 + $0x360] sm:$0xf]  ;;  %v2794_v53 = vld [vmem:[%s4949_s0 + $0x384] sm:$0xf0] }
 0x257   :  { %v2195_v1 = vpack.c.bf16 %v2095_v12, %v2095_v12  ;;  %v1411_v42 = vadd.f32 %v4677_v32, %v1410_v50  ;;  %v1669_v34 = vpop.f32.mrf.mxu1  ;;  %v2781_v43 = vor.u32 %v3177_v7, %v2780_v44  ;;  %v3179_v12 = vld [vmem:[%s4949_s0 + $0x37c] sm:$0xf] }
 0x258   :  { %v2125_v6 = vmax.f32 %v2002_v33, 0.0 }
 0x259   :  { %2296 = vst.msk [vmem:[%s4951_s3 + $0xd8] sm:$0xf] %vm2241_vm1, %v2195_v1  ;;  %v1670_v46 = vadd.f32 %v1669_v34, %v1411_v42  ;;  %v2797_v34 = vor.u32 %v3179_v12, %v2794_v53 }
 0x25a   :  { %v2225_v13 = vpack.c.bf16 %v2125_v6, %v2125_v6  ;;  %3055 = vmatmul.msk.bf16.gmra.mxu2 %vm1113_vm0, %v2801_v48 }
 0x25b   :  { %v1929_v10 = vadd.f32 %v1928_v17, %v1670_v46 }
 0x25c   :  { %2326 = vst.msk [vmem:[%s4951_s3 + $0x150] sm:$0xf] %vm2241_vm1, %v2225_v13 }
 0x25d   :  { %v2096_v20 = vmax.f32 %v1929_v10, 0.0  ;;  %v1936_v62 = vpop.f32.mrf.mxu2  ;;  %v2003_v22 = vpop.f32.mrf.mxu3 }
 0x25e   :  { %v2004_v0 = vadd.f32 %v2003_v22, %v4259_v60  ;;  %v1413_v17 = vpop.f32.mrf.mxu0  ;;  %v2812_v60 = vld [vmem:[%s4949_s0 + $0x398] sm:$0xf] }
 0x25f   :  { %v2196_v3 = vpack.c.bf16 %v2096_v20, %v2096_v20  ;;  %v1414_v57 = vadd.f32 %v4677_v32, %v1413_v17  ;;  %v1672_v25 = vpop.f32.mrf.mxu1 }
 0x260   :  { %v2126_v11 = vmax.f32 %v2004_v0, 0.0 }
 0x261   :  { %2297 = vst.msk [vmem:[%s4951_s3 + $0xdc] sm:$0xf] %vm2241_vm1, %v2196_v3  ;;  %v1673_v26 = vadd.f32 %v1672_v25, %v1414_v57  ;;  %1452 = vmatmul.bf16.gmra.mxu0 %v2781_v43 }
 0x262   :  { %v2226_v5 = vpack.c.bf16 %v2126_v11, %v2126_v11  ;;  %1711 = vmatmul.bf16.gmra.mxu1 %v2785_v24 }
 0x263   :  { %v1932_v37 = vadd.f32 %v1931_v19, %v1673_v26  ;;  %v2813_v19 = vor.u32 %v3184_v51, %v2812_v60 }
 0x264   :  { %2327 = vst.msk [vmem:[%s4951_s3 + $0x154] sm:$0xf] %vm2241_vm1, %v2226_v5 }
 0x265   :  { %v2097_v40 = vmax.f32 %v1932_v37, 0.0  ;;  %v1938_v18 = vpop.f32.mrf.mxu2  ;;  %v2006_v56 = vpop.f32.mrf.mxu3 }
 0x266   :  { %v2007_v8 = vadd.f32 %v2006_v56, %v4275_v28  ;;  %v1415_v45 = vpop.f32.mrf.mxu0  ;;  %v2792_v28 = vld [vmem:[%s4949_s0 + $0x378] sm:$0xf] }
 0x267   :  { %v2197_v9 = vpack.c.bf16 %v2097_v40, %v2097_v40  ;;  %v1416_v47 = vadd.f32 %v4677_v32, %v1415_v45  ;;  %v1674_v23 = vpop.f32.mrf.mxu1  ;;  %v2793_v1 = vor.u32 %v3180_v29, %v2792_v28 }
 0x268   :  { %v2127_v55 = vmax.f32 %v2007_v8, 0.0 }
 0x269   :  { %2298 = vst.msk [vmem:[%s4951_s3 + $0xe0] sm:$0xf] %vm2241_vm1, %v2197_v9  ;;  %v1675_v16 = vadd.f32 %v1674_v23, %v1416_v47 }
 0x26a   :  { %v2227_v35 = vpack.c.bf16 %v2127_v55, %v2127_v55  ;;  %3056 = vmatmul.msk.bf16.gmra.mxu2 %vm1113_vm0, %v2813_v19 }
 0x26b   :  { %v1934_v59 = vadd.f32 %v1933_v30, %v1675_v16 }
 0x26c   :  { %2328 = vst.msk [vmem:[%s4951_s3 + $0x158] sm:$0xf] %vm2241_vm1, %v2227_v35 }
 0x26d   :  { %v2098_v33 = vmax.f32 %v1934_v59, 0.0  ;;  %v1941_v50 = vpop.f32.mrf.mxu2  ;;  %v2008_v48 = vpop.f32.mrf.mxu3 }
 0x26e   :  { %v2009_v42 = vadd.f32 %v2008_v48, %v4303_v27  ;;  %v1418_v30 = vpop.f32.mrf.mxu0 }
 0x26f   :  { %v2198_v6 = vpack.c.bf16 %v2098_v33, %v2098_v33  ;;  %v1419_v46 = vadd.f32 %v4677_v32, %v1418_v30  ;;  %v1677_v13 = vpop.f32.mrf.mxu1 }
 0x270   :  { %v2128_v44 = vmax.f32 %v2009_v42, 0.0 }
 0x271   :  { %2299 = vst.msk [vmem:[%s4951_s3 + $0xe4] sm:$0xf] %vm2241_vm1, %v2198_v6  ;;  %v1678_v7 = vadd.f32 %v1677_v13, %v1419_v46  ;;  %1457 = vmatmul.bf16.gmra.mxu0 %v2793_v1 }
 0x272   :  { %v2228_v10 = vpack.c.bf16 %v2128_v44, %v2128_v44  ;;  %1716 = vmatmul.bf16.gmra.mxu1 %v2797_v34 }
 0x273   :  { %v1937_v54 = vadd.f32 %v1936_v62, %v1678_v7 }
 0x274   :  { %2329 = vst.msk [vmem:[%s4951_s3 + $0x15c] sm:$0xf] %vm2241_vm1, %v2228_v10 }
 0x275   :  { %v2099_v27 = vmax.f32 %v1937_v54, 0.0  ;;  %v1943_v39 = vpop.f32.mrf.mxu2  ;;  %v2011_v20 = vpop.f32.mrf.mxu3 }
 0x276   :  { %v2012_v22 = vadd.f32 %v2011_v20, %v4319_v58  ;;  %v1420_v43 = vpop.f32.mrf.mxu0 }
 0x277   :  { %v2199_v0 = vpack.c.bf16 %v2099_v27, %v2099_v27  ;;  %v1421_v17 = vadd.f32 %v4677_v32, %v1420_v43  ;;  %v1679_v24 = vpop.f32.mrf.mxu1 }
 0x278   :  { %v2129_v3 = vmax.f32 %v2012_v22, 0.0 }
 0x279   :  { %2300 = vst.msk [vmem:[%s4951_s3 + $0xe8] sm:$0xf] %vm2241_vm1, %v2199_v0  ;;  %v1680_v62 = vadd.f32 %v1679_v24, %v1421_v17 }
 0x27a   :  { %v2229_v57 = vpack.c.bf16 %v2129_v3, %v2129_v3 }
 0x27b   :  { %v1939_v25 = vadd.f32 %v1938_v18, %v1680_v62 }
 0x27c   :  { %2330 = vst.msk [vmem:[%s4951_s3 + $0x160] sm:$0xf] %vm2241_vm1, %v2229_v57 }
 0x27d   :  { %v2100_v58 = vmax.f32 %v1939_v25, 0.0  ;;  %v1946_v11 = vpop.f32.mrf.mxu2  ;;  %v2013_v26 = vpop.f32.mrf.mxu3 }
 0x27e   :  { %v2014_v5 = vadd.f32 %v2013_v26, %v4347_v61  ;;  %v1423_v37 = vpop.f32.mrf.mxu0 }
 0x27f   :  { %v2200_v60 = vpack.c.bf16 %v2100_v58, %v2100_v58  ;;  %v1424_v51 = vadd.f32 %v4677_v32, %v1423_v37  ;;  %v1682_v40 = vpop.f32.mrf.mxu1 }
 0x280   :  { %v2130_v56 = vmax.f32 %v2014_v5, 0.0 }
 0x281   :  { %2301 = vst.msk [vmem:[%s4951_s3 + $0xec] sm:$0xf] %vm2241_vm1, %v2200_v60  ;;  %v1683_v18 = vadd.f32 %v1682_v40, %v1424_v51 }
 0x282   :  { %v2230_v8 = vpack.c.bf16 %v2130_v56, %v2130_v56 }
 0x283   :  { %v1942_v45 = vadd.f32 %v1941_v50, %v1683_v18 }
 0x284   :  { %2331 = vst.msk [vmem:[%s4951_s3 + $0x164] sm:$0xf] %vm2241_vm1, %v2230_v8 }
 0x285   :  { %v2101_v61 = vmax.f32 %v1942_v45, 0.0  ;;  %v1948_v19 = vpop.f32.mrf.mxu2  ;;  %v2016_v9 = vpop.f32.mrf.mxu3 }
 0x286   :  { %v2017_v47 = vadd.f32 %v2016_v9, %v4363_v15  ;;  %v1425_v23 = vpop.f32.mrf.mxu0 }
 0x287   :  { %v2201_v55 = vpack.c.bf16 %v2101_v61, %v2101_v61  ;;  %v1426_v16 = vadd.f32 %v4677_v32, %v1425_v23  ;;  %v1684_v35 = vpop.f32.mrf.mxu1 }
 0x288   :  { %v2131_v28 = vmax.f32 %v2017_v47, 0.0 }
 0x289   :  { %2302 = vst.msk [vmem:[%s4951_s3 + $0xf0] sm:$0xf] %vm2241_vm1, %v2201_v55  ;;  %v1685_v29 = vadd.f32 %v1684_v35, %v1426_v16 }
 0x28a   :  { %v2231_v59 = vpack.c.bf16 %v2131_v28, %v2131_v28 }
 0x28b   :  { %v1944_v12 = vadd.f32 %v1943_v39, %v1685_v29 }
 0x28c   :  { %2332 = vst.msk [vmem:[%s4951_s3 + $0x168] sm:$0xf] %vm2241_vm1, %v2231_v59 }
 0x28d   :  { %v2102_v15 = vmax.f32 %v1944_v12, 0.0  ;;  %v1951_v53 = vpop.f32.mrf.mxu2  ;;  %v2018_v33 = vpop.f32.mrf.mxu3 }
 0x28e   :  { %v2019_v50 = vadd.f32 %v2018_v33, %v4391_v31  ;;  %v1428_v48 = vpop.f32.mrf.mxu0 }
 0x28f   :  { %v2202_v1 = vpack.c.bf16 %v2102_v15, %v2102_v15  ;;  %v1429_v42 = vadd.f32 %v4677_v32, %v1428_v48  ;;  %v1687_v30 = vpop.f32.mrf.mxu1 }
 0x290   :  { %v2132_v34 = vmax.f32 %v2019_v50, 0.0 }
 0x291   :  { %2303 = vst.msk [vmem:[%s4951_s3 + $0xf4] sm:$0xf] %vm2241_vm1, %v2202_v1  ;;  %v1688_v6 = vadd.f32 %v1687_v30, %v1429_v42 }
 0x292   :  { %v2232_v46 = vpack.c.bf16 %v2132_v34, %v2132_v34 }
 0x293   :  { %v1947_v13 = vadd.f32 %v1946_v11, %v1688_v6 }
 0x294   :  { %2333 = vst.msk [vmem:[%s4951_s3 + $0x16c] sm:$0xf] %vm2241_vm1, %v2232_v46 }
 0x295   :  { %v2103_v31 = vmax.f32 %v1947_v13, 0.0  ;;  %v1953_v44 = vpop.f32.mrf.mxu2  ;;  %v2021_v7 = vpop.f32.mrf.mxu3 }
 0x296   :  { %v2022_v10 = vadd.f32 %v2021_v7, %v4407_v4  ;;  %v1430_v54 = vpop.f32.mrf.mxu0 }
 0x297   :  { %v2203_v27 = vpack.c.bf16 %v2103_v31, %v2103_v31  ;;  %v1431_v39 = vadd.f32 %v4677_v32, %v1430_v54  ;;  %v1689_v20 = vpop.f32.mrf.mxu1 }
 0x298   :  { %v2133_v22 = vmax.f32 %v2022_v10, 0.0 }
 0x299   :  { %2304 = vst.msk [vmem:[%s4951_s3 + $0xf8] sm:$0xf] %vm2241_vm1, %v2203_v27  ;;  %v1690_v43 = vadd.f32 %v1689_v20, %v1431_v39 }
 0x29a   :  { %v2233_v0 = vpack.c.bf16 %v2133_v22, %v2133_v22 }
 0x29b   :  { %v1949_v17 = vadd.f32 %v1948_v19, %v1690_v43 }
 0x29c   :  { %2334 = vst.msk [vmem:[%s4951_s3 + $0x170] sm:$0xf] %vm2241_vm1, %v2233_v0 }
 0x29d   :  { %v2104_v4 = vmax.f32 %v1949_v17, 0.0  ;;  %v1956_v24 = vpop.f32.mrf.mxu2  ;;  %v2023_v3 = vpop.f32.mrf.mxu3 }
 0x29e   :  { %v2024_v62 = vadd.f32 %v2023_v3, %v4435_v2  ;;  %v1433_v57 = vpop.f32.mrf.mxu0 }
 0x29f   :  { %v2204_v25 = vpack.c.bf16 %v2104_v4, %v2104_v4  ;;  %v1434_v58 = vadd.f32 %v4677_v32, %v1433_v57  ;;  %v1692_v11 = vpop.f32.mrf.mxu1 }
 0x2a0   :  { %v2134_v26 = vmax.f32 %v2024_v62, 0.0 }
 0x2a1   :  { %2305 = vst.msk [vmem:[%s4951_s3 + $0xfc] sm:$0xf] %vm2241_vm1, %v2204_v25  ;;  %v1693_v5 = vadd.f32 %v1692_v11, %v1434_v58 }
 0x2a2   :  { %v2234_v37 = vpack.c.bf16 %v2134_v26, %v2134_v26 }
 0x2a3   :  { %v1952_v60 = vadd.f32 %v1951_v53, %v1693_v5 }
 0x2a4   :  { %2335 = vst.msk [vmem:[%s4951_s3 + $0x174] sm:$0xf] %vm2241_vm1, %v2234_v37 }
 0x2a5   :  { %v2105_v2 = vmax.f32 %v1952_v60, 0.0  ;;  %v1958_v51 = vpop.f32.mrf.mxu2  ;;  %v2026_v40 = vpop.f32.mrf.mxu3 }
 0x2a6   :  { %v2027_v56 = vadd.f32 %v2026_v40, %v4451_v63  ;;  %v1435_v18 = vpop.f32.mrf.mxu0 }
 0x2a7   :  { %v2205_v8 = vpack.c.bf16 %v2105_v2, %v2105_v2  ;;  %v1436_v45 = vadd.f32 %v4677_v32, %v1435_v18  ;;  %v1694_v61 = vpop.f32.mrf.mxu1 }
 0x2a8   :  { %v2135_v19 = vmax.f32 %v2027_v56, 0.0 }
 0x2a9   :  { %2306 = vst.msk [vmem:[%s4951_s3 + $0x100] sm:$0xf] %vm2241_vm1, %v2205_v8  ;;  %v1695_v9 = vadd.f32 %v1694_v61, %v1436_v45 }
 0x2aa   :  { %v2235_v47 = vpack.c.bf16 %v2135_v19, %v2135_v19 }
 0x2ab   :  { %v1954_v23 = vadd.f32 %v1953_v44, %v1695_v9 }
 0x2ac   :  { %2336 = vst.msk [vmem:[%s4951_s3 + $0x178] sm:$0xf] %vm2241_vm1, %v2235_v47 }
 0x2ad   :  { %v2106_v63 = vmax.f32 %v1954_v23, 0.0  ;;  %v1961_v55 = vpop.f32.mrf.mxu2  ;;  %v2028_v16 = vpop.f32.mrf.mxu3 }
 0x2ae   :  { %v2029_v35 = vadd.f32 %v2028_v16, %v4479_v38  ;;  %v1438_v28 = vpop.f32.mrf.mxu0 }
 0x2af   :  { %v2206_v29 = vpack.c.bf16 %v2106_v63, %v2106_v63  ;;  %v1439_v59 = vadd.f32 %v4677_v32, %v1438_v28  ;;  %v1697_v12 = vpop.f32.mrf.mxu1 }
 0x2b0   :  { %v2136_v15 = vmax.f32 %v2029_v35, 0.0 }
 0x2b1   :  { %2307 = vst.msk [vmem:[%s4951_s3 + $0x104] sm:$0xf] %vm2241_vm1, %v2206_v29  ;;  %v1698_v53 = vadd.f32 %v1697_v12, %v1439_v59 }
 0x2b2   :  { %v2236_v33 = vpack.c.bf16 %v2136_v15, %v2136_v15 }
 0x2b3   :  { %v1957_v50 = vadd.f32 %v1956_v24, %v1698_v53 }
 0x2b4   :  { %2337 = vst.msk [vmem:[%s4951_s3 + $0x17c] sm:$0xf] %vm2241_vm1, %v2236_v33 }
 0x2b5   :  { %v2107_v38 = vmax.f32 %v1957_v50, 0.0  ;;  %v1963_v48 = vpop.f32.mrf.mxu2  ;;  %v2031_v1 = vpop.f32.mrf.mxu3 }
 0x2b6   :  { %v2032_v42 = vadd.f32 %v2031_v1, %v4495_v49  ;;  %v1440_v30 = vpop.f32.mrf.mxu0 }
 0x2b7   :  { %v2207_v34 = vpack.c.bf16 %v2107_v38, %v2107_v38  ;;  %v1441_v6 = vadd.f32 %v4677_v32, %v1440_v30  ;;  %v1699_v46 = vpop.f32.mrf.mxu1 }
 0x2b8   :  { %v2137_v13 = vmax.f32 %v2032_v42, 0.0 }
 0x2b9   :  { %2308 = vst.msk [vmem:[%s4951_s3 + $0x108] sm:$0xf] %vm2241_vm1, %v2207_v34  ;;  %v1700_v31 = vadd.f32 %v1699_v46, %v1441_v6 }
 0x2ba   :  { %v2237_v44 = vpack.c.bf16 %v2137_v13, %v2137_v13 }
 0x2bb   :  { %v1959_v7 = vadd.f32 %v1958_v51, %v1700_v31 }
 0x2bc   :  { %2338 = vst.msk [vmem:[%s4951_s3 + $0x180] sm:$0xf] %vm2241_vm1, %v2237_v44 }
 0x2bd   :  { %v2108_v49 = vmax.f32 %v1959_v7, 0.0  ;;  %v1966_v10 = vpop.f32.mrf.mxu2  ;;  %v2033_v54 = vpop.f32.mrf.mxu3 }
 0x2be   :  { %v2034_v27 = vadd.f32 %v2033_v54, %v4523_v14  ;;  %v1443_v39 = vpop.f32.mrf.mxu0 }
 0x2bf   :  { %v2208_v20 = vpack.c.bf16 %v2108_v49, %v2108_v49  ;;  %v1444_v22 = vadd.f32 %v4677_v32, %v1443_v39  ;;  %v1702_v43 = vpop.f32.mrf.mxu1 }
 0x2c0   :  { %v2138_v0 = vmax.f32 %v2034_v27, 0.0 }
 0x2c1   :  { %2309 = vst.msk [vmem:[%s4951_s3 + $0x10c] sm:$0xf] %vm2241_vm1, %v2208_v20  ;;  %v1703_v17 = vadd.f32 %v1702_v43, %v1444_v22 }
 0x2c2   :  { %v2238_v4 = vpack.c.bf16 %v2138_v0, %v2138_v0 }
 0x2c3   :  { %v1962_v24 = vadd.f32 %v1961_v55, %v1703_v17 }
 0x2c4   :  { %2339 = vst.msk [vmem:[%s4951_s3 + $0x184] sm:$0xf] %vm2241_vm1, %v2238_v4 }
 0x2c5   :  { %v2109_v14 = vmax.f32 %v1962_v24, 0.0  ;;  %v1968_v3 = vpop.f32.mrf.mxu2  ;;  %v2036_v62 = vpop.f32.mrf.mxu3 }
 0x2c6   :  { %v2037_v57 = vadd.f32 %v2036_v62, %v4539_v41  ;;  %v1445_v25 = vpop.f32.mrf.mxu0 }
 0x2c7   :  { %v2209_v58 = vpack.c.bf16 %v2109_v14, %v2109_v14  ;;  %v1446_v11 = vadd.f32 %v4677_v32, %v1445_v25  ;;  %v1704_v26 = vpop.f32.mrf.mxu1 }
 0x2c8   :  { %v2139_v5 = vmax.f32 %v2037_v57, 0.0 }
 0x2c9   :  { %2310 = vst.msk [vmem:[%s4951_s3 + $0x110] sm:$0xf] %vm2241_vm1, %v2209_v58  ;;  %v1705_v37 = vadd.f32 %v1704_v26, %v1446_v11 }
 0x2ca   :  { %v2239_v60 = vpack.c.bf16 %v2139_v5, %v2139_v5 }
 0x2cb   :  { %v1964_v2 = vadd.f32 %v1963_v48, %v1705_v37 }
 0x2cc   :  { %2340 = vst.msk [vmem:[%s4951_s3 + $0x188] sm:$0xf] %vm2241_vm1, %v2239_v60 }
 0x2cd   :  { %v2110_v41 = vmax.f32 %v1964_v2, 0.0  ;;  %v1971_v51 = vpop.f32.mrf.mxu2  ;;  %v2038_v40 = vpop.f32.mrf.mxu3 }
 0x2ce   :  { %v2039_v56 = vadd.f32 %v2038_v40, %v4567_v52  ;;  %v1448_v18 = vpop.f32.mrf.mxu0 }
 0x2cf   :  { %v2210_v8 = vpack.c.bf16 %v2110_v41, %v2110_v41  ;;  %v1449_v45 = vadd.f32 %v4677_v32, %v1448_v18  ;;  %v1707_v61 = vpop.f32.mrf.mxu1 }
 0x2d0   :  { %v2140_v19 = vmax.f32 %v2039_v56, 0.0 }
 0x2d1   :  { %2311 = vst.msk [vmem:[%s4951_s3 + $0x114] sm:$0xf] %vm2241_vm1, %v2210_v8  ;;  %v1708_v9 = vadd.f32 %v1707_v61, %v1449_v45 }
 0x2d2   :  { %v2240_v47 = vpack.c.bf16 %v2140_v19, %v2140_v19 }
 0x2d3   :  { %v1967_v23 = vadd.f32 %v1966_v10, %v1708_v9 }
 0x2d4   :  { %2341 = vst.msk [vmem:[%s4951_s3 + $0x18c] sm:$0xf] %vm2241_vm1, %v2240_v47 }
 0x2d5   :  { %v2111_v52 = vmax.f32 %v1967_v23, 0.0  ;;  %v1973_v63 = vpop.f32.mrf.mxu2 }
 0x2d6   :  { %v1450_v55 = vpop.f32.mrf.mxu0 }
 0x2d7   :  { %v2211_v16 = vpack.c.bf16 %v2111_v52, %v2111_v52  ;;  %v1451_v35 = vadd.f32 %v4677_v32, %v1450_v55  ;;  %v1709_v28 = vpop.f32.mrf.mxu1 }
 0x2d9   :  { %2312 = vst.msk [vmem:[%s4951_s3 + $0x118] sm:$0xf] %vm2241_vm1, %v2211_v16  ;;  %v1710_v29 = vadd.f32 %v1709_v28, %v1451_v35 }
 0x2db   :  { %v1969_v59 = vadd.f32 %v1968_v3, %v1710_v29 }
 0x2dd   :  { %v2112_v12 = vmax.f32 %v1969_v59, 0.0  ;;  %v1976_v15 = vpop.f32.mrf.mxu2 }
 0x2de   :  { %v1453_v53 = vpop.f32.mrf.mxu0 }
 0x2df   :  { %v2212_v33 = vpack.c.bf16 %v2112_v12, %v2112_v12  ;;  %v1454_v50 = vadd.f32 %v4677_v32, %v1453_v53  ;;  %v1712_v38 = vpop.f32.mrf.mxu1 }
 0x2e1   :  { %2313 = vst.msk [vmem:[%s4951_s3 + $0x11c] sm:$0xf] %vm2241_vm1, %v2212_v33  ;;  %v1713_v48 = vadd.f32 %v1712_v38, %v1454_v50 }
 0x2e3   :  { %v1972_v1 = vadd.f32 %v1971_v51, %v1713_v48 }
 0x2e5   :  { %v2113_v42 = vmax.f32 %v1972_v1, 0.0  ;;  %v1978_v30 = vpop.f32.mrf.mxu2 }
 0x2e6   :  { %v1455_v34 = vpop.f32.mrf.mxu0 }
 0x2e7   :  { %v2213_v6 = vpack.c.bf16 %v2113_v42, %v2113_v42  ;;  %v1456_v46 = vadd.f32 %v4677_v32, %v1455_v34  ;;  %v1714_v13 = vpop.f32.mrf.mxu1 }
 0x2e9   :  { %2314 = vst.msk [vmem:[%s4951_s3 + $0x120] sm:$0xf] %vm2241_vm1, %v2213_v6  ;;  %v1715_v31 = vadd.f32 %v1714_v13, %v1456_v46 }
 0x2eb   :  { %v1974_v44 = vadd.f32 %v1973_v63, %v1715_v31 }
 0x2ed   :  { %v2114_v7 = vmax.f32 %v1974_v44, 0.0  ;;  %v1981_v49 = vpop.f32.mrf.mxu2 }
 0x2ee   :  { %v1982_v10 = vadd.f32 %v1981_v49, %v4053_v21  ;;  %v1458_v54 = vpop.f32.mrf.mxu0 }
 0x2ef   :  { %v2214_v27 = vpack.c.bf16 %v2114_v7, %v2114_v7  ;;  %v1459_v39 = vadd.f32 %v4677_v32, %v1458_v54  ;;  %v1717_v20 = vpop.f32.mrf.mxu1 }
 0x2f0   :  { %v2117_v22 = vmax.f32 %v1982_v10, 0.0 }
 0x2f1   :  { %2315 = vst.msk [vmem:[%s4951_s3 + $0x124] sm:$0xf] %vm2241_vm1, %v2214_v27  ;;  %v1718_v43 = vadd.f32 %v1717_v20, %v1459_v39 }
 0x2f2   :  { %v2217_v0 = vpack.c.bf16 %v2117_v22, %v2117_v22 }
 0x2f3   :  { %v1977_v17 = vadd.f32 %v1976_v15, %v1718_v43 }
 0x2f4   :  { %2318 = vst.msk [vmem:[%s4951_s3 + $0x130] sm:$0xf] %vm2241_vm1, %v2217_v0 }
 0x2f5   :  { %v2115_v21 = vmax.f32 %v1977_v17, 0.0  ;;  %v1983_v4 = vpop.f32.mrf.mxu2 }
 0x2f6   :  { %v1984_v24 = vadd.f32 %v1983_v4, %v4081_v36  ;;  %v1460_v14 = vpop.f32.mrf.mxu0 }
 0x2f7   :  { %v2215_v3 = vpack.c.bf16 %v2115_v21, %v2115_v21  ;;  %v1461_v62 = vadd.f32 %v4677_v32, %v1460_v14  ;;  %v1719_v25 = vpop.f32.mrf.mxu1 }
 0x2f8   :  { %v2118_v57 = vmax.f32 %v1984_v24, 0.0 }
 0x2f9   :  { %2316 = vst.msk [vmem:[%s4951_s3 + $0x128] sm:$0xf] %vm2241_vm1, %v2215_v3  ;;  %v1720_v58 = vadd.f32 %v1719_v25, %v1461_v62 }
 0x2fa   :  { %v2218_v11 = vpack.c.bf16 %v2118_v57, %v2118_v57 }
 0x2fb   :  { %v1979_v26 = vadd.f32 %v1978_v30, %v1720_v58 }
 0x2fc   :  { %2319 = vst.msk [vmem:[%s4951_s3 + $0x134] sm:$0xf] %vm2241_vm1, %v2218_v11 }
 0x2fd   :  { %v2116_v36 = vmax.f32 %v1979_v26, 0.0 }
 0x2ff   :  { %v2216_v5 = vpack.c.bf16 %v2116_v36, %v2116_v36 }
 0x301   :  { %2317 = vst.msk [vmem:[%s4951_s3 + $0x12c] sm:$0xf] %vm2241_vm1, %v2216_v5 }

// kernel: neural_network2_forward.6
= control target key start
LH: loop header
LB: loop body
LE: loop exit
PB: predicated region body
PF: predicated region fallthrough
CT: control target
= control target key end

     0   :  { %vm365_vm0 = vcmask 261120   ;;  %vm630_vm1 = vcmask 257024   ;;  %vm651_vm2 = vcmask 253952   ;;  %s1342_s1 = inlined_call_operand.vmem [shape: bf16[288,32], index: 1, kind: input, shape index: {}]   ;;  %s1343_s0 = inlined_call_operand.vmem [shape: bf16[162,288], index: 0, kind: input, shape index: {}]   ;;  %s1344_s2 = inlined_call_operand.vmem [shape: f32[1,32], index: 2, kind: input, shape index: {}]   ;;  %s1345_s3 = inlined_call_operand.vmem [shape: bf16[162,32], index: 3, kind: output, shape index: {}]  }
   0x1   :  { %v897_v0 = vld [vmem:[%s1342_s1 + $0x38] sm:$0xff]  ;;  %v953_v1 = vld [vmem:[%s1342_s1 + $0x88] sm:$0xff]  ;;  %v896_v3 = vld [vmem:[%s1342_s1 + $0x30] sm:$0xff] }
   0x2   :  { %v905_v2 = vld [vmem:[%s1342_s1 + $0x78] sm:$0xff]  ;;  %399 = vmatpush.bf16.msra.mxu0 %v897_v0  ;;  %908 = vmatpush.bf16.msra.mxu3 %v897_v0  ;;  %v964_v4 = vld [vmem:[%s1342_s1 + $0x80] sm:$0xff]  ;;  %v904_v5 = vld [vmem:[%s1342_s1 + $0x70] sm:$0xff] }
   0x3   :  { %531 = vmatpush.bf16.msra.mxu2 %v953_v1  ;;  %462 = vmatpush.bf16.msra.mxu1 %v905_v2  ;;  %v667_v6 = vld [vmem:[%s1343_s0 + $0x8] sm:$0xf]  ;;  %v862_v7 = vld [vmem:[%s1343_s0 + $0x10] sm:$0xf0]  ;;  %v894_v11 = vld [vmem:[%s1342_s1 + $0x20] sm:$0xff] }
   0x4   :  { %v668_v8 = vor.u32 %v862_v7, %v667_v6  ;;  %v895_v9 = vld [vmem:[%s1342_s1 + $0x28] sm:$0xff]  ;;  %v902_v12 = vld [vmem:[%s1342_s1 + $0x60] sm:$0xff]  ;;  %v893_v13 = vld [vmem:[%s1342_s1 + $0x18] sm:$0xff] }
   0x5   :  { %v903_v10 = vld [vmem:[%s1342_s1 + $0x68] sm:$0xff]  ;;  %v901_v14 = vld [vmem:[%s1342_s1 + $0x58] sm:$0xff]  ;;  %v892_v15 = vld [vmem:[%s1342_s1 + $0x10] sm:$0xff] }
   0x6   :  { %400 = vmatpush.bf16.msra.mxu0 %v896_v3  ;;  %909 = vmatpush.bf16.msra.mxu3 %v896_v3  ;;  %v900_v16 = vld [vmem:[%s1342_s1 + $0x50] sm:$0xff]  ;;  %v679_v17 = vld [vmem:[%s1343_s0 + $0x20] sm:$0xf]  ;;  %v865_v18 = vld [vmem:[%s1343_s0 + $0x28] sm:$0xf0] }
   0x7   :  { %532 = vmatpush.bf16.msra.mxu2 %v964_v4  ;;  %463 = vmatpush.bf16.msra.mxu1 %v904_v5  ;;  %v680_v19 = vor.u32 %v865_v18, %v679_v17  ;;  %v891_v20 = vld [vmem:[%s1342_s1 + $0x8] sm:$0xff]  ;;  %v890_v22 = vld [vmem:[%s1342_s1] sm:$0xff]  ;;  %v661_v29 = vld [vmem:[%s1343_s0 + $0xc] sm:$0xf0] }
   0x8   :  { %v899_v21 = vld [vmem:[%s1342_s1 + $0x48] sm:$0xff]  ;;  %v898_v23 = vld [vmem:[%s1342_s1 + $0x40] sm:$0xff]  ;;  %v691_v33 = vld [vmem:[%s1343_s0 + $0x38] sm:$0xf] }
   0x9   :  { %v659_v24 = vld [vmem:[%s1343_s0] sm:$0xf]  ;;  %v861_v25 = vld [vmem:[%s1343_s0 + $0x8] sm:$0xf0]  ;;  %v860_v28 = vld [vmem:[%s1343_s0 + $0x4] sm:$0xf] }
   0xa   :  { %849 = vmatmul.msk.bf16.vlgmr.msra.gmra.mxu2 %vm365_vm0, %v668_v8  ;;  %401 = vmatpush.bf16.msra.mxu0 %v895_v9  ;;  %v755_v26 = vld [vmem:[%s1343_s0 + $0xc0] sm:$0xf]  ;;  %v885_v27 = vld [vmem:[%s1343_s0 + $0xc8] sm:$0xf0]  ;;  %v660_v30 = vor.u32 %v861_v25, %v659_v24  ;;  %v664_v32 = vor.u32 %v860_v28, %v661_v29  ;;  %v868_v34 = vld [vmem:[%s1343_s0 + $0x40] sm:$0xf0] }
   0xb   :  { %910 = vmatpush.bf16.msra.mxu3 %v895_v9  ;;  %464 = vmatpush.bf16.msra.mxu1 %v903_v10  ;;  %v756_v31 = vor.u32 %v885_v27, %v755_v26  ;;  %v692_v35 = vor.u32 %v868_v34, %v691_v33  ;;  %v671_v36 = vld [vmem:[%s1343_s0 + $0x18] sm:$0xf]  ;;  %v864_v37 = vld [vmem:[%s1343_s0 + $0x20] sm:$0xf0]  ;;  %v863_v40 = vld [vmem:[%s1343_s0 + $0x1c] sm:$0xf] }
   0xc   :  { %v767_v38 = vld [vmem:[%s1343_s0 + $0xd8] sm:$0xf]  ;;  %v888_v39 = vld [vmem:[%s1343_s0 + $0xe0] sm:$0xf0]  ;;  %v673_v41 = vld [vmem:[%s1343_s0 + $0x24] sm:$0xf0]  ;;  %v672_v42 = vor.u32 %v864_v37, %v671_v36 }
   0xd   :  { %v768_v43 = vor.u32 %v888_v39, %v767_v38  ;;  %v676_v44 = vor.u32 %v863_v40, %v673_v41  ;;  %v703_v45 = vld [vmem:[%s1343_s0 + $0x50] sm:$0xf]  ;;  %v871_v46 = vld [vmem:[%s1343_s0 + $0x58] sm:$0xf0]  ;;  %v866_v52 = vld [vmem:[%s1343_s0 + $0x34] sm:$0xf] }
   0xe   :  { %402 = vmatpush.bf16.msra.mxu0 %v894_v11  ;;  %v704_v47 = vor.u32 %v871_v46, %v703_v45  ;;  %v55_v48 = vld [vmem:[%s1343_s0 + $0xf0] sm:$0x11]  ;;  %v867_v50 = vld [vmem:[%s1343_s0 + $0x38] sm:$0xf0]  ;;  %v685_v53 = vld [vmem:[%s1343_s0 + $0x3c] sm:$0xf0] }
   0xf   :  { %911 = vmatpush.bf16.msra.mxu3 %v894_v11  ;;  %465 = vmatpush.bf16.msra.mxu1 %v902_v12  ;;  %v683_v49 = vld [vmem:[%s1343_s0 + $0x30] sm:$0xf]  ;;  %v199_v51 = vunpack.c.l.b16 %v55_v48  ;;  %v688_v56 = vor.u32 %v866_v52, %v685_v53  ;;  %v715_v57 = vld [vmem:[%s1343_s0 + $0x68] sm:$0xf]  ;;  %v874_v58 = vld [vmem:[%s1343_s0 + $0x70] sm:$0xf0] }
  0x10   :  { %v684_v54 = vor.u32 %v867_v50, %v683_v49  ;;  %v716_v59 = vor.u32 %v874_v58, %v715_v57  ;;  %v695_v60 = vld [vmem:[%s1343_s0 + $0x48] sm:$0xf]  ;;  %v870_v61 = vld [vmem:[%s1343_s0 + $0x50] sm:$0xf0]  ;;  %v884_v62 = vld [vmem:[%s1343_s0 + $0xc4] sm:$0xf] }
  0x11   :  { %v232_v55 = vpack.c.b16 %v199_v51, %v199_v51  ;;  %v757_v63 = vld [vmem:[%s1343_s0 + $0xcc] sm:$0xf0]  ;;  %v869_v0 = vld [vmem:[%s1343_s0 + $0x4c] sm:$0xf]  ;;  %v707_v8 = vld [vmem:[%s1343_s0 + $0x60] sm:$0xf] }
  0x12   :  { %403 = vmatpush.bf16.msra.mxu0 %v893_v13  ;;  %v760_v3 = vor.u32 %v884_v62, %v757_v63  ;;  %v877_v6 = vld [vmem:[%s1343_s0 + $0x88] sm:$0xf0]  ;;  %v769_v11 = vld [vmem:[%s1343_s0 + $0xe4] sm:$0xf0]  ;;  %v739_v17 = vld [vmem:[%s1343_s0 + $0x98] sm:$0xf] }
  0x13   :  { %912 = vmatpush.bf16.msra.mxu3 %v893_v13  ;;  %466 = vmatpush.bf16.msra.mxu1 %v901_v14  ;;  %v873_v9 = vld [vmem:[%s1343_s0 + $0x68] sm:$0xf0]  ;;  %v709_v13 = vld [vmem:[%s1343_s0 + $0x6c] sm:$0xf0]  ;;  %v880_v18 = vld [vmem:[%s1343_s0 + $0xa0] sm:$0xf0] }
  0x14   :  { %v721_v24 = vld [vmem:[%s1343_s0 + $0x84] sm:$0xf0]  ;;  %v751_v28 = vld [vmem:[%s1343_s0 + $0xb0] sm:$0xf]  ;;  %v883_v29 = vld [vmem:[%s1343_s0 + $0xb8] sm:$0xf0] }
  0x15   :  { %v879_v33 = vld [vmem:[%s1343_s0 + $0x98] sm:$0xf0]  ;;  %v733_v36 = vld [vmem:[%s1343_s0 + $0x9c] sm:$0xf0]  ;;  %v763_v40 = vld [vmem:[%s1343_s0 + $0xc8] sm:$0xf] }
  0x16   :  { %404 = vmatpush.bf16.msra.mxu0 %v892_v15  ;;  %v886_v41 = vld [vmem:[%s1343_s0 + $0xd0] sm:$0xf0]  ;;  %v881_v45 = vld [vmem:[%s1343_s0 + $0xac] sm:$0xf]  ;;  %v745_v46 = vld [vmem:[%s1343_s0 + $0xb4] sm:$0xf0] }
  0x17   :  { %913 = vmatpush.bf16.msra.mxu3 %v892_v15  ;;  %467 = vmatpush.bf16.msra.mxu1 %v900_v16  ;;  %v748_v49 = vor.u32 %v881_v45, %v745_v46  ;;  %v775_v50 = vld [vmem:[%s1343_s0 + $0xe0] sm:$0xf]  ;;  %v889_v51 = vld [vmem:[%s1343_s0 + $0xe8] sm:$0xf0] }
  0x18   :  { %v776_v53 = vor.u32 %v889_v51, %v775_v50 }
  0x1a   :  { %850 = vmatmul.msk.bf16.gmra.mxu2 %vm365_vm0, %v680_v19  ;;  %405 = vmatpush.bf16.msra.mxu0 %v891_v20  ;;  %v740_v19 = vor.u32 %v880_v18, %v739_v17 }
  0x1b   :  { %914 = vmatpush.bf16.msra.mxu3 %v891_v20  ;;  %468 = vmatpush.bf16.msra.mxu1 %v899_v21  ;;  %v719_v20 = vld [vmem:[%s1343_s0 + $0x78] sm:$0xf] }
  0x1e   :  { %406 = vmatpush.bf16.msra.mxu0 %v890_v22 }
  0x1f   :  { %915 = vmatpush.bf16.msra.mxu3 %v890_v22  ;;  %469 = vmatpush.bf16.msra.mxu1 %v898_v23  ;;  %v200_v22 = vunpack.c.h.b16 %v55_v48 }
  0x21   :  { %407 = vmatmul.bf16.vlgmr.msra.gmra.mxu0 %v660_v30  ;;  %v233_v26 = vpack.c.b16 %v200_v22, %v200_v22  ;;  %v752_v30 = vor.u32 %v883_v29, %v751_v28 }
  0x22   :  { %447 = vmatmul.bf16.vlgmr.msra.gmra.mxu3 %v756_v31  ;;  %470 = vmatmul.bf16.vlgmr.msra.gmra.mxu1 %v664_v32  ;;  %v56_v31 = vld [vmem:[%s1343_s0 + $0xf8] sm:$0x1]  ;;  %v731_v32 = vld [vmem:[%s1343_s0 + $0x90] sm:$0xf] }
  0x23   :  { %916 = vmatpush.bf16.msrb.mxu3 %v905_v2  ;;  %v696_v2 = vor.u32 %v870_v61, %v695_v60  ;;  %v201_v34 = vunpack.c.l.b16 %v56_v31  ;;  %v732_v37 = vor.u32 %v879_v33, %v731_v32 }
  0x25   :  { %v234_v38 = vpack.c.b16 %v201_v34, %v201_v34 }
  0x27   :  { %917 = vmatpush.bf16.msrb.mxu3 %v904_v5  ;;  %v727_v5 = vld [vmem:[%s1343_s0 + $0x80] sm:$0xf] }
  0x28   :  { %v728_v7 = vor.u32 %v877_v6, %v727_v5 }
  0x2a   :  { %851 = vmatmul.msk.bf16.gmra.mxu2 %vm365_vm0, %v692_v35  ;;  %v878_v35 = vld [vmem:[%s1343_s0 + $0x94] sm:$0xf] }
  0x2b   :  { %918 = vmatpush.bf16.msrb.mxu3 %v903_v10  ;;  %v887_v10 = vld [vmem:[%s1343_s0 + $0xdc] sm:$0xf]  ;;  %v736_v39 = vor.u32 %v878_v35, %v733_v36 }
  0x2c   :  { %v772_v15 = vor.u32 %v887_v10, %v769_v11 }
  0x2f   :  { %919 = vmatpush.bf16.msrb.mxu3 %v902_v12  ;;  %v872_v12 = vld [vmem:[%s1343_s0 + $0x64] sm:$0xf] }
  0x31   :  { %412 = vmatmul.bf16.gmra.mxu0 %v672_v42  ;;  %v764_v42 = vor.u32 %v886_v41, %v763_v40 }
  0x32   :  { %452 = vmatmul.bf16.gmra.mxu3 %v768_v43  ;;  %475 = vmatmul.bf16.gmra.mxu1 %v676_v44  ;;  %v743_v43 = vld [vmem:[%s1343_s0 + $0xa8] sm:$0xf]  ;;  %v882_v44 = vld [vmem:[%s1343_s0 + $0xb0] sm:$0xf0] }
  0x33   :  { %920 = vmatpush.bf16.msrb.mxu3 %v901_v14  ;;  %v708_v14 = vor.u32 %v873_v9, %v707_v8  ;;  %v744_v48 = vor.u32 %v882_v44, %v743_v43 }
  0x37   :  { %921 = vmatpush.bf16.msrb.mxu3 %v900_v16  ;;  %v712_v16 = vor.u32 %v872_v12, %v709_v13 }
  0x3a   :  { %852 = vmatmul.msk.bf16.gmra.mxu2 %vm365_vm0, %v704_v47 }
  0x3b   :  { %922 = vmatpush.bf16.msrb.mxu3 %v899_v21  ;;  %v876_v21 = vld [vmem:[%s1343_s0 + $0x80] sm:$0xf0] }
  0x3c   :  { %v720_v25 = vor.u32 %v876_v21, %v719_v20 }
  0x3f   :  { %923 = vmatpush.bf16.msrb.mxu3 %v898_v23  ;;  %v875_v23 = vld [vmem:[%s1343_s0 + $0x7c] sm:$0xf] }
  0x40   :  { %v724_v27 = vor.u32 %v875_v23, %v721_v24 }
  0x41   :  { %417 = vmatmul.bf16.gmra.mxu0 %v684_v54  ;;  %v1209_v54 = vld [vmem:[%s1344_s2] ss:$0 sm:$0xff] }
  0x42   :  { %457 = vmatmul.bf16.gmra.mxu3 %v232_v55  ;;  %480 = vmatmul.bf16.gmra.mxu1 %v688_v56 }
  0x43   :  { %924 = vmatpush.bf16.msra.mxu3 %v953_v1  ;;  %v697_v1 = vld [vmem:[%s1343_s0 + $0x54] sm:$0xf0] }
  0x47   :  { %925 = vmatpush.bf16.msra.mxu3 %v964_v4  ;;  %v700_v4 = vor.u32 %v869_v0, %v697_v1 }
  0x4a   :  { %853 = vmatmul.msk.bf16.gmra.mxu2 %vm365_vm0, %v716_v59 }
  0x51   :  { %422 = vmatmul.bf16.gmra.mxu0 %v696_v2 }
  0x52   :  { %510 = vmatmul.bf16.vlgmr.msrb.gmra.mxu3 %v760_v3  ;;  %485 = vmatmul.bf16.gmra.mxu1 %v700_v4 }
  0x5a   :  { %854 = vmatmul.msk.bf16.gmra.mxu2 %vm365_vm0, %v728_v7 }
  0x61   :  { %427 = vmatmul.bf16.gmra.mxu0 %v708_v14 }
  0x62   :  { %515 = vmatmul.bf16.gmra.mxu3 %v772_v15  ;;  %490 = vmatmul.bf16.gmra.mxu1 %v712_v16 }
  0x6a   :  { %855 = vmatmul.msk.bf16.gmra.mxu2 %vm365_vm0, %v740_v19 }
  0x71   :  { %432 = vmatmul.bf16.gmra.mxu0 %v720_v25 }
  0x72   :  { %520 = vmatmul.bf16.gmra.mxu3 %v233_v26  ;;  %495 = vmatmul.bf16.gmra.mxu1 %v724_v27 }
  0x7a   :  { %856 = vmatmul.msk.bf16.gmra.mxu2 %vm365_vm0, %v752_v30 }
  0x81   :  { %437 = vmatmul.bf16.gmra.mxu0 %v732_v37 }
  0x82   :  { %859 = vmatmul.msk.bf16.vlgmr.msra.gmra.mxu3 %vm365_vm0, %v234_v38  ;;  %500 = vmatmul.bf16.gmra.mxu1 %v736_v39 }
  0x8a   :  { %857 = vmatmul.msk.bf16.gmra.mxu2 %vm365_vm0, %v764_v42 }
  0x8d   :  { %v534_v47 = vpop.f32.mrf.mxu2 }
  0x91   :  { %442 = vmatmul.bf16.gmra.mxu0 %v744_v48 }
  0x92   :  { %505 = vmatmul.bf16.gmra.mxu1 %v748_v49 }
  0x95   :  { %v536_v52 = vpop.f32.mrf.mxu2 }
  0x9a   :  { %858 = vmatmul.msk.bf16.gmra.mxu2 %vm365_vm0, %v776_v53 }
  0x9d   :  { %v539_v55 = vpop.f32.mrf.mxu2 }
  0x9e   :  { %v408_v56 = vpop.f32.mrf.mxu0 }
  0x9f   :  { %v409_v57 = vadd.f32 %v1209_v54, %v408_v56  ;;  %v471_v58 = vpop.f32.mrf.mxu1 }
  0xa1   :  { %v472_v59 = vadd.f32 %v471_v58, %v409_v57 }
  0xa3   :  { %v535_v60 = vadd.f32 %v534_v47, %v472_v59 }
  0xa5   :  { %v588_v61 = vmax.f32 %v535_v60, 0.0  ;;  %v1212_v62 = vpop.f32.mrf.mxu3  ;;  %v541_v63 = vpop.f32.mrf.mxu2 }
  0xa6   :  { %v410_v0 = vpop.f32.mrf.mxu0 }
  0xa7   :  { %v609_v1 = vpack.c.bf16 %v588_v61, %v588_v61  ;;  %v411_v2 = vadd.f32 %v1209_v54, %v410_v0  ;;  %v473_v3 = vpop.f32.mrf.mxu1 }
  0xa9   :  { %631 = vst.msk [vmem:[%s1345_s3] sm:$0xf] %vm630_vm1, %v609_v1  ;;  %v474_v4 = vadd.f32 %v473_v3, %v411_v2 }
  0xab   :  { %v537_v5 = vadd.f32 %v536_v52, %v474_v4 }
  0xad   :  { %v589_v6 = vmax.f32 %v537_v5, 0.0  ;;  %v1219_v7 = vpop.f32.mrf.mxu3  ;;  %v544_v8 = vpop.f32.mrf.mxu2 }
  0xae   :  { %v413_v9 = vpop.f32.mrf.mxu0 }
  0xaf   :  { %v610_v10 = vpack.c.bf16 %v589_v6, %v589_v6  ;;  %v414_v11 = vadd.f32 %v1209_v54, %v413_v9  ;;  %v476_v12 = vpop.f32.mrf.mxu1 }
  0xb1   :  { %632 = vst.msk [vmem:[%s1345_s3 + $0x4] sm:$0xf] %vm630_vm1, %v610_v10  ;;  %v477_v13 = vadd.f32 %v476_v12, %v414_v11 }
  0xb3   :  { %v540_v14 = vadd.f32 %v539_v55, %v477_v13 }
  0xb5   :  { %v590_v15 = vmax.f32 %v540_v14, 0.0  ;;  %v1226_v16 = vpop.f32.mrf.mxu3  ;;  %v546_v17 = vpop.f32.mrf.mxu2 }
  0xb6   :  { %v415_v18 = vpop.f32.mrf.mxu0 }
  0xb7   :  { %v611_v19 = vpack.c.bf16 %v590_v15, %v590_v15  ;;  %v416_v20 = vadd.f32 %v1209_v54, %v415_v18  ;;  %v478_v21 = vpop.f32.mrf.mxu1 }
  0xb9   :  { %633 = vst.msk [vmem:[%s1345_s3 + $0x8] sm:$0xf] %vm630_vm1, %v611_v19  ;;  %v479_v22 = vadd.f32 %v478_v21, %v416_v20 }
  0xbb   :  { %v542_v23 = vadd.f32 %v541_v63, %v479_v22 }
  0xbd   :  { %v591_v24 = vmax.f32 %v542_v23, 0.0  ;;  %v1233_v25 = vpop.f32.mrf.mxu3  ;;  %v549_v26 = vpop.f32.mrf.mxu2 }
  0xbe   :  { %v418_v27 = vpop.f32.mrf.mxu0 }
  0xbf   :  { %v612_v28 = vpack.c.bf16 %v591_v24, %v591_v24  ;;  %v419_v29 = vadd.f32 %v1209_v54, %v418_v27  ;;  %v481_v30 = vpop.f32.mrf.mxu1 }
  0xc1   :  { %634 = vst.msk [vmem:[%s1345_s3 + $0xc] sm:$0xf] %vm630_vm1, %v612_v28  ;;  %v482_v31 = vadd.f32 %v481_v30, %v419_v29 }
  0xc3   :  { %v545_v32 = vadd.f32 %v544_v8, %v482_v31 }
  0xc5   :  { %v592_v33 = vmax.f32 %v545_v32, 0.0  ;;  %v1240_v34 = vpop.f32.mrf.mxu3  ;;  %v551_v35 = vpop.f32.mrf.mxu2 }
  0xc6   :  { %v420_v36 = vpop.f32.mrf.mxu0 }
  0xc7   :  { %v613_v37 = vpack.c.bf16 %v592_v33, %v592_v33  ;;  %v421_v38 = vadd.f32 %v1209_v54, %v420_v36  ;;  %v483_v39 = vpop.f32.mrf.mxu1 }
  0xc9   :  { %635 = vst.msk [vmem:[%s1345_s3 + $0x10] sm:$0xf] %vm630_vm1, %v613_v37  ;;  %v484_v40 = vadd.f32 %v483_v39, %v421_v38 }
  0xcb   :  { %v547_v41 = vadd.f32 %v546_v17, %v484_v40 }
  0xcd   :  { %v593_v42 = vmax.f32 %v547_v41, 0.0  ;;  %v460_v43 = vpop.f32.mrf.mxu3  ;;  %v554_v44 = vpop.f32.mrf.mxu2 }
  0xce   :  { %v423_v45 = vpop.f32.mrf.mxu0 }
  0xcf   :  { %v614_v46 = vpack.c.bf16 %v593_v42, %v593_v42  ;;  %v424_v47 = vadd.f32 %v1209_v54, %v423_v45  ;;  %v486_v48 = vpop.f32.mrf.mxu1 }
  0xd1   :  { %636 = vst.msk [vmem:[%s1345_s3 + $0x14] sm:$0xf] %vm630_vm1, %v614_v46  ;;  %v487_v49 = vadd.f32 %v486_v48, %v424_v47  ;;  %v459_v46 = vadd.f32 %v1209_v54, %v1240_v34  ;;  %v449_v34 = vadd.f32 %v1209_v54, %v1212_v62 }
  0xd3   :  { %v550_v50 = vadd.f32 %v549_v26, %v487_v49 }
  0xd5   :  { %v594_v51 = vmax.f32 %v550_v50, 0.0  ;;  %v1252_v52 = vpop.f32.mrf.mxu3  ;;  %v556_v53 = vpop.f32.mrf.mxu2 }
  0xd6   :  { %v425_v55 = vpop.f32.mrf.mxu0 }
  0xd7   :  { %v615_v56 = vpack.c.bf16 %v594_v51, %v594_v51  ;;  %v426_v57 = vadd.f32 %v1209_v54, %v425_v55  ;;  %v488_v58 = vpop.f32.mrf.mxu1 }
  0xd9   :  { %637 = vst.msk [vmem:[%s1345_s3 + $0x18] sm:$0xf] %vm630_vm1, %v615_v56  ;;  %v489_v59 = vadd.f32 %v488_v58, %v426_v57 }
  0xdb   :  { %v552_v60 = vadd.f32 %v551_v35, %v489_v59 }
  0xdd   :  { %v595_v61 = vmax.f32 %v552_v60, 0.0  ;;  %v1259_v63 = vpop.f32.mrf.mxu3  ;;  %v559_v0 = vpop.f32.mrf.mxu2 }
  0xde   :  { %v428_v1 = vpop.f32.mrf.mxu0 }
  0xdf   :  { %v616_v2 = vpack.c.bf16 %v595_v61, %v595_v61  ;;  %v429_v3 = vadd.f32 %v1209_v54, %v428_v1  ;;  %v491_v4 = vpop.f32.mrf.mxu1  ;;  %v512_v1 = vadd.f32 %v1252_v52, %v449_v34  ;;  %v451_v52 = vadd.f32 %v1209_v54, %v1219_v7 }
  0xe1   :  { %638 = vst.msk [vmem:[%s1345_s3 + $0x1c] sm:$0xf] %vm630_vm1, %v616_v2  ;;  %v492_v5 = vadd.f32 %v491_v4, %v429_v3 }
  0xe3   :  { %v555_v6 = vadd.f32 %v554_v44, %v492_v5 }
  0xe5   :  { %v596_v8 = vmax.f32 %v555_v6, 0.0  ;;  %v1266_v9 = vpop.f32.mrf.mxu3  ;;  %v561_v10 = vpop.f32.mrf.mxu2 }
  0xe6   :  { %v430_v11 = vpop.f32.mrf.mxu0 }
  0xe7   :  { %v617_v12 = vpack.c.bf16 %v596_v8, %v596_v8  ;;  %v431_v13 = vadd.f32 %v1209_v54, %v430_v11  ;;  %v493_v14 = vpop.f32.mrf.mxu1 }
  0xe9   :  { %639 = vst.msk [vmem:[%s1345_s3 + $0x20] sm:$0xf] %vm630_vm1, %v617_v12  ;;  %v494_v15 = vadd.f32 %v493_v14, %v431_v13 }
  0xeb   :  { %v557_v17 = vadd.f32 %v556_v53, %v494_v15  ;;  %v514_v15 = vadd.f32 %v1259_v63, %v451_v52  ;;  %v454_v63 = vadd.f32 %v1209_v54, %v1226_v16  ;;  %v456_v16 = vadd.f32 %v1209_v54, %v1233_v25 }
  0xed   :  { %v597_v18 = vmax.f32 %v557_v17, 0.0  ;;  %v1273_v19 = vpop.f32.mrf.mxu3  ;;  %v564_v20 = vpop.f32.mrf.mxu2 }
  0xee   :  { %v433_v21 = vpop.f32.mrf.mxu0 }
  0xef   :  { %v618_v22 = vpack.c.bf16 %v597_v18, %v597_v18  ;;  %v434_v23 = vadd.f32 %v1209_v54, %v433_v21  ;;  %v496_v24 = vpop.f32.mrf.mxu1 }
  0xf1   :  { %640 = vst.msk [vmem:[%s1345_s3 + $0x24] sm:$0xf] %vm630_vm1, %v618_v22  ;;  %v497_v26 = vadd.f32 %v496_v24, %v434_v23 }
  0xf3   :  { %v560_v27 = vadd.f32 %v559_v0, %v497_v26 }
  0xf5   :  { %v598_v28 = vmax.f32 %v560_v27, 0.0  ;;  %v521_v29 = vpop.f32.mrf.mxu3  ;;  %v566_v30 = vpop.f32.mrf.mxu2 }
  0xf6   :  { %v435_v31 = vpop.f32.mrf.mxu0  ;;  %v522_v48 = vadd.f32 %v521_v29, %v459_v46  ;;  %v517_v29 = vadd.f32 %v1266_v9, %v454_v63  ;;  %v519_v9 = vadd.f32 %v1273_v19, %v456_v16 }
  0xf7   :  { %v619_v32 = vpack.c.bf16 %v598_v28, %v598_v28  ;;  %v436_v33 = vadd.f32 %v1209_v54, %v435_v31  ;;  %v498_v35 = vpop.f32.mrf.mxu1 }
  0xf9   :  { %641 = vst.msk [vmem:[%s1345_s3 + $0x28] sm:$0xf] %vm630_vm1, %v619_v32  ;;  %v499_v36 = vadd.f32 %v498_v35, %v436_v33 }
  0xfb   :  { %v562_v37 = vadd.f32 %v561_v10, %v499_v36 }
  0xfd   :  { %v599_v38 = vmax.f32 %v562_v37, 0.0  ;;  %v523_v39 = vpop.f32.mrf.mxu3  ;;  %v569_v40 = vpop.f32.mrf.mxu2 }
  0xfe   :  { %v438_v41 = vpop.f32.mrf.mxu0 }
  0xff   :  { %v620_v42 = vpack.c.bf16 %v599_v38, %v599_v38  ;;  %v439_v43 = vadd.f32 %v1209_v54, %v438_v41  ;;  %v501_v44 = vpop.f32.mrf.mxu1 }
 0x101   :  { %642 = vst.msk [vmem:[%s1345_s3 + $0x2c] sm:$0xf] %vm630_vm1, %v620_v42  ;;  %v502_v45 = vadd.f32 %v501_v44, %v439_v43 }
 0x103   :  { %v565_v47 = vadd.f32 %v564_v20, %v502_v45 }
 0x105   :  { %v600_v49 = vmax.f32 %v565_v47, 0.0  ;;  %v571_v50 = vpop.f32.mrf.mxu2  ;;  %v584_v51 = vpop.f32.mrf.mxu3 }
 0x106   :  { %v585_v53 = vadd.f32 %v584_v51, %v522_v48  ;;  %v440_v55 = vpop.f32.mrf.mxu0 }
 0x107   :  { %v621_v56 = vpack.c.bf16 %v600_v49, %v600_v49  ;;  %v441_v57 = vadd.f32 %v1209_v54, %v440_v55  ;;  %v503_v58 = vpop.f32.mrf.mxu1 }
 0x108   :  { %v608_v59 = vmax.f32 %v585_v53, 0.0 }
 0x109   :  { %643 = vst.msk [vmem:[%s1345_s3 + $0x30] sm:$0xf] %vm630_vm1, %v621_v56  ;;  %v504_v60 = vadd.f32 %v503_v58, %v441_v57 }
 0x10a   :  { %v629_v61 = vpack.c.bf16 %v608_v59, %v608_v59 }
 0x10b   :  { %v567_v0 = vadd.f32 %v566_v30, %v504_v60 }
 0x10c   :  { %652 = vst.msk [vmem:[%s1345_s3 + $0x50] sm:$0x1] %vm651_vm2, %v629_v61 }
 0x10d   :  { %v601_v2 = vmax.f32 %v567_v0, 0.0  ;;  %v574_v3 = vpop.f32.mrf.mxu2  ;;  %v586_v4 = vpop.f32.mrf.mxu3 }
 0x10e   :  { %v575_v5 = vadd.f32 %v574_v3, %v512_v1  ;;  %v443_v6 = vpop.f32.mrf.mxu0 }
 0x10f   :  { %v622_v8 = vpack.c.bf16 %v601_v2, %v601_v2  ;;  %v444_v10 = vadd.f32 %v1209_v54, %v443_v6  ;;  %v506_v11 = vpop.f32.mrf.mxu1 }
 0x110   :  { %v604_v12 = vmax.f32 %v575_v5, 0.0 }
 0x111   :  { %644 = vst.msk [vmem:[%s1345_s3 + $0x34] sm:$0xf] %vm630_vm1, %v622_v8  ;;  %v507_v62 = vadd.f32 %v506_v11, %v444_v10 }
 0x112   :  { %v625_v13 = vpack.c.bf16 %v604_v12, %v604_v12 }
 0x113   :  { %v570_v14 = vadd.f32 %v569_v40, %v507_v62 }
 0x114   :  { %647 = vst.msk [vmem:[%s1345_s3 + $0x40] sm:$0xf] %vm630_vm1, %v625_v13 }
 0x115   :  { %v602_v17 = vmax.f32 %v570_v14, 0.0  ;;  %v576_v18 = vpop.f32.mrf.mxu2 }
 0x116   :  { %v577_v20 = vadd.f32 %v576_v18, %v514_v15  ;;  %v445_v21 = vpop.f32.mrf.mxu0 }
 0x117   :  { %v623_v22 = vpack.c.bf16 %v602_v17, %v602_v17  ;;  %v446_v23 = vadd.f32 %v1209_v54, %v445_v21  ;;  %v508_v24 = vpop.f32.mrf.mxu1 }
 0x118   :  { %v605_v26 = vmax.f32 %v577_v20, 0.0 }
 0x119   :  { %645 = vst.msk [vmem:[%s1345_s3 + $0x38] sm:$0xf] %vm630_vm1, %v623_v22  ;;  %v509_v7 = vadd.f32 %v508_v24, %v446_v23 }
 0x11a   :  { %v626_v27 = vpack.c.bf16 %v605_v26, %v605_v26 }
 0x11b   :  { %v572_v28 = vadd.f32 %v571_v50, %v509_v7 }
 0x11c   :  { %648 = vst.msk [vmem:[%s1345_s3 + $0x44] sm:$0xf] %vm630_vm1, %v626_v27 }
 0x11d   :  { %v603_v30 = vmax.f32 %v572_v28, 0.0  ;;  %v579_v31 = vpop.f32.mrf.mxu2 }
 0x11e   :  { %v580_v32 = vadd.f32 %v579_v31, %v517_v29 }
 0x11f   :  { %v624_v33 = vpack.c.bf16 %v603_v30, %v603_v30 }
 0x120   :  { %v606_v35 = vmax.f32 %v580_v32, 0.0 }
 0x121   :  { %646 = vst.msk [vmem:[%s1345_s3 + $0x3c] sm:$0xf] %vm630_vm1, %v624_v33 }
 0x122   :  { %v627_v36 = vpack.c.bf16 %v606_v35, %v606_v35 }
 0x124   :  { %649 = vst.msk [vmem:[%s1345_s3 + $0x48] sm:$0xf] %vm630_vm1, %v627_v36 }
 0x125   :  { %v581_v37 = vpop.f32.mrf.mxu2 }
 0x126   :  { %v582_v38 = vadd.f32 %v581_v37, %v519_v9 }
 0x128   :  { %v607_v39 = vmax.f32 %v582_v38, 0.0 }
 0x12a   :  { %v628_v40 = vpack.c.bf16 %v607_v39, %v607_v39 }
 0x12c   :  { %650 = vst.msk [vmem:[%s1345_s3 + $0x4c] sm:$0xf] %vm630_vm1, %v628_v40 }

// kernel: neural_network2_forward.7
= control target key start
LH: loop header
LB: loop body
LE: loop exit
PB: predicated region body
PF: predicated region fallthrough
CT: control target
= control target key end

     0   :  { %vm214_vm0 = vcmask 261120   ;;  %s4736_s0 = inlined_call_operand.vmem [shape: bf16[32,288], index: 0, kind: input, shape index: {}]   ;;  %s4737_s1 = inlined_call_operand.vmem [shape: bf16[288,32], index: 1, kind: input, shape index: {}]   ;;  %s4738_s2 = inlined_call_operand.vmem [shape: f32[1,32], index: 2, kind: input, shape index: {}]   ;;  %s4739_s3 = inlined_call_operand.vmem [shape: bf16[512,512], index: 3, kind: input, shape index: {}]   ;;  %s4740_s4 = inlined_call_operand.vmem [shape: f32[1,512], index: 4, kind: input, shape index: {}]   ;;  %s4741_s5 = inlined_call_operand.vmem [shape: bf16[512,6], index: 5, kind: input, shape index: {}]   ;;  %s4742_s6 = inlined_call_operand.vmem [shape: f32[1,6], index: 6, kind: input, shape index: {}]   ;;  %s4743_s7 = inlined_call_operand.hbm [shape: f32[2,6], index: 7, kind: output, shape index: {}]  }
   0x1   :  { %v3248_v0 = vld [vmem:[%s4737_s1 + $0x38] sm:$0xff]  ;;  %v3247_v2 = vld [vmem:[%s4737_s1 + $0x30] sm:$0xff]  ;;  %v3258_v4 = vld [vmem:[%s4737_s1 + $0x88] sm:$0xff] }
   0x2   :  { %v3256_v1 = vld [vmem:[%s4737_s1 + $0x78] sm:$0xff]  ;;  %221 = vmatpush.bf16.msra.mxu0 %v3248_v0  ;;  %v3255_v3 = vld [vmem:[%s4737_s1 + $0x70] sm:$0xff]  ;;  %265 = vmatpush.bf16.msra.mxu2 %v3258_v4  ;;  %v3257_v5 = vld [vmem:[%s4737_s1 + $0x80] sm:$0xff] }
   0x3   :  { %240 = vmatpush.bf16.msra.mxu1 %v3256_v1  ;;  %v2443_v6 = vld [vmem:[%s4736_s0 + $0x8] sm:$0xf]  ;;  %v3237_v7 = vld [vmem:[%s4736_s0 + $0x10] sm:$0xf0]  ;;  %v3245_v11 = vld [vmem:[%s4737_s1 + $0x20] sm:$0xff] }
   0x4   :  { %v3246_v8 = vld [vmem:[%s4737_s1 + $0x28] sm:$0xff]  ;;  %v2444_v10 = vor.u32 %v3237_v7, %v2443_v6  ;;  %v3253_v12 = vld [vmem:[%s4737_s1 + $0x60] sm:$0xff] }
   0x5   :  { %v3254_v9 = vld [vmem:[%s4737_s1 + $0x68] sm:$0xff] }
   0x6   :  { %222 = vmatpush.bf16.msra.mxu0 %v3247_v2  ;;  %266 = vmatpush.bf16.msra.mxu2 %v3257_v5 }
   0x7   :  { %241 = vmatpush.bf16.msra.mxu1 %v3255_v3 }
   0xa   :  { %223 = vmatpush.bf16.msra.mxu0 %v3246_v8 }
   0xb   :  { %242 = vmatpush.bf16.msra.mxu1 %v3254_v9 }
   0xc   :  { %12 = vsyncpa [#allocation3], 0  ;;  %2529 = vmatmul.msk.bf16.vlgmr.msra.gmra.mxu2 %vm214_vm0, %v2444_v10  ;;  %v3244_v13 = vld [vmem:[%s4737_s1 + $0x18] sm:$0xff]  ;;  %v3243_v15 = vld [vmem:[%s4737_s1 + $0x10] sm:$0xff]  ;;  %vm293_vm1 = vcmask 1040384   ;;  %s3448_s20 = smov [#allocation2]  }
   0xd   :  { %v3252_v14 = vld [vmem:[%s4737_s1 + $0x58] sm:$0xff]  ;;  %v3251_v16 = vld [vmem:[%s4737_s1 + $0x50] sm:$0xff]  ;;  %v2455_v17 = vld [vmem:[%s4736_s0 + $0x20] sm:$0xf]  ;;  %vm294_vm2 = vsmask.f32 256 }
   0xe   :  { %224 = vmatpush.bf16.msra.mxu0 %v3245_v11  ;;  %v3240_v18 = vld [vmem:[%s4736_s0 + $0x28] sm:$0xf0]  ;;  %v3241_v22 = vld [vmem:[%s4737_s1] sm:$0xff]  ;;  %v2437_v27 = vld [vmem:[%s4736_s0 + $0xc] sm:$0xf0]  ;;  %s2422_s21 = sshll.u32 %s3448_s20, 4  ;;  %s2423_s21 = int_to_ptr.vmem [resolvable:$true] %s2422_s21 }
   0xf   :  { %243 = vmatpush.bf16.msra.mxu1 %v3253_v12  ;;  %v3242_v19 = vld [vmem:[%s4737_s1 + $0x8] sm:$0xff]  ;;  %v2456_v21 = vor.u32 %v3240_v18, %v2455_v17  ;;  %v3249_v23 = vld [vmem:[%s4737_s1 + $0x40] sm:$0xff]  ;;  %v2447_v30 = vld [vmem:[%s4736_s0 + $0x18] sm:$0xf]  ;;  %s2424_s23 = sshll.u32 %s4743_s7, 4  ;;  %vm2415_vm4 = vcmask 41984   ;;  %s2425_s23 = int_to_ptr.hbm [resolvable:$true] %s2424_s23 }
  0x10   :  { %v3250_v20 = vld [vmem:[%s4737_s1 + $0x48] sm:$0xff]  ;;  %v2435_v24 = vld [vmem:[%s4736_s0] sm:$0xf]  ;;  %v3235_v26 = vld [vmem:[%s4736_s0 + $0x4] sm:$0xf] }
  0x11   :  { %v3236_v25 = vld [vmem:[%s4736_s0 + $0x8] sm:$0xf0]  ;;  %v2440_v29 = vor.u32 %v3235_v26, %v2437_v27  ;;  %v3239_v31 = vld [vmem:[%s4736_s0 + $0x20] sm:$0xf0]  ;;  %v3238_v32 = vld [vmem:[%s4736_s0 + $0x1c] sm:$0xf] }
  0x12   :  { %225 = vmatpush.bf16.msra.mxu0 %v3244_v13  ;;  %v2436_v28 = vor.u32 %v3236_v25, %v2435_v24  ;;  %v2449_v33 = vld [vmem:[%s4736_s0 + $0x24] sm:$0xf0]  ;;  %v2448_v34 = vor.u32 %v3239_v31, %v2447_v30  ;;  %v2549_v36 = vld [vmem:[%s4739_s3 + $0x60] sm:$0xf]  ;;  %v3273_v37 = vld [vmem:[%s4739_s3 + $0x6c] sm:$0xf0] }
  0x13   :  { %244 = vmatpush.bf16.msra.mxu1 %v3252_v14  ;;  %v2452_v35 = vor.u32 %v3238_v32, %v2449_v33  ;;  %v2557_v38 = vld [vmem:[%s4739_s3 + $0x68] sm:$0xf]  ;;  %v2550_v39 = vor.u32 %v3273_v37, %v2549_v36  ;;  %v3274_v40 = vld [vmem:[%s4739_s3 + $0x74] sm:$0xf0]  ;;  %v2533_v42 = vld [vmem:[%s4739_s3 + $0x40] sm:$0xf] }
  0x14   :  { %v2558_v41 = vor.u32 %v3274_v40, %v2557_v38  ;;  %v3269_v43 = vld [vmem:[%s4739_s3 + $0x4c] sm:$0xf0]  ;;  %v2541_v44 = vld [vmem:[%s4739_s3 + $0x48] sm:$0xf]  ;;  %v3270_v46 = vld [vmem:[%s4739_s3 + $0x54] sm:$0xf0] }
  0x15   :  { %370 = vmatpush.bf16.msra.mxu3 %v2550_v39  ;;  %v2534_v45 = vor.u32 %v3269_v43, %v2533_v42  ;;  %v2542_v47 = vor.u32 %v3270_v46, %v2541_v44  ;;  %v2593_v48 = vld [vmem:[%s4739_s3 + $0x28] sm:$0xf]  ;;  %v3266_v49 = vld [vmem:[%s4739_s3 + $0x34] sm:$0xf0]  ;;  %v3264_v50 = vld [vmem:[%s4739_s3 + $0x2c] sm:$0xf] }
  0x16   :  { %226 = vmatpush.bf16.msra.mxu0 %v3243_v15  ;;  %396 = vmatpush.bf16.msrb.mxu2 %v2558_v41  ;;  %v2594_v51 = vor.u32 %v3266_v49, %v2593_v48  ;;  %v2595_v52 = vld [vmem:[%s4739_s3 + $0x38] sm:$0xf0]  ;;  %v2577_v54 = vld [vmem:[%s4739_s3 + $0x8] sm:$0xf]  ;;  %v3262_v55 = vld [vmem:[%s4739_s3 + $0x14] sm:$0xf0] }
  0x17   :  { %245 = vmatpush.bf16.msra.mxu1 %v3251_v16  ;;  %v2598_v53 = vor.u32 %v3264_v50, %v2595_v52  ;;  %v3260_v56 = vld [vmem:[%s4739_s3 + $0xc] sm:$0xf]  ;;  %v3629_v58 = vld [vmem:[%s4738_s2] ss:$0 sm:$0xff]  ;;  %v2578_v59 = vor.u32 %v3262_v55, %v2577_v54  ;;  %v2579_v60 = vld [vmem:[%s4739_s3 + $0x18] sm:$0xf0] }
  0x18   :  { %v2582_v61 = vor.u32 %v3260_v56, %v2579_v60  ;;  %v3271_v1 = vld [vmem:[%s4739_s3 + $0x64] sm:$0xf]  ;;  %v2551_v2 = vld [vmem:[%s4739_s3 + $0x70] sm:$0xf0]  ;;  %v2585_v3 = vld [vmem:[%s4739_s3 + $0x20] sm:$0xf] }
  0x19   :  { %371 = vmatpush.bf16.msra.mxu3 %v2534_v45  ;;  %v2554_v5 = vor.u32 %v3271_v1, %v2551_v2  ;;  %v3265_v6 = vld [vmem:[%s4739_s3 + $0x2c] sm:$0xf0]  ;;  %v3267_v9 = vld [vmem:[%s4739_s3 + $0x44] sm:$0xf]  ;;  %v2535_v10 = vld [vmem:[%s4739_s3 + $0x50] sm:$0xf0] }
  0x1a   :  { %227 = vmatpush.bf16.msra.mxu0 %v3242_v19  ;;  %397 = vmatpush.bf16.msrb.mxu2 %v2542_v47  ;;  %v2586_v7 = vor.u32 %v3265_v6, %v2585_v3  ;;  %v2569_v11 = vld [vmem:[%s4739_s3] sm:$0xf]  ;;  %v2538_v12 = vor.u32 %v3267_v9, %v2535_v10  ;;  %v3261_v13 = vld [vmem:[%s4739_s3 + $0xc] sm:$0xf0]  ;;  %v2629_v14 = vld [vmem:[%s4739_s3 + $0xa8] sm:$0xf] }
  0x1b   :  { %246 = vmatpush.bf16.msra.mxu1 %v3250_v20  ;;  %v3282_v15 = vld [vmem:[%s4739_s3 + $0xb4] sm:$0xf0]  ;;  %v2570_v17 = vor.u32 %v3261_v13, %v2569_v11  ;;  %v3280_v19 = vld [vmem:[%s4739_s3 + $0xac] sm:$0xf]  ;;  %v2631_v20 = vld [vmem:[%s4739_s3 + $0xb8] sm:$0xf0] }
  0x1c   :  { %2530 = vmatmul.msk.bf16.gmra.mxu2 %vm214_vm0, %v2456_v21  ;;  %v2630_v18 = vor.u32 %v3282_v15, %v2629_v14  ;;  %v2634_v24 = vor.u32 %v3280_v19, %v2631_v20  ;;  %v3278_v30 = vld [vmem:[%s4739_s3 + $0x94] sm:$0xf0]  ;;  %v3276_v31 = vld [vmem:[%s4739_s3 + $0x8c] sm:$0xf]  ;;  %v2615_v32 = vld [vmem:[%s4739_s3 + $0x98] sm:$0xf0] }
  0x1d   :  { %383 = vmatpush.bf16.msrb.mxu3 %v2554_v5  ;;  %v3272_v45 = vld [vmem:[%s4739_s3 + $0x6c] sm:$0xf]  ;;  %v2559_v46 = vld [vmem:[%s4739_s3 + $0x78] sm:$0xf0]  ;;  %v2621_v47 = vld [vmem:[%s4739_s3 + $0xa0] sm:$0xf] }
  0x1e   :  { %228 = vmatpush.bf16.msra.mxu0 %v3241_v22  ;;  %465 = vmatpush.bf16.msra.mxu2 %v2586_v7  ;;  %v3281_v48 = vld [vmem:[%s4739_s3 + $0xac] sm:$0xf0]  ;;  %vm3704_vm3 = vmand %vm293_vm1, %vm294_vm2  ;;  %v3268_v54 = vld [vmem:[%s4739_s3 + $0x4c] sm:$0xf] }
  0x1f   :  { %247 = vmatpush.bf16.msra.mxu1 %v3249_v23  ;;  %v2622_v60 = vor.u32 %v3281_v48, %v2621_v47  ;;  %v2665_v2 = vld [vmem:[%s4739_s3 + $0xe8] sm:$0xf]  ;;  %v3290_v3 = vld [vmem:[%s4739_s3 + $0xf4] sm:$0xf0]  ;;  %v3288_v7 = vld [vmem:[%s4739_s3 + $0xec] sm:$0xf] }
  0x20   :  { %v2649_v13 = vld [vmem:[%s4739_s3 + $0xc8] sm:$0xf]  ;;  %v3284_v20 = vld [vmem:[%s4739_s3 + $0xcc] sm:$0xf] }
  0x21   :  { %229 = vmatmul.bf16.vlgmr.msra.gmra.mxu0 %v2436_v28  ;;  %384 = vmatpush.bf16.msrb.mxu3 %v2538_v12  ;;  %v2613_v28 = vld [vmem:[%s4739_s3 + $0x88] sm:$0xf]  ;;  %v2666_v12 = vor.u32 %v3290_v3, %v2665_v2 }
  0x22   :  { %248 = vmatmul.bf16.vlgmr.msra.gmra.mxu1 %v2440_v29  ;;  %491 = vmatpush.bf16.msrb.mxu0 %v2594_v51  ;;  %v2614_v33 = vor.u32 %v3278_v30, %v2613_v28  ;;  %v2695_v51 = vld [vmem:[%s4739_s3 + $0x130] sm:$0xf0] }
  0x23   :  { %504 = vmatpush.bf16.msrb.mxu1 %v2598_v53  ;;  %466 = vmatpush.bf16.msra.mxu2 %v2570_v17  ;;  %v2562_v53 = vor.u32 %v3272_v45, %v2559_v46 }
  0x26   :  { %492 = vmatpush.bf16.msrb.mxu0 %v2578_v59  ;;  %v2543_v59 = vld [vmem:[%s4739_s3 + $0x58] sm:$0xf0] }
  0x27   :  { %505 = vmatpush.bf16.msrb.mxu1 %v2582_v61  ;;  %v2605_v61 = vld [vmem:[%s4739_s3 + $0x80] sm:$0xf]  ;;  %v2546_v5 = vor.u32 %v3268_v54, %v2543_v59 }
  0x2a   :  { %599 = vmatpush.bf16.msra.mxu0 %v2630_v18  ;;  %v3286_v18 = vld [vmem:[%s4739_s3 + $0xd4] sm:$0xf0] }
  0x2b   :  { %612 = vmatpush.bf16.msra.mxu1 %v2634_v24  ;;  %v2650_v30 = vor.u32 %v3286_v18, %v2649_v13 }
  0x2e   :  { %600 = vmatpush.bf16.msra.mxu0 %v2614_v33  ;;  %v3263_v33 = vld [vmem:[%s4739_s3 + $0x24] sm:$0xf] }
  0x31   :  { %234 = vmatmul.bf16.gmra.mxu0 %v2448_v34  ;;  %v2618_v34 = vor.u32 %v3276_v31, %v2615_v32 }
  0x32   :  { %253 = vmatmul.bf16.gmra.mxu1 %v2452_v35 }
  0x33   :  { %613 = vmatpush.bf16.msra.mxu1 %v2618_v34  ;;  %v2587_v34 = vld [vmem:[%s4739_s3 + $0x30] sm:$0xf0] }
  0x8f   :  { %v268_v57 = vpop.f32.mrf.mxu2 }
  0x97   :  { %v270_v16 = vpop.f32.mrf.mxu2 }
  0x9e   :  { %v230_v62 = vpop.f32.mrf.mxu0 }
  0x9f   :  { %v249_v63 = vpop.f32.mrf.mxu1  ;;  %v231_v0 = vadd.f32 %v3629_v58, %v230_v62  ;;  %v273_v40 = vpop.f32.mrf.mxu2  ;;  %v3277_v62 = vld [vmem:[%s4739_s3 + $0x8c] sm:$0xf0] }
  0xa0   :  { %v2606_v6 = vor.u32 %v3277_v62, %v2605_v61 }
  0xa1   :  { %v250_v4 = vadd.f32 %v249_v63, %v231_v0 }
  0xa3   :  { %v269_v8 = vadd.f32 %v268_v57, %v250_v4 }
  0xa5   :  { %v278_v21 = vmax.f32 %v269_v8, 0.0  ;;  %v2667_v8 = vld [vmem:[%s4739_s3 + $0xf8] sm:$0xf0] }
  0xa6   :  { %v232_v22 = vpop.f32.mrf.mxu0  ;;  %v2670_v17 = vor.u32 %v3288_v7, %v2667_v8  ;;  %v3298_v7 = vld [vmem:[%s4739_s3 + $0x134] sm:$0xf0]  ;;  %v3296_v8 = vld [vmem:[%s4739_s3 + $0x12c] sm:$0xf] }
  0xa7   :  { %v251_v23 = vpop.f32.mrf.mxu1  ;;  %v233_v25 = vadd.f32 %v3629_v58, %v232_v22  ;;  %v3672_v27 = vpack.c.bf16 %v278_v21, %v278_v21  ;;  %v275_v4 = vpop.f32.mrf.mxu2  ;;  %v2651_v21 = vld [vmem:[%s4739_s3 + $0xd8] sm:$0xf0] }
  0xa8   :  { %v2654_v31 = vor.u32 %v3284_v20, %v2651_v21  ;;  %v3294_v20 = vld [vmem:[%s4739_s3 + $0x114] sm:$0xf0]  ;;  %v3292_v21 = vld [vmem:[%s4739_s3 + $0x10c] sm:$0xf] }
  0xa9   :  { %v252_v26 = vadd.f32 %v251_v23, %v233_v25  ;;  %v306_v35 = vunpack.c.l.b16 %v3672_v27 }
  0xab   :  { %v271_v29 = vadd.f32 %v270_v16, %v252_v26  ;;  %v3688_v42 = vpack.c.b16 %v306_v35, %v306_v35 }
  0xad   :  { %v279_v38 = vmax.f32 %v271_v29, 0.0  ;;  %v3709_v52 = vshrl.u32 %v3688_v42, 16 }
  0xae   :  { %v235_v36 = vpop.f32.mrf.mxu0 }
  0xaf   :  { %v254_v37 = vpop.f32.mrf.mxu1  ;;  %v236_v39 = vadd.f32 %v3629_v58, %v235_v36  ;;  %v3690_v43 = vpack.c.bf16 %v279_v38, %v279_v38  ;;  %v847_v14 = vrot.slane %v3709_v52, 2  ;;  %v1071_v22 = vrot.slane %v3709_v52, 3  ;;  %v2657_v36 = vld [vmem:[%s4739_s3 + $0xe0] sm:$0xf] }
  0xb0   :  { %v959_v38 = vrot.slane %v3688_v42, 3 }
  0xb1   :  { %v255_v41 = vadd.f32 %v254_v37, %v236_v39  ;;  %v1299_v55 = vunpack.c.l.b16 %v3690_v43  ;;  %v3289_v37 = vld [vmem:[%s4739_s3 + $0xec] sm:$0xf0] }
  0xb3   :  { %v274_v44 = vadd.f32 %v273_v40, %v255_v41  ;;  %v3746_v9 = vpack.c.b16 %v1299_v55, %v1299_v55 }
  0xb5   :  { %v280_v49 = vmax.f32 %v274_v44, 0.0  ;;  %v1302_v26 = vshrl.u32 %v3746_v9, 16  ;;  %v1413_v40 = vrot.slane %v3746_v9, 1  ;;  %v1637_v44 = vrot.slane %v3746_v9, 2 }
  0xb6   :  { %v237_v50 = vpop.f32.mrf.mxu0 }
  0xb7   :  { %v284_v56 = vpack.c.bf16 %v280_v49, %v280_v49  ;;  %v238_v57 = vadd.f32 %v3629_v58, %v237_v50  ;;  %v256_v63 = vpop.f32.mrf.mxu1  ;;  %v1525_v41 = vrot.slane %v1302_v26, 1  ;;  %v1749_v45 = vrot.slane %v1302_v26, 2 }
  0xb8   :  { %v1973_v49 = vrot.slane %v1302_v26, 3  ;;  %v2590_v50 = vor.u32 %v3263_v33, %v2587_v34  ;;  %v3297_v33 = vld [vmem:[%s4739_s3 + $0x12c] sm:$0xf0] }
  0xb9   :  { %v287_v0 = vunpack.c.l.b16 %v284_v56  ;;  %v257_v1 = vadd.f32 %v256_v63, %v238_v57  ;;  %v3728_v58 = vsel %vm3704_vm3, %v3709_v52, %v284_v56  ;;  %v3259_v56 = vld [vmem:[%s4739_s3 + $0x4] sm:$0xf]  ;;  %v2571_v57 = vld [vmem:[%s4739_s3 + $0x10] sm:$0xf0]  ;;  %v2641_v63 = vld [vmem:[%s4739_s3 + $0xc0] sm:$0xf] }
  0xba   :  { %2563 = vmatmul.msk.bf16.vlgmr.msra.gmra.mxu3 %vm214_vm0, %v3728_v58  ;;  %2565 = vmatmul.msk.bf16.vlgmr.msrb.gmra.mxu2 %vm214_vm0, %v3728_v58  ;;  %v2574_v13 = vor.u32 %v3259_v56, %v2571_v57  ;;  %v2723_v56 = vld [vmem:[%s4739_s3 + $0x158] sm:$0xf0] }
  0xbb   :  { %v3748_v10 = vpack.c.b16 %v287_v0, %v287_v0  ;;  %v276_v11 = vadd.f32 %v275_v4, %v257_v1  ;;  %409 = vmatpush.bf16.msra.mxu3 %v2562_v53  ;;  %573 = vmatpush.bf16.msrb.mxu2 %v2622_v60  ;;  %v2658_v53 = vor.u32 %v3289_v37, %v2657_v36  ;;  %v3285_v0 = vld [vmem:[%s4739_s3 + $0xcc] sm:$0xf0]  ;;  %v2701_v4 = vld [vmem:[%s4739_s3 + $0x128] sm:$0xf]  ;;  %v2607_v37 = vld [vmem:[%s4739_s3 + $0x90] sm:$0xf0] }
  0xbd   :  { %v281_v15 = vmax.f32 %v276_v11, 0.0  ;;  %v3755_v16 = vshll.u32 %v3748_v10, 16  ;;  %v849_v19 = vrot.slane %v3748_v10, 2  ;;  %v1073_v23 = vrot.slane %v3748_v10, 3 }
  0xbf   :  { %v285_v24 = vpack.c.bf16 %v281_v15, %v281_v15  ;;  %v3773_v25 = vsel %vm3704_vm3, %v3672_v27, %v3755_v16  ;;  %410 = vmatpush.bf16.msra.mxu3 %v2546_v5  ;;  %574 = vmatpush.bf16.msrb.mxu2 %v2606_v6  ;;  %v3782_v28 = vsel %vm3704_vm3, %v847_v14, %v849_v19  ;;  %v961_v39 = vrot.slane %v3755_v16, 3  ;;  %v2685_v19 = vld [vmem:[%s4739_s3 + $0x108] sm:$0xf] }
  0xc0   :  { %2601 = vmatmul.msk.bf16.vlgmr.msrb.gmra.mxu0 %vm214_vm0, %v3773_v25  ;;  %2602 = vmatmul.msk.bf16.vlgmr.msrb.gmra.mxu1 %vm214_vm0, %v3773_v25  ;;  %v3786_v29 = vsel %vm3704_vm3, %v1071_v22, %v1073_v23  ;;  %v2642_v14 = vor.u32 %v3285_v0, %v2641_v63  ;;  %v511_v15 = vrot.slane %v3688_v42, 1  ;;  %v2687_v22 = vld [vmem:[%s4739_s3 + $0x118] sm:$0xf0]  ;;  %v2659_v63 = vld [vmem:[%s4739_s3 + $0xf0] sm:$0xf0] }
  0xc1   :  { %v1184_v27 = vunpack.c.l.b16 %v285_v24  ;;  %711 = vmatpush.bf16.msrb.mxu0 %v2666_v12  ;;  %724 = vmatpush.bf16.msrb.mxu1 %v2670_v17  ;;  %v3790_v32 = vsel %vm3704_vm3, %v1302_v26, %v285_v24  ;;  %v3810_v46 = vsel %vm3704_vm3, %v959_v38, %v961_v39  ;;  %v513_v12 = vrot.slane %v3755_v16, 1  ;;  %v2677_v38 = vld [vmem:[%s4739_s3 + $0x100] sm:$0xf]  ;;  %v3293_v39 = vld [vmem:[%s4739_s3 + $0x10c] sm:$0xf0] }
  0xc2   :  { %v2702_v17 = vor.u32 %v3298_v7, %v2701_v4  ;;  %v2686_v24 = vor.u32 %v3294_v20, %v2685_v19  ;;  %v2690_v26 = vor.u32 %v3292_v21, %v2687_v22  ;;  %v2729_v0 = vld [vmem:[%s4739_s3 + $0x160] sm:$0xf]  ;;  %v3283_v4 = vld [vmem:[%s4739_s3 + $0xc4] sm:$0xf]  ;;  %v735_v20 = vrot.slane %v3688_v42, 2 }
  0xc3   :  { %v1185_v35 = vpack.c.b16 %v1184_v27, %v1184_v27  ;;  %v3886_v23 = vsel %vm3704_vm3, %v511_v15, %v513_v12  ;;  %v3279_v27 = vld [vmem:[%s4739_s3 + $0xa4] sm:$0xf]  ;;  %v3301_v12 = vld [vmem:[%s4739_s3 + $0x14c] sm:$0xf0]  ;;  %v3312_v15 = vld [vmem:[%s4739_s3 + $0x1ac] sm:$0xf] }
  0xc5   :  { %712 = vmatpush.bf16.msrb.mxu0 %v2650_v30  ;;  %725 = vmatpush.bf16.msrb.mxu1 %v2654_v31  ;;  %v1187_v47 = vshll.u32 %v1185_v35, 16  ;;  %v1527_v48 = vrot.slane %v1185_v35, 1  ;;  %v1751_v54 = vrot.slane %v1185_v35, 2  ;;  %v1975_v55 = vrot.slane %v1185_v35, 3  ;;  %v2623_v30 = vld [vmem:[%s4739_s3 + $0xb0] sm:$0xf0] }
  0xc6   :  { %v2693_v31 = vld [vmem:[%s4739_s3 + $0x120] sm:$0xf]  ;;  %v2626_v34 = vor.u32 %v3279_v27, %v2623_v30  ;;  %v3275_v35 = vld [vmem:[%s4739_s3 + $0x84] sm:$0xf]  ;;  %v2759_v27 = vld [vmem:[%s4739_s3 + $0x198] sm:$0xf0] }
  0xc7   :  { %v3821_v59 = vsel %vm3704_vm3, %v3690_v43, %v1187_v47  ;;  %v1415_v60 = vrot.slane %v1187_v47, 1  ;;  %v3825_v61 = vsel %vm3704_vm3, %v1525_v41, %v1527_v48  ;;  %v1639_v62 = vrot.slane %v1187_v47, 2  ;;  %v3306_v41 = vld [vmem:[%s4739_s3 + $0x174] sm:$0xf0] }
  0xc8   :  { %v3835_v1 = vsel %vm3704_vm3, %v1749_v45, %v1751_v54  ;;  %v1861_v43 = vrot.slane %v3746_v9, 3  ;;  %v1863_v2 = vrot.slane %v1187_v47, 3  ;;  %v3840_v3 = vsel %vm3704_vm3, %v1973_v49, %v1975_v55  ;;  %v2703_v9 = vld [vmem:[%s4739_s3 + $0x138] sm:$0xf0]  ;;  %v2721_v54 = vld [vmem:[%s4739_s3 + $0x148] sm:$0xf] }
  0xc9   :  { %v3847_v5 = vsel %vm3704_vm3, %v1413_v40, %v1415_v60  ;;  %v3851_v6 = vsel %vm3704_vm3, %v1637_v44, %v1639_v62  ;;  %v2706_v18 = vor.u32 %v3296_v8, %v2703_v9  ;;  %v2694_v36 = vor.u32 %v3297_v33, %v2693_v31  ;;  %v2737_v40 = vld [vmem:[%s4739_s3 + $0x168] sm:$0xf]  ;;  %v3304_v44 = vld [vmem:[%s4739_s3 + $0x16c] sm:$0xf]  ;;  %v2739_v45 = vld [vmem:[%s4739_s3 + $0x178] sm:$0xf0] }
  0xca   :  { %2564 = vmatmul.msk.bf16.vlgmr.msrb.gmra.mxu3 %vm214_vm0, %v3728_v58  ;;  %2599 = vmatmul.msk.bf16.vlgmr.msra.gmra.mxu2 %vm214_vm0, %v3773_v25  ;;  %v3868_v11 = vsel %vm3704_vm3, %v1861_v43, %v1863_v2  ;;  %v625_v47 = vrot.slane %v3748_v10, 1  ;;  %v2610_v48 = vor.u32 %v3275_v35, %v2607_v37  ;;  %v623_v49 = vrot.slane %v3709_v52, 1  ;;  %v3302_v55 = vld [vmem:[%s4739_s3 + $0x154] sm:$0xf0]  ;;  %v3300_v10 = vld [vmem:[%s4739_s3 + $0x14c] sm:$0xf] }
  0xcb   :  { %478 = vmatpush.bf16.msrb.mxu3 %v2590_v50  ;;  %685 = vmatpush.bf16.msra.mxu2 %v2658_v53  ;;  %v2738_v50 = vor.u32 %v3306_v41, %v2737_v40  ;;  %v2742_v53 = vor.u32 %v3304_v44, %v2739_v45  ;;  %v2722_v57 = vor.u32 %v3302_v55, %v2721_v54  ;;  %v3287_v62 = vld [vmem:[%s4739_s3 + $0xe4] sm:$0xf]  ;;  %v3305_v43 = vld [vmem:[%s4739_s3 + $0x16c] sm:$0xf0]  ;;  %v2643_v8 = vld [vmem:[%s4739_s3 + $0xd0] sm:$0xf0] }
  0xcc   :  { %v3948_v52 = vsel %vm3704_vm3, %v623_v49, %v625_v47  ;;  %v2726_v60 = vor.u32 %v3300_v10, %v2723_v56  ;;  %v2662_v2 = vor.u32 %v3287_v62, %v2659_v63  ;;  %v2730_v7 = vor.u32 %v3305_v43, %v2729_v0  ;;  %v2713_v9 = vld [vmem:[%s4739_s3 + $0x140] sm:$0xf]  ;;  %v3295_v33 = vld [vmem:[%s4739_s3 + $0x124] sm:$0xf]  ;;  %v3313_v35 = vld [vmem:[%s4739_s3 + $0x1ac] sm:$0xf0] }
  0xcd   :  { %v2646_v19 = vor.u32 %v3283_v4, %v2643_v8  ;;  %v3291_v37 = vld [vmem:[%s4739_s3 + $0x104] sm:$0xf]  ;;  %v2749_v40 = vld [vmem:[%s4739_s3 + $0x180] sm:$0xf]  ;;  %v3309_v41 = vld [vmem:[%s4739_s3 + $0x18c] sm:$0xf0] }
  0xce   :  { %v2809_v44 = vld [vmem:[%s4739_s3 + $0x1e8] sm:$0xf]  ;;  %v3322_v45 = vld [vmem:[%s4739_s3 + $0x1f4] sm:$0xf0]  ;;  %v3320_v47 = vld [vmem:[%s4739_s3 + $0x1ec] sm:$0xf]  ;;  %v2750_v49 = vor.u32 %v3309_v41, %v2749_v40 }
  0xcf   :  { %479 = vmatpush.bf16.msrb.mxu3 %v2574_v13  ;;  %686 = vmatpush.bf16.msra.mxu2 %v2642_v14  ;;  %v2773_v13 = vld [vmem:[%s4739_s3 + $0x1a8] sm:$0xf]  ;;  %v3314_v14 = vld [vmem:[%s4739_s3 + $0x1b4] sm:$0xf0]  ;;  %v3316_v55 = vld [vmem:[%s4739_s3 + $0x1cc] sm:$0xf] }
  0xd0   :  { %2637 = vmatmul.msk.bf16.vlgmr.msra.gmra.mxu0 %vm214_vm0, %v3886_v23  ;;  %2638 = vmatmul.msk.bf16.vlgmr.msra.gmra.mxu1 %vm214_vm0, %v3886_v23  ;;  %v2774_v21 = vor.u32 %v3314_v14, %v2773_v13  ;;  %v3318_v54 = vld [vmem:[%s4739_s3 + $0x1d4] sm:$0xf0]  ;;  %v2795_v10 = vld [vmem:[%s4739_s3 + $0x1d8] sm:$0xf0]  ;;  %v2731_v62 = vld [vmem:[%s4739_s3 + $0x170] sm:$0xf0] }
  0xd1   :  { %823 = vmatpush.bf16.msra.mxu0 %v2702_v17  ;;  %836 = vmatpush.bf16.msra.mxu1 %v2706_v18  ;;  %v2775_v17 = vld [vmem:[%s4739_s3 + $0x1b8] sm:$0xf0]  ;;  %v737_v18 = vrot.slane %v3755_v16, 2  ;;  %v3308_v16 = vld [vmem:[%s4739_s3 + $0x18c] sm:$0xf] }
  0xd2   :  { %v2778_v22 = vor.u32 %v3312_v15, %v2775_v17  ;;  %v2762_v31 = vor.u32 %v3308_v16, %v2759_v27  ;;  %v2801_v63 = vld [vmem:[%s4739_s3 + $0x1e0] sm:$0xf]  ;;  %v3321_v0 = vld [vmem:[%s4739_s3 + $0x1ec] sm:$0xf0]  ;;  %v3330_v13 = vld [vmem:[%s4739_s3 + $0x234] sm:$0xf0] }
  0xd3   :  { %v4010_v42 = vsel %vm3704_vm3, %v735_v20, %v737_v18  ;;  %v2802_v4 = vor.u32 %v3321_v0, %v2801_v63  ;;  %v2785_v8 = vld [vmem:[%s4739_s3 + $0x1c0] sm:$0xf]  ;;  %v3328_v14 = vld [vmem:[%s4739_s3 + $0x22c] sm:$0xf]  ;;  %v2847_v15 = vld [vmem:[%s4739_s3 + $0x238] sm:$0xf0] }
  0xd4   :  { %v3326_v20 = vld [vmem:[%s4739_s3 + $0x214] sm:$0xf0]  ;;  %v3311_v16 = vld [vmem:[%s4739_s3 + $0x1a4] sm:$0xf]  ;;  %v2767_v27 = vld [vmem:[%s4739_s3 + $0x1b0] sm:$0xf0] }
  0xd5   :  { %824 = vmatpush.bf16.msra.mxu0 %v2686_v24  ;;  %837 = vmatpush.bf16.msra.mxu1 %v2690_v26  ;;  %v2757_v24 = vld [vmem:[%s4739_s3 + $0x188] sm:$0xf]  ;;  %v3310_v26 = vld [vmem:[%s4739_s3 + $0x194] sm:$0xf0]  ;;  %v3336_v40 = vld [vmem:[%s4739_s3 + $0x26c] sm:$0xf] }
  0xd6   :  { %v2758_v30 = vor.u32 %v3310_v26, %v2757_v24  ;;  %v2883_v41 = vld [vmem:[%s4739_s3 + $0x278] sm:$0xf0]  ;;  %v2787_v63 = vld [vmem:[%s4739_s3 + $0x1d0] sm:$0xf0]  ;;  %v2857_v0 = vld [vmem:[%s4739_s3 + $0x240] sm:$0xf] }
  0xda   :  { %2566 = vmatmul.msk.bf16.vlgmr.msra.gmra.mxu3 %vm214_vm0, %v3728_v58  ;;  %2635 = vmatmul.msk.bf16.vlgmr.msrb.gmra.mxu2 %vm214_vm0, %v3886_v23  ;;  %v2678_v58 = vor.u32 %v3293_v39, %v2677_v38  ;;  %v2679_v39 = vld [vmem:[%s4739_s3 + $0x110] sm:$0xf0] }
  0xdb   :  { %586 = vmatpush.bf16.msra.mxu3 %v2626_v34  ;;  %797 = vmatpush.bf16.msrb.mxu2 %v2694_v36  ;;  %v2765_v34 = vld [vmem:[%s4739_s3 + $0x1a0] sm:$0xf]  ;;  %v2698_v36 = vor.u32 %v3295_v33, %v2695_v51  ;;  %v2770_v33 = vor.u32 %v3311_v16, %v2767_v27  ;;  %v3307_v51 = vld [vmem:[%s4739_s3 + $0x184] sm:$0xf]  ;;  %v2823_v27 = vld [vmem:[%s4739_s3 + $0x210] sm:$0xf0] }
  0xdc   :  { %v2766_v38 = vor.u32 %v3313_v35, %v2765_v34  ;;  %v2751_v35 = vld [vmem:[%s4739_s3 + $0x190] sm:$0xf0] }
  0xdf   :  { %587 = vmatpush.bf16.msra.mxu3 %v2610_v48  ;;  %798 = vmatpush.bf16.msrb.mxu2 %v2678_v58  ;;  %v2811_v48 = vld [vmem:[%s4739_s3 + $0x1f8] sm:$0xf0]  ;;  %v2682_v58 = vor.u32 %v3291_v37, %v2679_v39  ;;  %v3325_v37 = vld [vmem:[%s4739_s3 + $0x20c] sm:$0xf0]  ;;  %v3338_v39 = vld [vmem:[%s4739_s3 + $0x274] sm:$0xf0] }
  0xe0   :  { %2673 = vmatmul.msk.bf16.vlgmr.msrb.gmra.mxu0 %vm214_vm0, %v3948_v52  ;;  %2674 = vmatmul.msk.bf16.vlgmr.msrb.gmra.mxu1 %vm214_vm0, %v3948_v52 }
  0xe1   :  { %935 = vmatpush.bf16.msrb.mxu0 %v2738_v50  ;;  %948 = vmatpush.bf16.msrb.mxu1 %v2742_v53  ;;  %v2814_v50 = vor.u32 %v3320_v47, %v2811_v48  ;;  %v2793_v53 = vld [vmem:[%s4739_s3 + $0x1c8] sm:$0xf]  ;;  %v2886_v47 = vor.u32 %v3336_v40, %v2883_v41 }
  0xe2   :  { %v2794_v56 = vor.u32 %v3318_v54, %v2793_v53  ;;  %v2865_v48 = vld [vmem:[%s4739_s3 + $0x248] sm:$0xf]  ;;  %v3319_v54 = vld [vmem:[%s4739_s3 + $0x1e4] sm:$0xf] }
  0xe5   :  { %936 = vmatpush.bf16.msrb.mxu0 %v2722_v57  ;;  %949 = vmatpush.bf16.msrb.mxu1 %v2726_v60  ;;  %v2798_v57 = vor.u32 %v3316_v55, %v2795_v10  ;;  %v3303_v60 = vld [vmem:[%s4739_s3 + $0x164] sm:$0xf]  ;;  %v2803_v55 = vld [vmem:[%s4739_s3 + $0x1f0] sm:$0xf0]  ;;  %v2873_v10 = vld [vmem:[%s4739_s3 + $0x260] sm:$0xf] }
  0xe6   :  { %v2734_v43 = vor.u32 %v3303_v60, %v2731_v62  ;;  %v3315_v60 = vld [vmem:[%s4739_s3 + $0x1c4] sm:$0xf] }
  0xea   :  { %2600 = vmatmul.msk.bf16.vlgmr.msrb.gmra.mxu3 %vm214_vm0, %v3773_v25  ;;  %2671 = vmatmul.msk.bf16.vlgmr.msra.gmra.mxu2 %vm214_vm0, %v3948_v52  ;;  %v2714_v25 = vor.u32 %v3301_v12, %v2713_v9  ;;  %v3317_v9 = vld [vmem:[%s4739_s3 + $0x1cc] sm:$0xf0]  ;;  %v2845_v12 = vld [vmem:[%s4739_s3 + $0x228] sm:$0xf] }
  0xeb   :  { %698 = vmatpush.bf16.msrb.mxu3 %v2662_v2  ;;  %909 = vmatpush.bf16.msra.mxu2 %v2730_v7  ;;  %v3299_v2 = vld [vmem:[%s4739_s3 + $0x144] sm:$0xf]  ;;  %v2715_v7 = vld [vmem:[%s4739_s3 + $0x150] sm:$0xf0]  ;;  %v2786_v18 = vor.u32 %v3317_v9, %v2785_v8  ;;  %v2919_v8 = vld [vmem:[%s4739_s3 + $0x2b8] sm:$0xf0]  ;;  %v2790_v9 = vor.u32 %v3315_v60, %v2787_v63 }
  0xec   :  { %v2718_v17 = vor.u32 %v3299_v2, %v2715_v7  ;;  %v2917_v2 = vld [vmem:[%s4739_s3 + $0x2a8] sm:$0xf]  ;;  %v3344_v7 = vld [vmem:[%s4739_s3 + $0x2ac] sm:$0xf]  ;;  %v3331_v63 = vld [vmem:[%s4739_s3 + $0x244] sm:$0xf] }
  0xef   :  { %699 = vmatpush.bf16.msrb.mxu3 %v2646_v19  ;;  %910 = vmatpush.bf16.msra.mxu2 %v2714_v25  ;;  %v2850_v19 = vor.u32 %v3328_v14, %v2847_v15  ;;  %v2829_v25 = vld [vmem:[%s4739_s3 + $0x208] sm:$0xf]  ;;  %v3342_v15 = vld [vmem:[%s4739_s3 + $0x294] sm:$0xf0] }
  0xf0   :  { %2709 = vmatmul.msk.bf16.vlgmr.msra.gmra.mxu0 %vm214_vm0, %v4010_v42  ;;  %2710 = vmatmul.msk.bf16.vlgmr.msra.gmra.mxu1 %vm214_vm0, %v4010_v42  ;;  %v2830_v24 = vor.u32 %v3326_v20, %v2829_v25  ;;  %v2901_v14 = vld [vmem:[%s4739_s3 + $0x288] sm:$0xf]  ;;  %v3327_v25 = vld [vmem:[%s4739_s3 + $0x224] sm:$0xf]  ;;  %v2839_v20 = vld [vmem:[%s4739_s3 + $0x230] sm:$0xf0] }
  0xf1   :  { %1047 = vmatpush.bf16.msra.mxu0 %v2774_v21  ;;  %1060 = vmatpush.bf16.msra.mxu1 %v2778_v22  ;;  %v3324_v21 = vld [vmem:[%s4739_s3 + $0x20c] sm:$0xf]  ;;  %v2831_v22 = vld [vmem:[%s4739_s3 + $0x218] sm:$0xf0] }
  0xf2   :  { %v2834_v26 = vor.u32 %v3324_v21, %v2831_v22  ;;  %v2909_v21 = vld [vmem:[%s4739_s3 + $0x2a0] sm:$0xf]  ;;  %v3345_v22 = vld [vmem:[%s4739_s3 + $0x2ac] sm:$0xf0] }
  0xf3   :  { %v2910_v16 = vor.u32 %v3345_v22, %v2909_v21  ;;  %v3356_v21 = vld [vmem:[%s4739_s3 + $0x30c] sm:$0xf] }
  0xf5   :  { %1048 = vmatpush.bf16.msra.mxu0 %v2758_v30  ;;  %1061 = vmatpush.bf16.msra.mxu1 %v2762_v31  ;;  %v2837_v30 = vld [vmem:[%s4739_s3 + $0x220] sm:$0xf]  ;;  %v3329_v31 = vld [vmem:[%s4739_s3 + $0x22c] sm:$0xf0] }
  0xf6   :  { %v2838_v34 = vor.u32 %v3329_v31, %v2837_v30  ;;  %v2893_v30 = vld [vmem:[%s4739_s3 + $0x280] sm:$0xf]  ;;  %v3341_v31 = vld [vmem:[%s4739_s3 + $0x28c] sm:$0xf0] }
  0xfa   :  { %2636 = vmatmul.msk.bf16.vlgmr.msra.gmra.mxu3 %vm214_vm0, %v3886_v23  ;;  %2707 = vmatmul.msk.bf16.vlgmr.msrb.gmra.mxu2 %vm214_vm0, %v4010_v42  ;;  %v2810_v23 = vor.u32 %v3322_v45, %v2809_v44  ;;  %v2754_v44 = vor.u32 %v3307_v51, %v2751_v35  ;;  %v3354_v51 = vld [vmem:[%s4739_s3 + $0x2f4] sm:$0xf0]  ;;  %v2955_v35 = vld [vmem:[%s4739_s3 + $0x2f8] sm:$0xf0] }
  0xfb   :  { %810 = vmatpush.bf16.msra.mxu3 %v2698_v36  ;;  %1021 = vmatpush.bf16.msrb.mxu2 %v2766_v38  ;;  %v2821_v36 = vld [vmem:[%s4739_s3 + $0x200] sm:$0xf]  ;;  %v2881_v38 = vld [vmem:[%s4739_s3 + $0x268] sm:$0xf] }
  0xfc   :  { %v2822_v45 = vor.u32 %v3325_v37, %v2821_v36  ;;  %v2894_v37 = vor.u32 %v3341_v31, %v2893_v30  ;;  %v2911_v30 = vld [vmem:[%s4739_s3 + $0x2b0] sm:$0xf0]  ;;  %v2981_v31 = vld [vmem:[%s4739_s3 + $0x320] sm:$0xf] }
  0xff   :  { %811 = vmatpush.bf16.msra.mxu3 %v2682_v58  ;;  %1022 = vmatpush.bf16.msrb.mxu2 %v2750_v49  ;;  %v3334_v58 = vld [vmem:[%s4739_s3 + $0x254] sm:$0xf0]  ;;  %v3332_v49 = vld [vmem:[%s4739_s3 + $0x24c] sm:$0xf] }
 0x100   :  { %2745 = vmatmul.msk.bf16.vlgmr.msrb.gmra.mxu0 %vm214_vm0, %v3782_v28  ;;  %2746 = vmatmul.msk.bf16.vlgmr.msrb.gmra.mxu1 %vm214_vm0, %v3782_v28 }
 0x101   :  { %1159 = vmatpush.bf16.msrb.mxu0 %v2810_v23  ;;  %1172 = vmatpush.bf16.msrb.mxu1 %v2814_v50  ;;  %v2867_v23 = vld [vmem:[%s4739_s3 + $0x258] sm:$0xf0]  ;;  %v2866_v50 = vor.u32 %v3334_v58, %v2865_v48 }
 0x102   :  { %v2870_v53 = vor.u32 %v3332_v49, %v2867_v23  ;;  %v2939_v58 = vld [vmem:[%s4739_s3 + $0x2d8] sm:$0xf0] }
 0x105   :  { %1160 = vmatpush.bf16.msrb.mxu0 %v2794_v56  ;;  %1173 = vmatpush.bf16.msrb.mxu1 %v2798_v57  ;;  %v3337_v56 = vld [vmem:[%s4739_s3 + $0x26c] sm:$0xf0]  ;;  %v2806_v57 = vor.u32 %v3319_v54, %v2803_v55  ;;  %v2945_v54 = vld [vmem:[%s4739_s3 + $0x2e0] sm:$0xf] }
 0x106   :  { %v2874_v62 = vor.u32 %v3337_v56, %v2873_v10  ;;  %v3353_v55 = vld [vmem:[%s4739_s3 + $0x2ec] sm:$0xf0] }
 0x10a   :  { %2672 = vmatmul.msk.bf16.vlgmr.msrb.gmra.mxu3 %vm214_vm0, %v3948_v52  ;;  %2743 = vmatmul.msk.bf16.vlgmr.msra.gmra.mxu2 %vm214_vm0, %v3782_v28  ;;  %v2846_v52 = vor.u32 %v3330_v13, %v2845_v12  ;;  %v2922_v13 = vor.u32 %v3344_v7, %v2919_v8  ;;  %v2989_v7 = vld [vmem:[%s4739_s3 + $0x328] sm:$0xf]  ;;  %v3362_v8 = vld [vmem:[%s4739_s3 + $0x334] sm:$0xf0] }
 0x10b   :  { %922 = vmatpush.bf16.msrb.mxu3 %v2734_v43  ;;  %1133 = vmatpush.bf16.msra.mxu2 %v2802_v4  ;;  %v3333_v43 = vld [vmem:[%s4739_s3 + $0x24c] sm:$0xf0]  ;;  %v3346_v4 = vld [vmem:[%s4739_s3 + $0x2b4] sm:$0xf0] }
 0x10c   :  { %v2858_v12 = vor.u32 %v3333_v43, %v2857_v0  ;;  %v2946_v0 = vor.u32 %v3353_v55, %v2945_v54  ;;  %v2859_v43 = vld [vmem:[%s4739_s3 + $0x250] sm:$0xf0] }
 0x10f   :  { %923 = vmatpush.bf16.msrb.mxu3 %v2718_v17  ;;  %1134 = vmatpush.bf16.msra.mxu2 %v2786_v18  ;;  %v3340_v17 = vld [vmem:[%s4739_s3 + $0x28c] sm:$0xf]  ;;  %v2903_v18 = vld [vmem:[%s4739_s3 + $0x298] sm:$0xf0] }
 0x110   :  { %2781 = vmatmul.msk.bf16.vlgmr.msra.gmra.mxu0 %vm214_vm0, %v3810_v46  ;;  %2782 = vmatmul.msk.bf16.vlgmr.msra.gmra.mxu1 %vm214_vm0, %v3810_v46 }
 0x111   :  { %1274 = vmatpush.bf16.msra.mxu0 %v2846_v52  ;;  %1287 = vmatpush.bf16.msra.mxu1 %v2850_v19  ;;  %v2902_v52 = vor.u32 %v3342_v15, %v2901_v14  ;;  %v2906_v19 = vor.u32 %v3340_v17, %v2903_v18  ;;  %v2990_v15 = vor.u32 %v3362_v8, %v2989_v7  ;;  %v3351_v7 = vld [vmem:[%s4739_s3 + $0x2e4] sm:$0xf]  ;;  %v2947_v8 = vld [vmem:[%s4739_s3 + $0x2f0] sm:$0xf0] }
 0x115   :  { %1275 = vmatpush.bf16.msra.mxu0 %v2830_v24  ;;  %1288 = vmatpush.bf16.msra.mxu1 %v2834_v26  ;;  %v2842_v24 = vor.u32 %v3327_v25, %v2839_v20  ;;  %v3323_v26 = vld [vmem:[%s4739_s3 + $0x204] sm:$0xf]  ;;  %v2973_v25 = vld [vmem:[%s4739_s3 + $0x308] sm:$0xf]  ;;  %v3358_v20 = vld [vmem:[%s4739_s3 + $0x314] sm:$0xf0] }
 0x116   :  { %v2826_v36 = vor.u32 %v3323_v26, %v2823_v27  ;;  %v2974_v26 = vor.u32 %v3358_v20, %v2973_v25  ;;  %v3343_v27 = vld [vmem:[%s4739_s3 + $0x2a4] sm:$0xf]  ;;  %v3001_v25 = vld [vmem:[%s4739_s3 + $0x340] sm:$0xf]  ;;  %v3365_v20 = vld [vmem:[%s4739_s3 + $0x34c] sm:$0xf0] }
 0x11a   :  { %2708 = vmatmul.msk.bf16.vlgmr.msra.gmra.mxu3 %vm214_vm0, %v4010_v42  ;;  %2779 = vmatmul.msk.bf16.vlgmr.msrb.gmra.mxu2 %vm214_vm0, %v3810_v46  ;;  %v2882_v42 = vor.u32 %v3338_v39, %v2881_v38 }
 0x11b   :  { %1034 = vmatpush.bf16.msra.mxu3 %v2770_v33  ;;  %1248 = vmatpush.bf16.msrb.mxu2 %v2838_v34  ;;  %v2953_v33 = vld [vmem:[%s4739_s3 + $0x2e8] sm:$0xf]  ;;  %v3352_v34 = vld [vmem:[%s4739_s3 + $0x2ec] sm:$0xf] }
 0x11c   :  { %v2954_v39 = vor.u32 %v3354_v51, %v2953_v33  ;;  %v2958_v40 = vor.u32 %v3352_v34, %v2955_v35  ;;  %v3361_v33 = vld [vmem:[%s4739_s3 + $0x32c] sm:$0xf0] }
 0x11f   :  { %1035 = vmatpush.bf16.msra.mxu3 %v2754_v44  ;;  %1249 = vmatpush.bf16.msrb.mxu2 %v2822_v45  ;;  %v2937_v45 = vld [vmem:[%s4739_s3 + $0x2c8] sm:$0xf] }
 0x120   :  { %2817 = vmatmul.msk.bf16.vlgmr.msrb.gmra.mxu0 %vm214_vm0, %v3786_v29  ;;  %2818 = vmatmul.msk.bf16.vlgmr.msrb.gmra.mxu1 %vm214_vm0, %v3786_v29 }
 0x121   :  { %1389 = vmatpush.bf16.msrb.mxu0 %v2882_v42  ;;  %1402 = vmatpush.bf16.msrb.mxu1 %v2886_v47  ;;  %v3350_v42 = vld [vmem:[%s4739_s3 + $0x2d4] sm:$0xf0]  ;;  %v3348_v47 = vld [vmem:[%s4739_s3 + $0x2cc] sm:$0xf] }
 0x122   :  { %v2938_v49 = vor.u32 %v3350_v42, %v2937_v45  ;;  %v2942_v23 = vor.u32 %v3348_v47, %v2939_v58  ;;  %v3025_v45 = vld [vmem:[%s4739_s3 + $0x368] sm:$0xf]  ;;  %v3370_v42 = vld [vmem:[%s4739_s3 + $0x374] sm:$0xf0]  ;;  %v3368_v47 = vld [vmem:[%s4739_s3 + $0x36c] sm:$0xf] }
 0x125   :  { %1390 = vmatpush.bf16.msrb.mxu0 %v2866_v50  ;;  %1403 = vmatpush.bf16.msrb.mxu1 %v2870_v53  ;;  %v3335_v50 = vld [vmem:[%s4739_s3 + $0x264] sm:$0xf]  ;;  %v2875_v53 = vld [vmem:[%s4739_s3 + $0x270] sm:$0xf0] }
 0x12a   :  { %2744 = vmatmul.msk.bf16.vlgmr.msrb.gmra.mxu3 %vm214_vm0, %v3782_v28  ;;  %2815 = vmatmul.msk.bf16.vlgmr.msra.gmra.mxu2 %vm214_vm0, %v3786_v29  ;;  %v2918_v28 = vor.u32 %v3346_v4, %v2917_v2  ;;  %v2929_v2 = vld [vmem:[%s4739_s3 + $0x2c0] sm:$0xf]  ;;  %v3349_v4 = vld [vmem:[%s4739_s3 + $0x2cc] sm:$0xf0] }
 0x12b   :  { %1146 = vmatpush.bf16.msrb.mxu3 %v2806_v57  ;;  %1363 = vmatpush.bf16.msra.mxu2 %v2874_v62  ;;  %v2878_v62 = vor.u32 %v3335_v50, %v2875_v53  ;;  %v3026_v50 = vor.u32 %v3370_v42, %v3025_v45  ;;  %v3359_v42 = vld [vmem:[%s4739_s3 + $0x324] sm:$0xf] }
 0x12f   :  { %1147 = vmatpush.bf16.msrb.mxu3 %v2790_v9  ;;  %1364 = vmatpush.bf16.msra.mxu2 %v2858_v12  ;;  %v3360_v9 = vld [vmem:[%s4739_s3 + $0x32c] sm:$0xf]  ;;  %v2991_v12 = vld [vmem:[%s4739_s3 + $0x338] sm:$0xf0] }
 0x130   :  { %2853 = vmatmul.msk.bf16.vlgmr.msra.gmra.mxu0 %vm214_vm0, %v3821_v59  ;;  %2854 = vmatmul.msk.bf16.vlgmr.msra.gmra.mxu1 %vm214_vm0, %v3821_v59  ;;  %v2994_v17 = vor.u32 %v3360_v9, %v2991_v12  ;;  %v3017_v9 = vld [vmem:[%s4739_s3 + $0x360] sm:$0xf]  ;;  %v3369_v12 = vld [vmem:[%s4739_s3 + $0x36c] sm:$0xf0] }
 0x131   :  { %1501 = vmatpush.bf16.msra.mxu0 %v2918_v28  ;;  %1514 = vmatpush.bf16.msra.mxu1 %v2922_v13  ;;  %v2862_v28 = vor.u32 %v3331_v63, %v2859_v43  ;;  %v2930_v13 = vor.u32 %v3349_v4, %v2929_v2 }
 0x135   :  { %1502 = vmatpush.bf16.msra.mxu0 %v2902_v52  ;;  %1515 = vmatpush.bf16.msra.mxu1 %v2906_v19 }
 0x13a   :  { %2780 = vmatmul.msk.bf16.vlgmr.msra.gmra.mxu3 %vm214_vm0, %v3810_v46  ;;  %2851 = vmatmul.msk.bf16.vlgmr.msrb.gmra.mxu2 %vm214_vm0, %v3821_v59 }
 0x13b   :  { %1261 = vmatpush.bf16.msra.mxu3 %v2842_v24  ;;  %1475 = vmatpush.bf16.msrb.mxu2 %v2910_v16  ;;  %v2975_v24 = vld [vmem:[%s4739_s3 + $0x318] sm:$0xf0] }
 0x13c   :  { %v2978_v16 = vor.u32 %v3356_v21, %v2975_v24  ;;  %v3061_v21 = vld [vmem:[%s4739_s3 + $0x3a8] sm:$0xf]  ;;  %v3376_v24 = vld [vmem:[%s4739_s3 + $0x3ac] sm:$0xf] }
 0x13d   :  { %v373_v46 = vpop.f32.mrf.mxu3  ;;  %v399_v38 = vpop.f32.mrf.mxu2 }
 0x13e   :  { %v494_v41 = vpop.f32.mrf.mxu0  ;;  %v4280_v44 = vpop.f32.mrf.mxu1 }
 0x13f   :  { %v495_v48 = vadd.f32 %v494_v41, %v399_v38  ;;  %1262 = vmatpush.bf16.msra.mxu3 %v2826_v36  ;;  %1476 = vmatpush.bf16.msrb.mxu2 %v2894_v37  ;;  %v2914_v37 = vor.u32 %v3343_v27, %v2911_v30  ;;  %v2982_v38 = vor.u32 %v3361_v33, %v2981_v31  ;;  %v3357_v41 = vld [vmem:[%s4739_s3 + $0x30c] sm:$0xf0] }
 0x140   :  { %2889 = vmatmul.msk.bf16.vlgmr.msrb.gmra.mxu0 %vm214_vm0, %v3790_v32  ;;  %2890 = vmatmul.msk.bf16.vlgmr.msrb.gmra.mxu1 %vm214_vm0, %v3790_v32  ;;  %v3002_v27 = vor.u32 %v3365_v20, %v3001_v25  ;;  %v3367_v20 = vld [vmem:[%s4739_s3 + $0x364] sm:$0xf] }
 0x141   :  { %1613 = vmatpush.bf16.msrb.mxu0 %v2954_v39  ;;  %1626 = vmatpush.bf16.msrb.mxu1 %v2958_v40  ;;  %v2895_v39 = vld [vmem:[%s4739_s3 + $0x290] sm:$0xf0]  ;;  %v2965_v40 = vld [vmem:[%s4739_s3 + $0x300] sm:$0xf] }
 0x145   :  { %v375_v10 = vpop.f32.mrf.mxu3  ;;  %v401_v56 = vpop.f32.mrf.mxu2  ;;  %1614 = vmatpush.bf16.msrb.mxu0 %v2938_v49  ;;  %1627 = vmatpush.bf16.msrb.mxu1 %v2942_v23  ;;  %v2966_v49 = vor.u32 %v3357_v41, %v2965_v40 }
 0x146   :  { %v496_v57 = vpop.f32.mrf.mxu0  ;;  %v509_v60 = vpop.f32.mrf.mxu1 }
 0x147   :  { %v3009_v57 = vld [vmem:[%s4739_s3 + $0x348] sm:$0xf]  ;;  %v3366_v60 = vld [vmem:[%s4739_s3 + $0x354] sm:$0xf0] }
 0x148   :  { %v3010_v43 = vor.u32 %v3366_v60, %v3009_v57  ;;  %v3373_v57 = vld [vmem:[%s4739_s3 + $0x38c] sm:$0xf0]  ;;  %v3097_v60 = vld [vmem:[%s4739_s3 + $0x3e8] sm:$0xf] }
 0x14a   :  { %2816 = vmatmul.msk.bf16.vlgmr.msrb.gmra.mxu3 %vm214_vm0, %v3786_v29  ;;  %2887 = vmatmul.msk.bf16.vlgmr.msra.gmra.mxu2 %vm214_vm0, %v3790_v32 }
 0x14b   :  { %1376 = vmatpush.bf16.msrb.mxu3 %v2878_v62  ;;  %1587 = vmatpush.bf16.msra.mxu2 %v2946_v0  ;;  %v3364_v62 = vld [vmem:[%s4739_s3 + $0x34c] sm:$0xf] }
 0x14d   :  { %v4338_v29 = vpop.f32.mrf.mxu3  ;;  %v468_v14 = vpop.f32.mrf.mxu2 }
 0x14e   :  { %v469_v18 = vadd.f32 %v468_v14, %v373_v46  ;;  %v602_v52 = vpop.f32.mrf.mxu0  ;;  %v615_v19 = vpop.f32.mrf.mxu1  ;;  %v3339_v46 = vld [vmem:[%s4739_s3 + $0x284] sm:$0xf] }
 0x14f   :  { %v621_v22 = vadd.f32 %v602_v52, %v495_v48  ;;  %1377 = vmatpush.bf16.msrb.mxu3 %v2862_v28  ;;  %1588 = vmatpush.bf16.msra.mxu2 %v2930_v13  ;;  %v3027_v48 = vld [vmem:[%s4739_s3 + $0x378] sm:$0xf0]  ;;  %v2898_v58 = vor.u32 %v3339_v46, %v2895_v39  ;;  %v3018_v52 = vor.u32 %v3369_v12, %v3017_v9  ;;  %v3374_v46 = vld [vmem:[%s4739_s3 + $0x394] sm:$0xf0] }
 0x150   :  { %2925 = vmatmul.msk.bf16.vlgmr.msra.gmra.mxu0 %vm214_vm0, %v3847_v5  ;;  %2926 = vmatmul.msk.bf16.vlgmr.msra.gmra.mxu1 %vm214_vm0, %v3847_v5  ;;  %v3030_v53 = vor.u32 %v3368_v47, %v3027_v48  ;;  %v2983_v47 = vld [vmem:[%s4739_s3 + $0x330] sm:$0xf0]  ;;  %v3053_v48 = vld [vmem:[%s4739_s3 + $0x3a0] sm:$0xf] }
 0x151   :  { %1725 = vmatpush.bf16.msra.mxu0 %v2990_v15  ;;  %1738 = vmatpush.bf16.msra.mxu1 %v2994_v17  ;;  %v2950_v17 = vor.u32 %v3351_v7, %v2947_v8 }
 0x155   :  { %v388_v51 = vpop.f32.mrf.mxu3  ;;  %v470_v34 = vpop.f32.mrf.mxu2  ;;  %1726 = vmatpush.bf16.msra.mxu0 %v2974_v26  ;;  %1739 = vmatpush.bf16.msra.mxu1 %v2978_v16  ;;  %v3063_v26 = vld [vmem:[%s4739_s3 + $0x3b8] sm:$0xf0] }
 0x156   :  { %v604_v35 = vpop.f32.mrf.mxu0  ;;  %v617_v36 = vpop.f32.mrf.mxu1  ;;  %v3066_v33 = vor.u32 %v3376_v24, %v3063_v26  ;;  %v3385_v24 = vld [vmem:[%s4739_s3 + $0x3ec] sm:$0xf0] }
 0x15a   :  { %2852 = vmatmul.msk.bf16.vlgmr.msra.gmra.mxu3 %vm214_vm0, %v3821_v59  ;;  %2923 = vmatmul.msk.bf16.vlgmr.msrb.gmra.mxu2 %vm214_vm0, %v3847_v5 }
 0x15b   :  { %1488 = vmatpush.bf16.msra.mxu3 %v2914_v37  ;;  %1699 = vmatpush.bf16.msrb.mxu2 %v2982_v38  ;;  %v3045_v37 = vld [vmem:[%s4739_s3 + $0x388] sm:$0xf]  ;;  %v3372_v38 = vld [vmem:[%s4739_s3 + $0x38c] sm:$0xf] }
 0x15c   :  { %v3046_v41 = vor.u32 %v3374_v46, %v3045_v37 }
 0x15d   :  { %v412_v59 = vpop.f32.mrf.mxu3  ;;  %v576_v23 = vpop.f32.mrf.mxu2 }
 0x15e   :  { %v508_v54 = vadd.f32 %v4280_v44, %v412_v59  ;;  %v619_v55 = vadd.f32 %v576_v23, %v469_v18  ;;  %v714_v10 = vpop.f32.mrf.mxu0  ;;  %v727_v56 = vpop.f32.mrf.mxu1  ;;  %v3011_v44 = vld [vmem:[%s4739_s3 + $0x358] sm:$0xf0]  ;;  %v3347_v18 = vld [vmem:[%s4739_s3 + $0x2c4] sm:$0xf] }
 0x15f   :  { %v733_v63 = vadd.f32 %v714_v10, %v621_v22  ;;  %1489 = vmatpush.bf16.msra.mxu3 %v2898_v58  ;;  %1700 = vmatpush.bf16.msrb.mxu2 %v2966_v49  ;;  %v3014_v2 = vor.u32 %v3364_v62, %v3011_v44  ;;  %v3378_v22 = vld [vmem:[%s4739_s3 + $0x3b4] sm:$0xf0]  ;;  %v3377_v58 = vld [vmem:[%s4739_s3 + $0x3ac] sm:$0xf0]  ;;  %v2967_v10 = vld [vmem:[%s4739_s3 + $0x310] sm:$0xf0] }
 0x160   :  { %v622_v0 = vadd.f32 %v615_v19, %v508_v54  ;;  %2961 = vmatmul.msk.bf16.vlgmr.msrb.gmra.mxu0 %vm214_vm0, %v3825_v61  ;;  %2962 = vmatmul.msk.bf16.vlgmr.msrb.gmra.mxu1 %vm214_vm0, %v3825_v61  ;;  %v2931_v19 = vld [vmem:[%s4739_s3 + $0x2d0] sm:$0xf0]  ;;  %v3062_v31 = vor.u32 %v3378_v22, %v3061_v21  ;;  %v3355_v54 = vld [vmem:[%s4739_s3 + $0x304] sm:$0xf]  ;;  %v3386_v62 = vld [vmem:[%s4739_s3 + $0x3f4] sm:$0xf0] }
 0x161   :  { %1837 = vmatpush.bf16.msrb.mxu0 %v3026_v50  ;;  %1850 = vmatpush.bf16.msrb.mxu1 %v3030_v53  ;;  %v2934_v16 = vor.u32 %v3347_v18, %v2931_v19  ;;  %v2986_v53 = vor.u32 %v3359_v42, %v2983_v47  ;;  %v3099_v44 = vld [vmem:[%s4739_s3 + $0x3f8] sm:$0xf0]  ;;  %v3019_v21 = vld [vmem:[%s4739_s3 + $0x370] sm:$0xf0]  ;;  %v3089_v22 = vld [vmem:[%s4739_s3 + $0x3e0] sm:$0xf] }
 0x162   :  { %v734_v4 = vadd.f32 %v727_v56, %v622_v0  ;;  %v3037_v56 = vld [vmem:[%s4739_s3 + $0x380] sm:$0xf]  ;;  %v2970_v0 = vor.u32 %v3355_v54, %v2967_v10  ;;  %v3055_v47 = vld [vmem:[%s4739_s3 + $0x3b0] sm:$0xf0] }
 0x165   :  { %v414_v28 = vpop.f32.mrf.mxu3  ;;  %v578_v13 = vpop.f32.mrf.mxu2  ;;  %1838 = vmatpush.bf16.msrb.mxu0 %v3010_v43  ;;  %1851 = vmatpush.bf16.msrb.mxu1 %v3014_v2  ;;  %v3038_v43 = vor.u32 %v3373_v57, %v3037_v56 }
 0x166   :  { %v716_v14 = vpop.f32.mrf.mxu0  ;;  %v729_v15 = vpop.f32.mrf.mxu1  ;;  %v3081_v13 = vld [vmem:[%s4739_s3 + $0x3c8] sm:$0xf] }
 0x167   :  { %v3382_v14 = vld [vmem:[%s4739_s3 + $0x3d4] sm:$0xf0]  ;;  %v3380_v15 = vld [vmem:[%s4739_s3 + $0x3cc] sm:$0xf] }
 0x168   :  { %v3082_v19 = vor.u32 %v3382_v14, %v3081_v13 }
 0x16a   :  { %2888 = vmatmul.msk.bf16.vlgmr.msrb.gmra.mxu3 %vm214_vm0, %v3790_v32  ;;  %2959 = vmatmul.msk.bf16.vlgmr.msra.gmra.mxu2 %vm214_vm0, %v3825_v61 }
 0x16b   :  { %1600 = vmatpush.bf16.msrb.mxu3 %v2950_v17  ;;  %1811 = vmatpush.bf16.msra.mxu2 %v3018_v52  ;;  %v3083_v52 = vld [vmem:[%s4739_s3 + $0x3d8] sm:$0xf0] }
 0x16c   :  { %v3086_v25 = vor.u32 %v3380_v15, %v3083_v52 }
 0x16d   :  { %v481_v32 = vpop.f32.mrf.mxu3  ;;  %v688_v30 = vpop.f32.mrf.mxu2 }
 0x16e   :  { %v482_v51 = vadd.f32 %v481_v32, %v4338_v29  ;;  %v731_v34 = vadd.f32 %v688_v30, %v619_v55  ;;  %v826_v35 = vpop.f32.mrf.mxu0  ;;  %v839_v36 = vpop.f32.mrf.mxu1  ;;  %v3047_v29 = vld [vmem:[%s4739_s3 + $0x398] sm:$0xf0]  ;;  %v3054_v55 = vor.u32 %v3377_v58, %v3053_v48  ;;  %v3022_v30 = vor.u32 %v3367_v20, %v3019_v21 }
 0x16f   :  { %v845_v39 = vadd.f32 %v826_v35, %v733_v63  ;;  %v846_v40 = vadd.f32 %v839_v36, %v734_v4  ;;  %1601 = vmatpush.bf16.msrb.mxu3 %v2934_v16  ;;  %1812 = vmatpush.bf16.msra.mxu2 %v3002_v27  ;;  %v3050_v45 = vor.u32 %v3372_v38, %v3047_v29  ;;  %v3384_v63 = vld [vmem:[%s4739_s3 + $0x3ec] sm:$0xf]  ;;  %v3381_v35 = vld [vmem:[%s4739_s3 + $0x3cc] sm:$0xf0] }
 0x170   :  { %2997 = vmatmul.msk.bf16.vlgmr.msra.gmra.mxu0 %vm214_vm0, %v3851_v6  ;;  %2998 = vmatmul.msk.bf16.vlgmr.msra.gmra.mxu1 %vm214_vm0, %v3851_v6  ;;  %v3098_v4 = vor.u32 %v3386_v62, %v3097_v60  ;;  %v3102_v7 = vor.u32 %v3384_v63, %v3099_v44 }
 0x171   :  { %1949 = vmatpush.bf16.msra.mxu0 %v3062_v31  ;;  %1962 = vmatpush.bf16.msra.mxu1 %v3066_v33  ;;  %v3363_v31 = vld [vmem:[%s4739_s3 + $0x344] sm:$0xf]  ;;  %v3090_v33 = vor.u32 %v3385_v24, %v3089_v22 }
 0x175   :  { %v483_v49 = vpop.f32.mrf.mxu3  ;;  %v690_v59 = vpop.f32.mrf.mxu2  ;;  %1950 = vmatpush.bf16.msra.mxu0 %v3046_v41  ;;  %1963 = vmatpush.bf16.msra.mxu1 %v3050_v45 }
 0x176   :  { %v828_v23 = vpop.f32.mrf.mxu0  ;;  %v841_v50 = vpop.f32.mrf.mxu1 }
 0x177   :  { %v3371_v50 = vld [vmem:[%s4739_s3 + $0x384] sm:$0xf] }
 0x17a   :  { %2924 = vmatmul.msk.bf16.vlgmr.msra.gmra.mxu3 %vm214_vm0, %v3847_v5  ;;  %2995 = vmatmul.msk.bf16.vlgmr.msrb.gmra.mxu2 %vm214_vm0, %v3851_v6 }
 0x17b   :  { %1712 = vmatpush.bf16.msra.mxu3 %v2986_v53  ;;  %1923 = vmatpush.bf16.msrb.mxu2 %v3054_v55  ;;  %v3039_v53 = vld [vmem:[%s4739_s3 + $0x390] sm:$0xf0] }
 0x17c   :  { %v3042_v54 = vor.u32 %v3371_v50, %v3039_v53 }
 0x17d   :  { %v589_v5 = vpop.f32.mrf.mxu3  ;;  %v800_v2 = vpop.f32.mrf.mxu2 }
 0x17e   :  { %v620_v8 = vadd.f32 %v589_v5, %v482_v51  ;;  %v843_v9 = vadd.f32 %v800_v2, %v731_v34  ;;  %v938_v12 = vpop.f32.mrf.mxu0  ;;  %v951_v28 = vpop.f32.mrf.mxu1  ;;  %v3003_v51 = vld [vmem:[%s4739_s3 + $0x350] sm:$0xf0]  ;;  %v3073_v34 = vld [vmem:[%s4739_s3 + $0x3c0] sm:$0xf] }
 0x17f   :  { %v957_v17 = vadd.f32 %v938_v12, %v845_v39  ;;  %v958_v18 = vadd.f32 %v951_v28, %v846_v40  ;;  %1713 = vmatpush.bf16.msra.mxu3 %v2970_v0  ;;  %1924 = vmatpush.bf16.msrb.mxu2 %v3038_v43  ;;  %v3006_v36 = vor.u32 %v3363_v31, %v3003_v51  ;;  %v3091_v0 = vld [vmem:[%s4739_s3 + $0x3f0] sm:$0xf0] }
 0x180   :  { %3033 = vmatmul.msk.bf16.vlgmr.msrb.gmra.mxu0 %vm214_vm0, %v3835_v1  ;;  %3034 = vmatmul.msk.bf16.vlgmr.msrb.gmra.mxu1 %vm214_vm0, %v3835_v1  ;;  %v3074_v37 = vor.u32 %v3381_v35, %v3073_v34 }
 0x181   :  { %2061 = vmatpush.bf16.msrb.mxu0 %v3098_v4  ;;  %2074 = vmatpush.bf16.msrb.mxu1 %v3102_v7 }
 0x185   :  { %v591_v26 = vpop.f32.mrf.mxu3  ;;  %v802_v16 = vpop.f32.mrf.mxu2  ;;  %2062 = vmatpush.bf16.msrb.mxu0 %v3082_v19  ;;  %2075 = vmatpush.bf16.msrb.mxu1 %v3086_v25 }
 0x186   :  { %v940_v27 = vpop.f32.mrf.mxu0  ;;  %v953_v32 = vpop.f32.mrf.mxu1 }
 0x18a   :  { %2960 = vmatmul.msk.bf16.vlgmr.msrb.gmra.mxu3 %vm214_vm0, %v3825_v61  ;;  %3031 = vmatmul.msk.bf16.vlgmr.msra.gmra.mxu2 %vm214_vm0, %v3835_v1  ;;  %v3375_v61 = vld [vmem:[%s4739_s3 + $0x3a4] sm:$0xf] }
 0x18b   :  { %1824 = vmatpush.bf16.msrb.mxu3 %v3022_v30  ;;  %2035 = vmatpush.bf16.msra.mxu2 %v3090_v33  ;;  %v3058_v23 = vor.u32 %v3375_v61, %v3055_v47 }
 0x18d   :  { %v701_v46 = vpop.f32.mrf.mxu3  ;;  %v912_v38 = vpop.f32.mrf.mxu2 }
 0x18e   :  { %v732_v39 = vadd.f32 %v701_v46, %v620_v8  ;;  %v955_v40 = vadd.f32 %v912_v38, %v843_v9  ;;  %v1050_v29 = vpop.f32.mrf.mxu0  ;;  %v1063_v41 = vpop.f32.mrf.mxu1  ;;  %v3379_v8 = vld [vmem:[%s4739_s3 + $0x3c4] sm:$0xf]  ;;  %v3075_v9 = vld [vmem:[%s4739_s3 + $0x3d0] sm:$0xf0] }
 0x18f   :  { %v1069_v45 = vadd.f32 %v1050_v29, %v957_v17  ;;  %v1070_v42 = vadd.f32 %v1063_v41, %v958_v18  ;;  %1825 = vmatpush.bf16.msrb.mxu3 %v3006_v36  ;;  %2036 = vmatpush.bf16.msra.mxu2 %v3074_v37  ;;  %v3078_v12 = vor.u32 %v3379_v8, %v3075_v9 }
 0x190   :  { %3069 = vmatmul.msk.bf16.vlgmr.msra.gmra.mxu0 %vm214_vm0, %v3868_v11  ;;  %3070 = vmatmul.msk.bf16.vlgmr.msra.gmra.mxu1 %vm214_vm0, %v3868_v11 }
 0x195   :  { %v703_v48 = vpop.f32.mrf.mxu3  ;;  %v914_v58 = vpop.f32.mrf.mxu2 }
 0x196   :  { %v1052_v49 = vpop.f32.mrf.mxu0  ;;  %v1065_v59 = vpop.f32.mrf.mxu1 }
 0x19a   :  { %2996 = vmatmul.msk.bf16.vlgmr.msra.gmra.mxu3 %vm214_vm0, %v3851_v6  ;;  %3067 = vmatmul.msk.bf16.vlgmr.msrb.gmra.mxu2 %vm214_vm0, %v3868_v11  ;;  %v3383_v6 = vld [vmem:[%s4739_s3 + $0x3e4] sm:$0xf] }
 0x19b   :  { %1936 = vmatpush.bf16.msra.mxu3 %v3058_v23  ;;  %v3094_v7 = vor.u32 %v3383_v6, %v3091_v0  ;;  %v3408_v0 = vld [vmem:[%s4741_s5 + $0xa8] sm:$0xff] }
 0x19d   :  { %v813_v55 = vpop.f32.mrf.mxu3  ;;  %v1024_v10 = vpop.f32.mrf.mxu2 }
 0x19e   :  { %v844_v56 = vadd.f32 %v813_v55, %v732_v39  ;;  %v1067_v57 = vadd.f32 %v1024_v10, %v955_v40  ;;  %v1162_v60 = vpop.f32.mrf.mxu0  ;;  %v1175_v62 = vpop.f32.mrf.mxu1  ;;  %v3410_v55 = vld [vmem:[%s4741_s5 + $0xb8] sm:$0xff] }
 0x19f   :  { %v1181_v63 = vadd.f32 %v1162_v60, %v1069_v45  ;;  %v1182_v44 = vadd.f32 %v1175_v62, %v1070_v42  ;;  %1937 = vmatpush.bf16.msra.mxu3 %v3042_v54  ;;  %v3418_v10 = vld [vmem:[%s4741_s5 + $0xf8] sm:$0xff]  ;;  %2389 = vmatpush.bf16.msra.mxu0 %v3410_v55 }
 0x1a0   :  { %3105 = vmatmul.msk.bf16.vlgmr.msrb.gmra.mxu0 %vm214_vm0, %v3840_v3  ;;  %3106 = vmatmul.msk.bf16.vlgmr.msrb.gmra.mxu1 %vm214_vm0, %v3840_v3 }
 0x1a1   :  { %2402 = vmatpush.bf16.msra.mxu1 %v3418_v10 }
 0x1a5   :  { %v815_v43 = vpop.f32.mrf.mxu3  ;;  %v1026_v5 = vpop.f32.mrf.mxu2 }
 0x1a6   :  { %v1164_v2 = vpop.f32.mrf.mxu0  ;;  %v1177_v4 = vpop.f32.mrf.mxu1  ;;  %v3416_v43 = vld [vmem:[%s4741_s5 + $0xe8] sm:$0xff]  ;;  %v3407_v5 = vld [vmem:[%s4741_s5 + $0xa0] sm:$0xff] }
 0x1a7   :  { %v3415_v2 = vld [vmem:[%s4741_s5 + $0xe0] sm:$0xff] }
 0x1aa   :  { %3032 = vmatmul.msk.bf16.vlgmr.msrb.gmra.mxu3 %vm214_vm0, %v3835_v1  ;;  %3103 = vmatmul.msk.bf16.vlgmr.msra.gmra.mxu2 %vm214_vm0, %v3840_v3 }
 0x1ab   :  { %2048 = vmatpush.bf16.msrb.mxu3 %v3094_v7 }
 0x1ad   :  { %v925_v28 = vpop.f32.mrf.mxu3  ;;  %v1136_v13 = vpop.f32.mrf.mxu2 }
 0x1ae   :  { %v956_v14 = vadd.f32 %v925_v28, %v844_v56  ;;  %v1179_v15 = vadd.f32 %v1136_v13, %v1067_v57  ;;  %v1277_v17 = vpop.f32.mrf.mxu0  ;;  %v1290_v18 = vpop.f32.mrf.mxu1  ;;  %v3409_v56 = vld [vmem:[%s4741_s5 + $0xb0] sm:$0xff]  ;;  %v3406_v28 = vld [vmem:[%s4741_s5 + $0x98] sm:$0xff] }
 0x1af   :  { %v1296_v52 = vadd.f32 %v1277_v17, %v1181_v63  ;;  %v1297_v19 = vadd.f32 %v1290_v18, %v1182_v44  ;;  %2049 = vmatpush.bf16.msrb.mxu3 %v3078_v12  ;;  %v3417_v57 = vld [vmem:[%s4741_s5 + $0xf0] sm:$0xff]  ;;  %2390 = vmatpush.bf16.msra.mxu0 %v3409_v56  ;;  %v3394_v12 = vld [vmem:[%s4741_s5 + $0x38] sm:$0xff] }
 0x1b0   :  { %2403 = vmatpush.bf16.msra.mxu1 %v3417_v57  ;;  %v3414_v13 = vld [vmem:[%s4741_s5 + $0xd8] sm:$0xff]  ;;  %2363 = vmatpush.bf16.msrb.mxu2 %v3394_v12  ;;  %v3413_v17 = vld [vmem:[%s4741_s5 + $0xd0] sm:$0xff] }
 0x1b3   :  { %2391 = vmatpush.bf16.msra.mxu0 %v3408_v0 }
 0x1b4   :  { %2404 = vmatpush.bf16.msra.mxu1 %v3416_v43 }
 0x1b5   :  { %v927_v25 = vpop.f32.mrf.mxu3  ;;  %v1138_v20 = vpop.f32.mrf.mxu2 }
 0x1b6   :  { %v1279_v21 = vpop.f32.mrf.mxu0  ;;  %v1292_v22 = vpop.f32.mrf.mxu1 }
 0x1b7   :  { %2392 = vmatpush.bf16.msra.mxu0 %v3407_v5  ;;  %v3392_v21 = vld [vmem:[%s4741_s5 + $0x28] sm:$0xff] }
 0x1b8   :  { %2405 = vmatpush.bf16.msra.mxu1 %v3415_v2  ;;  %v3404_v22 = vld [vmem:[%s4741_s5 + $0x88] sm:$0xff] }
 0x1ba   :  { %3068 = vmatmul.msk.bf16.vlgmr.msra.gmra.mxu3 %vm214_vm0, %v3868_v11 }
 0x1bb   :  { %2393 = vmatpush.bf16.msra.mxu0 %v3406_v28 }
 0x1bc   :  { %2406 = vmatpush.bf16.msra.mxu1 %v3414_v13 }
 0x1bd   :  { %v1037_v1 = vpop.f32.mrf.mxu3  ;;  %v1251_v24 = vpop.f32.mrf.mxu2 }
 0x1be   :  { %v1068_v26 = vadd.f32 %v1037_v1, %v956_v14  ;;  %v1294_v16 = vadd.f32 %v1251_v24, %v1179_v15  ;;  %v1392_v27 = vpop.f32.mrf.mxu0  ;;  %v1405_v32 = vpop.f32.mrf.mxu1  ;;  %v3393_v14 = vld [vmem:[%s4741_s5 + $0x30] sm:$0xff]  ;;  %v3412_v1 = vld [vmem:[%s4741_s5 + $0xc8] sm:$0xff]  ;;  %v3391_v24 = vld [vmem:[%s4741_s5 + $0x20] sm:$0xff] }
 0x1bf   :  { %v1411_v30 = vadd.f32 %v1392_v27, %v1296_v52  ;;  %v1412_v31 = vadd.f32 %v1405_v32, %v1297_v19  ;;  %v3405_v15 = vld [vmem:[%s4741_s5 + $0x90] sm:$0xff]  ;;  %2364 = vmatpush.bf16.msrb.mxu2 %v3393_v14 }
 0x1c0   :  { %2394 = vmatpush.bf16.msra.mxu0 %v3405_v15  ;;  %2407 = vmatpush.bf16.msra.mxu1 %v3413_v17  ;;  %v3397_v14 = vld [vmem:[%s4741_s5 + $0x50] sm:$0xff] }
 0x1c3   :  { %2365 = vmatpush.bf16.msrb.mxu2 %v3392_v21 }
 0x1c4   :  { %2395 = vmatpush.bf16.msra.mxu0 %v3404_v22  ;;  %2408 = vmatpush.bf16.msra.mxu1 %v3412_v1 }
 0x1c5   :  { %v1039_v33 = vpop.f32.mrf.mxu3  ;;  %v1253_v51 = vpop.f32.mrf.mxu2 }
 0x1c6   :  { %v1394_v34 = vpop.f32.mrf.mxu0  ;;  %v1407_v35 = vpop.f32.mrf.mxu1  ;;  %v3390_v33 = vld [vmem:[%s4741_s5 + $0x18] sm:$0xff]  ;;  %v3389_v51 = vld [vmem:[%s4741_s5 + $0x10] sm:$0xff] }
 0x1c7   :  { %2366 = vmatpush.bf16.msrb.mxu2 %v3391_v24 }
 0x1ca   :  { %3104 = vmatmul.msk.bf16.vlgmr.msrb.gmra.mxu3 %vm214_vm0, %v3840_v3 }
 0x1cb   :  { %2367 = vmatpush.bf16.msrb.mxu2 %v3390_v33 }
 0x1cd   :  { %v1149_v36 = vpop.f32.mrf.mxu3  ;;  %v1366_v37 = vpop.f32.mrf.mxu2 }
 0x1ce   :  { %v1180_v46 = vadd.f32 %v1149_v36, %v1068_v26  ;;  %v1409_v38 = vadd.f32 %v1366_v37, %v1294_v16  ;;  %v1504_v11 = vpop.f32.mrf.mxu0  ;;  %v1517_v39 = vpop.f32.mrf.mxu1  ;;  %v3403_v26 = vld [vmem:[%s4741_s5 + $0x80] sm:$0xff] }
 0x1cf   :  { %v4598_v40 = vadd.f32 %v1504_v11, %v1411_v30  ;;  %v4600_v29 = vadd.f32 %v1517_v39, %v1412_v31  ;;  %v3411_v16 = vld [vmem:[%s4741_s5 + $0xc0] sm:$0xff]  ;;  %2396 = vmatpush.bf16.msra.mxu0 %v3403_v26  ;;  %2368 = vmatpush.bf16.msrb.mxu2 %v3389_v51 }
 0x1d0   :  { %2409 = vmatpush.bf16.msra.mxu1 %v3411_v16 }
 0x1d5   :  { %v1151_v41 = vpop.f32.mrf.mxu3  ;;  %v1368_v45 = vpop.f32.mrf.mxu2 }
 0x1d6   :  { %v1506_v42 = vpop.f32.mrf.mxu0  ;;  %v1519_v61 = vpop.f32.mrf.mxu1  ;;  %v3402_v41 = vld [vmem:[%s4741_s5 + $0x78] sm:$0xff] }
 0x1d7   :  { %2376 = vmatpush.bf16.msra.mxu3 %v3402_v41 }
 0x1dd   :  { %v1264_v47 = vpop.f32.mrf.mxu3  ;;  %v1478_v48 = vpop.f32.mrf.mxu2 }
 0x1de   :  { %v1295_v58 = vadd.f32 %v1264_v47, %v1180_v46  ;;  %v4602_v49 = vadd.f32 %v1478_v48, %v1409_v38  ;;  %v4604_v3 = vpop.f32.mrf.mxu0  ;;  %v4606_v59 = vpop.f32.mrf.mxu1  ;;  %v3388_v46 = vld [vmem:[%s4741_s5 + $0x8] sm:$0xff]  ;;  %v3387_v38 = vld [vmem:[%s4741_s5] sm:$0xff]  ;;  %v3401_v48 = vld [vmem:[%s4741_s5 + $0x70] sm:$0xff] }
 0x1df   :  { %2369 = vmatpush.bf16.msrb.mxu2 %v3388_v46  ;;  %v1635_v61 = vadd.f32 %v4604_v3, %v4598_v40  ;;  %v1636_v47 = vadd.f32 %v4606_v59, %v4600_v29  ;;  %2377 = vmatpush.bf16.msra.mxu3 %v3401_v48 }
 0x1e3   :  { %2370 = vmatpush.bf16.msrb.mxu2 %v3387_v38 }
 0x1e5   :  { %v1266_v23 = vpop.f32.mrf.mxu3  ;;  %v1480_v50 = vpop.f32.mrf.mxu2 }
 0x1e6   :  { %v1618_v53 = vpop.f32.mrf.mxu0  ;;  %v1631_v54 = vpop.f32.mrf.mxu1  ;;  %v2085_v50 = vld [vmem:[%s4740_s4] sm:$0xf] }
 0x1e7   :  { %v2089_v59 = vperm.slane %v2085_v50, 2  ;;  %v2090_v10 = vperm.slane %v2085_v50, 3  ;;  %v2088_v33 = vperm.slane %v2085_v50, 1 }
 0x1ed   :  { %v1379_v60 = vpop.f32.mrf.mxu3  ;;  %v4620_v62 = vpop.f32.mrf.mxu2 }
 0x1ee   :  { %v1410_v63 = vadd.f32 %v1379_v60, %v1295_v58  ;;  %v4622_v44 = vpop.f32.mrf.mxu0  ;;  %v4624_v6 = vpop.f32.mrf.mxu1  ;;  %v3400_v60 = vld [vmem:[%s4741_s5 + $0x68] sm:$0xff] }
 0x1ef   :  { %v1747_v58 = vadd.f32 %v4622_v44, %v1635_v61  ;;  %v1748_v23 = vadd.f32 %v4624_v6, %v1636_v47  ;;  %2378 = vmatpush.bf16.msra.mxu3 %v3400_v60  ;;  %v3399_v6 = vld [vmem:[%s4741_s5 + $0x60] sm:$0xff] }
 0x1f3   :  { %2379 = vmatpush.bf16.msra.mxu3 %v3399_v6 }
 0x1f5   :  { %v1381_v4 = vpop.f32.mrf.mxu3  ;;  %v1592_v7 = vpop.f32.mrf.mxu2 }
 0x1f6   :  { %v1730_v8 = vpop.f32.mrf.mxu0  ;;  %v1743_v9 = vpop.f32.mrf.mxu1 }
 0x1f7   :  { %v3398_v8 = vld [vmem:[%s4741_s5 + $0x58] sm:$0xff]  ;;  %v1633_v9 = vadd.f32 %v4620_v62, %v4602_v49  ;;  %v3396_v49 = vld [vmem:[%s4741_s5 + $0x48] sm:$0xff] }
 0x1f8   :  { %2380 = vmatpush.bf16.msra.mxu3 %v3398_v8 }
 0x1fc   :  { %2381 = vmatpush.bf16.msra.mxu3 %v3397_v14 }
 0x1fd   :  { %v1491_v18 = vpop.f32.mrf.mxu3  ;;  %v4656_v52 = vpop.f32.mrf.mxu2 }
 0x1fe   :  { %v4658_v19 = vadd.f32 %v1491_v18, %v1410_v63  ;;  %v1840_v25 = vpop.f32.mrf.mxu0  ;;  %v1853_v20 = vpop.f32.mrf.mxu1  ;;  %v1745_v13 = vadd.f32 %v4656_v52, %v1633_v9  ;;  %v2087_v18 = vperm.slane %v2085_v50, 0  ;;  %v3395_v52 = vld [vmem:[%s4741_s5 + $0x40] sm:$0xff] }
 0x1ff   :  { %v1859_v53 = vadd.f32 %v1840_v25, %v1747_v58  ;;  %v1860_v54 = vadd.f32 %v1853_v20, %v1748_v23 }
 0x200   :  { %2382 = vmatpush.bf16.msra.mxu3 %v3396_v49 }
 0x204   :  { %2383 = vmatpush.bf16.msra.mxu3 %v3395_v52 }
 0x205   :  { %v1493_v27 = vpop.f32.mrf.mxu3  ;;  %v1704_v32 = vpop.f32.mrf.mxu2 }
 0x206   :  { %v1842_v30 = vpop.f32.mrf.mxu0  ;;  %v1855_v31 = vpop.f32.mrf.mxu1 }
 0x20d   :  { %v4684_v34 = vpop.f32.mrf.mxu3  ;;  %v1814_v35 = vpop.f32.mrf.mxu2 }
 0x20e   :  { %v1952_v36 = vpop.f32.mrf.mxu0  ;;  %v1965_v37 = vpop.f32.mrf.mxu1  ;;  %v1857_v15 = vadd.f32 %v1814_v35, %v1745_v13  ;;  %v1634_v27 = vadd.f32 %v4684_v34, %v4658_v19  ;;  %v3421_v19 = vld [vmem:[%s4742_s6] ss:$0 sm:$0xff] }
 0x20f   :  { %v1971_v40 = vadd.f32 %v1952_v36, %v1859_v53  ;;  %v1972_v3 = vadd.f32 %v1965_v37, %v1860_v54 }
 0x215   :  { %v1605_v11 = vpop.f32.mrf.mxu3  ;;  %v1816_v39 = vpop.f32.mrf.mxu2 }
 0x216   :  { %v1954_v45 = vpop.f32.mrf.mxu0  ;;  %v1967_v42 = vpop.f32.mrf.mxu1 }
 0x21d   :  { %v1715_v55 = vpop.f32.mrf.mxu3  ;;  %v1926_v29 = vpop.f32.mrf.mxu2 }
 0x21e   :  { %v2064_v56 = vpop.f32.mrf.mxu0  ;;  %v2077_v57 = vpop.f32.mrf.mxu1  ;;  %v1969_v17 = vadd.f32 %v1926_v29, %v1857_v15  ;;  %v1746_v32 = vadd.f32 %v1715_v55, %v1634_v27 }
 0x21f   :  { %v2083_v63 = vadd.f32 %v2064_v56, %v1971_v40  ;;  %v2084_v44 = vadd.f32 %v2077_v57, %v1972_v3 }
 0x221   :  { %v2097_v0 = vadd.f32 %v2089_v59, %v2083_v63  ;;  %v2098_v43 = vadd.f32 %v2090_v10, %v2084_v44 }
 0x223   :  { %v2101_v5 = vpack.c.bf16 %v2097_v0, %v2097_v0  ;;  %v2102_v2 = vpack.c.bf16 %v2098_v43, %v2098_v43 }
 0x225   :  { %2397 = vmatmul.bf16.vlgmr.msra.gmra.mxu0 %v2101_v5  ;;  %2410 = vmatmul.bf16.vlgmr.msra.gmra.mxu1 %v2102_v2  ;;  %v1717_v4 = vpop.f32.mrf.mxu3  ;;  %v1928_v7 = vpop.f32.mrf.mxu2 }
 0x226   :  { %v2066_v12 = vpop.f32.mrf.mxu0  ;;  %v2079_v28 = vpop.f32.mrf.mxu1 }
 0x22d   :  { %v1827_v25 = vpop.f32.mrf.mxu3  ;;  %v2038_v20 = vpop.f32.mrf.mxu2 }
 0x22e   :  { %v2081_v21 = vadd.f32 %v2038_v20, %v1969_v17  ;;  %v1858_v30 = vadd.f32 %v1827_v25, %v1746_v32 }
 0x230   :  { %v2095_v62 = vadd.f32 %v2087_v18, %v2081_v21 }
 0x232   :  { %v2099_v22 = vpack.c.bf16 %v2095_v62, %v2095_v62 }
 0x234   :  { %2371 = vmatmul.bf16.vlgmr.msrb.gmra.mxu2 %v2099_v22 }
 0x235   :  { %v1829_v1 = vpop.f32.mrf.mxu3  ;;  %v2040_v24 = vpop.f32.mrf.mxu2 }
 0x23d   :  { %v1939_v26 = vpop.f32.mrf.mxu3 }
 0x23e   :  { %v1970_v31 = vadd.f32 %v1939_v26, %v1858_v30 }
 0x245   :  { %v1941_v16 = vpop.f32.mrf.mxu3 }
 0x24d   :  { %v2051_v51 = vpop.f32.mrf.mxu3 }
 0x24e   :  { %v2082_v35 = vadd.f32 %v2051_v51, %v1970_v31 }
 0x250   :  { %v2096_v36 = vadd.f32 %v2088_v33, %v2082_v35 }
 0x252   :  { %v2100_v37 = vpack.c.bf16 %v2096_v36, %v2096_v36 }
 0x254   :  { %2384 = vmatmul.bf16.vlgmr.msra.gmra.mxu3 %v2100_v37 }
 0x255   :  { %v2053_v46 = vpop.f32.mrf.mxu3 }
 0x2a2   :  { %v2398_v38 = vpop.f32.mrf.mxu0  ;;  %v2411_v11 = vpop.f32.mrf.mxu1 }
 0x2aa   :  { %v2400_v39 = vpop.f32.mrf.mxu0  ;;  %v2413_v41 = vpop.f32.mrf.mxu1 }
 0x2b7   :  { %v2372_v45 = vpop.f32.mrf.mxu2 }
 0x2b8   :  { %v2373_v34 = vadd.f32 %v3421_v19, %v2372_v45 }
 0x2bf   :  { %v2374_v42 = vpop.f32.mrf.mxu2 }
 0x2d7   :  { %v2385_v61 = vpop.f32.mrf.mxu3 }
 0x2d8   :  { %v2386_v47 = vadd.f32 %v2385_v61, %v2373_v34 }
 0x2da   :  { %v2399_v48 = vadd.f32 %v2398_v38, %v2386_v47 }
 0x2dc   :  { %v2412_v58 = vadd.f32 %v2411_v11, %v2399_v48 }
 0x2de   :  { %2416 = vst.msk [vmem:[#allocation2] sm:$0x3] %vm2415_vm4, %v2412_v58 }
 0x2df   :  { %v2387_v23 = vpop.f32.mrf.mxu3  ;;  %2427 = dma.vmem_to_hbm [thread:$0]  %s2423_s21, 32, %s2425_s23, [#allocation3]  }
 0x2e0   :  { %3446 = dma.done.wait [#allocation3], 32  }
 0x2e1   :  { %3447 = vsyncadd [#allocation3], 4294967264 }
 0x2e2   :  { %2432 = vsyncpa [#allocation3], 1 }

</bundles_post_ra>
